<compile_context>
chip_gen: v7x
topology: tpu7x:2x2x1
jax: 0.10.0
libtpu: 0.0.40
codegen_flags: <defaults>
</compile_context>

<pallas_src>
import jax
import jax.numpy as jnp
from jax import lax
from jax.experimental import pallas as pl
from jax.experimental.pallas import tpu as pltpu
import numpy as np


def _make_kernel(B, H, W, Cin, Cout, stride, has_downsample):
    # conv output spatial dims (kernel=3, padding=1)
    Ho = (H - 1) // stride + 1
    Wo = (W - 1) // stride + 1
    M = B * Ho * Wo
    HoWo = Ho * Wo
    Ct = 2 * Cout if has_downsample else Cout     # fused conv1 (+downsample) cols

    def _zero_border(ref):
        # Zero only the 1-pixel halo border (interior is rewritten every step).
        b, hp, wp, c = ref.shape
        zrow = jnp.zeros((b, 1, wp, c), ref.dtype)
        zcol = jnp.zeros((b, hp, 1, c), ref.dtype)
        ref[:, 0:1, :, :] = zrow
        ref[:, hp - 1:hp, :, :] = zrow
        ref[:, :, 0:1, :] = zcol
        ref[:, :, wp - 1:wp, :] = zcol

    def _im2col_to_slab(src_ref, slab_ref, s, c):
        # Write the 9 shifted taps straight into the shared bf16 slab scratch so
        # the whole 3x3 conv becomes ONE MXU matmul reading (M, 9*c).
        t = 0
        for dh in range(3):
            for dw in range(3):
                if s == 1:
                    patch = src_ref[:, dh:dh + Ho, dw:dw + Wo, :]
                else:
                    # TODO(synk): for stride-2 blocks compact the padded input
                    # into 4 parity planes once, then take dense taps (halves
                    # the XLU strided-gather work).  Not exercised at stride=1.
                    patch = src_ref[:, pl.ds(dh, Ho, s), pl.ds(dw, Wo, s), :]
                slab_ref[:, t * c:(t + 1) * c] = (
                    patch.reshape(M, c).astype(slab_ref.dtype))
                t += 1

    def kernel(x_ref, wc_ref, sc_ref, bc_ref, w2_ref, s2_ref, b2_ref,
               out_ref, xpad_ref, hpad_ref, slab_ref):
        # Unconditional border zeroing (cheap; correct even if the parallel
        # batch axis is sharded across TensorCores; amortised by B-image steps).
        _zero_border(xpad_ref)
        _zero_border(hpad_ref)

        # In-kernel halo padding for conv1 (input block arrives unpadded bf16).
        xpad_ref[:, 1:1 + H, 1:1 + W, :] = x_ref[...].astype(xpad_ref.dtype)

        # ---- conv1 (3x3, stride) + fused 1x1 downsample: ONE matmul, N = Ct --
        _im2col_to_slab(xpad_ref, slab_ref, stride, Cin)
        col1 = slab_ref[:, 0:9 * Cin]                          # (M, 9*Cin) bf16
        y1 = (jnp.dot(col1, wc_ref[...], preferred_element_type=jnp.float32)
              * sc_ref[...] + bc_ref[...])                     # (M, Ct) f32
        h1 = jnp.maximum(y1[:, 0:Cout], 0.0)                   # BN1 + ReLU

        if has_downsample:
            idt = y1[:, Cout:Ct]                               # 1x1 conv + BNd
        else:
            # identity branch: Cin == Cout and stride == 1 here
            idt = xpad_ref[:, 1:1 + Ho, 1:1 + Wo, :].reshape(M, Cin)

        # Stage conv1 output with halo for conv2.
        hpad_ref[:, 1:1 + Ho, 1:1 + Wo, :] = (
            h1.reshape(B, Ho, Wo, Cout).astype(hpad_ref.dtype))

        # ---- conv2 (3x3, stride 1) as one matmul + folded BN2 ----------------
        _im2col_to_slab(hpad_ref, slab_ref, 1, Cout)
        col2 = slab_ref[:, 0:9 * Cout]                         # (M, 9*Cout) bf16
        y2 = (jnp.dot(col2, w2_ref[...], preferred_element_type=jnp.float32)
              * s2_ref[...] + b2_ref[...])

        out = jnp.maximum(y2 + idt, 0.0)                       # (M, Cout) f32

        # Lane-dense, NCHW-native store: one f32 transpose (Cout, M), then
        # per-image lane slices at Ho*Wo-multiples -> unmasked 128-lane stores
        # and NO wrapper-side NHWC->NCHW transpose.
        out_t = out.T.astype(out_ref.dtype)                    # (Cout, M)
        for b in range(B):
            out_ref[b] = out_t[:, b * HoWo:(b + 1) * HoWo]

    return kernel, Ho, Wo, Ct


def _fold_bn(gamma, beta, mean, var, eps=1e-5):
    scale = gamma / jnp.sqrt(var + eps)
    bias = beta - mean * scale
    return (scale.reshape(1, -1).astype(jnp.float32),
            bias.reshape(1, -1).astype(jnp.float32))


def _full_spec(shape):
    rank = len(shape)
    return pl.BlockSpec(shape, lambda n, _r=rank: (0,) * _r)


def _vmem_estimate(B, H, W, Cin, Ho, Wo, Cout, Ct):
    """Bytes of VMEM used by one grid step (blocks, weights, scratch, accums)."""
    BF16, F32 = 2, 4
    M = B * Ho * Wo
    Cmax = max(Cin, Cout)
    blocks = 2 * B * H * W * Cin * BF16 + 2 * B * Cout * Ho * Wo * BF16
    weights = (2 * (9 * Cin * Ct + 9 * Cout * Cout) * BF16
               + 2 * 2 * (Ct + Cout) * F32)
    staging = (B * (H + 2) * (W + 2) * Cin
               + B * (Ho + 2) * (Wo + 2) * Cout) * F32
    slab = M * 9 * Cmax * BF16
    accums = 2 * M * max(Ct, Cout) * F32
    return blocks + weights + staging + slab + accums


def basic_block_forward(x_nchw, params, *, stride=1):
    in_ch = x_nchw.shape[1]
    out_ch = params["w1"].shape[-1]
    has_downsample = (in_ch != out_ch) or (stride != 1)

    # NCHW -> NHWC for the INPUT only (the kernel emits NCHW directly).
    # TODO(synk): if the surrounding model is NHWC, drop this transpose too.
    x = jnp.transpose(x_nchw, (0, 2, 3, 1)).astype(jnp.bfloat16)
    N, H, W, Cin = x.shape
    Ho = (H - 1) // stride + 1
    Wo = (W - 1) // stride + 1

    s1, b1 = _fold_bn(params["bn1_gamma"], params["bn1_beta"],
                      params["bn1_mean"], params["bn1_var"])
    s2, b2 = _fold_bn(params["bn2_gamma"], params["bn2_beta"],
                      params["bn2_mean"], params["bn2_var"])

    # 3x3 weights -> (9*Cin, Cout) bf16 in im2col tap order (dh, dw, cin).
    w1 = params["w1"].astype(jnp.bfloat16).reshape(9 * Cin, out_ch)
    w2 = params["w2"].astype(jnp.bfloat16).reshape(9 * out_ch, out_ch)

    if has_downsample:
        # Fuse the 1x1 downsample into conv1's matmul: wd occupies the
        # center-tap (dh=1,dw=1) K rows of the extra Cout output columns.
        sd, bd = _fold_bn(params["bnd_gamma"], params["bnd_beta"],
                          params["bnd_mean"], params["bnd_var"])
        wd = params["wd"].astype(jnp.bfloat16)                 # (Cin, Cout)
        wd_cols = jnp.zeros((9 * Cin, out_ch), jnp.bfloat16)
        wd_cols = wd_cols.at[4 * Cin:5 * Cin, :].set(wd)
        wc = jnp.concatenate([w1, wd_cols], axis=-1)           # (9*Cin, 2*Cout)
        sc = jnp.concatenate([s1, sd], axis=-1)
        bc = jnp.concatenate([b1, bd], axis=-1)
    else:
        wc, sc, bc = w1, s1, b1
    Ct = wc.shape[-1]

    # VMEM cap (v7x = 64 MiB/TC) and images-per-step selection from the budget.
    try:
        vmem_cap = int(pltpu.get_tpu_info().vmem_capacity_bytes)
    except Exception:
        vmem_cap = 64 << 20
    budget = vmem_cap // 2
    B = 1
    for cand in range(N, 0, -1):
        if N % cand == 0 and _vmem_estimate(cand, H, W, Cin, Ho, Wo,
                                            out_ch, Ct) <= budget:
            B = cand
            break

    kernel, Ho, Wo, _ = _make_kernel(B, H, W, Cin, out_ch, stride, has_downsample)

    est = _vmem_estimate(B, H, W, Cin, Ho, Wo, out_ch, Ct)
    vmem_limit = int(min(max((3 * est) // 2 + (16 << 20), 32 << 20),
                         (vmem_cap * 7) // 8))

    out = pl.pallas_call(
        kernel,
        out_shape=jax.ShapeDtypeStruct((N, out_ch, Ho * Wo), jnp.bfloat16),
        grid=(N // B,),
        in_specs=[
            pl.BlockSpec((B, H, W, Cin), lambda n: (n, 0, 0, 0)),
            _full_spec((9 * Cin, Ct)),                          # conv1 (+ds) W
            _full_spec((1, Ct)), _full_spec((1, Ct)),           # BN1 (+BNd)
            _full_spec((9 * out_ch, out_ch)),                   # conv2 W
            _full_spec((1, out_ch)), _full_spec((1, out_ch)),   # BN2
        ],
        out_specs=pl.BlockSpec((B, out_ch, Ho * Wo), lambda n: (n, 0, 0)),
        scratch_shapes=[
            pltpu.VMEM((B, H + 2, W + 2, Cin), jnp.float32),      # conv1 halo
            pltpu.VMEM((B, Ho + 2, Wo + 2, out_ch), jnp.float32), # conv2 halo
            pltpu.VMEM((B * Ho * Wo, 9 * max(Cin, out_ch)), jnp.bfloat16),  # im2col slab
        ],
        compiler_params=pltpu.CompilerParams(
            dimension_semantics=("parallel",),
            vmem_limit_bytes=vmem_limit),
    )(x, wc, sc, bc, w2, s2, b2)

    # Output is already channel-major: just a free reshape to NCHW.
    return out.reshape(N, out_ch, Ho, Wo)


# ---------------- pure-JAX reference (for validation only) ----------------
def ref_basic_block(x_nchw, params, *, stride=1):
    """Mirrors the kernel's numerics: bf16-quantized operands, f32 accumulate."""
    q = lambda a: a.astype(jnp.bfloat16).astype(jnp.float32)
    hp = lax.Precision.HIGHEST
    x = q(jnp.transpose(x_nchw, (0, 2, 3, 1)))
    in_ch = x.shape[-1]
    out_ch = params["w1"].shape[-1]

    def bn(y, g, b, m, v, eps=1e-5):
        return (y - m) / jnp.sqrt(v + eps) * g + b

    def conv(z, w, s, pad):
        return lax.conv_general_dilated(
            z, w, (s, s), pad,
            dimension_numbers=("NHWC", "HWIO", "NHWC"), precision=hp)

    out = conv(x, q(params["w1"]), stride, ((1, 1), (1, 1)))
    out = jnp.maximum(bn(out, params["bn1_gamma"], params["bn1_beta"],
                         params["bn1_mean"], params["bn1_var"]), 0.0)
    out = q(out)   # kernel feeds conv2 bf16 activations
    out = conv(out, q(params["w2"]), 1, ((1, 1), (1, 1)))
    out = bn(out, params["bn2_gamma"], params["bn2_beta"],
             params["bn2_mean"], params["bn2_var"])
    if (in_ch != out_ch) or (stride != 1):
        idt = conv(x, q(params["wd"])[None, None], stride, ((0, 0), (0, 0)))
        idt = bn(idt, params["bnd_gamma"], params["bnd_beta"],
                 params["bnd_mean"], params["bnd_var"])
    else:
        idt = x
    out = jnp.maximum(out + idt, 0.0)
    return jnp.transpose(out, (0, 3, 1, 2))


def init_params(key, in_ch, out_ch):
    ks = jax.random.split(key, 16)

    def bn_params(k0, k1, k2, k3, c):
        return dict(
            gamma=jax.random.uniform(k0, (c,), jnp.float32, 0.5, 1.5),
            beta=jax.random.normal(k1, (c,), jnp.float32) * 0.1,
            mean=jax.random.normal(k2, (c,), jnp.float32) * 0.1,
            var=jax.random.uniform(k3, (c,), jnp.float32, 0.5, 1.5),
        )

    bn1 = bn_params(ks[2], ks[3], ks[4], ks[5], out_ch)
    bn2 = bn_params(ks[6], ks[7], ks[8], ks[9], out_ch)
    bnd = bn_params(ks[11], ks[12], ks[13], ks[14], out_ch)
    return {
        "w1": jax.random.normal(ks[0], (3, 3, in_ch, out_ch), jnp.float32) * 0.1,
        "w2": jax.random.normal(ks[1], (3, 3, out_ch, out_ch), jnp.float32) * 0.1,
        "wd": jax.random.normal(ks[10], (in_ch, out_ch), jnp.float32) * 0.1,
        "bn1_gamma": bn1["gamma"], "bn1_beta": bn1["beta"],
        "bn1_mean": bn1["mean"], "bn1_var": bn1["var"],
        "bn2_gamma": bn2["gamma"], "bn2_beta": bn2["beta"],
        "bn2_mean": bn2["mean"], "bn2_var": bn2["var"],
        "bnd_gamma": bnd["gamma"], "bnd_beta": bnd["beta"],
        "bnd_mean": bnd["mean"], "bnd_var": bnd["var"],
    }


if __name__ == "__main__":
    key = jax.random.PRNGKey(0)
    kx, kp = jax.random.split(key)

    in_ch, out_ch, stride = 4, 8, 1         # in != out -> downsample branch active
    x = jax.random.normal(kx, (2, in_ch, 16, 16), jnp.float32)   # NCHW like PyTorch
    params = init_params(kp, in_ch, out_ch)

    y = jax.block_until_ready(basic_block_forward(x, params, stride=stride))
    y_ref = jax.block_until_ready(ref_basic_block(x, params, stride=stride))

    np.testing.assert_allclose(np.asarray(y.astype(jnp.float32)),
                               np.asarray(y_ref),
                               rtol=2e-2, atol=2e-2)
    print("KERNEL_OK")
</pallas_src>

<mosaic_0001>
module attributes {stable_mosaic.version = 11 : i64} {
  func.func @kernel(%arg0: i32, %arg1: memref<2x16x16x4xbf16, #tpu.memory_space<vmem>>, %arg2: memref<36x16xbf16, #tpu.memory_space<vmem>>, %arg3: memref<1x16xf32, #tpu.memory_space<vmem>>, %arg4: memref<1x16xf32, #tpu.memory_space<vmem>>, %arg5: memref<72x8xbf16, #tpu.memory_space<vmem>>, %arg6: memref<1x8xf32, #tpu.memory_space<vmem>>, %arg7: memref<1x8xf32, #tpu.memory_space<vmem>>, %arg8: memref<2x8x256xbf16, #tpu.memory_space<vmem>>, %arg9: memref<2x18x18x4xf32, #tpu.memory_space<vmem>>, %arg10: memref<2x18x18x8xf32, #tpu.memory_space<vmem>>, %arg11: memref<512x72xbf16, #tpu.memory_space<vmem>>) attributes {dimension_semantics = [#tpu.dimension_semantics<parallel>], iteration_bounds = array<i64: 1>, scalar_prefetch = 0 : i64, scratch_operands = 3 : i64, tpu.core_type = #tpu.core_type<tc>, window_params = [{transform_indices = @transform_0, window_bounds = array<i64: 2, 16, 16, 4>}, {pipeline_mode = #tpu.pipeline_mode<synchronous>, transform_indices = @transform_1, window_bounds = array<i64: 36, 16>}, {pipeline_mode = #tpu.pipeline_mode<synchronous>, transform_indices = @transform_2, window_bounds = array<i64: 1, 16>}, {pipeline_mode = #tpu.pipeline_mode<synchronous>, transform_indices = @transform_3, window_bounds = array<i64: 1, 16>}, {pipeline_mode = #tpu.pipeline_mode<synchronous>, transform_indices = @transform_4, window_bounds = array<i64: 72, 8>}, {pipeline_mode = #tpu.pipeline_mode<synchronous>, transform_indices = @transform_5, window_bounds = array<i64: 1, 8>}, {pipeline_mode = #tpu.pipeline_mode<synchronous>, transform_indices = @transform_6, window_bounds = array<i64: 1, 8>}, {transform_indices = @transform_7, window_bounds = array<i64: 2, 8, 256>}]} {
    %cst = arith.constant 0.000000e+00 : f32
    %0 = vector.broadcast %cst : f32 to vector<2x1x18x4xf32>
    %cst_0 = arith.constant 0.000000e+00 : f32
    %1 = vector.broadcast %cst_0 : f32 to vector<2x18x1x4xf32>
    %c0 = arith.constant 0 : index
    %c0_1 = arith.constant 0 : index
    %c0_2 = arith.constant 0 : index
    %c0_3 = arith.constant 0 : index
    %2 = vector.load %arg9[%c0, %c0_1, %c0_2, %c0_3] : memref<2x18x18x4xf32, #tpu.memory_space<vmem>>, vector<2x1x18x4xf32>
    tpu.vector_store %arg9[%c0, %c0_1, %c0_2, %c0_3], %0 {strides = array<i32>} : memref<2x18x18x4xf32, #tpu.memory_space<vmem>>, vector<2x1x18x4xf32>,
    %c0_4 = arith.constant 0 : index
    %c17 = arith.constant 17 : index
    %c0_5 = arith.constant 0 : index
    %c0_6 = arith.constant 0 : index
    %3 = vector.load %arg9[%c0_4, %c17, %c0_5, %c0_6] : memref<2x18x18x4xf32, #tpu.memory_space<vmem>>, vector<2x1x18x4xf32>
    tpu.vector_store %arg9[%c0_4, %c17, %c0_5, %c0_6], %0 {strides = array<i32>} : memref<2x18x18x4xf32, #tpu.memory_space<vmem>>, vector<2x1x18x4xf32>,
    %c0_7 = arith.constant 0 : index
    %c0_8 = arith.constant 0 : index
    %c0_9 = arith.constant 0 : index
    %c0_10 = arith.constant 0 : index
    %4 = vector.load %arg9[%c0_7, %c0_8, %c0_9, %c0_10] : memref<2x18x18x4xf32, #tpu.memory_space<vmem>>, vector<2x18x1x4xf32>
    tpu.vector_store %arg9[%c0_7, %c0_8, %c0_9, %c0_10], %1 {strides = array<i32>} : memref<2x18x18x4xf32, #tpu.memory_space<vmem>>, vector<2x18x1x4xf32>,
    %c0_11 = arith.constant 0 : index
    %c0_12 = arith.constant 0 : index
    %c17_13 = arith.constant 17 : index
    %c0_14 = arith.constant 0 : index
    %5 = vector.load %arg9[%c0_11, %c0_12, %c17_13, %c0_14] : memref<2x18x18x4xf32, #tpu.memory_space<vmem>>, vector<2x18x1x4xf32>
    tpu.vector_store %arg9[%c0_11, %c0_12, %c17_13, %c0_14], %1 {strides = array<i32>} : memref<2x18x18x4xf32, #tpu.memory_space<vmem>>, vector<2x18x1x4xf32>,
    %cst_15 = arith.constant 0.000000e+00 : f32
    %6 = vector.broadcast %cst_15 : f32 to vector<2x1x18x8xf32>
    %cst_16 = arith.constant 0.000000e+00 : f32
    %7 = vector.broadcast %cst_16 : f32 to vector<2x18x1x8xf32>
    %c0_17 = arith.constant 0 : index
    %c0_18 = arith.constant 0 : index
    %c0_19 = arith.constant 0 : index
    %c0_20 = arith.constant 0 : index
    %8 = vector.load %arg10[%c0_17, %c0_18, %c0_19, %c0_20] : memref<2x18x18x8xf32, #tpu.memory_space<vmem>>, vector<2x1x18x8xf32>
    tpu.vector_store %arg10[%c0_17, %c0_18, %c0_19, %c0_20], %6 {strides = array<i32>} : memref<2x18x18x8xf32, #tpu.memory_space<vmem>>, vector<2x1x18x8xf32>,
    %c0_21 = arith.constant 0 : index
    %c17_22 = arith.constant 17 : index
    %c0_23 = arith.constant 0 : index
    %c0_24 = arith.constant 0 : index
    %9 = vector.load %arg10[%c0_21, %c17_22, %c0_23, %c0_24] : memref<2x18x18x8xf32, #tpu.memory_space<vmem>>, vector<2x1x18x8xf32>
    tpu.vector_store %arg10[%c0_21, %c17_22, %c0_23, %c0_24], %6 {strides = array<i32>} : memref<2x18x18x8xf32, #tpu.memory_space<vmem>>, vector<2x1x18x8xf32>,
    %c0_25 = arith.constant 0 : index
    %c0_26 = arith.constant 0 : index
    %c0_27 = arith.constant 0 : index
    %c0_28 = arith.constant 0 : index
    %10 = vector.load %arg10[%c0_25, %c0_26, %c0_27, %c0_28] : memref<2x18x18x8xf32, #tpu.memory_space<vmem>>, vector<2x18x1x8xf32>
    tpu.vector_store %arg10[%c0_25, %c0_26, %c0_27, %c0_28], %7 {strides = array<i32>} : memref<2x18x18x8xf32, #tpu.memory_space<vmem>>, vector<2x18x1x8xf32>,
    %c0_29 = arith.constant 0 : index
    %c0_30 = arith.constant 0 : index
    %c17_31 = arith.constant 17 : index
    %c0_32 = arith.constant 0 : index
    %11 = vector.load %arg10[%c0_29, %c0_30, %c17_31, %c0_32] : memref<2x18x18x8xf32, #tpu.memory_space<vmem>>, vector<2x18x1x8xf32>
    tpu.vector_store %arg10[%c0_29, %c0_30, %c17_31, %c0_32], %7 {strides = array<i32>} : memref<2x18x18x8xf32, #tpu.memory_space<vmem>>, vector<2x18x1x8xf32>,
    %c0_33 = arith.constant 0 : index
    %c0_34 = arith.constant 0 : index
    %c0_35 = arith.constant 0 : index
    %c0_36 = arith.constant 0 : index
    %12 = vector.load %arg1[%c0_33, %c0_34, %c0_35, %c0_36] : memref<2x16x16x4xbf16, #tpu.memory_space<vmem>>, vector<2x16x16x4xbf16>
    %13 = arith.extf %12 : vector<2x16x16x4xbf16> to vector<2x16x16x4xf32>
    %c0_37 = arith.constant 0 : index
    %c1 = arith.constant 1 : index
    %c1_38 = arith.constant 1 : index
    %c0_39 = arith.constant 0 : index
    %14 = vector.load %arg9[%c0_37, %c1, %c1_38, %c0_39] : memref<2x18x18x4xf32, #tpu.memory_space<vmem>>, vector<2x16x16x4xf32>
    tpu.vector_store %arg9[%c0_37, %c1, %c1_38, %c0_39], %13 {strides = array<i32>} : memref<2x18x18x4xf32, #tpu.memory_space<vmem>>, vector<2x16x16x4xf32>,
    %c0_40 = arith.constant 0 : index
    %c0_41 = arith.constant 0 : index
    %c0_42 = arith.constant 0 : index
    %c0_43 = arith.constant 0 : index
    %15 = vector.load %arg9[%c0_40, %c0_41, %c0_42, %c0_43] : memref<2x18x18x4xf32, #tpu.memory_space<vmem>>, vector<2x16x16x4xf32>
    %16 = vector.shape_cast %15 : vector<2x16x16x4xf32> to vector<512x4xf32>
    %17 = arith.truncf %16 : vector<512x4xf32> to vector<512x4xbf16>
    %c0_44 = arith.constant 0 : index
    %c0_45 = arith.constant 0 : index
    %18 = vector.load %arg11[%c0_44, %c0_45] : memref<512x72xbf16, #tpu.memory_space<vmem>>, vector<512x4xbf16>
    tpu.vector_store %arg11[%c0_44, %c0_45], %17 {strides = array<i32>} : memref<512x72xbf16, #tpu.memory_space<vmem>>, vector<512x4xbf16>,
    %c0_46 = arith.constant 0 : index
    %c0_47 = arith.constant 0 : index
    %c1_48 = arith.constant 1 : index
    %c0_49 = arith.constant 0 : index
    %19 = vector.load %arg9[%c0_46, %c0_47, %c1_48, %c0_49] : memref<2x18x18x4xf32, #tpu.memory_space<vmem>>, vector<2x16x16x4xf32>
    %20 = vector.shape_cast %19 : vector<2x16x16x4xf32> to vector<512x4xf32>
    %21 = arith.truncf %20 : vector<512x4xf32> to vector<512x4xbf16>
    %c0_50 = arith.constant 0 : index
    %c4 = arith.constant 4 : index
    %22 = vector.load %arg11[%c0_50, %c4] : memref<512x72xbf16, #tpu.memory_space<vmem>>, vector<512x4xbf16>
    tpu.vector_store %arg11[%c0_50, %c4], %21 {strides = array<i32>} : memref<512x72xbf16, #tpu.memory_space<vmem>>, vector<512x4xbf16>,
    %c0_51 = arith.constant 0 : index
    %c0_52 = arith.constant 0 : index
    %c2 = arith.constant 2 : index
    %c0_53 = arith.constant 0 : index
    %23 = vector.load %arg9[%c0_51, %c0_52, %c2, %c0_53] : memref<2x18x18x4xf32, #tpu.memory_space<vmem>>, vector<2x16x16x4xf32>
    %24 = vector.shape_cast %23 : vector<2x16x16x4xf32> to vector<512x4xf32>
    %25 = arith.truncf %24 : vector<512x4xf32> to vector<512x4xbf16>
    %c0_54 = arith.constant 0 : index
    %c8 = arith.constant 8 : index
    %26 = vector.load %arg11[%c0_54, %c8] : memref<512x72xbf16, #tpu.memory_space<vmem>>, vector<512x4xbf16>
    tpu.vector_store %arg11[%c0_54, %c8], %25 {strides = array<i32>} : memref<512x72xbf16, #tpu.memory_space<vmem>>, vector<512x4xbf16>,
    %c0_55 = arith.constant 0 : index
    %c1_56 = arith.constant 1 : index
    %c0_57 = arith.constant 0 : index
    %c0_58 = arith.constant 0 : index
    %27 = vector.load %arg9[%c0_55, %c1_56, %c0_57, %c0_58] : memref<2x18x18x4xf32, #tpu.memory_space<vmem>>, vector<2x16x16x4xf32>
    %28 = vector.shape_cast %27 : vector<2x16x16x4xf32> to vector<512x4xf32>
    %29 = arith.truncf %28 : vector<512x4xf32> to vector<512x4xbf16>
    %c0_59 = arith.constant 0 : index
    %c12 = arith.constant 12 : index
    %30 = vector.load %arg11[%c0_59, %c12] : memref<512x72xbf16, #tpu.memory_space<vmem>>, vector<512x4xbf16>
    tpu.vector_store %arg11[%c0_59, %c12], %29 {strides = array<i32>} : memref<512x72xbf16, #tpu.memory_space<vmem>>, vector<512x4xbf16>,
    %c0_60 = arith.constant 0 : index
    %c1_61 = arith.constant 1 : index
    %c1_62 = arith.constant 1 : index
    %c0_63 = arith.constant 0 : index
    %31 = vector.load %arg9[%c0_60, %c1_61, %c1_62, %c0_63] : memref<2x18x18x4xf32, #tpu.memory_space<vmem>>, vector<2x16x16x4xf32>
    %32 = vector.shape_cast %31 : vector<2x16x16x4xf32> to vector<512x4xf32>
    %33 = arith.truncf %32 : vector<512x4xf32> to vector<512x4xbf16>
    %c0_64 = arith.constant 0 : index
    %c16 = arith.constant 16 : index
    %34 = vector.load %arg11[%c0_64, %c16] : memref<512x72xbf16, #tpu.memory_space<vmem>>, vector<512x4xbf16>
    tpu.vector_store %arg11[%c0_64, %c16], %33 {strides = array<i32>} : memref<512x72xbf16, #tpu.memory_space<vmem>>, vector<512x4xbf16>,
    %c0_65 = arith.constant 0 : index
    %c1_66 = arith.constant 1 : index
    %c2_67 = arith.constant 2 : index
    %c0_68 = arith.constant 0 : index
    %35 = vector.load %arg9[%c0_65, %c1_66, %c2_67, %c0_68] : memref<2x18x18x4xf32, #tpu.memory_space<vmem>>, vector<2x16x16x4xf32>
    %36 = vector.shape_cast %35 : vector<2x16x16x4xf32> to vector<512x4xf32>
    %37 = arith.truncf %36 : vector<512x4xf32> to vector<512x4xbf16>
    %c0_69 = arith.constant 0 : index
    %c20 = arith.constant 20 : index
    %38 = vector.load %arg11[%c0_69, %c20] : memref<512x72xbf16, #tpu.memory_space<vmem>>, vector<512x4xbf16>
    tpu.vector_store %arg11[%c0_69, %c20], %37 {strides = array<i32>} : memref<512x72xbf16, #tpu.memory_space<vmem>>, vector<512x4xbf16>,
    %c0_70 = arith.constant 0 : index
    %c2_71 = arith.constant 2 : index
    %c0_72 = arith.constant 0 : index
    %c0_73 = arith.constant 0 : index
    %39 = vector.load %arg9[%c0_70, %c2_71, %c0_72, %c0_73] : memref<2x18x18x4xf32, #tpu.memory_space<vmem>>, vector<2x16x16x4xf32>
    %40 = vector.shape_cast %39 : vector<2x16x16x4xf32> to vector<512x4xf32>
    %41 = arith.truncf %40 : vector<512x4xf32> to vector<512x4xbf16>
    %c0_74 = arith.constant 0 : index
    %c24 = arith.constant 24 : index
    %42 = vector.load %arg11[%c0_74, %c24] : memref<512x72xbf16, #tpu.memory_space<vmem>>, vector<512x4xbf16>
    tpu.vector_store %arg11[%c0_74, %c24], %41 {strides = array<i32>} : memref<512x72xbf16, #tpu.memory_space<vmem>>, vector<512x4xbf16>,
    %c0_75 = arith.constant 0 : index
    %c2_76 = arith.constant 2 : index
    %c1_77 = arith.constant 1 : index
    %c0_78 = arith.constant 0 : index
    %43 = vector.load %arg9[%c0_75, %c2_76, %c1_77, %c0_78] : memref<2x18x18x4xf32, #tpu.memory_space<vmem>>, vector<2x16x16x4xf32>
    %44 = vector.shape_cast %43 : vector<2x16x16x4xf32> to vector<512x4xf32>
    %45 = arith.truncf %44 : vector<512x4xf32> to vector<512x4xbf16>
    %c0_79 = arith.constant 0 : index
    %c28 = arith.constant 28 : index
    %46 = vector.load %arg11[%c0_79, %c28] : memref<512x72xbf16, #tpu.memory_space<vmem>>, vector<512x4xbf16>
    tpu.vector_store %arg11[%c0_79, %c28], %45 {strides = array<i32>} : memref<512x72xbf16, #tpu.memory_space<vmem>>, vector<512x4xbf16>,
    %c0_80 = arith.constant 0 : index
    %c2_81 = arith.constant 2 : index
    %c2_82 = arith.constant 2 : index
    %c0_83 = arith.constant 0 : index
    %47 = vector.load %arg9[%c0_80, %c2_81, %c2_82, %c0_83] : memref<2x18x18x4xf32, #tpu.memory_space<vmem>>, vector<2x16x16x4xf32>
    %48 = vector.shape_cast %47 : vector<2x16x16x4xf32> to vector<512x4xf32>
    %49 = arith.truncf %48 : vector<512x4xf32> to vector<512x4xbf16>
    %c0_84 = arith.constant 0 : index
    %c32 = arith.constant 32 : index
    %50 = vector.load %arg11[%c0_84, %c32] : memref<512x72xbf16, #tpu.memory_space<vmem>>, vector<512x4xbf16>
    tpu.vector_store %arg11[%c0_84, %c32], %49 {strides = array<i32>} : memref<512x72xbf16, #tpu.memory_space<vmem>>, vector<512x4xbf16>,
    %c0_85 = arith.constant 0 : index
    %c0_86 = arith.constant 0 : index
    %51 = vector.load %arg11[%c0_85, %c0_86] : memref<512x72xbf16, #tpu.memory_space<vmem>>, vector<512x36xbf16>
    %c0_87 = arith.constant 0 : index
    %c0_88 = arith.constant 0 : index
    %52 = vector.load %arg2[%c0_87, %c0_88] : memref<36x16xbf16, #tpu.memory_space<vmem>>, vector<36x16xbf16>
    %cst_89 = arith.constant dense<0.000000e+00> : vector<512x16xf32>
    %53 = tpu.matmul %51, %52, %cst_89 {dimension_numbers = #tpu.dot_dimension_numbers<[1], [0], [0], [1], [0, 0, 1, 1], [], []>} : vector<512x36xbf16>, vector<36x16xbf16>, vector<512x16xf32> -> vector<512x16xf32>
    %c0_90 = arith.constant 0 : index
    %c0_91 = arith.constant 0 : index
    %54 = vector.load %arg3[%c0_90, %c0_91] : memref<1x16xf32, #tpu.memory_space<vmem>>, vector<1x16xf32>
    %55 = vector.broadcast %54 : vector<1x16xf32> to vector<512x16xf32>
    %56 = arith.mulf %53, %55 : vector<512x16xf32>
    %c0_92 = arith.constant 0 : index
    %c0_93 = arith.constant 0 : index
    %57 = vector.load %arg4[%c0_92, %c0_93] : memref<1x16xf32, #tpu.memory_space<vmem>>, vector<1x16xf32>
    %58 = vector.broadcast %57 : vector<1x16xf32> to vector<512x16xf32>
    %59 = arith.addf %56, %58 : vector<512x16xf32>
    %60 = vector.extract_strided_slice %59 {offsets = [0, 0], sizes = [512, 8], strides = [1, 1]} : vector<512x16xf32> to vector<512x8xf32>
    %cst_94 = arith.constant 0.000000e+00 : f32
    %61 = vector.broadcast %cst_94 : f32 to vector<512x8xf32>
    %62 = arith.maximumf %60, %61 : vector<512x8xf32>
    %63 = vector.extract_strided_slice %59 {offsets = [0, 8], sizes = [512, 8], strides = [1, 1]} : vector<512x16xf32> to vector<512x8xf32>
    %64 = vector.shape_cast %62 : vector<512x8xf32> to vector<2x16x16x8xf32>
    %c0_95 = arith.constant 0 : index
    %c1_96 = arith.constant 1 : index
    %c1_97 = arith.constant 1 : index
    %c0_98 = arith.constant 0 : index
    %65 = vector.load %arg10[%c0_95, %c1_96, %c1_97, %c0_98] : memref<2x18x18x8xf32, #tpu.memory_space<vmem>>, vector<2x16x16x8xf32>
    tpu.vector_store %arg10[%c0_95, %c1_96, %c1_97, %c0_98], %64 {strides = array<i32>} : memref<2x18x18x8xf32, #tpu.memory_space<vmem>>, vector<2x16x16x8xf32>,
    %c0_99 = arith.constant 0 : index
    %c0_100 = arith.constant 0 : index
    %c0_101 = arith.constant 0 : index
    %c0_102 = arith.constant 0 : index
    %66 = vector.load %arg10[%c0_99, %c0_100, %c0_101, %c0_102] : memref<2x18x18x8xf32, #tpu.memory_space<vmem>>, vector<2x16x16x8xf32>
    %67 = vector.shape_cast %66 : vector<2x16x16x8xf32> to vector<512x8xf32>
    %68 = arith.truncf %67 : vector<512x8xf32> to vector<512x8xbf16>
    %c0_103 = arith.constant 0 : index
    %c0_104 = arith.constant 0 : index
    %69 = vector.load %arg11[%c0_103, %c0_104] : memref<512x72xbf16, #tpu.memory_space<vmem>>, vector<512x8xbf16>
    tpu.vector_store %arg11[%c0_103, %c0_104], %68 {strides = array<i32>} : memref<512x72xbf16, #tpu.memory_space<vmem>>, vector<512x8xbf16>,
    %c0_105 = arith.constant 0 : index
    %c0_106 = arith.constant 0 : index
    %c1_107 = arith.constant 1 : index
    %c0_108 = arith.constant 0 : index
    %70 = vector.load %arg10[%c0_105, %c0_106, %c1_107, %c0_108] : memref<2x18x18x8xf32, #tpu.memory_space<vmem>>, vector<2x16x16x8xf32>
    %71 = vector.shape_cast %70 : vector<2x16x16x8xf32> to vector<512x8xf32>
    %72 = arith.truncf %71 : vector<512x8xf32> to vector<512x8xbf16>
    %c0_109 = arith.constant 0 : index
    %c8_110 = arith.constant 8 : index
    %73 = vector.load %arg11[%c0_109, %c8_110] : memref<512x72xbf16, #tpu.memory_space<vmem>>, vector<512x8xbf16>
    tpu.vector_store %arg11[%c0_109, %c8_110], %72 {strides = array<i32>} : memref<512x72xbf16, #tpu.memory_space<vmem>>, vector<512x8xbf16>,
    %c0_111 = arith.constant 0 : index
    %c0_112 = arith.constant 0 : index
    %c2_113 = arith.constant 2 : index
    %c0_114 = arith.constant 0 : index
    %74 = vector.load %arg10[%c0_111, %c0_112, %c2_113, %c0_114] : memref<2x18x18x8xf32, #tpu.memory_space<vmem>>, vector<2x16x16x8xf32>
    %75 = vector.shape_cast %74 : vector<2x16x16x8xf32> to vector<512x8xf32>
    %76 = arith.truncf %75 : vector<512x8xf32> to vector<512x8xbf16>
    %c0_115 = arith.constant 0 : index
    %c16_116 = arith.constant 16 : index
    %77 = vector.load %arg11[%c0_115, %c16_116] : memref<512x72xbf16, #tpu.memory_space<vmem>>, vector<512x8xbf16>
    tpu.vector_store %arg11[%c0_115, %c16_116], %76 {strides = array<i32>} : memref<512x72xbf16, #tpu.memory_space<vmem>>, vector<512x8xbf16>,
    %c0_117 = arith.constant 0 : index
    %c1_118 = arith.constant 1 : index
    %c0_119 = arith.constant 0 : index
    %c0_120 = arith.constant 0 : index
    %78 = vector.load %arg10[%c0_117, %c1_118, %c0_119, %c0_120] : memref<2x18x18x8xf32, #tpu.memory_space<vmem>>, vector<2x16x16x8xf32>
    %79 = vector.shape_cast %78 : vector<2x16x16x8xf32> to vector<512x8xf32>
    %80 = arith.truncf %79 : vector<512x8xf32> to vector<512x8xbf16>
    %c0_121 = arith.constant 0 : index
    %c24_122 = arith.constant 24 : index
    %81 = vector.load %arg11[%c0_121, %c24_122] : memref<512x72xbf16, #tpu.memory_space<vmem>>, vector<512x8xbf16>
    tpu.vector_store %arg11[%c0_121, %c24_122], %80 {strides = array<i32>} : memref<512x72xbf16, #tpu.memory_space<vmem>>, vector<512x8xbf16>,
    %c0_123 = arith.constant 0 : index
    %c1_124 = arith.constant 1 : index
    %c1_125 = arith.constant 1 : index
    %c0_126 = arith.constant 0 : index
    %82 = vector.load %arg10[%c0_123, %c1_124, %c1_125, %c0_126] : memref<2x18x18x8xf32, #tpu.memory_space<vmem>>, vector<2x16x16x8xf32>
    %83 = vector.shape_cast %82 : vector<2x16x16x8xf32> to vector<512x8xf32>
    %84 = arith.truncf %83 : vector<512x8xf32> to vector<512x8xbf16>
    %c0_127 = arith.constant 0 : index
    %c32_128 = arith.constant 32 : index
    %85 = vector.load %arg11[%c0_127, %c32_128] : memref<512x72xbf16, #tpu.memory_space<vmem>>, vector<512x8xbf16>
    tpu.vector_store %arg11[%c0_127, %c32_128], %84 {strides = array<i32>} : memref<512x72xbf16, #tpu.memory_space<vmem>>, vector<512x8xbf16>,
    %c0_129 = arith.constant 0 : index
    %c1_130 = arith.constant 1 : index
    %c2_131 = arith.constant 2 : index
    %c0_132 = arith.constant 0 : index
    %86 = vector.load %arg10[%c0_129, %c1_130, %c2_131, %c0_132] : memref<2x18x18x8xf32, #tpu.memory_space<vmem>>, vector<2x16x16x8xf32>
    %87 = vector.shape_cast %86 : vector<2x16x16x8xf32> to vector<512x8xf32>
    %88 = arith.truncf %87 : vector<512x8xf32> to vector<512x8xbf16>
    %c0_133 = arith.constant 0 : index
    %c40 = arith.constant 40 : index
    %89 = vector.load %arg11[%c0_133, %c40] : memref<512x72xbf16, #tpu.memory_space<vmem>>, vector<512x8xbf16>
    tpu.vector_store %arg11[%c0_133, %c40], %88 {strides = array<i32>} : memref<512x72xbf16, #tpu.memory_space<vmem>>, vector<512x8xbf16>,
    %c0_134 = arith.constant 0 : index
    %c2_135 = arith.constant 2 : index
    %c0_136 = arith.constant 0 : index
    %c0_137 = arith.constant 0 : index
    %90 = vector.load %arg10[%c0_134, %c2_135, %c0_136, %c0_137] : memref<2x18x18x8xf32, #tpu.memory_space<vmem>>, vector<2x16x16x8xf32>
    %91 = vector.shape_cast %90 : vector<2x16x16x8xf32> to vector<512x8xf32>
    %92 = arith.truncf %91 : vector<512x8xf32> to vector<512x8xbf16>
    %c0_138 = arith.constant 0 : index
    %c48 = arith.constant 48 : index
    %93 = vector.load %arg11[%c0_138, %c48] : memref<512x72xbf16, #tpu.memory_space<vmem>>, vector<512x8xbf16>
    tpu.vector_store %arg11[%c0_138, %c48], %92 {strides = array<i32>} : memref<512x72xbf16, #tpu.memory_space<vmem>>, vector<512x8xbf16>,
    %c0_139 = arith.constant 0 : index
    %c2_140 = arith.constant 2 : index
    %c1_141 = arith.constant 1 : index
    %c0_142 = arith.constant 0 : index
    %94 = vector.load %arg10[%c0_139, %c2_140, %c1_141, %c0_142] : memref<2x18x18x8xf32, #tpu.memory_space<vmem>>, vector<2x16x16x8xf32>
    %95 = vector.shape_cast %94 : vector<2x16x16x8xf32> to vector<512x8xf32>
    %96 = arith.truncf %95 : vector<512x8xf32> to vector<512x8xbf16>
    %c0_143 = arith.constant 0 : index
    %c56 = arith.constant 56 : index
    %97 = vector.load %arg11[%c0_143, %c56] : memref<512x72xbf16, #tpu.memory_space<vmem>>, vector<512x8xbf16>
    tpu.vector_store %arg11[%c0_143, %c56], %96 {strides = array<i32>} : memref<512x72xbf16, #tpu.memory_space<vmem>>, vector<512x8xbf16>,
    %c0_144 = arith.constant 0 : index
    %c2_145 = arith.constant 2 : index
    %c2_146 = arith.constant 2 : index
    %c0_147 = arith.constant 0 : index
    %98 = vector.load %arg10[%c0_144, %c2_145, %c2_146, %c0_147] : memref<2x18x18x8xf32, #tpu.memory_space<vmem>>, vector<2x16x16x8xf32>
    %99 = vector.shape_cast %98 : vector<2x16x16x8xf32> to vector<512x8xf32>
    %100 = arith.truncf %99 : vector<512x8xf32> to vector<512x8xbf16>
    %c0_148 = arith.constant 0 : index
    %c64 = arith.constant 64 : index
    %101 = vector.load %arg11[%c0_148, %c64] : memref<512x72xbf16, #tpu.memory_space<vmem>>, vector<512x8xbf16>
    tpu.vector_store %arg11[%c0_148, %c64], %100 {strides = array<i32>} : memref<512x72xbf16, #tpu.memory_space<vmem>>, vector<512x8xbf16>,
    %c0_149 = arith.constant 0 : index
    %c0_150 = arith.constant 0 : index
    %102 = vector.load %arg11[%c0_149, %c0_150] : memref<512x72xbf16, #tpu.memory_space<vmem>>, vector<512x72xbf16>
    %c0_151 = arith.constant 0 : index
    %c0_152 = arith.constant 0 : index
    %103 = vector.load %arg5[%c0_151, %c0_152] : memref<72x8xbf16, #tpu.memory_space<vmem>>, vector<72x8xbf16>
    %cst_153 = arith.constant dense<0.000000e+00> : vector<512x8xf32>
    %104 = tpu.matmul %102, %103, %cst_153 {dimension_numbers = #tpu.dot_dimension_numbers<[1], [0], [0], [1], [0, 0, 1, 1], [], []>} : vector<512x72xbf16>, vector<72x8xbf16>, vector<512x8xf32> -> vector<512x8xf32>
    %c0_154 = arith.constant 0 : index
    %c0_155 = arith.constant 0 : index
    %105 = vector.load %arg6[%c0_154, %c0_155] : memref<1x8xf32, #tpu.memory_space<vmem>>, vector<1x8xf32>
    %106 = vector.broadcast %105 : vector<1x8xf32> to vector<512x8xf32>
    %107 = arith.mulf %104, %106 : vector<512x8xf32>
    %c0_156 = arith.constant 0 : index
    %c0_157 = arith.constant 0 : index
    %108 = vector.load %arg7[%c0_156, %c0_157] : memref<1x8xf32, #tpu.memory_space<vmem>>, vector<1x8xf32>
    %109 = vector.broadcast %108 : vector<1x8xf32> to vector<512x8xf32>
    %110 = arith.addf %107, %109 : vector<512x8xf32>
    %111 = arith.addf %110, %63 : vector<512x8xf32>
    %cst_158 = arith.constant 0.000000e+00 : f32
    %112 = vector.broadcast %cst_158 : f32 to vector<512x8xf32>
    %113 = arith.maximumf %111, %112 : vector<512x8xf32>
    %114 = tpu.transpose %113, [1, 0] : vector<512x8xf32> -> vector<8x512xf32>
    %115 = arith.truncf %114 : vector<8x512xf32> to vector<8x512xbf16>
    %116 = vector.extract_strided_slice %115 {offsets = [0, 0], sizes = [8, 256], strides = [1, 1]} : vector<8x512xbf16> to vector<8x256xbf16>
    %c0_159 = arith.constant 0 : index
    %c0_160 = arith.constant 0 : index
    %c0_161 = arith.constant 0 : index
    %117 = vector.load %arg8[%c0_159, %c0_160, %c0_161] : memref<2x8x256xbf16, #tpu.memory_space<vmem>>, vector<1x8x256xbf16>
    %118 = vector.shape_cast %117 : vector<1x8x256xbf16> to vector<8x256xbf16>
    %119 = vector.shape_cast %116 : vector<8x256xbf16> to vector<1x8x256xbf16>
    tpu.vector_store %arg8[%c0_159, %c0_160, %c0_161], %119 {strides = array<i32>} : memref<2x8x256xbf16, #tpu.memory_space<vmem>>, vector<1x8x256xbf16>,
    %120 = vector.extract_strided_slice %115 {offsets = [0, 256], sizes = [8, 256], strides = [1, 1]} : vector<8x512xbf16> to vector<8x256xbf16>
    %c1_162 = arith.constant 1 : index
    %c0_163 = arith.constant 0 : index
    %c0_164 = arith.constant 0 : index
    %121 = vector.load %arg8[%c1_162, %c0_163, %c0_164] : memref<2x8x256xbf16, #tpu.memory_space<vmem>>, vector<1x8x256xbf16>
    %122 = vector.shape_cast %121 : vector<1x8x256xbf16> to vector<8x256xbf16>
    %123 = vector.shape_cast %120 : vector<8x256xbf16> to vector<1x8x256xbf16>
    tpu.vector_store %arg8[%c1_162, %c0_163, %c0_164], %123 {strides = array<i32>} : memref<2x8x256xbf16, #tpu.memory_space<vmem>>, vector<1x8x256xbf16>,
    return
  }
  func.func @transform_0(%arg0: i32) -> (i32, i32, i32, i32) {
    %c0_i32 = arith.constant 0 : i32
    %c0_i32_0 = arith.constant 0 : i32
    %c0_i32_1 = arith.constant 0 : i32
    %c0_i32_2 = arith.constant 0 : i32
    return %arg0, %c0_i32, %c0_i32_0, %c0_i32_1 : i32, i32, i32, i32
  }
  func.func @transform_1(%arg0: i32) -> (i32, i32) {
    %c0_i32 = arith.constant 0 : i32
    %c0_i32_0 = arith.constant 0 : i32
    %c0_i32_1 = arith.constant 0 : i32
    return %c0_i32, %c0_i32_0 : i32, i32
  }
  func.func @transform_2(%arg0: i32) -> (i32, i32) {
    %c0_i32 = arith.constant 0 : i32
    %c0_i32_0 = arith.constant 0 : i32
    %c0_i32_1 = arith.constant 0 : i32
    return %c0_i32, %c0_i32_0 : i32, i32
  }
  func.func @transform_3(%arg0: i32) -> (i32, i32) {
    %c0_i32 = arith.constant 0 : i32
    %c0_i32_0 = arith.constant 0 : i32
    %c0_i32_1 = arith.constant 0 : i32
    return %c0_i32, %c0_i32_0 : i32, i32
  }
  func.func @transform_4(%arg0: i32) -> (i32, i32) {
    %c0_i32 = arith.constant 0 : i32
    %c0_i32_0 = arith.constant 0 : i32
    %c0_i32_1 = arith.constant 0 : i32
    return %c0_i32, %c0_i32_0 : i32, i32
  }
  func.func @transform_5(%arg0: i32) -> (i32, i32) {
    %c0_i32 = arith.constant 0 : i32
    %c0_i32_0 = arith.constant 0 : i32
    %c0_i32_1 = arith.constant 0 : i32
    return %c0_i32, %c0_i32_0 : i32, i32
  }
  func.func @transform_6(%arg0: i32) -> (i32, i32) {
    %c0_i32 = arith.constant 0 : i32
    %c0_i32_0 = arith.constant 0 : i32
    %c0_i32_1 = arith.constant 0 : i32
    return %c0_i32, %c0_i32_0 : i32, i32
  }
  func.func @transform_7(%arg0: i32) -> (i32, i32, i32) {
    %c0_i32 = arith.constant 0 : i32
    %c0_i32_0 = arith.constant 0 : i32
    %c0_i32_1 = arith.constant 0 : i32
    return %arg0, %c0_i32, %c0_i32_0 : i32, i32, i32
  }
}

</mosaic_0001>

<bundles_post_ra>
// kernel: tpu_custom_call.1
= control target key start
LH: loop header
LB: loop body
LE: loop exit
PB: predicated region body
PF: predicated region fallthrough
CT: control target
= control target key end

     0   :  { %vm28_vm0 = vcmask 31744   ;;  %vm31_vm1 = vcmask 25600   ;;  %vm43_vm2 = vcmask 24576   ;;  %v7208_v1 = vmov 0.0   ;;  %s7209_s28 = smov 4   ;;  %s7210_s18 = smov 8   ;;  %s10150_s0 = inlined_call_operand.vmem [shape: bf16[2,16,16,4], index: 0, kind: input, shape index: {}]   ;;  %s10151_s1 = inlined_call_operand.vmem [shape: bf16[36,16], index: 1, kind: input, shape index: {}]   ;;  %s10152_s2 = inlined_call_operand.vmem [shape: f32[1,16], index: 2, kind: input, shape index: {}]   ;;  %s10153_s3 = inlined_call_operand.vmem [shape: f32[1,16], index: 3, kind: input, shape index: {}]   ;;  %s10154_s4 = inlined_call_operand.vmem [shape: bf16[72,8], index: 4, kind: input, shape index: {}]   ;;  %s10155_s5 = inlined_call_operand.vmem [shape: f32[1,8], index: 5, kind: input, shape index: {}]   ;;  %s10156_s6 = inlined_call_operand.vmem [shape: f32[1,8], index: 6, kind: input, shape index: {}]   ;;  %s10157_s7 = inlined_call_operand.hbm [shape: bf16[2,8,256], index: 7, kind: output, shape index: {}]  }
   0x1   :  { %v7267_v0 = vld [vmem:[%s10150_s0 + $0x8] sm:$0xff]   ;;  %29 = vst.msk [vmem:[#allocation2] sm:$0xff] %vm28_vm0, %v7208_v1  ;;  %30 = vst.msk [vmem:[#allocation2 + $0x8] sm:$0xff] %vm28_vm0, %v7208_v1  ;;  %v6708_v4 = vld [vmem:[%s10150_s0] sm:$0xff]  }
   0x2   :  { %32 = vst.msk [vmem:[#allocation2 + $0x10] sm:$0x3] %vm31_vm1, %v7208_v1  ;;  %35 = vst.msk [vmem:[#allocation2 + $0x1c0] sm:$0x3] %vm31_vm1, %v7208_v1  ;;  %v6713_v2 = vunpack.c.l.bf16 %v7267_v0  ;;  %v6714_v3 = vunpack.c.h.bf16 %v7267_v0  ;;  %v6836_v5 = vld [vmem:[%s10150_s0 + $0x10] sm:$0xff]   ;;  %v6837_v6 = vld [vmem:[%s10150_s0 + $0x18] sm:$0xff]   ;;  %v6709_v7 = vunpack.c.l.bf16 %v6708_v4  ;;  %v6710_v8 = vunpack.c.h.bf16 %v6708_v4 }
   0x3   :  { %33 = vst.msk [vmem:[#allocation2 + $0x1b0] sm:$0xff] %vm28_vm0, %v7208_v1  ;;  %34 = vst.msk [vmem:[#allocation2 + $0x1b8] sm:$0xff] %vm28_vm0, %v7208_v1  ;;  %v6717_v9 = vunpack.c.l.bf16 %v6836_v5  ;;  %v6718_v10 = vunpack.c.h.bf16 %v6836_v5  ;;  %v6838_v11 = vld [vmem:[%s10150_s0 + $0x20] sm:$0xff]   ;;  %v6839_v12 = vld [vmem:[%s10150_s0 + $0x28] sm:$0xff]   ;;  %v6721_v14 = vunpack.c.l.bf16 %v6837_v6  ;;  %v6722_v15 = vunpack.c.h.bf16 %v6837_v6 }
   0x4   :  { %37 = vst.msk [vmem:[#allocation2 + $0x198] sm:$0xff] %vm28_vm0, %v7208_v1  ;;  %38 = vst.msk [vmem:[#allocation2 + $0x1a0] sm:$0xff] %vm28_vm0, %v7208_v1  ;;  %v6840_v13 = vld [vmem:[%s10150_s0 + $0x30] sm:$0xff]   ;;  %v6725_v16 = vunpack.c.l.bf16 %v6838_v11  ;;  %v6726_v17 = vunpack.c.h.bf16 %v6838_v11  ;;  %v6841_v18 = vld [vmem:[%s10150_s0 + $0x38] sm:$0xff]   ;;  %v6729_v21 = vunpack.c.l.bf16 %v6839_v12  ;;  %v6730_v22 = vunpack.c.h.bf16 %v6839_v12 }
   0x5   :  { %39 = vst.msk [vmem:[#allocation2 + $0x1a8] sm:$0x3] %vm31_vm1, %v7208_v1  ;;  %42 = vst.msk [vmem:[#allocation2 + $0x358] sm:$0x3] %vm31_vm1, %v7208_v1  ;;  %v6842_v19 = vld [vmem:[%s10150_s0 + $0x40] sm:$0xff]   ;;  %v6843_v20 = vld [vmem:[%s10150_s0 + $0x48] sm:$0xff]   ;;  %v6733_v23 = vunpack.c.l.bf16 %v6840_v13  ;;  %v6734_v24 = vunpack.c.h.bf16 %v6840_v13  ;;  %v6737_v28 = vunpack.c.l.bf16 %v6841_v18  ;;  %v6738_v29 = vunpack.c.h.bf16 %v6841_v18 }
   0x6   :  { %40 = vst.msk [vmem:[#allocation2 + $0x348] sm:$0xff] %vm28_vm0, %v7208_v1  ;;  %41 = vst.msk [vmem:[#allocation2 + $0x350] sm:$0xff] %vm28_vm0, %v7208_v1  ;;  %v6844_v25 = vld [vmem:[%s10150_s0 + $0x50] sm:$0xff]   ;;  %v6845_v26 = vld [vmem:[%s10150_s0 + $0x58] sm:$0xff]   ;;  %v6741_v30 = vunpack.c.l.bf16 %v6842_v19  ;;  %v6742_v31 = vunpack.c.h.bf16 %v6842_v19  ;;  %v6745_v34 = vunpack.c.l.bf16 %v6843_v20  ;;  %v6746_v35 = vunpack.c.h.bf16 %v6843_v20 }
   0x7   :  { %45 = vst.msk [vmem:[#allocation2 + $0x18] sm:$0x1] %vm43_vm2, %v7208_v1  ;;  %46 = vst.msk [vmem:[#allocation2 + $0x30] sm:$0x1] %vm43_vm2, %v7208_v1  ;;  %v6846_v27 = vld [vmem:[%s10150_s0 + $0x60] sm:$0xff]   ;;  %v6847_v32 = vld [vmem:[%s10150_s0 + $0x68] sm:$0xff]   ;;  %v6749_v36 = vunpack.c.l.bf16 %v6844_v25  ;;  %v6750_v37 = vunpack.c.h.bf16 %v6844_v25  ;;  %v6753_v40 = vunpack.c.l.bf16 %v6845_v26  ;;  %v6754_v41 = vunpack.c.h.bf16 %v6845_v26 }
   0x8   :  { %47 = vst.msk [vmem:[#allocation2 + $0x48] sm:$0x1] %vm43_vm2, %v7208_v1  ;;  %48 = vst.msk [vmem:[#allocation2 + $0x60] sm:$0x1] %vm43_vm2, %v7208_v1  ;;  %v6848_v33 = vld [vmem:[%s10150_s0 + $0x70] sm:$0xff]   ;;  %v6850_v38 = vld [vmem:[%s10150_s0 + $0x80] sm:$0xff]   ;;  %v6757_v42 = vunpack.c.l.bf16 %v6846_v27  ;;  %v6758_v43 = vunpack.c.h.bf16 %v6846_v27  ;;  %v6761_v49 = vunpack.c.l.bf16 %v6847_v32  ;;  %v6762_v50 = vunpack.c.h.bf16 %v6847_v32 }
   0x9   :  { %49 = vst.msk [vmem:[#allocation2 + $0x78] sm:$0x1] %vm43_vm2, %v7208_v1  ;;  %50 = vst.msk [vmem:[#allocation2 + $0x90] sm:$0x1] %vm43_vm2, %v7208_v1  ;;  %v6851_v39 = vld [vmem:[%s10150_s0 + $0x88] sm:$0xff]   ;;  %v6852_v44 = vld [vmem:[%s10150_s0 + $0x90] sm:$0xff]   ;;  %v6765_v51 = vunpack.c.l.bf16 %v6848_v33  ;;  %v6766_v52 = vunpack.c.h.bf16 %v6848_v33  ;;  %v6773_v55 = vunpack.c.l.bf16 %v6850_v38  ;;  %v6774_v56 = vunpack.c.h.bf16 %v6850_v38 }
   0xa   :  { %51 = vst.msk [vmem:[#allocation2 + $0xa8] sm:$0x1] %vm43_vm2, %v7208_v1  ;;  %52 = vst.msk [vmem:[#allocation2 + $0xc0] sm:$0x1] %vm43_vm2, %v7208_v1  ;;  %v6853_v45 = vld [vmem:[%s10150_s0 + $0x98] sm:$0xff]   ;;  %v7510_v46 = vld [vmem:[%s10150_s0 + $0xa0] sm:$0xff]   ;;  %v6777_v57 = vunpack.c.l.bf16 %v6851_v39  ;;  %v6778_v63 = vunpack.c.h.bf16 %v6851_v39  ;;  %v6781_v0 = vunpack.c.l.bf16 %v6852_v44 }
   0xb   :  { %53 = vst.msk [vmem:[#allocation2 + $0xd8] sm:$0x1] %vm43_vm2, %v7208_v1  ;;  %54 = vst.msk [vmem:[#allocation2 + $0xf0] sm:$0x1] %vm43_vm2, %v7208_v1  ;;  %v525_v47 = vld [vmem:[#allocation2 + $0x1] sm:$0xff]  ;;  %v526_v48 = vld [vmem:[#allocation2 + $0x9] sm:$0xff] }
   0xc   :  { %55 = vst.msk [vmem:[#allocation2 + $0x108] sm:$0x1] %vm43_vm2, %v7208_v1  ;;  %56 = vst.msk [vmem:[#allocation2 + $0x120] sm:$0x1] %vm43_vm2, %v7208_v1  ;;  %v6855_v53 = vld [vmem:[%s10150_s0 + $0xa8] sm:$0xff]   ;;  %v589_v54 = vpack.c.bf16 %v526_v48, %v525_v47  ;;  %v6856_v58 = vld [vmem:[%s10150_s0 + $0xb0] sm:$0xff]  }
   0xd   :  { %57 = vst.msk [vmem:[#allocation2 + $0x138] sm:$0x1] %vm43_vm2, %v7208_v1  ;;  %58 = vst.msk [vmem:[#allocation2 + $0x150] sm:$0x1] %vm43_vm2, %v7208_v1  ;;  %v6857_v59 = vld [vmem:[%s10150_s0 + $0xb8] sm:$0xff]   ;;  %v7532_v60 = vld [vmem:[%s10150_s0 + $0xc0] sm:$0xff]   ;;  %v6797_v19 = vunpack.c.l.bf16 %v6856_v58  ;;  %v6798_v20 = vunpack.c.h.bf16 %v6856_v58 }
   0xe   :  { %59 = vst.msk [vmem:[#allocation2 + $0x168] sm:$0x1] %vm43_vm2, %v7208_v1  ;;  %60 = vst.msk [vmem:[#allocation2 + $0x180] sm:$0x1] %vm43_vm2, %v7208_v1  ;;  %653 = vrot.lane.b32.xlu0 %v589_v54, %s7209_s28  ;;  %v6805_v25 = vunpack.c.l.bf16 %v7532_v60  ;;  %v6806_v27 = vunpack.c.h.bf16 %v7532_v60  ;;  %v6863_v58 = vld [vmem:[%s10150_s0 + $0xe8] sm:$0xff]  }
   0xf   :  { %63 = vst.msk [vmem:[#allocation2 + $0x1c8] sm:$0x1] %vm43_vm2, %v7208_v1  ;;  %64 = vst.msk [vmem:[#allocation2 + $0x1e0] sm:$0x1] %vm43_vm2, %v7208_v1 }
  0x10   :  { %65 = vst.msk [vmem:[#allocation2 + $0x1f8] sm:$0x1] %vm43_vm2, %v7208_v1  ;;  %66 = vst.msk [vmem:[#allocation2 + $0x210] sm:$0x1] %vm43_vm2, %v7208_v1 }
  0x11   :  { %67 = vst.msk [vmem:[#allocation2 + $0x228] sm:$0x1] %vm43_vm2, %v7208_v1  ;;  %68 = vst.msk [vmem:[#allocation2 + $0x240] sm:$0x1] %vm43_vm2, %v7208_v1 }
  0x12   :  { %69 = vst.msk [vmem:[#allocation2 + $0x258] sm:$0x1] %vm43_vm2, %v7208_v1  ;;  %70 = vst.msk [vmem:[#allocation2 + $0x270] sm:$0x1] %vm43_vm2, %v7208_v1 }
  0x13   :  { %71 = vst.msk [vmem:[#allocation2 + $0x288] sm:$0x1] %vm43_vm2, %v7208_v1  ;;  %72 = vst.msk [vmem:[#allocation2 + $0x2a0] sm:$0x1] %vm43_vm2, %v7208_v1 }
  0x14   :  { %73 = vst.msk [vmem:[#allocation2 + $0x2b8] sm:$0x1] %vm43_vm2, %v7208_v1  ;;  %74 = vst.msk [vmem:[#allocation2 + $0x2d0] sm:$0x1] %vm43_vm2, %v7208_v1 }
  0x15   :  { %75 = vst.msk [vmem:[#allocation2 + $0x2e8] sm:$0x1] %vm43_vm2, %v7208_v1  ;;  %76 = vst.msk [vmem:[#allocation2 + $0x300] sm:$0x1] %vm43_vm2, %v7208_v1 }
  0x16   :  { %77 = vst.msk [vmem:[#allocation2 + $0x318] sm:$0x1] %vm43_vm2, %v7208_v1  ;;  %78 = vst.msk [vmem:[#allocation2 + $0x330] sm:$0x1] %vm43_vm2, %v7208_v1 }
  0x17   :  { %81 = vst.msk [vmem:[#allocation2 + $0x29] sm:$0x1] %vm43_vm2, %v7208_v1  ;;  %82 = vst.msk [vmem:[#allocation2 + $0x41] sm:$0x1] %vm43_vm2, %v7208_v1 }
  0x18   :  { %83 = vst.msk [vmem:[#allocation2 + $0x59] sm:$0x1] %vm43_vm2, %v7208_v1  ;;  %84 = vst.msk [vmem:[#allocation2 + $0x71] sm:$0x1] %vm43_vm2, %v7208_v1 }
  0x19   :  { %85 = vst.msk [vmem:[#allocation2 + $0x89] sm:$0x1] %vm43_vm2, %v7208_v1  ;;  %86 = vst.msk [vmem:[#allocation2 + $0xa1] sm:$0x1] %vm43_vm2, %v7208_v1 }
  0x1a   :  { %87 = vst.msk [vmem:[#allocation2 + $0xb9] sm:$0x1] %vm43_vm2, %v7208_v1  ;;  %88 = vst.msk [vmem:[#allocation2 + $0xd1] sm:$0x1] %vm43_vm2, %v7208_v1 }
  0x1b   :  { %89 = vst.msk [vmem:[#allocation2 + $0xe9] sm:$0x1] %vm43_vm2, %v7208_v1  ;;  %90 = vst.msk [vmem:[#allocation2 + $0x101] sm:$0x1] %vm43_vm2, %v7208_v1 }
  0x1c   :  { %91 = vst.msk [vmem:[#allocation2 + $0x119] sm:$0x1] %vm43_vm2, %v7208_v1  ;;  %92 = vst.msk [vmem:[#allocation2 + $0x131] sm:$0x1] %vm43_vm2, %v7208_v1 }
  0x1d   :  { %93 = vst.msk [vmem:[#allocation2 + $0x149] sm:$0x1] %vm43_vm2, %v7208_v1  ;;  %94 = vst.msk [vmem:[#allocation2 + $0x161] sm:$0x1] %vm43_vm2, %v7208_v1 }
  0x1e   :  { %95 = vst.msk [vmem:[#allocation2 + $0x179] sm:$0x1] %vm43_vm2, %v7208_v1  ;;  %96 = vst.msk [vmem:[#allocation2 + $0x191] sm:$0x1] %vm43_vm2, %v7208_v1 }
  0x1f   :  { %99 = vst.msk [vmem:[#allocation2 + $0x1d9] sm:$0x1] %vm43_vm2, %v7208_v1  ;;  %100 = vst.msk [vmem:[#allocation2 + $0x1f1] sm:$0x1] %vm43_vm2, %v7208_v1 }
  0x20   :  { %101 = vst.msk [vmem:[#allocation2 + $0x209] sm:$0x1] %vm43_vm2, %v7208_v1  ;;  %102 = vst.msk [vmem:[#allocation2 + $0x221] sm:$0x1] %vm43_vm2, %v7208_v1 }
  0x21   :  { %103 = vst.msk [vmem:[#allocation2 + $0x239] sm:$0x1] %vm43_vm2, %v7208_v1  ;;  %104 = vst.msk [vmem:[#allocation2 + $0x251] sm:$0x1] %vm43_vm2, %v7208_v1 }
  0x22   :  { %105 = vst.msk [vmem:[#allocation2 + $0x269] sm:$0x1] %vm43_vm2, %v7208_v1  ;;  %106 = vst.msk [vmem:[#allocation2 + $0x281] sm:$0x1] %vm43_vm2, %v7208_v1 }
  0x23   :  { %107 = vst.msk [vmem:[#allocation2 + $0x299] sm:$0x1] %vm43_vm2, %v7208_v1  ;;  %108 = vst.msk [vmem:[#allocation2 + $0x2b1] sm:$0x1] %vm43_vm2, %v7208_v1 }
  0x24   :  { %109 = vst.msk [vmem:[#allocation2 + $0x2c9] sm:$0x1] %vm43_vm2, %v7208_v1  ;;  %110 = vst.msk [vmem:[#allocation2 + $0x2e1] sm:$0x1] %vm43_vm2, %v7208_v1 }
  0x25   :  { %111 = vst.msk [vmem:[#allocation2 + $0x2f9] sm:$0x1] %vm43_vm2, %v7208_v1  ;;  %112 = vst.msk [vmem:[#allocation2 + $0x311] sm:$0x1] %vm43_vm2, %v7208_v1 }
  0x26   :  { %113 = vst.msk [vmem:[#allocation2 + $0x329] sm:$0x1] %vm43_vm2, %v7208_v1  ;;  %114 = vst.msk [vmem:[#allocation2 + $0x341] sm:$0x1] %vm43_vm2, %v7208_v1 }
  0x27   :  { %80 = vst.msk [vmem:[#allocation2 + $0x11] sm:$0x1] %vm43_vm2, %v7208_v1  ;;  %44 = vst.msk [vmem:[#allocation2] sm:$0x1] %vm43_vm2, %v7208_v1 }
  0x28   :  { %61 = vst.msk [vmem:[#allocation2 + $0x198] sm:$0x1] %vm43_vm2, %v7208_v1  ;;  %62 = vst.msk [vmem:[#allocation2 + $0x1b0] sm:$0x1] %vm43_vm2, %v7208_v1 }
  0x29   :  { %79 = vst.msk [vmem:[#allocation2 + $0x348] sm:$0x1] %vm43_vm2, %v7208_v1  ;;  %97 = vst.msk [vmem:[#allocation2 + $0x1a9] sm:$0x1] %vm43_vm2, %v7208_v1 }
  0x2a   :  { %98 = vst.msk [vmem:[#allocation2 + $0x1c1] sm:$0x1] %vm43_vm2, %v7208_v1  ;;  %115 = vst.msk [vmem:[#allocation2 + $0x359] sm:$0x1] %vm43_vm2, %v7208_v1 }
  0x2b   :  { %335 = vst.msk [vmem:[#allocation2 + $0x31] sm:$0xff] %vm28_vm0, %v6713_v2  ;;  %336 = vst.msk [vmem:[#allocation2 + $0x39] sm:$0xff] %vm28_vm0, %v6714_v3  ;;  %v6782_v2 = vunpack.c.h.bf16 %v6852_v44  ;;  %v6859_v3 = vld [vmem:[%s10150_s0 + $0xc8] sm:$0xff]  }
  0x2c   :  { %333 = vst.msk [vmem:[#allocation2 + $0x19] sm:$0xff] %vm28_vm0, %v6709_v7  ;;  %334 = vst.msk [vmem:[#allocation2 + $0x21] sm:$0xff] %vm28_vm0, %v6710_v8  ;;  %v6785_v8 = vunpack.c.l.bf16 %v6853_v45 }
  0x2d   :  { %337 = vst.msk [vmem:[#allocation2 + $0x49] sm:$0xff] %vm28_vm0, %v6717_v9  ;;  %338 = vst.msk [vmem:[#allocation2 + $0x51] sm:$0xff] %vm28_vm0, %v6718_v10  ;;  %v6786_v9 = vunpack.c.h.bf16 %v6853_v45  ;;  %v6789_v10 = vunpack.c.l.bf16 %v7510_v46 }
  0x2e   :  { %339 = vst.msk [vmem:[#allocation2 + $0x61] sm:$0xff] %vm28_vm0, %v6721_v14  ;;  %340 = vst.msk [vmem:[#allocation2 + $0x69] sm:$0xff] %vm28_vm0, %v6722_v15  ;;  %v6790_v15 = vunpack.c.h.bf16 %v7510_v46 }
  0x2f   :  { %341 = vst.msk [vmem:[#allocation2 + $0x79] sm:$0xff] %vm28_vm0, %v6725_v16  ;;  %342 = vst.msk [vmem:[#allocation2 + $0x81] sm:$0xff] %vm28_vm0, %v6726_v17  ;;  %v6793_v16 = vunpack.c.l.bf16 %v6855_v53  ;;  %v6794_v17 = vunpack.c.h.bf16 %v6855_v53 }
  0x30   :  { %343 = vst.msk [vmem:[#allocation2 + $0x91] sm:$0xff] %vm28_vm0, %v6729_v21  ;;  %344 = vst.msk [vmem:[#allocation2 + $0x99] sm:$0xff] %vm28_vm0, %v6730_v22 }
  0x31   :  { %345 = vst.msk [vmem:[#allocation2 + $0xa9] sm:$0xff] %vm28_vm0, %v6733_v23  ;;  %346 = vst.msk [vmem:[#allocation2 + $0xb1] sm:$0xff] %vm28_vm0, %v6734_v24  ;;  %v6801_v23 = vunpack.c.l.bf16 %v6857_v59  ;;  %v6802_v24 = vunpack.c.h.bf16 %v6857_v59  ;;  %v6864_v59 = vld [vmem:[%s10150_s0 + $0xf0] sm:$0xff]  }
  0x32   :  { %347 = vst.msk [vmem:[#allocation2 + $0xc1] sm:$0xff] %vm28_vm0, %v6737_v28  ;;  %348 = vst.msk [vmem:[#allocation2 + $0xc9] sm:$0xff] %vm28_vm0, %v6738_v29  ;;  %v529_v61 = vld [vmem:[#allocation2 + $0x31] sm:$0xff]  ;;  %v530_v62 = vld [vmem:[#allocation2 + $0x39] sm:$0xff]  ;;  %v6809_v28 = vunpack.c.l.bf16 %v6859_v3 }
  0x33   :  { %349 = vst.msk [vmem:[#allocation2 + $0xd9] sm:$0xff] %vm28_vm0, %v6741_v30  ;;  %350 = vst.msk [vmem:[#allocation2 + $0xe1] sm:$0xff] %vm28_vm0, %v6742_v31  ;;  %v591_v4 = vpack.c.bf16 %v530_v62, %v529_v61  ;;  %v527_v5 = vld [vmem:[#allocation2 + $0x19] sm:$0xff]  ;;  %v528_v6 = vld [vmem:[#allocation2 + $0x21] sm:$0xff]  ;;  %v6810_v31 = vunpack.c.h.bf16 %v6859_v3  ;;  %v6825_v62 = vunpack.c.l.bf16 %v6863_v58  ;;  %v6829_v3 = vunpack.c.l.bf16 %v6864_v59 }
  0x34   :  { %351 = vst.msk [vmem:[#allocation2 + $0xf1] sm:$0xff] %vm28_vm0, %v6745_v34  ;;  %352 = vst.msk [vmem:[#allocation2 + $0xf9] sm:$0xff] %vm28_vm0, %v6746_v35  ;;  %v531_v7 = vld [vmem:[#allocation2 + $0x49] sm:$0xff]  ;;  %v590_v11 = vpack.c.bf16 %v528_v6, %v527_v5  ;;  %v532_v12 = vld [vmem:[#allocation2 + $0x51] sm:$0xff] }
  0x35   :  { %353 = vst.msk [vmem:[#allocation2 + $0x109] sm:$0xff] %vm28_vm0, %v6749_v36  ;;  %354 = vst.msk [vmem:[#allocation2 + $0x111] sm:$0xff] %vm28_vm0, %v6750_v37  ;;  %v533_v13 = vld [vmem:[#allocation2 + $0x61] sm:$0xff]  ;;  %v534_v14 = vld [vmem:[#allocation2 + $0x69] sm:$0xff]  ;;  %657 = vrot.lane.b32.xlu1 %v591_v4, %s7209_s28  ;;  %v592_v18 = vpack.c.bf16 %v532_v12, %v531_v7  ;;  %v6830_v4 = vunpack.c.h.bf16 %v6864_v59 }
  0x36   :  { %355 = vst.msk [vmem:[#allocation2 + $0x121] sm:$0xff] %vm28_vm0, %v6753_v40  ;;  %356 = vst.msk [vmem:[#allocation2 + $0x129] sm:$0xff] %vm28_vm0, %v6754_v41  ;;  %v535_v21 = vld [vmem:[#allocation2 + $0x79] sm:$0xff]  ;;  %v536_v22 = vld [vmem:[#allocation2 + $0x81] sm:$0xff]  ;;  %655 = vrot.lane.b32.xlu0 %v590_v11, %s7209_s28  ;;  %v593_v26 = vpack.c.bf16 %v534_v14, %v533_v13 }
  0x37   :  { %357 = vst.msk [vmem:[#allocation2 + $0x139] sm:$0xff] %vm28_vm0, %v6757_v42  ;;  %358 = vst.msk [vmem:[#allocation2 + $0x141] sm:$0xff] %vm28_vm0, %v6758_v43  ;;  %v537_v29 = vld [vmem:[#allocation2 + $0x91] sm:$0xff]  ;;  %v538_v30 = vld [vmem:[#allocation2 + $0x99] sm:$0xff]  ;;  %v594_v32 = vpack.c.bf16 %v536_v22, %v535_v21 }
  0x38   :  { %359 = vst.msk [vmem:[#allocation2 + $0x151] sm:$0xff] %vm28_vm0, %v6761_v49  ;;  %360 = vst.msk [vmem:[#allocation2 + $0x159] sm:$0xff] %vm28_vm0, %v6762_v50  ;;  %v539_v33 = vld [vmem:[#allocation2 + $0xa9] sm:$0xff]  ;;  %v540_v34 = vld [vmem:[#allocation2 + $0xb1] sm:$0xff]  ;;  %v595_v35 = vpack.c.bf16 %v538_v30, %v537_v29 }
  0x39   :  { %361 = vst.msk [vmem:[#allocation2 + $0x169] sm:$0xff] %vm28_vm0, %v6765_v51  ;;  %362 = vst.msk [vmem:[#allocation2 + $0x171] sm:$0xff] %vm28_vm0, %v6766_v52  ;;  %659 = vrot.lane.b32.xlu1 %v592_v18, %s7209_s28  ;;  %v541_v36 = vld [vmem:[#allocation2 + $0xc1] sm:$0xff]  ;;  %v542_v37 = vld [vmem:[#allocation2 + $0xc9] sm:$0xff]  ;;  %v596_v38 = vpack.c.bf16 %v540_v34, %v539_v33 }
  0x3a   :  { %365 = vst.msk [vmem:[#allocation2 + $0x1c9] sm:$0xff] %vm28_vm0, %v6773_v55  ;;  %366 = vst.msk [vmem:[#allocation2 + $0x1d1] sm:$0xff] %vm28_vm0, %v6774_v56  ;;  %661 = vrot.lane.b32.xlu0 %v593_v26, %s7209_s28  ;;  %v543_v39 = vld [vmem:[#allocation2 + $0xd9] sm:$0xff]  ;;  %v544_v40 = vld [vmem:[#allocation2 + $0xe1] sm:$0xff]  ;;  %v597_v41 = vpack.c.bf16 %v542_v37, %v541_v36 }
  0x3b   :  { %367 = vst.msk [vmem:[#allocation2 + $0x1e1] sm:$0xff] %vm28_vm0, %v6777_v57  ;;  %368 = vst.msk [vmem:[#allocation2 + $0x1e9] sm:$0xff] %vm28_vm0, %v6778_v63  ;;  %v545_v42 = vld [vmem:[#allocation2 + $0xf1] sm:$0xff]  ;;  %v546_v43 = vld [vmem:[#allocation2 + $0xf9] sm:$0xff]  ;;  %v598_v46 = vpack.c.bf16 %v544_v40, %v543_v39  ;;  %v6826_v63 = vunpack.c.h.bf16 %v6863_v58 }
  0x3c   :  { %369 = vst.msk [vmem:[#allocation2 + $0x1f9] sm:$0xff] %vm28_vm0, %v6781_v0  ;;  %370 = vst.msk [vmem:[#allocation2 + $0x201] sm:$0xff] %vm28_vm0, %v6782_v2  ;;  %v547_v44 = vld [vmem:[#allocation2 + $0x109] sm:$0xff]  ;;  %v548_v45 = vld [vmem:[#allocation2 + $0x111] sm:$0xff]  ;;  %v599_v48 = vpack.c.bf16 %v546_v43, %v545_v42 }
  0x3d   :  { %371 = vst.msk [vmem:[#allocation2 + $0x211] sm:$0xff] %vm28_vm0, %v6785_v8  ;;  %372 = vst.msk [vmem:[#allocation2 + $0x219] sm:$0xff] %vm28_vm0, %v6786_v9  ;;  %663 = vrot.lane.b32.xlu1 %v594_v32, %s7209_s28  ;;  %v549_v47 = vld [vmem:[#allocation2 + $0x121] sm:$0xff]  ;;  %v600_v49 = vpack.c.bf16 %v548_v45, %v547_v44  ;;  %v6860_v50 = vld [vmem:[%s10150_s0 + $0xd0] sm:$0xff]  }
  0x3e   :  { %373 = vst.msk [vmem:[#allocation2 + $0x229] sm:$0xff] %vm28_vm0, %v6789_v10  ;;  %374 = vst.msk [vmem:[#allocation2 + $0x231] sm:$0xff] %vm28_vm0, %v6790_v15  ;;  %665 = vrot.lane.b32.xlu0 %v595_v35, %s7209_s28  ;;  %v6861_v51 = vld [vmem:[%s10150_s0 + $0xd8] sm:$0xff]   ;;  %v6862_v52 = vld [vmem:[%s10150_s0 + $0xe0] sm:$0xff]   ;;  %v6813_v54 = vunpack.c.l.bf16 %v6860_v50  ;;  %v6814_v55 = vunpack.c.h.bf16 %v6860_v50 }
  0x3f   :  { %375 = vst.msk [vmem:[#allocation2 + $0x241] sm:$0xff] %vm28_vm0, %v6793_v16  ;;  %376 = vst.msk [vmem:[#allocation2 + $0x249] sm:$0xff] %vm28_vm0, %v6794_v17  ;;  %v550_v53 = vld [vmem:[#allocation2 + $0x129] sm:$0xff]  ;;  %v6817_v56 = vunpack.c.l.bf16 %v6861_v51  ;;  %v6818_v57 = vunpack.c.h.bf16 %v6861_v51  ;;  %v6821_v60 = vunpack.c.l.bf16 %v6862_v52  ;;  %v6822_v61 = vunpack.c.h.bf16 %v6862_v52  ;;  %v551_v0 = vld [vmem:[#allocation2 + $0x139] sm:$0xff] }
  0x40   :  { %377 = vst.msk [vmem:[#allocation2 + $0x259] sm:$0xff] %vm28_vm0, %v6797_v19  ;;  %378 = vst.msk [vmem:[#allocation2 + $0x261] sm:$0xff] %vm28_vm0, %v6798_v20  ;;  %v552_v2 = vld [vmem:[#allocation2 + $0x141] sm:$0xff]  ;;  %v601_v5 = vpack.c.bf16 %v550_v53, %v549_v47  ;;  %v553_v6 = vld [vmem:[#allocation2 + $0x151] sm:$0xff] }
  0x41   :  { %379 = vst.msk [vmem:[#allocation2 + $0x271] sm:$0xff] %vm28_vm0, %v6801_v23  ;;  %380 = vst.msk [vmem:[#allocation2 + $0x279] sm:$0xff] %vm28_vm0, %v6802_v24  ;;  %667 = vrot.lane.b32.xlu1 %v596_v38, %s7209_s28  ;;  %v554_v7 = vld [vmem:[#allocation2 + $0x159] sm:$0xff]  ;;  %v602_v8 = vpack.c.bf16 %v552_v2, %v551_v0  ;;  %v555_v9 = vld [vmem:[#allocation2 + $0x169] sm:$0xff] }
  0x42   :  { %381 = vst.msk [vmem:[#allocation2 + $0x289] sm:$0xff] %vm28_vm0, %v6805_v25  ;;  %382 = vst.msk [vmem:[#allocation2 + $0x291] sm:$0xff] %vm28_vm0, %v6806_v27  ;;  %669 = vrot.lane.b32.xlu0 %v597_v41, %s7209_s28  ;;  %v556_v10 = vld [vmem:[#allocation2 + $0x171] sm:$0xff]  ;;  %v603_v11 = vpack.c.bf16 %v554_v7, %v553_v6  ;;  %v558_v13 = vld [vmem:[#allocation2 + $0x1b9] sm:$0xff] }
  0x43   :  { %383 = vst.msk [vmem:[#allocation2 + $0x2a1] sm:$0xff] %vm28_vm0, %v6809_v28  ;;  %384 = vst.msk [vmem:[#allocation2 + $0x2a9] sm:$0xff] %vm28_vm0, %v6810_v31  ;;  %v557_v12 = vld [vmem:[#allocation2 + $0x1b1] sm:$0xff]  ;;  %v604_v14 = vpack.c.bf16 %v556_v10, %v555_v9  ;;  %v559_v15 = vld [vmem:[#allocation2 + $0x1c9] sm:$0xff] }
  0x44   :  { %385 = vst.msk [vmem:[#allocation2 + $0x2b9] sm:$0xff] %vm28_vm0, %v6813_v54  ;;  %386 = vst.msk [vmem:[#allocation2 + $0x2c1] sm:$0xff] %vm28_vm0, %v6814_v55  ;;  %v560_v16 = vld [vmem:[#allocation2 + $0x1d1] sm:$0xff]  ;;  %v605_v17 = vpack.c.bf16 %v558_v13, %v557_v12  ;;  %v561_v18 = vld [vmem:[#allocation2 + $0x1e1] sm:$0xff] }
  0x45   :  { %671 = vrot.lane.b32.xlu1 %v598_v46, %s7209_s28  ;;  %387 = vst.msk [vmem:[#allocation2 + $0x2d1] sm:$0xff] %vm28_vm0, %v6817_v56  ;;  %388 = vst.msk [vmem:[#allocation2 + $0x2d9] sm:$0xff] %vm28_vm0, %v6818_v57  ;;  %v562_v19 = vld [vmem:[#allocation2 + $0x1e9] sm:$0xff]  ;;  %v606_v20 = vpack.c.bf16 %v560_v16, %v559_v15  ;;  %v563_v21 = vld [vmem:[#allocation2 + $0x1f9] sm:$0xff] }
  0x46   :  { %673 = vrot.lane.b32.xlu0 %v599_v48, %s7209_s28  ;;  %389 = vst.msk [vmem:[#allocation2 + $0x2e9] sm:$0xff] %vm28_vm0, %v6821_v60  ;;  %390 = vst.msk [vmem:[#allocation2 + $0x2f1] sm:$0xff] %vm28_vm0, %v6822_v61  ;;  %v564_v22 = vld [vmem:[#allocation2 + $0x201] sm:$0xff]  ;;  %v607_v23 = vpack.c.bf16 %v562_v19, %v561_v18  ;;  %v565_v24 = vld [vmem:[#allocation2 + $0x211] sm:$0xff] }
  0x47   :  { %391 = vst.msk [vmem:[#allocation2 + $0x301] sm:$0xff] %vm28_vm0, %v6825_v62  ;;  %392 = vst.msk [vmem:[#allocation2 + $0x309] sm:$0xff] %vm28_vm0, %v6826_v63  ;;  %v566_v25 = vld [vmem:[#allocation2 + $0x219] sm:$0xff]  ;;  %v608_v26 = vpack.c.bf16 %v564_v22, %v563_v21  ;;  %v567_v27 = vld [vmem:[#allocation2 + $0x229] sm:$0xff] }
  0x48   :  { %393 = vst.msk [vmem:[#allocation2 + $0x319] sm:$0xff] %vm28_vm0, %v6829_v3  ;;  %394 = vst.msk [vmem:[#allocation2 + $0x321] sm:$0xff] %vm28_vm0, %v6830_v4  ;;  %v568_v28 = vld [vmem:[#allocation2 + $0x231] sm:$0xff]  ;;  %v609_v29 = vpack.c.bf16 %v566_v25, %v565_v24  ;;  %v569_v30 = vld [vmem:[#allocation2 + $0x241] sm:$0xff] }
  0x49   :  { %675 = vrot.lane.b32.xlu1 %v600_v49, %s7209_s28  ;;  %v570_v31 = vld [vmem:[#allocation2 + $0x249] sm:$0xff]  ;;  %v610_v32 = vpack.c.bf16 %v568_v28, %v567_v27  ;;  %v571_v33 = vld [vmem:[#allocation2 + $0x259] sm:$0xff]  ;;  %v572_v36 = vld [vmem:[#allocation2 + $0x261] sm:$0xff] }
  0x4a   :  { %677 = vrot.lane.b32.xlu0 %v601_v5, %s7209_s28  ;;  %v398_v34 = vld [vmem:[#allocation2 + $0x8] sm:$0xff]  ;;  %v397_v35 = vld [vmem:[#allocation2] sm:$0xff]  ;;  %v401_v38 = vld [vmem:[#allocation2 + $0x30] sm:$0xff]  ;;  %v611_v40 = vpack.c.bf16 %v570_v31, %v569_v30  ;;  %v612_v47 = vpack.c.bf16 %v572_v36, %v571_v33 }
  0x4b   :  { %v461_v37 = vpack.c.bf16 %v398_v34, %v397_v35  ;;  %v402_v39 = vld [vmem:[#allocation2 + $0x38] sm:$0xff]  ;;  %v400_v45 = vld [vmem:[#allocation2 + $0x20] sm:$0xff]  ;;  %v403_v46 = vld [vmem:[#allocation2 + $0x48] sm:$0xff] }
  0x4c   :  { %v573_v41 = vld [vmem:[#allocation2 + $0x271] sm:$0xff]  ;;  %v574_v42 = vld [vmem:[#allocation2 + $0x279] sm:$0xff]  ;;  %v7611_v43 = vpack.c.bf16 %v402_v39, %v401_v38  ;;  %v575_v50 = vld [vmem:[#allocation2 + $0x289] sm:$0xff] }
  0x4d   :  { %679 = vrot.lane.b32.xlu1 %v602_v8, %s7209_s28  ;;  %493 = vst.msk [vmem:[#allocation4] sm:$0xff] %vm28_vm0, %v461_v37  ;;  %v399_v44 = vld [vmem:[#allocation2 + $0x18] sm:$0xff]  ;;  %v404_v49 = vld [vmem:[#allocation2 + $0x50] sm:$0xff]  ;;  %v405_v53 = vld [vmem:[#allocation2 + $0x60] sm:$0xff]  ;;  %v613_v54 = vpack.c.bf16 %v574_v42, %v573_v41 }
  0x4e   :  { %681 = vrot.lane.b32.xlu0 %v603_v11, %s7209_s28  ;;  %495 = vst.msk [vmem:[#allocation4 + $0x10] sm:$0xff] %vm28_vm0, %v7611_v43  ;;  %v7617_v48 = vpack.c.bf16 %v400_v45, %v399_v44  ;;  %v576_v51 = vld [vmem:[#allocation2 + $0x291] sm:$0xff]  ;;  %v7619_v52 = vpack.c.bf16 %v404_v49, %v403_v46  ;;  %v406_v55 = vld [vmem:[#allocation2 + $0x68] sm:$0xff]  ;;  %v408_v57 = vld [vmem:[#allocation2 + $0x80] sm:$0xff] }
  0x4f   :  { %v407_v56 = vld [vmem:[#allocation2 + $0x78] sm:$0xff]  ;;  %v577_v58 = vld [vmem:[#allocation2 + $0x2a1] sm:$0xff]  ;;  %v578_v59 = vld [vmem:[#allocation2 + $0x2a9] sm:$0xff]  ;;  %v7628_v61 = vpack.c.bf16 %v406_v55, %v405_v53  ;;  %v614_v63 = vpack.c.bf16 %v576_v51, %v575_v50 }
  0x50   :  { %494 = vst.msk [vmem:[#allocation4 + $0x8] sm:$0xff] %vm28_vm0, %v7617_v48  ;;  %v7624_v60 = vld [vmem:[#allocation2 + $0x2b9] sm:$0xff]  ;;  %496 = vst.msk [vmem:[#allocation4 + $0x18] sm:$0xff] %vm28_vm0, %v7619_v52  ;;  %v7630_v62 = vpack.c.bf16 %v408_v57, %v407_v56  ;;  %v580_v0 = vld [vmem:[#allocation2 + $0x2c1] sm:$0xff]  ;;  %v615_v10 = vpack.c.bf16 %v578_v59, %v577_v58 }
  0x51   :  { %683 = vrot.lane.b32.xlu1 %v604_v14, %s7209_s28  ;;  %v409_v2 = vld [vmem:[#allocation2 + $0x90] sm:$0xff]  ;;  %v410_v3 = vld [vmem:[#allocation2 + $0x98] sm:$0xff]  ;;  %497 = vst.msk [vmem:[#allocation4 + $0x20] sm:$0xff] %vm28_vm0, %v7628_v61  ;;  %v411_v7 = vld [vmem:[#allocation2 + $0xa8] sm:$0xff]  ;;  %v616_v22 = vpack.c.bf16 %v580_v0, %v7624_v60 }
  0x52   :  { %685 = vrot.lane.b32.xlu0 %v605_v17, %s7209_s28  ;;  %v7633_v4 = vld [vmem:[#allocation2 + $0x2d1] sm:$0xff]  ;;  %v7635_v5 = vld [vmem:[#allocation2 + $0x2d9] sm:$0xff]  ;;  %498 = vst.msk [vmem:[#allocation4 + $0x28] sm:$0xff] %vm28_vm0, %v7630_v62  ;;  %v7641_v6 = vpack.c.bf16 %v410_v3, %v409_v2  ;;  %v414_v12 = vld [vmem:[#allocation2 + $0xc8] sm:$0xff] }
  0x53   :  { %v412_v8 = vld [vmem:[#allocation2 + $0xb0] sm:$0xff]  ;;  %v413_v9 = vld [vmem:[#allocation2 + $0xc0] sm:$0xff]  ;;  %v415_v13 = vld [vmem:[#allocation2 + $0xd8] sm:$0xff]  ;;  %v617_v34 = vpack.c.bf16 %v7635_v5, %v7633_v4 }
  0x54   :  { %v7644_v11 = vpack.c.bf16 %v412_v8, %v411_v7  ;;  %v416_v14 = vld [vmem:[#allocation2 + $0xe0] sm:$0xff]  ;;  %v7646_v15 = vld [vmem:[#allocation2 + $0x2e9] sm:$0xff]  ;;  %v7648_v16 = vld [vmem:[#allocation2 + $0x2f1] sm:$0xff]  ;;  %499 = vst.msk [vmem:[#allocation4 + $0x30] sm:$0xff] %vm28_vm0, %v7641_v6  ;;  %v7652_v17 = vpack.c.bf16 %v414_v12, %v413_v9 }
  0x55   :  { %687 = vrot.lane.b32.xlu1 %v606_v20, %s7209_s28  ;;  %v7654_v18 = vpack.c.bf16 %v416_v14, %v415_v13  ;;  %v417_v19 = vld [vmem:[#allocation2 + $0xf0] sm:$0xff]  ;;  %v418_v20 = vld [vmem:[#allocation2 + $0xf8] sm:$0xff]  ;;  %v419_v21 = vld [vmem:[#allocation2 + $0x108] sm:$0xff] }
  0x56   :  { %689 = vrot.lane.b32.xlu0 %v607_v23, %s7209_s28  ;;  %500 = vst.msk [vmem:[#allocation4 + $0x38] sm:$0xff] %vm28_vm0, %v7644_v11  ;;  %v7660_v23 = vpack.c.bf16 %v418_v20, %v417_v19  ;;  %v420_v24 = vld [vmem:[#allocation2 + $0x110] sm:$0xff]  ;;  %v421_v25 = vld [vmem:[#allocation2 + $0x120] sm:$0xff]  ;;  %501 = vst.msk [vmem:[#allocation4 + $0x40] sm:$0xff] %vm28_vm0, %v7652_v17 }
  0x57   :  { %v7662_v27 = vld [vmem:[#allocation2 + $0x301] sm:$0xff]  ;;  %v7664_v28 = vld [vmem:[#allocation2 + $0x309] sm:$0xff]  ;;  %502 = vst.msk [vmem:[#allocation4 + $0x48] sm:$0xff] %vm28_vm0, %v7654_v18  ;;  %v423_v31 = vld [vmem:[#allocation2 + $0x138] sm:$0xff] }
  0x58   :  { %v425_v33 = vld [vmem:[#allocation2 + $0x150] sm:$0xff]  ;;  %503 = vst.msk [vmem:[#allocation4 + $0x50] sm:$0xff] %vm28_vm0, %v7660_v23  ;;  %v426_v36 = vld [vmem:[#allocation2 + $0x158] sm:$0xff]  ;;  %v427_v37 = vld [vmem:[#allocation2 + $0x168] sm:$0xff] }
  0x59   :  { %691 = vrot.lane.b32.xlu1 %v608_v26, %s7209_s28  ;;  %v422_v26 = vld [vmem:[#allocation2 + $0x128] sm:$0xff]  ;;  %v428_v38 = vld [vmem:[#allocation2 + $0x170] sm:$0xff]  ;;  %v7681_v39 = vld [vmem:[#allocation2 + $0x319] sm:$0xff]  ;;  %v7689_v41 = vpack.c.bf16 %v426_v36, %v425_v33 }
  0x5a   :  { %693 = vrot.lane.b32.xlu0 %v609_v29, %s7209_s28  ;;  %v7670_v29 = vpack.c.bf16 %v420_v24, %v419_v21  ;;  %v7672_v30 = vpack.c.bf16 %v422_v26, %v421_v25  ;;  %v7691_v42 = vpack.c.bf16 %v428_v38, %v427_v37  ;;  %v429_v44 = vld [vmem:[#allocation2 + $0x1b0] sm:$0xff]  ;;  %v430_v45 = vld [vmem:[#allocation2 + $0x1b8] sm:$0xff]  ;;  %v431_v46 = vld [vmem:[#allocation2 + $0x1c8] sm:$0xff] }
  0x5b   :  { %v477_v49 = vpack.c.bf16 %v430_v45, %v429_v44  ;;  %v432_v50 = vld [vmem:[#allocation2 + $0x1d0] sm:$0xff]  ;;  %v433_v51 = vld [vmem:[#allocation2 + $0x1e0] sm:$0xff]  ;;  %v434_v53 = vld [vmem:[#allocation2 + $0x1e8] sm:$0xff]  ;;  %507 = vst.msk [vmem:[#allocation4 + $0x70] sm:$0xff] %vm28_vm0, %v7689_v41 }
  0x5c   :  { %504 = vst.msk [vmem:[#allocation4 + $0x58] sm:$0xff] %vm28_vm0, %v7670_v29  ;;  %505 = vst.msk [vmem:[#allocation4 + $0x60] sm:$0xff] %vm28_vm0, %v7672_v30  ;;  %v7700_v55 = vld [vmem:[#allocation2 + $0xa] sm:$0xff]  ;;  %v7706_v56 = vpack.c.bf16 %v432_v50, %v431_v46  ;;  %v7708_v57 = vpack.c.bf16 %v434_v53, %v433_v51  ;;  %v435_v58 = vld [vmem:[#allocation2 + $0x1f8] sm:$0xff] }
  0x5d   :  { %695 = vrot.lane.b32.xlu1 %v610_v32, %s7209_s28  ;;  %v424_v32 = vld [vmem:[#allocation2 + $0x140] sm:$0xff]  ;;  %508 = vst.msk [vmem:[#allocation4 + $0x78] sm:$0xff] %vm28_vm0, %v7691_v42  ;;  %v437_v60 = vld [vmem:[#allocation2 + $0x210] sm:$0xff]  ;;  %509 = vst.msk [vmem:[#allocation4 + $0x80] sm:$0xff] %vm28_vm0, %v477_v49 }
  0x5e   :  { %697 = vrot.lane.b32.xlu0 %v611_v40, %s7209_s28  ;;  %v7679_v35 = vpack.c.bf16 %v424_v32, %v423_v31  ;;  %v7683_v40 = vld [vmem:[#allocation2 + $0x321] sm:$0xff]  ;;  %v438_v2 = vld [vmem:[#allocation2 + $0x218] sm:$0xff]  ;;  %v440_v4 = vld [vmem:[#allocation2 + $0x230] sm:$0xff]  ;;  %510 = vst.msk [vmem:[#allocation4 + $0x88] sm:$0xff] %vm28_vm0, %v7706_v56 }
  0x5f   :  { %v436_v59 = vld [vmem:[#allocation2 + $0x200] sm:$0xff]  ;;  %v439_v3 = vld [vmem:[#allocation2 + $0x228] sm:$0xff]  ;;  %511 = vst.msk [vmem:[#allocation4 + $0x90] sm:$0xff] %vm28_vm0, %v7708_v57  ;;  %v7724_v8 = vpack.c.bf16 %v438_v2, %v437_v60  ;;  %v620_v14 = vpack.c.bf16 %v7683_v40, %v7681_v39  ;;  %v443_v20 = vld [vmem:[#allocation2 + $0x258] sm:$0xff] }
  0x60   :  { %506 = vst.msk [vmem:[#allocation4 + $0x68] sm:$0xff] %vm28_vm0, %v7679_v35  ;;  %v7714_v0 = vpack.c.bf16 %v436_v59, %v435_v58  ;;  %v7716_v5 = vld [vmem:[#allocation2 + $0x1a] sm:$0xff]  ;;  %v7718_v7 = vld [vmem:[#allocation2 + $0x22] sm:$0xff]  ;;  %v7726_v9 = vpack.c.bf16 %v440_v4, %v439_v3  ;;  %v786_v24 = vld [vmem:[#allocation2 + $0x32] sm:$0xff] }
  0x61   :  { %699 = vrot.lane.b32.xlu1 %v612_v47, %s7209_s28  ;;  %v618_v47 = vpack.c.bf16 %v7648_v16, %v7646_v15  ;;  %v441_v12 = vld [vmem:[#allocation2 + $0x240] sm:$0xff]  ;;  %v442_v13 = vld [vmem:[#allocation2 + $0x248] sm:$0xff]  ;;  %513 = vst.msk [vmem:[#allocation4 + $0xa0] sm:$0xff] %vm28_vm0, %v7724_v8  ;;  %v448_v31 = vld [vmem:[#allocation2 + $0x290] sm:$0xff]  ;;  %v847_v49 = vpack.c.bf16 %v7718_v7, %v7716_v5 }
  0x62   :  { %701 = vrot.lane.b32.xlu0 %v613_v54, %s7209_s28  ;;  %v7698_v54 = vld [vmem:[#allocation2 + $0x2] sm:$0xff]  ;;  %512 = vst.msk [vmem:[#allocation4 + $0x98] sm:$0xff] %vm28_vm0, %v7714_v0  ;;  %v7736_v19 = vpack.c.bf16 %v442_v13, %v441_v12  ;;  %v787_v25 = vld [vmem:[#allocation2 + $0x3a] sm:$0xff]  ;;  %514 = vst.msk [vmem:[#allocation4 + $0xa8] sm:$0xff] %vm28_vm0, %v7726_v9 }
  0x63   :  { %v444_v21 = vld [vmem:[#allocation2 + $0x260] sm:$0xff]  ;;  %v846_v32 = vpack.c.bf16 %v7700_v55, %v7698_v54  ;;  %v450_v37 = vld [vmem:[#allocation2 + $0x2a8] sm:$0xff]  ;;  %v451_v38 = vld [vmem:[#allocation2 + $0x2b8] sm:$0xff]  ;;  %v848_v2 = vpack.c.bf16 %v787_v25, %v786_v24 }
  0x64   :  { %v7742_v26 = vpack.c.bf16 %v444_v21, %v443_v20  ;;  %515 = vst.msk [vmem:[#allocation4 + $0xb0] sm:$0xff] %vm28_vm0, %v7736_v19  ;;  %v449_v36 = vld [vmem:[#allocation2 + $0x2a0] sm:$0xff]  ;;  %v788_v39 = vld [vmem:[#allocation2 + $0x4a] sm:$0xff]  ;;  %v789_v40 = vld [vmem:[#allocation2 + $0x52] sm:$0xff] }
  0x65   :  { %703 = vrot.lane.b32.xlu1 %v614_v63, %s7209_s28  ;;  %v619_v63 = vpack.c.bf16 %v7664_v28, %v7662_v27  ;;  %v446_v27 = vld [vmem:[#allocation2 + $0x278] sm:$0xff]  ;;  %v447_v28 = vld [vmem:[#allocation2 + $0x288] sm:$0xff]  ;;  %v7757_v44 = vpack.c.bf16 %v450_v37, %v449_v36  ;;  %v452_v45 = vld [vmem:[#allocation2 + $0x2c0] sm:$0xff] }
  0x66   :  { %705 = vrot.lane.b32.xlu0 %v615_v10, %s7209_s28  ;;  %v6849_v10 = vld [vmem:[%s10150_s0 + $0x78] sm:$0xff]   ;;  %516 = vst.msk [vmem:[#allocation4 + $0xb8] sm:$0xff] %vm28_vm0, %v7742_v26  ;;  %v453_v46 = vld [vmem:[#allocation2 + $0x2d0] sm:$0xff]  ;;  %v7766_v50 = vpack.c.bf16 %v452_v45, %v451_v38  ;;  %v455_v53 = vld [vmem:[#allocation2 + $0x2e8] sm:$0xff] }
  0x67   :  { %v6769_v15 = vunpack.c.l.bf16 %v6849_v10  ;;  %v6770_v16 = vunpack.c.h.bf16 %v6849_v10  ;;  %v456_v54 = vld [vmem:[#allocation2 + $0x2f0] sm:$0xff]  ;;  %v457_v55 = vld [vmem:[#allocation2 + $0x300] sm:$0xff]  ;;  %519 = vst.msk [vmem:[#allocation4 + $0xd0] sm:$0xff] %vm28_vm0, %v7757_v44  ;;  %v458_v59 = vld [vmem:[#allocation2 + $0x308] sm:$0xff] }
  0x68   :  { %v7772_v58 = vpack.c.bf16 %v456_v54, %v455_v53  ;;  %v459_v60 = vld [vmem:[#allocation2 + $0x318] sm:$0xff]  ;;  %520 = vst.msk [vmem:[#allocation4 + $0xd8] sm:$0xff] %vm28_vm0, %v7766_v50  ;;  %v7779_v3 = vpack.c.bf16 %v458_v59, %v457_v55  ;;  %v790_v7 = vld [vmem:[#allocation2 + $0x62] sm:$0xff]  ;;  %v791_v10 = vld [vmem:[#allocation2 + $0x6a] sm:$0xff] }
  0x69   :  { %707 = vrot.lane.b32.xlu1 %v616_v22, %s7209_s28  ;;  %v445_v22 = vld [vmem:[#allocation2 + $0x270] sm:$0xff]  ;;  %363 = vst.msk [vmem:[#allocation2 + $0x181] sm:$0xff] %vm28_vm0, %v6769_v15  ;;  %364 = vst.msk [vmem:[#allocation2 + $0x189] sm:$0xff] %vm28_vm0, %v6770_v16  ;;  %v6865_v5 = vld [vmem:[%s10150_s0 + $0xf8] sm:$0xff]   ;;  %v850_v21 = vpack.c.bf16 %v791_v10, %v790_v7 }
  0x6a   :  { %709 = vrot.lane.b32.xlu0 %v617_v34, %s7209_s28  ;;  %v7751_v33 = vpack.c.bf16 %v446_v27, %v445_v22  ;;  %v7753_v34 = vpack.c.bf16 %v448_v31, %v447_v28  ;;  %522 = vst.msk [vmem:[#allocation4 + $0xe8] sm:$0xff] %vm28_vm0, %v7772_v58  ;;  %v6833_v12 = vunpack.c.l.bf16 %v6865_v5  ;;  %v6834_v13 = vunpack.c.h.bf16 %v6865_v5  ;;  %523 = vst.msk [vmem:[#allocation4 + $0xf0] sm:$0xff] %vm28_vm0, %v7779_v3  ;;  %v792_v15 = vld [vmem:[#allocation2 + $0x7a] sm:$0xff]  ;;  %v793_v16 = vld [vmem:[#allocation2 + $0x82] sm:$0xff] }
  0x6b   :  { %v794_v20 = vld [vmem:[#allocation2 + $0x92] sm:$0xff]  ;;  %v795_v22 = vld [vmem:[#allocation2 + $0x9a] sm:$0xff]  ;;  %v851_v24 = vpack.c.bf16 %v793_v16, %v792_v15  ;;  %v796_v25 = vld [vmem:[#allocation2 + $0xaa] sm:$0xff] }
  0x6c   :  { %517 = vst.msk [vmem:[#allocation4 + $0xc0] sm:$0xff] %vm28_vm0, %v7751_v33  ;;  %518 = vst.msk [vmem:[#allocation4 + $0xc8] sm:$0xff] %vm28_vm0, %v7753_v34  ;;  %v797_v27 = vld [vmem:[#allocation2 + $0xb2] sm:$0xff]  ;;  %v798_v28 = vld [vmem:[#allocation2 + $0xc2] sm:$0xff] }
  0x6d   :  { %711 = vrot.lane.b32.xlu1 %v618_v47, %s7209_s28  ;;  %v454_v47 = vld [vmem:[#allocation2 + $0x2d8] sm:$0xff]  ;;  %395 = vst.msk [vmem:[#allocation2 + $0x331] sm:$0xff] %vm28_vm0, %v6833_v12  ;;  %396 = vst.msk [vmem:[#allocation2 + $0x339] sm:$0xff] %vm28_vm0, %v6834_v13  ;;  %v799_v31 = vld [vmem:[#allocation2 + $0xca] sm:$0xff] }
  0x6e   :  { %713 = vrot.lane.b32.xlu0 %v619_v63, %s7209_s28  ;;  %v7768_v51 = vpack.c.bf16 %v454_v47, %v453_v46  ;;  %v460_v63 = vld [vmem:[#allocation2 + $0x320] sm:$0xff] }
  0x6f   :  { %v7781_v4 = vpack.c.bf16 %v460_v63, %v459_v60 }
  0x70   :  { %521 = vst.msk [vmem:[#allocation4 + $0xe0] sm:$0xff] %vm28_vm0, %v7768_v51 }
  0x71   :  { %715 = vrot.lane.b32.xlu1 %v620_v14, %s7209_s28  ;;  %v849_v14 = vpack.c.bf16 %v789_v40, %v788_v39  ;;  %524 = vst.msk [vmem:[#allocation4 + $0xf8] sm:$0xff] %vm28_vm0, %v7781_v4 }
  0x72   :  { %910 = vrot.lane.b32.xlu0 %v846_v32, %s7210_s18  ;;  %v852_v32 = vpack.c.bf16 %v795_v22, %v794_v20 }
  0x75   :  { %912 = vrot.lane.b32.xlu1 %v847_v49, %s7210_s18 }
  0x76   :  { %914 = vrot.lane.b32.xlu0 %v848_v2, %s7210_s18 }
  0x79   :  { %916 = vrot.lane.b32.xlu1 %v849_v14, %s7210_s18 }
  0x7a   :  { %918 = vrot.lane.b32.xlu0 %v850_v21, %s7210_s18 }
  0x7b   :  { %12 = vsyncpa [#allocation6], 0  ;;  %v853_v36 = vpack.c.bf16 %v797_v27, %v796_v25  ;;  %v800_v37 = vld [vmem:[#allocation2 + $0xda] sm:$0xff]  ;;  %v801_v38 = vld [vmem:[#allocation2 + $0xe2] sm:$0xff]  ;;  %v854_v39 = vpack.c.bf16 %v799_v31, %v798_v28  ;;  %vm749_vm3 = vcmask 64544   ;;  %s7211_s0 = smov 12  }
  0x7c   :  { %v802_v40 = vld [vmem:[#allocation2 + $0xf2] sm:$0xff]  ;;  %v803_v45 = vld [vmem:[#allocation2 + $0xfa] sm:$0xff]  ;;  %v855_v46 = vpack.c.bf16 %v801_v38, %v800_v37  ;;  %v804_v47 = vld [vmem:[#allocation2 + $0x10a] sm:$0xff]  ;;  %vm1006_vm4 = vcmask 97344   ;;  %s7212_s21 = smov 16   ;;  %vm1263_vm5 = vcmask 130144  }
  0x7d   :  { %920 = vrot.lane.b32.xlu1 %v851_v24, %s7210_s18  ;;  %v805_v49 = vld [vmem:[#allocation2 + $0x112] sm:$0xff]  ;;  %v856_v53 = vpack.c.bf16 %v803_v45, %v802_v40  ;;  %v806_v54 = vld [vmem:[#allocation2 + $0x122] sm:$0xff]  ;;  %v807_v55 = vld [vmem:[#allocation2 + $0x12a] sm:$0xff]  ;;  %s7213_s22 = smov 20   ;;  %vm1520_vm6 = vcmask 162944   ;;  %s7214_s23 = smov 24  }
  0x7e   :  { %922 = vrot.lane.b32.xlu0 %v852_v32, %s7210_s18  ;;  %v857_v59 = vpack.c.bf16 %v805_v49, %v804_v47  ;;  %v808_v60 = vld [vmem:[#allocation2 + $0x13a] sm:$0xff]  ;;  %v809_v63 = vld [vmem:[#allocation2 + $0x142] sm:$0xff]  ;;  %v858_v2 = vpack.c.bf16 %v807_v55, %v806_v54  ;;  %v810_v5 = vld [vmem:[#allocation2 + $0x152] sm:$0xff]  ;;  %vm1777_vm7 = vcmask 195744   ;;  %s7215_s24 = smov 28   ;;  %vm2035_vm8 = vcmask 228544  }
  0x7f   :  { %v811_v7 = vld [vmem:[#allocation2 + $0x15a] sm:$0xff]  ;;  %v859_v10 = vpack.c.bf16 %v809_v63, %v808_v60  ;;  %v812_v12 = vld [vmem:[#allocation2 + $0x16a] sm:$0xff]  ;;  %v813_v13 = vld [vmem:[#allocation2 + $0x172] sm:$0xff]  ;;  %vm2731_vm9 = vcmask 1041408   ;;  %vm2292_vm10 = vcmask 261344   ;;  %vm2549_vm11 = vcmask 294144  }
  0x80   :  { %v860_v14 = vpack.c.bf16 %v811_v7, %v810_v5  ;;  %v814_v15 = vld [vmem:[#allocation2 + $0x1b2] sm:$0xff]  ;;  %v815_v16 = vld [vmem:[#allocation2 + $0x1ba] sm:$0xff]  ;;  %v861_v20 = vpack.c.bf16 %v813_v13, %v812_v12  ;;  %v816_v21 = vld [vmem:[#allocation2 + $0x1ca] sm:$0xff]  ;;  %vm116_vm12 = vcmask 64512   ;;  %vm2634_vm13 = vcmask 293888   ;;  %s7218_s17 = smov 48  }
  0x81   :  { %924 = vrot.lane.b32.xlu1 %v853_v36, %s7210_s18  ;;  %v817_v22 = vld [vmem:[#allocation2 + $0x1d2] sm:$0xff]  ;;  %v862_v24 = vpack.c.bf16 %v815_v16, %v814_v15  ;;  %v818_v25 = vld [vmem:[#allocation2 + $0x1e2] sm:$0xff]  ;;  %v819_v27 = vld [vmem:[#allocation2 + $0x1ea] sm:$0xff]  ;;  %117 = vst.msk [vmem:[#allocation3] sm:$0xff] %vm116_vm12, %v7208_v1  ;;  %vm119_vm14 = vcmask 58368   ;;  %vm131_vm15 = vcmask 57344  }
  0x82   :  { %926 = vrot.lane.b32.xlu0 %v854_v39, %s7210_s18  ;;  %v863_v28 = vpack.c.bf16 %v817_v22, %v816_v21  ;;  %v820_v31 = vld [vmem:[#allocation2 + $0x1fa] sm:$0xff]  ;;  %v821_v32 = vld [vmem:[#allocation2 + $0x202] sm:$0xff]  ;;  %v864_v36 = vpack.c.bf16 %v819_v27, %v818_v25  ;;  %v822_v37 = vld [vmem:[#allocation2 + $0x212] sm:$0xff]  ;;  %118 = vst.msk [vmem:[#allocation3 + $0x8] sm:$0xff] %vm116_vm12, %v7208_v1  ;;  %vm3647_vm0 = vcmask 130112   ;;  %vm3904_vm1 = vcmask 195712  }
  0x83   :  { %v823_v38 = vld [vmem:[#allocation2 + $0x21a] sm:$0xff]  ;;  %v865_v39 = vpack.c.bf16 %v821_v32, %v820_v31  ;;  %v824_v40 = vld [vmem:[#allocation2 + $0x22a] sm:$0xff]  ;;  %v825_v45 = vld [vmem:[#allocation2 + $0x232] sm:$0xff]  ;;  %121 = vst.msk [vmem:[#allocation3 + $0x1b0] sm:$0xff] %vm116_vm12, %v7208_v1  ;;  %vm4161_vm2 = vcmask 261312   ;;  %s7220_s25 = smov 64  }
  0x84   :  { %v826_v47 = vld [vmem:[#allocation2 + $0x242] sm:$0xff]  ;;  %v827_v49 = vld [vmem:[#allocation2 + $0x24a] sm:$0xff]  ;;  %v828_v54 = vld [vmem:[#allocation2 + $0x25a] sm:$0xff]  ;;  %122 = vst.msk [vmem:[#allocation3 + $0x1b8] sm:$0xff] %vm116_vm12, %v7208_v1 }
  0x85   :  { %928 = vrot.lane.b32.xlu1 %v855_v46, %s7210_s18  ;;  %v866_v46 = vpack.c.bf16 %v823_v38, %v822_v37  ;;  %v829_v55 = vld [vmem:[#allocation2 + $0x262] sm:$0xff]  ;;  %v830_v60 = vld [vmem:[#allocation2 + $0x272] sm:$0xff]  ;;  %v831_v63 = vld [vmem:[#allocation2 + $0x27a] sm:$0xff]  ;;  %125 = vst.msk [vmem:[#allocation3 + $0x198] sm:$0xff] %vm116_vm12, %v7208_v1 }
  0x86   :  { %930 = vrot.lane.b32.xlu0 %v856_v53, %s7210_s18  ;;  %v867_v53 = vpack.c.bf16 %v825_v45, %v824_v40  ;;  %v832_v5 = vld [vmem:[#allocation2 + $0x28a] sm:$0xff]  ;;  %v833_v7 = vld [vmem:[#allocation2 + $0x292] sm:$0xff]  ;;  %v834_v12 = vld [vmem:[#allocation2 + $0x2a2] sm:$0xff]  ;;  %126 = vst.msk [vmem:[#allocation3 + $0x1a0] sm:$0xff] %vm116_vm12, %v7208_v1 }
  0x87   :  { %v835_v13 = vld [vmem:[#allocation2 + $0x2aa] sm:$0xff]  ;;  %v836_v15 = vld [vmem:[#allocation2 + $0x2ba] sm:$0xff]  ;;  %v837_v16 = vld [vmem:[#allocation2 + $0x2c2] sm:$0xff]  ;;  %128 = vst.msk [vmem:[#allocation3 + $0x348] sm:$0xff] %vm116_vm12, %v7208_v1 }
  0x88   :  { %v838_v21 = vld [vmem:[#allocation2 + $0x2d2] sm:$0xff]  ;;  %v839_v22 = vld [vmem:[#allocation2 + $0x2da] sm:$0xff]  ;;  %v873_v25 = vpack.c.bf16 %v837_v16, %v836_v15  ;;  %v840_v27 = vld [vmem:[#allocation2 + $0x2ea] sm:$0xff]  ;;  %129 = vst.msk [vmem:[#allocation3 + $0x350] sm:$0xff] %vm116_vm12, %v7208_v1 }
  0x89   :  { %932 = vrot.lane.b32.xlu1 %v857_v59, %s7210_s18  ;;  %v868_v59 = vpack.c.bf16 %v827_v49, %v826_v47  ;;  %v874_v32 = vpack.c.bf16 %v839_v22, %v838_v21  ;;  %v843_v37 = vld [vmem:[#allocation2 + $0x30a] sm:$0xff]  ;;  %v844_v40 = vld [vmem:[#allocation2 + $0x31a] sm:$0xff]  ;;  %v845_v45 = vld [vmem:[#allocation2 + $0x322] sm:$0xff]  ;;  %120 = vst.msk [vmem:[#allocation3 + $0x10] sm:$0x3] %vm119_vm14, %v7208_v1 }
  0x8a   :  { %934 = vrot.lane.b32.xlu0 %v858_v2, %s7210_s18  ;;  %v869_v2 = vpack.c.bf16 %v829_v55, %v828_v54  ;;  %v1297_v15 = vld [vmem:[#allocation2 + $0x21] sm:$0xff]  ;;  %123 = vst.msk [vmem:[#allocation3 + $0x1c0] sm:$0x3] %vm119_vm14, %v7208_v1  ;;  %127 = vst.msk [vmem:[#allocation3 + $0x1a8] sm:$0x3] %vm119_vm14, %v7208_v1 }
  0x8b   :  { %130 = vst.msk [vmem:[#allocation3 + $0x358] sm:$0x3] %vm119_vm14, %v7208_v1 }
  0x8c   :  { %132 = vst.msk [vmem:[#allocation3] sm:$0x1] %vm131_vm15, %v7208_v1  ;;  %133 = vst.msk [vmem:[#allocation3 + $0x18] sm:$0x1] %vm131_vm15, %v7208_v1 }
  0x8d   :  { %936 = vrot.lane.b32.xlu1 %v859_v10, %s7210_s18  ;;  %v870_v10 = vpack.c.bf16 %v831_v63, %v830_v60  ;;  %134 = vst.msk [vmem:[#allocation3 + $0x30] sm:$0x1] %vm131_vm15, %v7208_v1  ;;  %135 = vst.msk [vmem:[#allocation3 + $0x48] sm:$0x1] %vm131_vm15, %v7208_v1 }
  0x8e   :  { %938 = vrot.lane.b32.xlu0 %v860_v14, %s7210_s18  ;;  %v871_v14 = vpack.c.bf16 %v833_v7, %v832_v5  ;;  %v1070_v5 = vld [vmem:[#allocation2 + $0x188] sm:$0xff]  ;;  %136 = vst.msk [vmem:[#allocation3 + $0x60] sm:$0x1] %vm131_vm15, %v7208_v1  ;;  %137 = vst.msk [vmem:[#allocation3 + $0x78] sm:$0x1] %vm131_vm15, %v7208_v1 }
  0x8f   :  { %138 = vst.msk [vmem:[#allocation3 + $0x90] sm:$0x1] %vm131_vm15, %v7208_v1  ;;  %139 = vst.msk [vmem:[#allocation3 + $0xa8] sm:$0x1] %vm131_vm15, %v7208_v1 }
  0x90   :  { %140 = vst.msk [vmem:[#allocation3 + $0xc0] sm:$0x1] %vm131_vm15, %v7208_v1  ;;  %141 = vst.msk [vmem:[#allocation3 + $0xd8] sm:$0x1] %vm131_vm15, %v7208_v1 }
  0x91   :  { %940 = vrot.lane.b32.xlu1 %v861_v20, %s7210_s18  ;;  %v872_v20 = vpack.c.bf16 %v835_v13, %v834_v12  ;;  %v1102_v13 = vld [vmem:[#allocation2 + $0x338] sm:$0xff]  ;;  %142 = vst.msk [vmem:[#allocation3 + $0xf0] sm:$0x1] %vm131_vm15, %v7208_v1  ;;  %143 = vst.msk [vmem:[#allocation3 + $0x108] sm:$0x1] %vm131_vm15, %v7208_v1 }
  0x92   :  { %942 = vrot.lane.b32.xlu0 %v862_v24, %s7210_s18  ;;  %v654_v24 = vpop.permute.xlu0 %653  ;;  %144 = vst.msk [vmem:[#allocation3 + $0x120] sm:$0x1] %vm131_vm15, %v7208_v1  ;;  %145 = vst.msk [vmem:[#allocation3 + $0x138] sm:$0x1] %vm131_vm15, %v7208_v1 }
  0x93   :  { %750 = vst.msk [vmem:[#allocation4] sm:$0xff] %vm749_vm3, %v654_v24  ;;  %v1301_v24 = vld [vmem:[#allocation2 + $0x51] sm:$0xff] }
  0x94   :  { %146 = vst.msk [vmem:[#allocation3 + $0x150] sm:$0x1] %vm131_vm15, %v7208_v1  ;;  %147 = vst.msk [vmem:[#allocation3 + $0x168] sm:$0x1] %vm131_vm15, %v7208_v1 }
  0x95   :  { %944 = vrot.lane.b32.xlu1 %v863_v28, %s7210_s18  ;;  %v841_v28 = vld [vmem:[#allocation2 + $0x2f2] sm:$0xff]  ;;  %148 = vst.msk [vmem:[#allocation3 + $0x180] sm:$0x1] %vm131_vm15, %v7208_v1  ;;  %149 = vst.msk [vmem:[#allocation3 + $0x198] sm:$0x1] %vm131_vm15, %v7208_v1 }
  0x96   :  { %946 = vrot.lane.b32.xlu0 %v864_v36, %s7210_s18  ;;  %v842_v36 = vld [vmem:[#allocation2 + $0x302] sm:$0xff]  ;;  %150 = vst.msk [vmem:[#allocation3 + $0x1b0] sm:$0x1] %vm131_vm15, %v7208_v1  ;;  %151 = vst.msk [vmem:[#allocation3 + $0x1c8] sm:$0x1] %vm131_vm15, %v7208_v1 }
  0x97   :  { %v876_v47 = vpack.c.bf16 %v843_v37, %v842_v36  ;;  %v1305_v36 = vld [vmem:[#allocation2 + $0x81] sm:$0xff]  ;;  %152 = vst.msk [vmem:[#allocation3 + $0x1e0] sm:$0x1] %vm131_vm15, %v7208_v1  ;;  %153 = vst.msk [vmem:[#allocation3 + $0x1f8] sm:$0x1] %vm131_vm15, %v7208_v1 }
  0x98   :  { %154 = vst.msk [vmem:[#allocation3 + $0x210] sm:$0x1] %vm131_vm15, %v7208_v1  ;;  %155 = vst.msk [vmem:[#allocation3 + $0x228] sm:$0x1] %vm131_vm15, %v7208_v1 }
  0x99   :  { %948 = vrot.lane.b32.xlu1 %v865_v39, %s7210_s18  ;;  %v875_v39 = vpack.c.bf16 %v841_v28, %v840_v27  ;;  %v1303_v28 = vld [vmem:[#allocation2 + $0x69] sm:$0xff]  ;;  %156 = vst.msk [vmem:[#allocation3 + $0x240] sm:$0x1] %vm131_vm15, %v7208_v1  ;;  %157 = vst.msk [vmem:[#allocation3 + $0x258] sm:$0x1] %vm131_vm15, %v7208_v1 }
  0x9a   :  { %950 = vrot.lane.b32.xlu0 %v866_v46, %s7210_s18  ;;  %158 = vst.msk [vmem:[#allocation3 + $0x270] sm:$0x1] %vm131_vm15, %v7208_v1  ;;  %159 = vst.msk [vmem:[#allocation3 + $0x288] sm:$0x1] %vm131_vm15, %v7208_v1 }
  0x9b   :  { %160 = vst.msk [vmem:[#allocation3 + $0x2a0] sm:$0x1] %vm131_vm15, %v7208_v1  ;;  %161 = vst.msk [vmem:[#allocation3 + $0x2b8] sm:$0x1] %vm131_vm15, %v7208_v1 }
  0x9c   :  { %162 = vst.msk [vmem:[#allocation3 + $0x2d0] sm:$0x1] %vm131_vm15, %v7208_v1  ;;  %163 = vst.msk [vmem:[#allocation3 + $0x2e8] sm:$0x1] %vm131_vm15, %v7208_v1 }
  0x9d   :  { %952 = vrot.lane.b32.xlu1 %v867_v53, %s7210_s18  ;;  %v877_v53 = vpack.c.bf16 %v845_v45, %v844_v40  ;;  %v1307_v40 = vld [vmem:[#allocation2 + $0x99] sm:$0xff]  ;;  %164 = vst.msk [vmem:[#allocation3 + $0x300] sm:$0x1] %vm131_vm15, %v7208_v1  ;;  %165 = vst.msk [vmem:[#allocation3 + $0x318] sm:$0x1] %vm131_vm15, %v7208_v1 }
  0x9e   :  { %954 = vrot.lane.b32.xlu0 %v868_v59, %s7210_s18  ;;  %166 = vst.msk [vmem:[#allocation3 + $0x330] sm:$0x1] %vm131_vm15, %v7208_v1  ;;  %167 = vst.msk [vmem:[#allocation3 + $0x348] sm:$0x1] %vm131_vm15, %v7208_v1 }
  0x9f   :  { %168 = vst.msk [vmem:[#allocation3 + $0x11] sm:$0x1] %vm131_vm15, %v7208_v1  ;;  %169 = vst.msk [vmem:[#allocation3 + $0x29] sm:$0x1] %vm131_vm15, %v7208_v1 }
  0xa0   :  { %170 = vst.msk [vmem:[#allocation3 + $0x41] sm:$0x1] %vm131_vm15, %v7208_v1  ;;  %171 = vst.msk [vmem:[#allocation3 + $0x59] sm:$0x1] %vm131_vm15, %v7208_v1 }
  0xa1   :  { %956 = vrot.lane.b32.xlu1 %v869_v2, %s7210_s18  ;;  %172 = vst.msk [vmem:[#allocation3 + $0x71] sm:$0x1] %vm131_vm15, %v7208_v1  ;;  %173 = vst.msk [vmem:[#allocation3 + $0x89] sm:$0x1] %vm131_vm15, %v7208_v1 }
  0xa2   :  { %958 = vrot.lane.b32.xlu0 %v870_v10, %s7210_s18  ;;  %174 = vst.msk [vmem:[#allocation3 + $0xa1] sm:$0x1] %vm131_vm15, %v7208_v1  ;;  %175 = vst.msk [vmem:[#allocation3 + $0xb9] sm:$0x1] %vm131_vm15, %v7208_v1 }
  0xa3   :  { %176 = vst.msk [vmem:[#allocation3 + $0xd1] sm:$0x1] %vm131_vm15, %v7208_v1  ;;  %177 = vst.msk [vmem:[#allocation3 + $0xe9] sm:$0x1] %vm131_vm15, %v7208_v1 }
  0xa4   :  { %178 = vst.msk [vmem:[#allocation3 + $0x101] sm:$0x1] %vm131_vm15, %v7208_v1  ;;  %179 = vst.msk [vmem:[#allocation3 + $0x119] sm:$0x1] %vm131_vm15, %v7208_v1 }
  0xa5   :  { %960 = vrot.lane.b32.xlu1 %v871_v14, %s7210_s18  ;;  %180 = vst.msk [vmem:[#allocation3 + $0x131] sm:$0x1] %vm131_vm15, %v7208_v1  ;;  %181 = vst.msk [vmem:[#allocation3 + $0x149] sm:$0x1] %vm131_vm15, %v7208_v1 }
  0xa6   :  { %962 = vrot.lane.b32.xlu0 %v872_v20, %s7210_s18  ;;  %v1299_v20 = vld [vmem:[#allocation2 + $0x39] sm:$0xff]  ;;  %182 = vst.msk [vmem:[#allocation3 + $0x161] sm:$0x1] %vm131_vm15, %v7208_v1  ;;  %183 = vst.msk [vmem:[#allocation3 + $0x179] sm:$0x1] %vm131_vm15, %v7208_v1 }
  0xa7   :  { %v658_v31 = vpop.permute.xlu1 %657  ;;  %184 = vst.msk [vmem:[#allocation3 + $0x191] sm:$0x1] %vm131_vm15, %v7208_v1  ;;  %187 = vst.msk [vmem:[#allocation3 + $0x1d9] sm:$0x1] %vm131_vm15, %v7208_v1 }
  0xa8   :  { %752 = vst.msk [vmem:[#allocation4 + $0x10] sm:$0xff] %vm749_vm3, %v658_v31  ;;  %v656_v38 = vpop.permute.xlu0 %655 }
  0xa9   :  { %964 = vrot.lane.b32.xlu1 %v873_v25, %s7210_s18  ;;  %751 = vst.msk [vmem:[#allocation4 + $0x8] sm:$0xff] %vm749_vm3, %v656_v38 }
  0xaa   :  { %966 = vrot.lane.b32.xlu0 %v874_v32, %s7210_s18  ;;  %188 = vst.msk [vmem:[#allocation3 + $0x1f1] sm:$0x1] %vm131_vm15, %v7208_v1  ;;  %189 = vst.msk [vmem:[#allocation3 + $0x209] sm:$0x1] %vm131_vm15, %v7208_v1 }
  0xab   :  { %v660_v46 = vpop.permute.xlu1 %659  ;;  %190 = vst.msk [vmem:[#allocation3 + $0x221] sm:$0x1] %vm131_vm15, %v7208_v1  ;;  %191 = vst.msk [vmem:[#allocation3 + $0x239] sm:$0x1] %vm131_vm15, %v7208_v1 }
  0xac   :  { %753 = vst.msk [vmem:[#allocation4 + $0x18] sm:$0xff] %vm749_vm3, %v660_v46  ;;  %v662_v49 = vpop.permute.xlu0 %661 }
  0xad   :  { %968 = vrot.lane.b32.xlu1 %v875_v39, %s7210_s18  ;;  %754 = vst.msk [vmem:[#allocation4 + $0x20] sm:$0xff] %vm749_vm3, %v662_v49  ;;  %v1306_v39 = vld [vmem:[#allocation2 + $0x91] sm:$0xff] }
  0xae   :  { %970 = vrot.lane.b32.xlu0 %v876_v47, %s7210_s18  ;;  %v1308_v47 = vld [vmem:[#allocation2 + $0xa9] sm:$0xff]  ;;  %v1309_v49 = vld [vmem:[#allocation2 + $0xb1] sm:$0xff]  ;;  %192 = vst.msk [vmem:[#allocation3 + $0x251] sm:$0x1] %vm131_vm15, %v7208_v1  ;;  %193 = vst.msk [vmem:[#allocation3 + $0x269] sm:$0x1] %vm131_vm15, %v7208_v1 }
  0xaf   :  { %v664_v54 = vpop.permute.xlu1 %663  ;;  %194 = vst.msk [vmem:[#allocation3 + $0x281] sm:$0x1] %vm131_vm15, %v7208_v1  ;;  %195 = vst.msk [vmem:[#allocation3 + $0x299] sm:$0x1] %vm131_vm15, %v7208_v1 }
  0xb0   :  { %755 = vst.msk [vmem:[#allocation4 + $0x28] sm:$0xff] %vm749_vm3, %v664_v54  ;;  %v666_v55 = vpop.permute.xlu0 %665  ;;  %v1365_v54 = vpack.c.bf16 %v1307_v40, %v1306_v39  ;;  %v1338_v40 = vld [vmem:[#allocation2 + $0x241] sm:$0xff] }
  0xb1   :  { %972 = vrot.lane.b32.xlu1 %v877_v53, %s7210_s18  ;;  %756 = vst.msk [vmem:[#allocation4 + $0x30] sm:$0xff] %vm749_vm3, %v666_v55  ;;  %v1310_v55 = vld [vmem:[#allocation2 + $0xc1] sm:$0xff] }
  0xb2   :  { %1167 = vrot.lane.b32.xlu0 %v7617_v48, %s7211_s0  ;;  %196 = vst.msk [vmem:[#allocation3 + $0x2b1] sm:$0x1] %vm131_vm15, %v7208_v1  ;;  %197 = vst.msk [vmem:[#allocation3 + $0x2c9] sm:$0x1] %vm131_vm15, %v7208_v1 }
  0xb3   :  { %v668_v59 = vpop.permute.xlu1 %667  ;;  %198 = vst.msk [vmem:[#allocation3 + $0x2e1] sm:$0x1] %vm131_vm15, %v7208_v1  ;;  %199 = vst.msk [vmem:[#allocation3 + $0x2f9] sm:$0x1] %vm131_vm15, %v7208_v1 }
  0xb4   :  { %757 = vst.msk [vmem:[#allocation4 + $0x38] sm:$0xff] %vm749_vm3, %v668_v59  ;;  %v670_v60 = vpop.permute.xlu0 %669  ;;  %v1311_v59 = vld [vmem:[#allocation2 + $0xc9] sm:$0xff] }
  0xb5   :  { %1169 = vrot.lane.b32.xlu1 %v7611_v43, %s7211_s0  ;;  %758 = vst.msk [vmem:[#allocation4 + $0x40] sm:$0xff] %vm749_vm3, %v670_v60 }
  0xb6   :  { %1171 = vrot.lane.b32.xlu0 %v7619_v52, %s7211_s0  ;;  %200 = vst.msk [vmem:[#allocation3 + $0x311] sm:$0x1] %vm131_vm15, %v7208_v1  ;;  %201 = vst.msk [vmem:[#allocation3 + $0x329] sm:$0x1] %vm131_vm15, %v7208_v1 }
  0xb7   :  { %v672_v63 = vpop.permute.xlu1 %671  ;;  %202 = vst.msk [vmem:[#allocation3 + $0x341] sm:$0x1] %vm131_vm15, %v7208_v1  ;;  %185 = vst.msk [vmem:[#allocation3 + $0x1a9] sm:$0x1] %vm131_vm15, %v7208_v1 }
  0xb8   :  { %759 = vst.msk [vmem:[#allocation4 + $0x48] sm:$0xff] %vm749_vm3, %v672_v63  ;;  %v674_v2 = vpop.permute.xlu0 %673  ;;  %v1366_v63 = vpack.c.bf16 %v1309_v49, %v1308_v47  ;;  %v1340_v49 = vld [vmem:[#allocation2 + $0x259] sm:$0xff] }
  0xb9   :  { %1173 = vrot.lane.b32.xlu1 %v7628_v61, %s7211_s0  ;;  %760 = vst.msk [vmem:[#allocation4 + $0x50] sm:$0xff] %vm749_vm3, %v674_v2  ;;  %v1312_v2 = vld [vmem:[#allocation2 + $0xd9] sm:$0xff] }
  0xba   :  { %1175 = vrot.lane.b32.xlu0 %v7630_v62, %s7211_s0  ;;  %186 = vst.msk [vmem:[#allocation3 + $0x1c1] sm:$0x1] %vm131_vm15, %v7208_v1  ;;  %203 = vst.msk [vmem:[#allocation3 + $0x359] sm:$0x1] %vm131_vm15, %v7208_v1 }
  0xbb   :  { %v676_v48 = vpop.permute.xlu1 %675 }
  0xbc   :  { %761 = vst.msk [vmem:[#allocation4 + $0x58] sm:$0xff] %vm749_vm3, %v676_v48  ;;  %v678_v43 = vpop.permute.xlu0 %677  ;;  %v1313_v48 = vld [vmem:[#allocation2 + $0xe1] sm:$0xff] }
  0xbd   :  { %1177 = vrot.lane.b32.xlu1 %v7641_v6, %s7211_s0  ;;  %762 = vst.msk [vmem:[#allocation4 + $0x60] sm:$0xff] %vm749_vm3, %v678_v43 }
  0xbe   :  { %1179 = vrot.lane.b32.xlu0 %v7644_v11, %s7211_s0 }
  0xbf   :  { %v680_v52 = vpop.permute.xlu1 %679 }
  0xc0   :  { %763 = vst.msk [vmem:[#allocation4 + $0x68] sm:$0xff] %vm749_vm3, %v680_v52  ;;  %v682_v61 = vpop.permute.xlu0 %681  ;;  %v1367_v52 = vpack.c.bf16 %v1311_v59, %v1310_v55  ;;  %v1342_v59 = vld [vmem:[#allocation2 + $0x271] sm:$0xff] }
  0xc1   :  { %1181 = vrot.lane.b32.xlu1 %v7652_v17, %s7211_s0  ;;  %764 = vst.msk [vmem:[#allocation4 + $0x70] sm:$0xff] %vm749_vm3, %v682_v61  ;;  %v1314_v61 = vld [vmem:[#allocation2 + $0xf1] sm:$0xff] }
  0xc2   :  { %1183 = vrot.lane.b32.xlu0 %v7654_v18, %s7211_s0  ;;  %v1069_v18 = vld [vmem:[#allocation2 + $0x180] sm:$0xff] }
  0xc3   :  { %v684_v62 = vpop.permute.xlu1 %683 }
  0xc4   :  { %765 = vst.msk [vmem:[#allocation4 + $0x78] sm:$0xff] %vm749_vm3, %v684_v62  ;;  %v686_v6 = vpop.permute.xlu0 %685  ;;  %v1315_v62 = vld [vmem:[#allocation2 + $0xf9] sm:$0xff] }
  0xc5   :  { %1185 = vrot.lane.b32.xlu1 %v7660_v23, %s7211_s0  ;;  %766 = vst.msk [vmem:[#allocation4 + $0x80] sm:$0xff] %vm749_vm3, %v686_v6 }
  0xc6   :  { %1187 = vrot.lane.b32.xlu0 %v7670_v29, %s7211_s0  ;;  %v1118_v29 = vpack.c.bf16 %v1070_v5, %v1069_v18  ;;  %v1317_v18 = vld [vmem:[#allocation2 + $0x111] sm:$0xff] }
  0xc7   :  { %v688_v11 = vpop.permute.xlu1 %687 }
  0xc8   :  { %767 = vst.msk [vmem:[#allocation4 + $0x88] sm:$0xff] %vm749_vm3, %v688_v11  ;;  %v690_v17 = vpop.permute.xlu0 %689  ;;  %v1368_v11 = vpack.c.bf16 %v1313_v48, %v1312_v2  ;;  %v1344_v48 = vld [vmem:[#allocation2 + $0x289] sm:$0xff] }
  0xc9   :  { %1189 = vrot.lane.b32.xlu1 %v7672_v30, %s7211_s0  ;;  %768 = vst.msk [vmem:[#allocation4 + $0x90] sm:$0xff] %vm749_vm3, %v690_v17  ;;  %v1316_v17 = vld [vmem:[#allocation2 + $0x109] sm:$0xff] }
  0xca   :  { %1191 = vrot.lane.b32.xlu0 %v7679_v35, %s7211_s0 }
  0xcb   :  { %v692_v7 = vpop.permute.xlu1 %691 }
  0xcc   :  { %769 = vst.msk [vmem:[#allocation4 + $0x98] sm:$0xff] %vm749_vm3, %v692_v7  ;;  %v694_v23 = vpop.permute.xlu0 %693  ;;  %v1369_v7 = vpack.c.bf16 %v1315_v62, %v1314_v61  ;;  %v1346_v62 = vld [vmem:[#allocation2 + $0x2a1] sm:$0xff] }
  0xcd   :  { %1193 = vrot.lane.b32.xlu1 %v7689_v41, %s7211_s0  ;;  %770 = vst.msk [vmem:[#allocation4 + $0xa0] sm:$0xff] %vm749_vm3, %v694_v23  ;;  %v1318_v23 = vld [vmem:[#allocation2 + $0x121] sm:$0xff] }
  0xce   :  { %1195 = vrot.lane.b32.xlu0 %v7691_v42, %s7211_s0 }
  0xcf   :  { %v696_v10 = vpop.permute.xlu1 %695 }
  0xd0   :  { %771 = vst.msk [vmem:[#allocation4 + $0xa8] sm:$0xff] %vm749_vm3, %v696_v10  ;;  %v698_v30 = vpop.permute.xlu0 %697 }
  0xd1   :  { %1197 = vrot.lane.b32.xlu1 %v1118_v29, %s7211_s0  ;;  %772 = vst.msk [vmem:[#allocation4 + $0xb0] sm:$0xff] %vm749_vm3, %v698_v30  ;;  %v1319_v29 = vld [vmem:[#allocation2 + $0x129] sm:$0xff]  ;;  %v1370_v30 = vpack.c.bf16 %v1317_v18, %v1316_v17  ;;  %v1348_v18 = vld [vmem:[#allocation2 + $0x2b9] sm:$0xff] }
  0xd2   :  { %1199 = vrot.lane.b32.xlu0 %v7706_v56, %s7211_s0 }
  0xd3   :  { %v700_v35 = vpop.permute.xlu1 %699 }
  0xd4   :  { %773 = vst.msk [vmem:[#allocation4 + $0xb8] sm:$0xff] %vm749_vm3, %v700_v35  ;;  %v702_v41 = vpop.permute.xlu0 %701  ;;  %v1320_v35 = vld [vmem:[#allocation2 + $0x139] sm:$0xff] }
  0xd5   :  { %1201 = vrot.lane.b32.xlu1 %v7708_v57, %s7211_s0  ;;  %774 = vst.msk [vmem:[#allocation4 + $0xc0] sm:$0xff] %vm749_vm3, %v702_v41  ;;  %v1321_v41 = vld [vmem:[#allocation2 + $0x141] sm:$0xff] }
  0xd6   :  { %1203 = vrot.lane.b32.xlu0 %v7714_v0, %s7211_s0 }
  0xd7   :  { %v704_v42 = vpop.permute.xlu1 %703 }
  0xd8   :  { %775 = vst.msk [vmem:[#allocation4 + $0xc8] sm:$0xff] %vm749_vm3, %v704_v42  ;;  %v706_v12 = vpop.permute.xlu0 %705 }
  0xd9   :  { %1205 = vrot.lane.b32.xlu1 %v7724_v8, %s7211_s0  ;;  %776 = vst.msk [vmem:[#allocation4 + $0xd0] sm:$0xff] %vm749_vm3, %v706_v12  ;;  %v1371_v12 = vpack.c.bf16 %v1319_v29, %v1318_v23  ;;  %v1350_v29 = vld [vmem:[#allocation2 + $0x2d1] sm:$0xff] }
  0xda   :  { %1207 = vrot.lane.b32.xlu0 %v7726_v9, %s7211_s0 }
  0xdb   :  { %v708_v56 = vpop.permute.xlu1 %707 }
  0xdc   :  { %777 = vst.msk [vmem:[#allocation4 + $0xd8] sm:$0xff] %vm749_vm3, %v708_v56  ;;  %v710_v57 = vpop.permute.xlu0 %709  ;;  %v1322_v56 = vld [vmem:[#allocation2 + $0x151] sm:$0xff] }
  0xdd   :  { %1209 = vrot.lane.b32.xlu1 %v7736_v19, %s7211_s0  ;;  %778 = vst.msk [vmem:[#allocation4 + $0xe0] sm:$0xff] %vm749_vm3, %v710_v57  ;;  %v1323_v57 = vld [vmem:[#allocation2 + $0x159] sm:$0xff] }
  0xde   :  { %1211 = vrot.lane.b32.xlu0 %v7742_v26, %s7211_s0 }
  0xdf   :  { %v712_v0 = vpop.permute.xlu1 %711 }
  0xe0   :  { %779 = vst.msk [vmem:[#allocation4 + $0xe8] sm:$0xff] %vm749_vm3, %v712_v0  ;;  %v714_v8 = vpop.permute.xlu0 %713 }
  0xe1   :  { %1213 = vrot.lane.b32.xlu1 %v7751_v33, %s7211_s0  ;;  %780 = vst.msk [vmem:[#allocation4 + $0xf0] sm:$0xff] %vm749_vm3, %v714_v8  ;;  %v1372_v8 = vpack.c.bf16 %v1321_v41, %v1320_v35  ;;  %v1352_v41 = vld [vmem:[#allocation2 + $0x2e9] sm:$0xff] }
  0xe2   :  { %1215 = vrot.lane.b32.xlu0 %v7753_v34, %s7211_s0  ;;  %v1101_v34 = vld [vmem:[#allocation2 + $0x330] sm:$0xff] }
  0xe3   :  { %v716_v9 = vpop.permute.xlu1 %715  ;;  %v1134_v16 = vpack.c.bf16 %v1102_v13, %v1101_v34  ;;  %v1326_v34 = vld [vmem:[#allocation2 + $0x181] sm:$0xff]  ;;  %v1327_v13 = vld [vmem:[#allocation2 + $0x189] sm:$0xff] }
  0xe4   :  { %781 = vst.msk [vmem:[#allocation4 + $0xf8] sm:$0xff] %vm749_vm3, %v716_v9  ;;  %v911_v19 = vpop.permute.xlu0 %910  ;;  %v1324_v9 = vld [vmem:[#allocation2 + $0x169] sm:$0xff]  ;;  %vm4418_vm3 = vcmask 326912  }
  0xe5   :  { %1217 = vrot.lane.b32.xlu1 %v7757_v44, %s7211_s0  ;;  %1007 = vst.msk [vmem:[#allocation4] sm:$0xff] %vm1006_vm4, %v911_v19  ;;  %v1296_v44 = vld [vmem:[#allocation2 + $0x19] sm:$0xff]  ;;  %v1325_v19 = vld [vmem:[#allocation2 + $0x171] sm:$0xff] }
  0xe6   :  { %1219 = vrot.lane.b32.xlu0 %v7766_v50, %s7211_s0  ;;  %v1360_v22 = vpack.c.bf16 %v1297_v15, %v1296_v44  ;;  %v1374_v44 = vpack.c.bf16 %v1325_v19, %v1324_v9  ;;  %v1328_v15 = vld [vmem:[#allocation2 + $0x1c9] sm:$0xff]  ;;  %v1356_v19 = vld [vmem:[#allocation2 + $0x319] sm:$0xff] }
  0xe7   :  { %v913_v26 = vpop.permute.xlu1 %912 }
  0xe8   :  { %1008 = vst.msk [vmem:[#allocation4 + $0x8] sm:$0xff] %vm1006_vm4, %v913_v26  ;;  %v915_v33 = vpop.permute.xlu0 %914 }
  0xe9   :  { %1221 = vrot.lane.b32.xlu1 %v7768_v51, %s7211_s0  ;;  %1009 = vst.msk [vmem:[#allocation4 + $0x10] sm:$0xff] %vm1006_vm4, %v915_v33  ;;  %v1298_v51 = vld [vmem:[#allocation2 + $0x31] sm:$0xff]  ;;  %v1373_v33 = vpack.c.bf16 %v1323_v57, %v1322_v56  ;;  %v1354_v57 = vld [vmem:[#allocation2 + $0x301] sm:$0xff] }
  0xea   :  { %1223 = vrot.lane.b32.xlu0 %v7772_v58, %s7211_s0  ;;  %v1300_v58 = vld [vmem:[#allocation2 + $0x49] sm:$0xff]  ;;  %v1361_v27 = vpack.c.bf16 %v1299_v20, %v1298_v51  ;;  %v1375_v51 = vpack.c.bf16 %v1327_v13, %v1326_v34  ;;  %v1330_v20 = vld [vmem:[#allocation2 + $0x1e1] sm:$0xff]  ;;  %v1358_v13 = vld [vmem:[#allocation2 + $0x331] sm:$0xff] }
  0xeb   :  { %v917_v14 = vpop.permute.xlu1 %916  ;;  %v1362_v32 = vpack.c.bf16 %v1301_v24, %v1300_v58  ;;  %v1332_v24 = vld [vmem:[#allocation2 + $0x1f9] sm:$0xff] }
  0xec   :  { %1010 = vst.msk [vmem:[#allocation4 + $0x18] sm:$0xff] %vm1006_vm4, %v917_v14  ;;  %v919_v50 = vpop.permute.xlu0 %918 }
  0xed   :  { %1225 = vrot.lane.b32.xlu1 %v7779_v3, %s7211_s0  ;;  %1011 = vst.msk [vmem:[#allocation4 + $0x20] sm:$0xff] %vm1006_vm4, %v919_v50  ;;  %v1302_v3 = vld [vmem:[#allocation2 + $0x61] sm:$0xff]  ;;  %v1329_v50 = vld [vmem:[#allocation2 + $0x1d1] sm:$0xff] }
  0xee   :  { %1227 = vrot.lane.b32.xlu0 %v7781_v4, %s7211_s0  ;;  %v1304_v4 = vld [vmem:[#allocation2 + $0x79] sm:$0xff]  ;;  %v1363_v38 = vpack.c.bf16 %v1303_v28, %v1302_v3  ;;  %v1376_v58 = vpack.c.bf16 %v1329_v50, %v1328_v15  ;;  %v1334_v28 = vld [vmem:[#allocation2 + $0x211] sm:$0xff] }
  0xef   :  { %v921_v21 = vpop.permute.xlu1 %920  ;;  %v1364_v46 = vpack.c.bf16 %v1305_v36, %v1304_v4  ;;  %v1336_v36 = vld [vmem:[#allocation2 + $0x229] sm:$0xff]  ;;  %v1553_v50 = vld [vmem:[#allocation2 + $0x1a] sm:$0xff] }
  0xf0   :  { %1012 = vst.msk [vmem:[#allocation4 + $0x28] sm:$0xff] %vm1006_vm4, %v921_v21  ;;  %v923_v25 = vpop.permute.xlu0 %922  ;;  %v1331_v21 = vld [vmem:[#allocation2 + $0x1e9] sm:$0xff] }
  0xf1   :  { %1229 = vrot.lane.b32.xlu1 %v1134_v16, %s7211_s0  ;;  %1013 = vst.msk [vmem:[#allocation4 + $0x30] sm:$0xff] %vm1006_vm4, %v923_v25  ;;  %v1333_v25 = vld [vmem:[#allocation2 + $0x201] sm:$0xff]  ;;  %v1377_v3 = vpack.c.bf16 %v1331_v21, %v1330_v20  ;;  %v1555_v21 = vld [vmem:[#allocation2 + $0x32] sm:$0xff] }
  0xf2   :  { %1424 = vrot.lane.b32.xlu0 %v1360_v22, %s7212_s21  ;;  %v1378_v4 = vpack.c.bf16 %v1333_v25, %v1332_v24  ;;  %v1557_v25 = vld [vmem:[#allocation2 + $0x4a] sm:$0xff] }
  0xf3   :  { %v925_v31 = vpop.permute.xlu1 %924 }
  0xf4   :  { %1014 = vst.msk [vmem:[#allocation4 + $0x38] sm:$0xff] %vm1006_vm4, %v925_v31  ;;  %v927_v37 = vpop.permute.xlu0 %926  ;;  %v1335_v31 = vld [vmem:[#allocation2 + $0x219] sm:$0xff] }
  0xf5   :  { %1426 = vrot.lane.b32.xlu1 %v1361_v27, %s7212_s21  ;;  %1015 = vst.msk [vmem:[#allocation4 + $0x40] sm:$0xff] %vm1006_vm4, %v927_v37  ;;  %v1337_v37 = vld [vmem:[#allocation2 + $0x231] sm:$0xff]  ;;  %v1379_v39 = vpack.c.bf16 %v1335_v31, %v1334_v28  ;;  %v1559_v31 = vld [vmem:[#allocation2 + $0x62] sm:$0xff] }
  0xf6   :  { %1428 = vrot.lane.b32.xlu0 %v1362_v32, %s7212_s21  ;;  %v1380_v47 = vpack.c.bf16 %v1337_v37, %v1336_v36  ;;  %v1561_v37 = vld [vmem:[#allocation2 + $0x7a] sm:$0xff] }
  0xf7   :  { %v929_v45 = vpop.permute.xlu1 %928 }
  0xf8   :  { %1016 = vst.msk [vmem:[#allocation4 + $0x48] sm:$0xff] %vm1006_vm4, %v929_v45  ;;  %v931_v53 = vpop.permute.xlu0 %930  ;;  %v1339_v45 = vld [vmem:[#allocation2 + $0x249] sm:$0xff] }
  0xf9   :  { %1430 = vrot.lane.b32.xlu1 %v1363_v38, %s7212_s21  ;;  %1017 = vst.msk [vmem:[#allocation4 + $0x50] sm:$0xff] %vm1006_vm4, %v931_v53  ;;  %v1341_v53 = vld [vmem:[#allocation2 + $0x261] sm:$0xff]  ;;  %v1381_v55 = vpack.c.bf16 %v1339_v45, %v1338_v40  ;;  %v1563_v45 = vld [vmem:[#allocation2 + $0x92] sm:$0xff] }
  0xfa   :  { %1432 = vrot.lane.b32.xlu0 %v1364_v46, %s7212_s21  ;;  %v1382_v2 = vpack.c.bf16 %v1341_v53, %v1340_v49  ;;  %v1565_v53 = vld [vmem:[#allocation2 + $0xaa] sm:$0xff] }
  0xfb   :  { %v933_v60 = vpop.permute.xlu1 %932 }
  0xfc   :  { %1018 = vst.msk [vmem:[#allocation4 + $0x58] sm:$0xff] %vm1006_vm4, %v933_v60  ;;  %v935_v43 = vpop.permute.xlu0 %934  ;;  %v1343_v60 = vld [vmem:[#allocation2 + $0x279] sm:$0xff] }
  0xfd   :  { %1434 = vrot.lane.b32.xlu1 %v1365_v54, %s7212_s21  ;;  %1019 = vst.msk [vmem:[#allocation4 + $0x60] sm:$0xff] %vm1006_vm4, %v935_v43  ;;  %v1345_v43 = vld [vmem:[#allocation2 + $0x291] sm:$0xff]  ;;  %v1383_v61 = vpack.c.bf16 %v1343_v60, %v1342_v59  ;;  %v1567_v60 = vld [vmem:[#allocation2 + $0xc2] sm:$0xff] }
  0xfe   :  { %1436 = vrot.lane.b32.xlu0 %v1366_v63, %s7212_s21  ;;  %v1384_v17 = vpack.c.bf16 %v1345_v43, %v1344_v48  ;;  %v1569_v43 = vld [vmem:[#allocation2 + $0xda] sm:$0xff] }
  0xff   :  { %v937_v6 = vpop.permute.xlu1 %936 }
 0x100   :  { %1020 = vst.msk [vmem:[#allocation4 + $0x68] sm:$0xff] %vm1006_vm4, %v937_v6  ;;  %v939_v5 = vpop.permute.xlu0 %938  ;;  %v1347_v6 = vld [vmem:[#allocation2 + $0x2a9] sm:$0xff] }
 0x101   :  { %1438 = vrot.lane.b32.xlu1 %v1367_v52, %s7212_s21  ;;  %1021 = vst.msk [vmem:[#allocation4 + $0x70] sm:$0xff] %vm1006_vm4, %v939_v5  ;;  %v1349_v5 = vld [vmem:[#allocation2 + $0x2c1] sm:$0xff]  ;;  %v1385_v23 = vpack.c.bf16 %v1347_v6, %v1346_v62  ;;  %v1571_v6 = vld [vmem:[#allocation2 + $0xf2] sm:$0xff] }
 0x102   :  { %1440 = vrot.lane.b32.xlu0 %v1368_v11, %s7212_s21  ;;  %v1386_v35 = vpack.c.bf16 %v1349_v5, %v1348_v18  ;;  %v1573_v5 = vld [vmem:[#allocation2 + $0x10a] sm:$0xff] }
 0x103   :  { %v941_v10 = vpop.permute.xlu1 %940 }
 0x104   :  { %1022 = vst.msk [vmem:[#allocation4 + $0x78] sm:$0xff] %vm1006_vm4, %v941_v10  ;;  %v943_v42 = vpop.permute.xlu0 %942  ;;  %v1351_v10 = vld [vmem:[#allocation2 + $0x2d9] sm:$0xff] }
 0x105   :  { %1442 = vrot.lane.b32.xlu1 %v1369_v7, %s7212_s21  ;;  %1023 = vst.msk [vmem:[#allocation4 + $0x80] sm:$0xff] %vm1006_vm4, %v943_v42  ;;  %v1353_v42 = vld [vmem:[#allocation2 + $0x2f1] sm:$0xff]  ;;  %v1387_v56 = vpack.c.bf16 %v1351_v10, %v1350_v29  ;;  %v1575_v10 = vld [vmem:[#allocation2 + $0x122] sm:$0xff] }
 0x106   :  { %1444 = vrot.lane.b32.xlu0 %v1370_v30, %s7212_s21  ;;  %v1388_v9 = vpack.c.bf16 %v1353_v42, %v1352_v41  ;;  %v1577_v42 = vld [vmem:[#allocation2 + $0x13a] sm:$0xff] }
 0x107   :  { %v945_v0 = vpop.permute.xlu1 %944 }
 0x108   :  { %1024 = vst.msk [vmem:[#allocation4 + $0x88] sm:$0xff] %vm1006_vm4, %v945_v0  ;;  %v947_v26 = vpop.permute.xlu0 %946  ;;  %v1355_v0 = vld [vmem:[#allocation2 + $0x309] sm:$0xff] }
 0x109   :  { %1446 = vrot.lane.b32.xlu1 %v1371_v12, %s7212_s21  ;;  %1025 = vst.msk [vmem:[#allocation4 + $0x90] sm:$0xff] %vm1006_vm4, %v947_v26  ;;  %v1357_v26 = vld [vmem:[#allocation2 + $0x321] sm:$0xff]  ;;  %v1389_v34 = vpack.c.bf16 %v1355_v0, %v1354_v57  ;;  %v1579_v0 = vld [vmem:[#allocation2 + $0x152] sm:$0xff] }
 0x10a   :  { %1448 = vrot.lane.b32.xlu0 %v1372_v8, %s7212_s21  ;;  %v1390_v15 = vpack.c.bf16 %v1357_v26, %v1356_v19  ;;  %v1581_v26 = vld [vmem:[#allocation2 + $0x16a] sm:$0xff] }
 0x10b   :  { %v949_v14 = vpop.permute.xlu1 %948 }
 0x10c   :  { %1026 = vst.msk [vmem:[#allocation4 + $0x98] sm:$0xff] %vm1006_vm4, %v949_v14  ;;  %v951_v16 = vpop.permute.xlu0 %950  ;;  %v1359_v14 = vld [vmem:[#allocation2 + $0x339] sm:$0xff] }
 0x10d   :  { %1450 = vrot.lane.b32.xlu1 %v1373_v33, %s7212_s21  ;;  %1027 = vst.msk [vmem:[#allocation4 + $0xa0] sm:$0xff] %vm1006_vm4, %v951_v16  ;;  %v1554_v16 = vld [vmem:[#allocation2 + $0x22] sm:$0xff]  ;;  %v1391_v20 = vpack.c.bf16 %v1359_v14, %v1358_v13 }
 0x10e   :  { %1452 = vrot.lane.b32.xlu0 %v1374_v44, %s7212_s21  ;;  %v1617_v24 = vpack.c.bf16 %v1554_v16, %v1553_v50  ;;  %v1583_v14 = vld [vmem:[#allocation2 + $0x182] sm:$0xff]  ;;  %v1585_v16 = vld [vmem:[#allocation2 + $0x1ca] sm:$0xff] }
 0x10f   :  { %v953_v22 = vpop.permute.xlu1 %952 }
 0x110   :  { %1028 = vst.msk [vmem:[#allocation4 + $0xa8] sm:$0xff] %vm1006_vm4, %v953_v22  ;;  %v955_v27 = vpop.permute.xlu0 %954  ;;  %v1556_v22 = vld [vmem:[#allocation2 + $0x3a] sm:$0xff] }
 0x111   :  { %1454 = vrot.lane.b32.xlu1 %v1375_v51, %s7212_s21  ;;  %1029 = vst.msk [vmem:[#allocation4 + $0xb0] sm:$0xff] %vm1006_vm4, %v955_v27  ;;  %v1558_v27 = vld [vmem:[#allocation2 + $0x52] sm:$0xff]  ;;  %v1618_v28 = vpack.c.bf16 %v1556_v22, %v1555_v21  ;;  %v1587_v22 = vld [vmem:[#allocation2 + $0x1e2] sm:$0xff] }
 0x112   :  { %1456 = vrot.lane.b32.xlu0 %v1376_v58, %s7212_s21  ;;  %v1619_v36 = vpack.c.bf16 %v1558_v27, %v1557_v25  ;;  %v1589_v27 = vld [vmem:[#allocation2 + $0x1fa] sm:$0xff] }
 0x113   :  { %v957_v32 = vpop.permute.xlu1 %956 }
 0x114   :  { %1030 = vst.msk [vmem:[#allocation4 + $0xb8] sm:$0xff] %vm1006_vm4, %v957_v32  ;;  %v959_v38 = vpop.permute.xlu0 %958  ;;  %v1560_v32 = vld [vmem:[#allocation2 + $0x6a] sm:$0xff] }
 0x115   :  { %1458 = vrot.lane.b32.xlu1 %v1377_v3, %s7212_s21  ;;  %1031 = vst.msk [vmem:[#allocation4 + $0xc0] sm:$0xff] %vm1006_vm4, %v959_v38  ;;  %v1562_v38 = vld [vmem:[#allocation2 + $0x82] sm:$0xff]  ;;  %v1620_v40 = vpack.c.bf16 %v1560_v32, %v1559_v31  ;;  %v1591_v32 = vld [vmem:[#allocation2 + $0x212] sm:$0xff] }
 0x116   :  { %1460 = vrot.lane.b32.xlu0 %v1378_v4, %s7212_s21  ;;  %v1621_v49 = vpack.c.bf16 %v1562_v38, %v1561_v37  ;;  %v1593_v38 = vld [vmem:[#allocation2 + $0x22a] sm:$0xff] }
 0x117   :  { %v961_v46 = vpop.permute.xlu1 %960 }
 0x118   :  { %1032 = vst.msk [vmem:[#allocation4 + $0xc8] sm:$0xff] %vm1006_vm4, %v961_v46  ;;  %v963_v54 = vpop.permute.xlu0 %962  ;;  %v1564_v46 = vld [vmem:[#allocation2 + $0x9a] sm:$0xff] }
 0x119   :  { %1462 = vrot.lane.b32.xlu1 %v1379_v39, %s7212_s21  ;;  %1033 = vst.msk [vmem:[#allocation4 + $0xd0] sm:$0xff] %vm1006_vm4, %v963_v54  ;;  %v1566_v54 = vld [vmem:[#allocation2 + $0xb2] sm:$0xff]  ;;  %v1622_v59 = vpack.c.bf16 %v1564_v46, %v1563_v45  ;;  %v1595_v46 = vld [vmem:[#allocation2 + $0x242] sm:$0xff] }
 0x11a   :  { %1464 = vrot.lane.b32.xlu0 %v1380_v47, %s7212_s21  ;;  %v1623_v48 = vpack.c.bf16 %v1566_v54, %v1565_v53  ;;  %v1597_v54 = vld [vmem:[#allocation2 + $0x25a] sm:$0xff] }
 0x11b   :  { %v965_v63 = vpop.permute.xlu1 %964 }
 0x11c   :  { %1034 = vst.msk [vmem:[#allocation4 + $0xd8] sm:$0xff] %vm1006_vm4, %v965_v63  ;;  %v967_v52 = vpop.permute.xlu0 %966  ;;  %v1568_v63 = vld [vmem:[#allocation2 + $0xca] sm:$0xff] }
 0x11d   :  { %1466 = vrot.lane.b32.xlu1 %v1381_v55, %s7212_s21  ;;  %1035 = vst.msk [vmem:[#allocation4 + $0xe0] sm:$0xff] %vm1006_vm4, %v967_v52  ;;  %v1570_v52 = vld [vmem:[#allocation2 + $0xe2] sm:$0xff]  ;;  %v1624_v62 = vpack.c.bf16 %v1568_v63, %v1567_v60  ;;  %v1599_v63 = vld [vmem:[#allocation2 + $0x272] sm:$0xff] }
 0x11e   :  { %1468 = vrot.lane.b32.xlu0 %v1382_v2, %s7212_s21  ;;  %v1625_v18 = vpack.c.bf16 %v1570_v52, %v1569_v43  ;;  %v1601_v52 = vld [vmem:[#allocation2 + $0x28a] sm:$0xff] }
 0x11f   :  { %v969_v11 = vpop.permute.xlu1 %968 }
 0x120   :  { %1036 = vst.msk [vmem:[#allocation4 + $0xe8] sm:$0xff] %vm1006_vm4, %v969_v11  ;;  %v971_v7 = vpop.permute.xlu0 %970  ;;  %v1572_v11 = vld [vmem:[#allocation2 + $0xfa] sm:$0xff] }
 0x121   :  { %1470 = vrot.lane.b32.xlu1 %v1383_v61, %s7212_s21  ;;  %1037 = vst.msk [vmem:[#allocation4 + $0xf0] sm:$0xff] %vm1006_vm4, %v971_v7  ;;  %v1574_v7 = vld [vmem:[#allocation2 + $0x112] sm:$0xff]  ;;  %v1626_v29 = vpack.c.bf16 %v1572_v11, %v1571_v6  ;;  %v1603_v11 = vld [vmem:[#allocation2 + $0x2a2] sm:$0xff] }
 0x122   :  { %1472 = vrot.lane.b32.xlu0 %v1384_v17, %s7212_s21  ;;  %v1627_v41 = vpack.c.bf16 %v1574_v7, %v1573_v5  ;;  %v1605_v7 = vld [vmem:[#allocation2 + $0x2ba] sm:$0xff] }
 0x123   :  { %v973_v30 = vpop.permute.xlu1 %972 }
 0x124   :  { %1038 = vst.msk [vmem:[#allocation4 + $0xf8] sm:$0xff] %vm1006_vm4, %v973_v30  ;;  %v1168_v12 = vpop.permute.xlu0 %1167  ;;  %v1576_v30 = vld [vmem:[#allocation2 + $0x12a] sm:$0xff]  ;;  %vm5645_vm4 = vcmask 1043456  }
 0x125   :  { %1474 = vrot.lane.b32.xlu1 %v1385_v23, %s7212_s21  ;;  %1264 = vst.msk [vmem:[#allocation4] sm:$0xff] %vm1263_vm5, %v1168_v12  ;;  %v1578_v12 = vld [vmem:[#allocation2 + $0x142] sm:$0xff]  ;;  %v1628_v57 = vpack.c.bf16 %v1576_v30, %v1575_v10  ;;  %v1607_v30 = vld [vmem:[#allocation2 + $0x2d2] sm:$0xff] }
 0x126   :  { %1476 = vrot.lane.b32.xlu0 %v1386_v35, %s7212_s21  ;;  %v1629_v19 = vpack.c.bf16 %v1578_v12, %v1577_v42  ;;  %v1609_v12 = vld [vmem:[#allocation2 + $0x2ea] sm:$0xff] }
 0x127   :  { %v1170_v8 = vpop.permute.xlu1 %1169 }
 0x128   :  { %1265 = vst.msk [vmem:[#allocation4 + $0x8] sm:$0xff] %vm1263_vm5, %v1170_v8  ;;  %v1172_v33 = vpop.permute.xlu0 %1171  ;;  %v1580_v8 = vld [vmem:[#allocation2 + $0x15a] sm:$0xff] }
 0x129   :  { %1478 = vrot.lane.b32.xlu1 %v1387_v56, %s7212_s21  ;;  %1266 = vst.msk [vmem:[#allocation4 + $0x10] sm:$0xff] %vm1263_vm5, %v1172_v33  ;;  %v1582_v33 = vld [vmem:[#allocation2 + $0x172] sm:$0xff]  ;;  %v1630_v13 = vpack.c.bf16 %v1580_v8, %v1579_v0  ;;  %v1611_v8 = vld [vmem:[#allocation2 + $0x302] sm:$0xff] }
 0x12a   :  { %1480 = vrot.lane.b32.xlu0 %v1388_v9, %s7212_s21  ;;  %v1631_v50 = vpack.c.bf16 %v1582_v33, %v1581_v26  ;;  %v1613_v33 = vld [vmem:[#allocation2 + $0x31a] sm:$0xff] }
 0x12b   :  { %v1174_v44 = vpop.permute.xlu1 %1173 }
 0x12c   :  { %1267 = vst.msk [vmem:[#allocation4 + $0x18] sm:$0xff] %vm1263_vm5, %v1174_v44  ;;  %v1176_v51 = vpop.permute.xlu0 %1175  ;;  %v1584_v44 = vld [vmem:[#allocation2 + $0x18a] sm:$0xff] }
 0x12d   :  { %1482 = vrot.lane.b32.xlu1 %v1389_v34, %s7212_s21  ;;  %1268 = vst.msk [vmem:[#allocation4 + $0x20] sm:$0xff] %vm1263_vm5, %v1176_v51  ;;  %v1586_v51 = vld [vmem:[#allocation2 + $0x1d2] sm:$0xff]  ;;  %v1632_v21 = vpack.c.bf16 %v1584_v44, %v1583_v14 }
 0x12e   :  { %1484 = vrot.lane.b32.xlu0 %v1390_v15, %s7212_s21  ;;  %v1633_v25 = vpack.c.bf16 %v1586_v51, %v1585_v16  ;;  %v1615_v44 = vld [vmem:[#allocation2 + $0x332] sm:$0xff] }
 0x12f   :  { %v1178_v58 = vpop.permute.xlu1 %1177  ;;  %v1811_v51 = vld [vmem:[#allocation2 + $0x30] sm:$0xff] }
 0x130   :  { %1269 = vst.msk [vmem:[#allocation4 + $0x28] sm:$0xff] %vm1263_vm5, %v1178_v58  ;;  %v1180_v3 = vpop.permute.xlu0 %1179  ;;  %v1588_v58 = vld [vmem:[#allocation2 + $0x1ea] sm:$0xff] }
 0x131   :  { %1486 = vrot.lane.b32.xlu1 %v1391_v20, %s7212_s21  ;;  %1270 = vst.msk [vmem:[#allocation4 + $0x30] sm:$0xff] %vm1263_vm5, %v1180_v3  ;;  %v1590_v3 = vld [vmem:[#allocation2 + $0x202] sm:$0xff]  ;;  %v1634_v31 = vpack.c.bf16 %v1588_v58, %v1587_v22 }
 0x132   :  { %1681 = vrot.lane.b32.xlu0 %v1617_v24, %s7213_s22  ;;  %v1635_v37 = vpack.c.bf16 %v1590_v3, %v1589_v27  ;;  %v1813_v58 = vld [vmem:[#allocation2 + $0x48] sm:$0xff]  ;;  %v1815_v3 = vld [vmem:[#allocation2 + $0x60] sm:$0xff] }
 0x133   :  { %v1182_v4 = vpop.permute.xlu1 %1181 }
 0x134   :  { %1271 = vst.msk [vmem:[#allocation4 + $0x38] sm:$0xff] %vm1263_vm5, %v1182_v4  ;;  %v1184_v39 = vpop.permute.xlu0 %1183  ;;  %v1592_v4 = vld [vmem:[#allocation2 + $0x21a] sm:$0xff] }
 0x135   :  { %1683 = vrot.lane.b32.xlu1 %v1618_v28, %s7213_s22  ;;  %1272 = vst.msk [vmem:[#allocation4 + $0x40] sm:$0xff] %vm1263_vm5, %v1184_v39  ;;  %v1594_v39 = vld [vmem:[#allocation2 + $0x232] sm:$0xff]  ;;  %v1636_v45 = vpack.c.bf16 %v1592_v4, %v1591_v32 }
 0x136   :  { %1685 = vrot.lane.b32.xlu0 %v1619_v36, %s7213_s22  ;;  %v1637_v53 = vpack.c.bf16 %v1594_v39, %v1593_v38  ;;  %v1817_v4 = vld [vmem:[#allocation2 + $0x78] sm:$0xff]  ;;  %v1819_v39 = vld [vmem:[#allocation2 + $0x90] sm:$0xff] }
 0x137   :  { %v1186_v47 = vpop.permute.xlu1 %1185 }
 0x138   :  { %1273 = vst.msk [vmem:[#allocation4 + $0x48] sm:$0xff] %vm1263_vm5, %v1186_v47  ;;  %v1188_v55 = vpop.permute.xlu0 %1187  ;;  %v1596_v47 = vld [vmem:[#allocation2 + $0x24a] sm:$0xff] }
 0x139   :  { %1687 = vrot.lane.b32.xlu1 %v1620_v40, %s7213_s22  ;;  %1274 = vst.msk [vmem:[#allocation4 + $0x50] sm:$0xff] %vm1263_vm5, %v1188_v55  ;;  %v1598_v55 = vld [vmem:[#allocation2 + $0x262] sm:$0xff]  ;;  %v1638_v60 = vpack.c.bf16 %v1596_v47, %v1595_v46 }
 0x13a   :  { %1689 = vrot.lane.b32.xlu0 %v1621_v49, %s7213_s22  ;;  %v1639_v43 = vpack.c.bf16 %v1598_v55, %v1597_v54  ;;  %v1821_v47 = vld [vmem:[#allocation2 + $0xa8] sm:$0xff]  ;;  %v1823_v55 = vld [vmem:[#allocation2 + $0xc0] sm:$0xff] }
 0x13b   :  { %v1190_v2 = vpop.permute.xlu1 %1189 }
 0x13c   :  { %1275 = vst.msk [vmem:[#allocation4 + $0x58] sm:$0xff] %vm1263_vm5, %v1190_v2  ;;  %v1192_v61 = vpop.permute.xlu0 %1191  ;;  %v1600_v2 = vld [vmem:[#allocation2 + $0x27a] sm:$0xff] }
 0x13d   :  { %1691 = vrot.lane.b32.xlu1 %v1622_v59, %s7213_s22  ;;  %1276 = vst.msk [vmem:[#allocation4 + $0x60] sm:$0xff] %vm1263_vm5, %v1192_v61  ;;  %v1602_v61 = vld [vmem:[#allocation2 + $0x292] sm:$0xff]  ;;  %v1640_v6 = vpack.c.bf16 %v1600_v2, %v1599_v63 }
 0x13e   :  { %1693 = vrot.lane.b32.xlu0 %v1623_v48, %s7213_s22  ;;  %v1641_v5 = vpack.c.bf16 %v1602_v61, %v1601_v52  ;;  %v1825_v2 = vld [vmem:[#allocation2 + $0xd8] sm:$0xff]  ;;  %v1827_v61 = vld [vmem:[#allocation2 + $0xf0] sm:$0xff] }
 0x13f   :  { %v1194_v17 = vpop.permute.xlu1 %1193 }
 0x140   :  { %1277 = vst.msk [vmem:[#allocation4 + $0x68] sm:$0xff] %vm1263_vm5, %v1194_v17  ;;  %v1196_v23 = vpop.permute.xlu0 %1195  ;;  %v1604_v17 = vld [vmem:[#allocation2 + $0x2aa] sm:$0xff] }
 0x141   :  { %1695 = vrot.lane.b32.xlu1 %v1624_v62, %s7213_s22  ;;  %1278 = vst.msk [vmem:[#allocation4 + $0x70] sm:$0xff] %vm1263_vm5, %v1196_v23  ;;  %v1606_v23 = vld [vmem:[#allocation2 + $0x2c2] sm:$0xff]  ;;  %v1642_v10 = vpack.c.bf16 %v1604_v17, %v1603_v11 }
 0x142   :  { %1697 = vrot.lane.b32.xlu0 %v1625_v18, %s7213_s22  ;;  %v1643_v42 = vpack.c.bf16 %v1606_v23, %v1605_v7  ;;  %v1829_v17 = vld [vmem:[#allocation2 + $0x108] sm:$0xff]  ;;  %v1831_v23 = vld [vmem:[#allocation2 + $0x120] sm:$0xff] }
 0x143   :  { %v1198_v35 = vpop.permute.xlu1 %1197 }
 0x144   :  { %1279 = vst.msk [vmem:[#allocation4 + $0x78] sm:$0xff] %vm1263_vm5, %v1198_v35  ;;  %v1200_v56 = vpop.permute.xlu0 %1199  ;;  %v1608_v35 = vld [vmem:[#allocation2 + $0x2da] sm:$0xff] }
 0x145   :  { %1699 = vrot.lane.b32.xlu1 %v1626_v29, %s7213_s22  ;;  %1280 = vst.msk [vmem:[#allocation4 + $0x80] sm:$0xff] %vm1263_vm5, %v1200_v56  ;;  %v1610_v56 = vld [vmem:[#allocation2 + $0x2f2] sm:$0xff]  ;;  %v1644_v0 = vpack.c.bf16 %v1608_v35, %v1607_v30 }
 0x146   :  { %1701 = vrot.lane.b32.xlu0 %v1627_v41, %s7213_s22  ;;  %v1645_v26 = vpack.c.bf16 %v1610_v56, %v1609_v12  ;;  %v1833_v35 = vld [vmem:[#allocation2 + $0x138] sm:$0xff]  ;;  %v1835_v56 = vld [vmem:[#allocation2 + $0x150] sm:$0xff] }
 0x147   :  { %v1202_v9 = vpop.permute.xlu1 %1201 }
 0x148   :  { %1281 = vst.msk [vmem:[#allocation4 + $0x88] sm:$0xff] %vm1263_vm5, %v1202_v9  ;;  %v1204_v34 = vpop.permute.xlu0 %1203  ;;  %v1612_v9 = vld [vmem:[#allocation2 + $0x30a] sm:$0xff] }
 0x149   :  { %1703 = vrot.lane.b32.xlu1 %v1628_v57, %s7213_s22  ;;  %1282 = vst.msk [vmem:[#allocation4 + $0x90] sm:$0xff] %vm1263_vm5, %v1204_v34  ;;  %v1614_v34 = vld [vmem:[#allocation2 + $0x322] sm:$0xff]  ;;  %v1646_v14 = vpack.c.bf16 %v1612_v9, %v1611_v8 }
 0x14a   :  { %1705 = vrot.lane.b32.xlu0 %v1629_v19, %s7213_s22  ;;  %v1647_v16 = vpack.c.bf16 %v1614_v34, %v1613_v33  ;;  %v1837_v9 = vld [vmem:[#allocation2 + $0x168] sm:$0xff]  ;;  %v1839_v34 = vld [vmem:[#allocation2 + $0x180] sm:$0xff] }
 0x14b   :  { %v1206_v15 = vpop.permute.xlu1 %1205 }
 0x14c   :  { %1283 = vst.msk [vmem:[#allocation4 + $0x98] sm:$0xff] %vm1263_vm5, %v1206_v15  ;;  %v1208_v20 = vpop.permute.xlu0 %1207  ;;  %v1616_v15 = vld [vmem:[#allocation2 + $0x33a] sm:$0xff] }
 0x14d   :  { %1707 = vrot.lane.b32.xlu1 %v1630_v13, %s7213_s22  ;;  %1284 = vst.msk [vmem:[#allocation4 + $0xa0] sm:$0xff] %vm1263_vm5, %v1208_v20  ;;  %v1812_v20 = vld [vmem:[#allocation2 + $0x38] sm:$0xff]  ;;  %v1648_v22 = vpack.c.bf16 %v1616_v15, %v1615_v44 }
 0x14e   :  { %1709 = vrot.lane.b32.xlu0 %v1631_v50, %s7213_s22  ;;  %v1875_v27 = vpack.c.bf16 %v1812_v20, %v1811_v51  ;;  %v1841_v15 = vld [vmem:[#allocation2 + $0x198] sm:$0xff]  ;;  %v1843_v20 = vld [vmem:[#allocation2 + $0x1e0] sm:$0xff] }
 0x14f   :  { %v1210_v24 = vpop.permute.xlu1 %1209 }
 0x150   :  { %1285 = vst.msk [vmem:[#allocation4 + $0xa8] sm:$0xff] %vm1263_vm5, %v1210_v24  ;;  %v1212_v28 = vpop.permute.xlu0 %1211  ;;  %v1814_v24 = vld [vmem:[#allocation2 + $0x50] sm:$0xff] }
 0x151   :  { %1711 = vrot.lane.b32.xlu1 %v1632_v21, %s7213_s22  ;;  %1286 = vst.msk [vmem:[#allocation4 + $0xb0] sm:$0xff] %vm1263_vm5, %v1212_v28  ;;  %v1816_v28 = vld [vmem:[#allocation2 + $0x68] sm:$0xff]  ;;  %v1876_v32 = vpack.c.bf16 %v1814_v24, %v1813_v58  ;;  %v1845_v24 = vld [vmem:[#allocation2 + $0x1f8] sm:$0xff] }
 0x152   :  { %1713 = vrot.lane.b32.xlu0 %v1633_v25, %s7213_s22  ;;  %v1877_v38 = vpack.c.bf16 %v1816_v28, %v1815_v3  ;;  %v1847_v28 = vld [vmem:[#allocation2 + $0x210] sm:$0xff] }
 0x153   :  { %v1214_v36 = vpop.permute.xlu1 %1213 }
 0x154   :  { %1287 = vst.msk [vmem:[#allocation4 + $0xb8] sm:$0xff] %vm1263_vm5, %v1214_v36  ;;  %v1216_v40 = vpop.permute.xlu0 %1215  ;;  %v1818_v36 = vld [vmem:[#allocation2 + $0x80] sm:$0xff] }
 0x155   :  { %1715 = vrot.lane.b32.xlu1 %v1634_v31, %s7213_s22  ;;  %1288 = vst.msk [vmem:[#allocation4 + $0xc0] sm:$0xff] %vm1263_vm5, %v1216_v40  ;;  %v1820_v40 = vld [vmem:[#allocation2 + $0x98] sm:$0xff]  ;;  %v1878_v46 = vpack.c.bf16 %v1818_v36, %v1817_v4  ;;  %v1849_v36 = vld [vmem:[#allocation2 + $0x228] sm:$0xff] }
 0x156   :  { %1717 = vrot.lane.b32.xlu0 %v1635_v37, %s7213_s22  ;;  %v1879_v54 = vpack.c.bf16 %v1820_v40, %v1819_v39  ;;  %v1851_v40 = vld [vmem:[#allocation2 + $0x240] sm:$0xff] }
 0x157   :  { %v1218_v49 = vpop.permute.xlu1 %1217 }
 0x158   :  { %1289 = vst.msk [vmem:[#allocation4 + $0xc8] sm:$0xff] %vm1263_vm5, %v1218_v49  ;;  %v1220_v59 = vpop.permute.xlu0 %1219  ;;  %v1822_v49 = vld [vmem:[#allocation2 + $0xb0] sm:$0xff] }
 0x159   :  { %1719 = vrot.lane.b32.xlu1 %v1636_v45, %s7213_s22  ;;  %1290 = vst.msk [vmem:[#allocation4 + $0xd0] sm:$0xff] %vm1263_vm5, %v1220_v59  ;;  %v1824_v59 = vld [vmem:[#allocation2 + $0xc8] sm:$0xff]  ;;  %v1880_v63 = vpack.c.bf16 %v1822_v49, %v1821_v47  ;;  %v1853_v49 = vld [vmem:[#allocation2 + $0x258] sm:$0xff] }
 0x15a   :  { %1721 = vrot.lane.b32.xlu0 %v1637_v53, %s7213_s22  ;;  %v1881_v52 = vpack.c.bf16 %v1824_v59, %v1823_v55  ;;  %v1855_v59 = vld [vmem:[#allocation2 + $0x270] sm:$0xff] }
 0x15b   :  { %v1222_v48 = vpop.permute.xlu1 %1221 }
 0x15c   :  { %1291 = vst.msk [vmem:[#allocation4 + $0xd8] sm:$0xff] %vm1263_vm5, %v1222_v48  ;;  %v1224_v62 = vpop.permute.xlu0 %1223  ;;  %v1826_v48 = vld [vmem:[#allocation2 + $0xe0] sm:$0xff] }
 0x15d   :  { %1723 = vrot.lane.b32.xlu1 %v1638_v60, %s7213_s22  ;;  %1292 = vst.msk [vmem:[#allocation4 + $0xe0] sm:$0xff] %vm1263_vm5, %v1224_v62  ;;  %v1828_v62 = vld [vmem:[#allocation2 + $0xf8] sm:$0xff]  ;;  %v1882_v11 = vpack.c.bf16 %v1826_v48, %v1825_v2  ;;  %v1857_v48 = vld [vmem:[#allocation2 + $0x288] sm:$0xff] }
 0x15e   :  { %1725 = vrot.lane.b32.xlu0 %v1639_v43, %s7213_s22  ;;  %v1883_v7 = vpack.c.bf16 %v1828_v62, %v1827_v61  ;;  %v1859_v62 = vld [vmem:[#allocation2 + $0x2a0] sm:$0xff] }
 0x15f   :  { %v1226_v18 = vpop.permute.xlu1 %1225 }
 0x160   :  { %1293 = vst.msk [vmem:[#allocation4 + $0xe8] sm:$0xff] %vm1263_vm5, %v1226_v18  ;;  %v1228_v29 = vpop.permute.xlu0 %1227  ;;  %v1830_v18 = vld [vmem:[#allocation2 + $0x110] sm:$0xff] }
 0x161   :  { %1727 = vrot.lane.b32.xlu1 %v1640_v6, %s7213_s22  ;;  %1294 = vst.msk [vmem:[#allocation4 + $0xf0] sm:$0xff] %vm1263_vm5, %v1228_v29  ;;  %v1832_v29 = vld [vmem:[#allocation2 + $0x128] sm:$0xff]  ;;  %v1884_v30 = vpack.c.bf16 %v1830_v18, %v1829_v17  ;;  %v1861_v18 = vld [vmem:[#allocation2 + $0x2b8] sm:$0xff] }
 0x162   :  { %1729 = vrot.lane.b32.xlu0 %v1641_v5, %s7213_s22  ;;  %v1885_v12 = vpack.c.bf16 %v1832_v29, %v1831_v23  ;;  %v1863_v29 = vld [vmem:[#allocation2 + $0x2d0] sm:$0xff] }
 0x163   :  { %v1230_v41 = vpop.permute.xlu1 %1229 }
 0x164   :  { %1295 = vst.msk [vmem:[#allocation4 + $0xf8] sm:$0xff] %vm1263_vm5, %v1230_v41  ;;  %v1425_v57 = vpop.permute.xlu0 %1424  ;;  %v1834_v41 = vld [vmem:[#allocation2 + $0x140] sm:$0xff]  ;;  %vm4675_vm5 = vcmask 392512  }
 0x165   :  { %1731 = vrot.lane.b32.xlu1 %v1642_v10, %s7213_s22  ;;  %1521 = vst.msk [vmem:[#allocation4] sm:$0xff] %vm1520_vm6, %v1425_v57  ;;  %v1836_v57 = vld [vmem:[#allocation2 + $0x158] sm:$0xff]  ;;  %v1886_v8 = vpack.c.bf16 %v1834_v41, %v1833_v35  ;;  %v1865_v41 = vld [vmem:[#allocation2 + $0x2e8] sm:$0xff] }
 0x166   :  { %1733 = vrot.lane.b32.xlu0 %v1643_v42, %s7213_s22  ;;  %v1887_v33 = vpack.c.bf16 %v1836_v57, %v1835_v56  ;;  %v1867_v57 = vld [vmem:[#allocation2 + $0x300] sm:$0xff] }
 0x167   :  { %v1427_v19 = vpop.permute.xlu1 %1426 }
 0x168   :  { %1522 = vst.msk [vmem:[#allocation4 + $0x8] sm:$0xff] %vm1520_vm6, %v1427_v19  ;;  %v1429_v13 = vpop.permute.xlu0 %1428  ;;  %v1838_v19 = vld [vmem:[#allocation2 + $0x170] sm:$0xff] }
 0x169   :  { %1735 = vrot.lane.b32.xlu1 %v1644_v0, %s7213_s22  ;;  %1523 = vst.msk [vmem:[#allocation4 + $0x10] sm:$0xff] %vm1520_vm6, %v1429_v13  ;;  %v1840_v13 = vld [vmem:[#allocation2 + $0x188] sm:$0xff]  ;;  %v1888_v44 = vpack.c.bf16 %v1838_v19, %v1837_v9  ;;  %v1869_v19 = vld [vmem:[#allocation2 + $0x318] sm:$0xff] }
 0x16a   :  { %1737 = vrot.lane.b32.xlu0 %v1645_v26, %s7213_s22  ;;  %v1889_v51 = vpack.c.bf16 %v1840_v13, %v1839_v34  ;;  %v1871_v13 = vld [vmem:[#allocation2 + $0x330] sm:$0xff] }
 0x16b   :  { %v1431_v50 = vpop.permute.xlu1 %1430 }
 0x16c   :  { %1524 = vst.msk [vmem:[#allocation4 + $0x18] sm:$0xff] %vm1520_vm6, %v1431_v50  ;;  %v1433_v21 = vpop.permute.xlu0 %1432  ;;  %v1842_v50 = vld [vmem:[#allocation2 + $0x1a0] sm:$0xff] }
 0x16d   :  { %1739 = vrot.lane.b32.xlu1 %v1646_v14, %s7213_s22  ;;  %1525 = vst.msk [vmem:[#allocation4 + $0x20] sm:$0xff] %vm1520_vm6, %v1433_v21  ;;  %v1844_v21 = vld [vmem:[#allocation2 + $0x1e8] sm:$0xff]  ;;  %v1890_v58 = vpack.c.bf16 %v1842_v50, %v1841_v15 }
 0x16e   :  { %1741 = vrot.lane.b32.xlu0 %v1647_v16, %s7213_s22  ;;  %v1891_v3 = vpack.c.bf16 %v1844_v21, %v1843_v20  ;;  %v1873_v50 = vld [vmem:[#allocation2 + $0x348] sm:$0xff]  ;;  %v2068_v21 = vld [vmem:[#allocation2 + $0x31] sm:$0xff] }
 0x16f   :  { %v1435_v25 = vpop.permute.xlu1 %1434 }
 0x170   :  { %1526 = vst.msk [vmem:[#allocation4 + $0x28] sm:$0xff] %vm1520_vm6, %v1435_v25  ;;  %v1437_v31 = vpop.permute.xlu0 %1436  ;;  %v1846_v25 = vld [vmem:[#allocation2 + $0x200] sm:$0xff] }
 0x171   :  { %1743 = vrot.lane.b32.xlu1 %v1648_v22, %s7213_s22  ;;  %1527 = vst.msk [vmem:[#allocation4 + $0x30] sm:$0xff] %vm1520_vm6, %v1437_v31  ;;  %v1848_v31 = vld [vmem:[#allocation2 + $0x218] sm:$0xff]  ;;  %v1892_v4 = vpack.c.bf16 %v1846_v25, %v1845_v24  ;;  %v2070_v25 = vld [vmem:[#allocation2 + $0x49] sm:$0xff]  ;;  %s7219_s22 = smov 56  }
 0x172   :  { %1939 = vrot.lane.b32.xlu0 %v1875_v27, %s7214_s23  ;;  %v1893_v39 = vpack.c.bf16 %v1848_v31, %v1847_v28  ;;  %v2072_v31 = vld [vmem:[#allocation2 + $0x61] sm:$0xff] }
 0x173   :  { %v1439_v37 = vpop.permute.xlu1 %1438 }
 0x174   :  { %1528 = vst.msk [vmem:[#allocation4 + $0x38] sm:$0xff] %vm1520_vm6, %v1439_v37  ;;  %v1441_v45 = vpop.permute.xlu0 %1440  ;;  %v1850_v37 = vld [vmem:[#allocation2 + $0x230] sm:$0xff] }
 0x175   :  { %1941 = vrot.lane.b32.xlu1 %v1876_v32, %s7214_s23  ;;  %1529 = vst.msk [vmem:[#allocation4 + $0x40] sm:$0xff] %vm1520_vm6, %v1441_v45  ;;  %v1852_v45 = vld [vmem:[#allocation2 + $0x248] sm:$0xff]  ;;  %v1894_v47 = vpack.c.bf16 %v1850_v37, %v1849_v36  ;;  %v2074_v37 = vld [vmem:[#allocation2 + $0x79] sm:$0xff] }
 0x176   :  { %1943 = vrot.lane.b32.xlu0 %v1877_v38, %s7214_s23  ;;  %v1895_v55 = vpack.c.bf16 %v1852_v45, %v1851_v40  ;;  %v2076_v45 = vld [vmem:[#allocation2 + $0x91] sm:$0xff] }
 0x177   :  { %v1443_v53 = vpop.permute.xlu1 %1442 }
 0x178   :  { %1530 = vst.msk [vmem:[#allocation4 + $0x48] sm:$0xff] %vm1520_vm6, %v1443_v53  ;;  %v1445_v60 = vpop.permute.xlu0 %1444  ;;  %v1854_v53 = vld [vmem:[#allocation2 + $0x260] sm:$0xff] }
 0x179   :  { %1945 = vrot.lane.b32.xlu1 %v1878_v46, %s7214_s23  ;;  %1531 = vst.msk [vmem:[#allocation4 + $0x50] sm:$0xff] %vm1520_vm6, %v1445_v60  ;;  %v1856_v60 = vld [vmem:[#allocation2 + $0x278] sm:$0xff]  ;;  %v1896_v2 = vpack.c.bf16 %v1854_v53, %v1853_v49  ;;  %v2078_v53 = vld [vmem:[#allocation2 + $0xa9] sm:$0xff] }
 0x17a   :  { %1947 = vrot.lane.b32.xlu0 %v1879_v54, %s7214_s23  ;;  %v1897_v61 = vpack.c.bf16 %v1856_v60, %v1855_v59  ;;  %v2080_v60 = vld [vmem:[#allocation2 + $0xc1] sm:$0xff] }
 0x17b   :  { %v1447_v43 = vpop.permute.xlu1 %1446 }
 0x17c   :  { %1532 = vst.msk [vmem:[#allocation4 + $0x58] sm:$0xff] %vm1520_vm6, %v1447_v43  ;;  %v1449_v6 = vpop.permute.xlu0 %1448  ;;  %v1858_v43 = vld [vmem:[#allocation2 + $0x290] sm:$0xff] }
 0x17d   :  { %1949 = vrot.lane.b32.xlu1 %v1880_v63, %s7214_s23  ;;  %1533 = vst.msk [vmem:[#allocation4 + $0x60] sm:$0xff] %vm1520_vm6, %v1449_v6  ;;  %v1860_v6 = vld [vmem:[#allocation2 + $0x2a8] sm:$0xff]  ;;  %v1898_v17 = vpack.c.bf16 %v1858_v43, %v1857_v48  ;;  %v2082_v43 = vld [vmem:[#allocation2 + $0xd9] sm:$0xff] }
 0x17e   :  { %1951 = vrot.lane.b32.xlu0 %v1881_v52, %s7214_s23  ;;  %v1899_v23 = vpack.c.bf16 %v1860_v6, %v1859_v62  ;;  %v2084_v6 = vld [vmem:[#allocation2 + $0xf1] sm:$0xff] }
 0x17f   :  { %v1451_v5 = vpop.permute.xlu1 %1450 }
 0x180   :  { %1534 = vst.msk [vmem:[#allocation4 + $0x68] sm:$0xff] %vm1520_vm6, %v1451_v5  ;;  %v1453_v10 = vpop.permute.xlu0 %1452  ;;  %v1862_v5 = vld [vmem:[#allocation2 + $0x2c0] sm:$0xff] }
 0x181   :  { %1953 = vrot.lane.b32.xlu1 %v1882_v11, %s7214_s23  ;;  %1535 = vst.msk [vmem:[#allocation4 + $0x70] sm:$0xff] %vm1520_vm6, %v1453_v10  ;;  %v1864_v10 = vld [vmem:[#allocation2 + $0x2d8] sm:$0xff]  ;;  %v1900_v35 = vpack.c.bf16 %v1862_v5, %v1861_v18  ;;  %v2086_v5 = vld [vmem:[#allocation2 + $0x109] sm:$0xff] }
 0x182   :  { %1955 = vrot.lane.b32.xlu0 %v1883_v7, %s7214_s23  ;;  %v1901_v56 = vpack.c.bf16 %v1864_v10, %v1863_v29  ;;  %v2088_v10 = vld [vmem:[#allocation2 + $0x121] sm:$0xff] }
 0x183   :  { %v1455_v42 = vpop.permute.xlu1 %1454 }
 0x184   :  { %1536 = vst.msk [vmem:[#allocation4 + $0x78] sm:$0xff] %vm1520_vm6, %v1455_v42  ;;  %v1457_v0 = vpop.permute.xlu0 %1456  ;;  %v1866_v42 = vld [vmem:[#allocation2 + $0x2f0] sm:$0xff] }
 0x185   :  { %1957 = vrot.lane.b32.xlu1 %v1884_v30, %s7214_s23  ;;  %1537 = vst.msk [vmem:[#allocation4 + $0x80] sm:$0xff] %vm1520_vm6, %v1457_v0  ;;  %v1868_v0 = vld [vmem:[#allocation2 + $0x308] sm:$0xff]  ;;  %v1902_v9 = vpack.c.bf16 %v1866_v42, %v1865_v41  ;;  %v2090_v42 = vld [vmem:[#allocation2 + $0x139] sm:$0xff] }
 0x186   :  { %1959 = vrot.lane.b32.xlu0 %v1885_v12, %s7214_s23  ;;  %v1903_v34 = vpack.c.bf16 %v1868_v0, %v1867_v57  ;;  %v2092_v0 = vld [vmem:[#allocation2 + $0x151] sm:$0xff] }
 0x187   :  { %v1459_v26 = vpop.permute.xlu1 %1458 }
 0x188   :  { %1538 = vst.msk [vmem:[#allocation4 + $0x88] sm:$0xff] %vm1520_vm6, %v1459_v26  ;;  %v1461_v14 = vpop.permute.xlu0 %1460  ;;  %v1870_v26 = vld [vmem:[#allocation2 + $0x320] sm:$0xff] }
 0x189   :  { %1961 = vrot.lane.b32.xlu1 %v1886_v8, %s7214_s23  ;;  %1539 = vst.msk [vmem:[#allocation4 + $0x90] sm:$0xff] %vm1520_vm6, %v1461_v14  ;;  %v1872_v14 = vld [vmem:[#allocation2 + $0x338] sm:$0xff]  ;;  %v1904_v15 = vpack.c.bf16 %v1870_v26, %v1869_v19  ;;  %v2094_v26 = vld [vmem:[#allocation2 + $0x169] sm:$0xff] }
 0x18a   :  { %1963 = vrot.lane.b32.xlu0 %v1887_v33, %s7214_s23  ;;  %v1905_v20 = vpack.c.bf16 %v1872_v14, %v1871_v13  ;;  %v2096_v14 = vld [vmem:[#allocation2 + $0x181] sm:$0xff] }
 0x18b   :  { %v1463_v16 = vpop.permute.xlu1 %1462 }
 0x18c   :  { %1540 = vst.msk [vmem:[#allocation4 + $0x98] sm:$0xff] %vm1520_vm6, %v1463_v16  ;;  %v1465_v22 = vpop.permute.xlu0 %1464  ;;  %v1874_v16 = vld [vmem:[#allocation2 + $0x350] sm:$0xff] }
 0x18d   :  { %1965 = vrot.lane.b32.xlu1 %v1888_v44, %s7214_s23  ;;  %1541 = vst.msk [vmem:[#allocation4 + $0xa0] sm:$0xff] %vm1520_vm6, %v1465_v22  ;;  %v2069_v22 = vld [vmem:[#allocation2 + $0x39] sm:$0xff]  ;;  %v1906_v24 = vpack.c.bf16 %v1874_v16, %v1873_v50 }
 0x18e   :  { %1967 = vrot.lane.b32.xlu0 %v1889_v51, %s7214_s23  ;;  %v2132_v28 = vpack.c.bf16 %v2069_v22, %v2068_v21  ;;  %v2098_v16 = vld [vmem:[#allocation2 + $0x199] sm:$0xff]  ;;  %v2100_v22 = vld [vmem:[#allocation2 + $0x1e1] sm:$0xff] }
 0x18f   :  { %v1467_v27 = vpop.permute.xlu1 %1466 }
 0x190   :  { %1542 = vst.msk [vmem:[#allocation4 + $0xa8] sm:$0xff] %vm1520_vm6, %v1467_v27  ;;  %v1469_v32 = vpop.permute.xlu0 %1468  ;;  %v2071_v27 = vld [vmem:[#allocation2 + $0x51] sm:$0xff] }
 0x191   :  { %1969 = vrot.lane.b32.xlu1 %v1890_v58, %s7214_s23  ;;  %1543 = vst.msk [vmem:[#allocation4 + $0xb0] sm:$0xff] %vm1520_vm6, %v1469_v32  ;;  %v2073_v32 = vld [vmem:[#allocation2 + $0x69] sm:$0xff]  ;;  %v2133_v36 = vpack.c.bf16 %v2071_v27, %v2070_v25  ;;  %v2102_v27 = vld [vmem:[#allocation2 + $0x1f9] sm:$0xff] }
 0x192   :  { %1971 = vrot.lane.b32.xlu0 %v1891_v3, %s7214_s23  ;;  %v2134_v40 = vpack.c.bf16 %v2073_v32, %v2072_v31  ;;  %v2104_v32 = vld [vmem:[#allocation2 + $0x211] sm:$0xff] }
 0x193   :  { %v1471_v38 = vpop.permute.xlu1 %1470 }
 0x194   :  { %1544 = vst.msk [vmem:[#allocation4 + $0xb8] sm:$0xff] %vm1520_vm6, %v1471_v38  ;;  %v1473_v46 = vpop.permute.xlu0 %1472  ;;  %v2075_v38 = vld [vmem:[#allocation2 + $0x81] sm:$0xff] }
 0x195   :  { %1973 = vrot.lane.b32.xlu1 %v1892_v4, %s7214_s23  ;;  %1545 = vst.msk [vmem:[#allocation4 + $0xc0] sm:$0xff] %vm1520_vm6, %v1473_v46  ;;  %v2077_v46 = vld [vmem:[#allocation2 + $0x99] sm:$0xff]  ;;  %v2135_v49 = vpack.c.bf16 %v2075_v38, %v2074_v37  ;;  %v2106_v38 = vld [vmem:[#allocation2 + $0x229] sm:$0xff] }
 0x196   :  { %1975 = vrot.lane.b32.xlu0 %v1893_v39, %s7214_s23  ;;  %v2136_v59 = vpack.c.bf16 %v2077_v46, %v2076_v45  ;;  %v2108_v46 = vld [vmem:[#allocation2 + $0x241] sm:$0xff] }
 0x197   :  { %v1475_v54 = vpop.permute.xlu1 %1474 }
 0x198   :  { %1546 = vst.msk [vmem:[#allocation4 + $0xc8] sm:$0xff] %vm1520_vm6, %v1475_v54  ;;  %v1477_v63 = vpop.permute.xlu0 %1476  ;;  %v2079_v54 = vld [vmem:[#allocation2 + $0xb1] sm:$0xff] }
 0x199   :  { %1977 = vrot.lane.b32.xlu1 %v1894_v47, %s7214_s23  ;;  %1547 = vst.msk [vmem:[#allocation4 + $0xd0] sm:$0xff] %vm1520_vm6, %v1477_v63  ;;  %v2081_v63 = vld [vmem:[#allocation2 + $0xc9] sm:$0xff]  ;;  %v2137_v48 = vpack.c.bf16 %v2079_v54, %v2078_v53  ;;  %v2110_v54 = vld [vmem:[#allocation2 + $0x259] sm:$0xff] }
 0x19a   :  { %1979 = vrot.lane.b32.xlu0 %v1895_v55, %s7214_s23  ;;  %v2138_v62 = vpack.c.bf16 %v2081_v63, %v2080_v60  ;;  %v2112_v63 = vld [vmem:[#allocation2 + $0x271] sm:$0xff] }
 0x19b   :  { %v1479_v52 = vpop.permute.xlu1 %1478 }
 0x19c   :  { %1548 = vst.msk [vmem:[#allocation4 + $0xd8] sm:$0xff] %vm1520_vm6, %v1479_v52  ;;  %v1481_v11 = vpop.permute.xlu0 %1480  ;;  %v2083_v52 = vld [vmem:[#allocation2 + $0xe1] sm:$0xff] }
 0x19d   :  { %1981 = vrot.lane.b32.xlu1 %v1896_v2, %s7214_s23  ;;  %1549 = vst.msk [vmem:[#allocation4 + $0xe0] sm:$0xff] %vm1520_vm6, %v1481_v11  ;;  %v2085_v11 = vld [vmem:[#allocation2 + $0xf9] sm:$0xff]  ;;  %v2139_v18 = vpack.c.bf16 %v2083_v52, %v2082_v43  ;;  %v2114_v52 = vld [vmem:[#allocation2 + $0x289] sm:$0xff] }
 0x19e   :  { %1983 = vrot.lane.b32.xlu0 %v1897_v61, %s7214_s23  ;;  %v2140_v29 = vpack.c.bf16 %v2085_v11, %v2084_v6  ;;  %v2116_v11 = vld [vmem:[#allocation2 + $0x2a1] sm:$0xff] }
 0x19f   :  { %v1483_v7 = vpop.permute.xlu1 %1482 }
 0x1a0   :  { %1550 = vst.msk [vmem:[#allocation4 + $0xe8] sm:$0xff] %vm1520_vm6, %v1483_v7  ;;  %v1485_v30 = vpop.permute.xlu0 %1484  ;;  %v2087_v7 = vld [vmem:[#allocation2 + $0x111] sm:$0xff] }
 0x1a1   :  { %1985 = vrot.lane.b32.xlu1 %v1898_v17, %s7214_s23  ;;  %1551 = vst.msk [vmem:[#allocation4 + $0xf0] sm:$0xff] %vm1520_vm6, %v1485_v30  ;;  %v2089_v30 = vld [vmem:[#allocation2 + $0x129] sm:$0xff]  ;;  %v2141_v41 = vpack.c.bf16 %v2087_v7, %v2086_v5  ;;  %v2118_v7 = vld [vmem:[#allocation2 + $0x2b9] sm:$0xff] }
 0x1a2   :  { %1987 = vrot.lane.b32.xlu0 %v1899_v23, %s7214_s23  ;;  %v2142_v57 = vpack.c.bf16 %v2089_v30, %v2088_v10  ;;  %v2120_v30 = vld [vmem:[#allocation2 + $0x2d1] sm:$0xff] }
 0x1a3   :  { %v1487_v12 = vpop.permute.xlu1 %1486 }
 0x1a4   :  { %1552 = vst.msk [vmem:[#allocation4 + $0xf8] sm:$0xff] %vm1520_vm6, %v1487_v12  ;;  %v1682_v8 = vpop.permute.xlu0 %1681  ;;  %v2091_v12 = vld [vmem:[#allocation2 + $0x141] sm:$0xff]  ;;  %vm4933_vm6 = vcmask 458112  }
 0x1a5   :  { %1989 = vrot.lane.b32.xlu1 %v1900_v35, %s7214_s23  ;;  %1778 = vst.msk [vmem:[#allocation4] sm:$0xff] %vm1777_vm7, %v1682_v8  ;;  %v2093_v8 = vld [vmem:[#allocation2 + $0x159] sm:$0xff]  ;;  %v2143_v19 = vpack.c.bf16 %v2091_v12, %v2090_v42  ;;  %v2122_v12 = vld [vmem:[#allocation2 + $0x2e9] sm:$0xff] }
 0x1a6   :  { %1991 = vrot.lane.b32.xlu0 %v1901_v56, %s7214_s23  ;;  %v2144_v13 = vpack.c.bf16 %v2093_v8, %v2092_v0 }
 0x1a7   :  { %v1684_v33 = vpop.permute.xlu1 %1683 }
 0x1a8   :  { %1779 = vst.msk [vmem:[#allocation4 + $0x8] sm:$0xff] %vm1777_vm7, %v1684_v33  ;;  %v1686_v44 = vpop.permute.xlu0 %1685  ;;  %v2095_v33 = vld [vmem:[#allocation2 + $0x171] sm:$0xff] }
 0x1a9   :  { %1993 = vrot.lane.b32.xlu1 %v1902_v9, %s7214_s23  ;;  %1780 = vst.msk [vmem:[#allocation4 + $0x10] sm:$0xff] %vm1777_vm7, %v1686_v44  ;;  %v2097_v44 = vld [vmem:[#allocation2 + $0x189] sm:$0xff]  ;;  %v2145_v50 = vpack.c.bf16 %v2095_v33, %v2094_v26 }
 0x1aa   :  { %1995 = vrot.lane.b32.xlu0 %v1903_v34, %s7214_s23  ;;  %v2146_v21 = vpack.c.bf16 %v2097_v44, %v2096_v14  ;;  %v7175_v14 = vld [vmem:[%s10151_s1 + $0x8] sm:$0xff]  }
 0x1ab   :  { %v1688_v51 = vpop.permute.xlu1 %1687 }
 0x1ac   :  { %1781 = vst.msk [vmem:[#allocation4 + $0x18] sm:$0xff] %vm1777_vm7, %v1688_v51  ;;  %v1690_v58 = vpop.permute.xlu0 %1689  ;;  %v2099_v51 = vld [vmem:[#allocation2 + $0x1a1] sm:$0xff] }
 0x1ad   :  { %1997 = vrot.lane.b32.xlu1 %v1904_v15, %s7214_s23  ;;  %1782 = vst.msk [vmem:[#allocation4 + $0x20] sm:$0xff] %vm1777_vm7, %v1690_v58  ;;  %v2101_v58 = vld [vmem:[#allocation2 + $0x1e9] sm:$0xff]  ;;  %v2147_v25 = vpack.c.bf16 %v2099_v51, %v2098_v16  ;;  %v2129_v16 = vld [vmem:[#allocation2 + $0x339] sm:$0xff] }
 0x1ae   :  { %1999 = vrot.lane.b32.xlu0 %v1905_v20, %s7214_s23  ;;  %v2148_v31 = vpack.c.bf16 %v2101_v58, %v2100_v22  ;;  %v7176_v51 = vld [vmem:[%s10151_s1 + $0x10] ss:$0 sps:$4 sm:$0x33]   ;;  %v2131_v58 = vld [vmem:[#allocation2 + $0x351] sm:$0xff] }
 0x1af   :  { %v1692_v3 = vpop.permute.xlu1 %1691  ;;  %v2130_v22 = vld [vmem:[#allocation2 + $0x349] sm:$0xff] }
 0x1b0   :  { %1783 = vst.msk [vmem:[#allocation4 + $0x28] sm:$0xff] %vm1777_vm7, %v1692_v3  ;;  %v1694_v4 = vpop.permute.xlu0 %1693  ;;  %v2103_v3 = vld [vmem:[#allocation2 + $0x201] sm:$0xff] }
 0x1b1   :  { %2001 = vrot.lane.b32.xlu1 %v1906_v24, %s7214_s23  ;;  %1784 = vst.msk [vmem:[#allocation4 + $0x30] sm:$0xff] %vm1777_vm7, %v1694_v4  ;;  %v2105_v4 = vld [vmem:[#allocation2 + $0x219] sm:$0xff]  ;;  %v2149_v37 = vpack.c.bf16 %v2103_v3, %v2102_v27 }
 0x1b2   :  { %2196 = vrot.lane.b32.xlu0 %v2132_v28, %s7215_s24  ;;  %v2150_v45 = vpack.c.bf16 %v2105_v4, %v2104_v32  ;;  %v2325_v3 = vld [vmem:[#allocation2 + $0x32] sm:$0xff]  ;;  %v2163_v32 = vpack.c.bf16 %v2131_v58, %v2130_v22  ;;  %v2327_v4 = vld [vmem:[#allocation2 + $0x4a] sm:$0xff] }
 0x1b3   :  { %v1696_v39 = vpop.permute.xlu1 %1695 }
 0x1b4   :  { %1785 = vst.msk [vmem:[#allocation4 + $0x38] sm:$0xff] %vm1777_vm7, %v1696_v39  ;;  %v1698_v47 = vpop.permute.xlu0 %1697  ;;  %v2107_v39 = vld [vmem:[#allocation2 + $0x231] sm:$0xff] }
 0x1b5   :  { %2198 = vrot.lane.b32.xlu1 %v2133_v36, %s7215_s24  ;;  %1786 = vst.msk [vmem:[#allocation4 + $0x40] sm:$0xff] %vm1777_vm7, %v1698_v47  ;;  %v2109_v47 = vld [vmem:[#allocation2 + $0x249] sm:$0xff]  ;;  %v2151_v53 = vpack.c.bf16 %v2107_v39, %v2106_v38 }
 0x1b6   :  { %2200 = vrot.lane.b32.xlu0 %v2134_v40, %s7215_s24  ;;  %v2152_v60 = vpack.c.bf16 %v2109_v47, %v2108_v46  ;;  %v2329_v39 = vld [vmem:[#allocation2 + $0x62] sm:$0xff]  ;;  %v2331_v47 = vld [vmem:[#allocation2 + $0x7a] sm:$0xff] }
 0x1b7   :  { %v1700_v55 = vpop.permute.xlu1 %1699 }
 0x1b8   :  { %1787 = vst.msk [vmem:[#allocation4 + $0x48] sm:$0xff] %vm1777_vm7, %v1700_v55  ;;  %v1702_v2 = vpop.permute.xlu0 %1701  ;;  %v2111_v55 = vld [vmem:[#allocation2 + $0x261] sm:$0xff] }
 0x1b9   :  { %2202 = vrot.lane.b32.xlu1 %v2135_v49, %s7215_s24  ;;  %1788 = vst.msk [vmem:[#allocation4 + $0x50] sm:$0xff] %vm1777_vm7, %v1702_v2  ;;  %v2113_v2 = vld [vmem:[#allocation2 + $0x279] sm:$0xff]  ;;  %v2153_v43 = vpack.c.bf16 %v2111_v55, %v2110_v54 }
 0x1ba   :  { %2204 = vrot.lane.b32.xlu0 %v2136_v59, %s7215_s24  ;;  %v2154_v6 = vpack.c.bf16 %v2113_v2, %v2112_v63  ;;  %v2333_v55 = vld [vmem:[#allocation2 + $0x92] sm:$0xff]  ;;  %v2335_v2 = vld [vmem:[#allocation2 + $0xaa] sm:$0xff] }
 0x1bb   :  { %v1704_v61 = vpop.permute.xlu1 %1703 }
 0x1bc   :  { %1789 = vst.msk [vmem:[#allocation4 + $0x58] sm:$0xff] %vm1777_vm7, %v1704_v61  ;;  %v1706_v17 = vpop.permute.xlu0 %1705  ;;  %v2115_v61 = vld [vmem:[#allocation2 + $0x291] sm:$0xff] }
 0x1bd   :  { %2206 = vrot.lane.b32.xlu1 %v2137_v48, %s7215_s24  ;;  %1790 = vst.msk [vmem:[#allocation4 + $0x60] sm:$0xff] %vm1777_vm7, %v1706_v17  ;;  %v2117_v17 = vld [vmem:[#allocation2 + $0x2a9] sm:$0xff]  ;;  %v2155_v5 = vpack.c.bf16 %v2115_v61, %v2114_v52 }
 0x1be   :  { %2208 = vrot.lane.b32.xlu0 %v2138_v62, %s7215_s24  ;;  %v2156_v10 = vpack.c.bf16 %v2117_v17, %v2116_v11  ;;  %v2337_v61 = vld [vmem:[#allocation2 + $0xc2] sm:$0xff]  ;;  %v2339_v17 = vld [vmem:[#allocation2 + $0xda] sm:$0xff] }
 0x1bf   :  { %v1708_v23 = vpop.permute.xlu1 %1707 }
 0x1c0   :  { %1791 = vst.msk [vmem:[#allocation4 + $0x68] sm:$0xff] %vm1777_vm7, %v1708_v23  ;;  %v1710_v35 = vpop.permute.xlu0 %1709  ;;  %v2119_v23 = vld [vmem:[#allocation2 + $0x2c1] sm:$0xff] }
 0x1c1   :  { %2210 = vrot.lane.b32.xlu1 %v2139_v18, %s7215_s24  ;;  %1792 = vst.msk [vmem:[#allocation4 + $0x70] sm:$0xff] %vm1777_vm7, %v1710_v35  ;;  %v2121_v35 = vld [vmem:[#allocation2 + $0x2d9] sm:$0xff]  ;;  %v2157_v42 = vpack.c.bf16 %v2119_v23, %v2118_v7 }
 0x1c2   :  { %2212 = vrot.lane.b32.xlu0 %v2140_v29, %s7215_s24  ;;  %v2158_v8 = vpack.c.bf16 %v2121_v35, %v2120_v30  ;;  %v2341_v23 = vld [vmem:[#allocation2 + $0xf2] sm:$0xff]  ;;  %v2343_v35 = vld [vmem:[#allocation2 + $0x10a] sm:$0xff] }
 0x1c3   :  { %v1712_v56 = vpop.permute.xlu1 %1711 }
 0x1c4   :  { %1793 = vst.msk [vmem:[#allocation4 + $0x78] sm:$0xff] %vm1777_vm7, %v1712_v56  ;;  %v1714_v9 = vpop.permute.xlu0 %1713  ;;  %v2123_v56 = vld [vmem:[#allocation2 + $0x2f1] sm:$0xff] }
 0x1c5   :  { %2214 = vrot.lane.b32.xlu1 %v2141_v41, %s7215_s24  ;;  %1794 = vst.msk [vmem:[#allocation4 + $0x80] sm:$0xff] %vm1777_vm7, %v1714_v9  ;;  %v2124_v9 = vld [vmem:[#allocation2 + $0x301] sm:$0xff]  ;;  %v2159_v33 = vpack.c.bf16 %v2123_v56, %v2122_v12 }
 0x1c6   :  { %2216 = vrot.lane.b32.xlu0 %v2142_v57, %s7215_s24  ;;  %v7174_v57 = vld [vmem:[%s10151_s1] sm:$0xff]   ;;  %s7216_s1 = smov 32  }
 0x1c7   :  { %v1716_v34 = vpop.permute.xlu1 %1715  ;;  %6938 = vmatprep.subr.bf16.mxu0 %v7174_v57  ;;  %v2345_v56 = vld [vmem:[#allocation2 + $0x122] sm:$0xff] }
 0x1c8   :  { %1795 = vst.msk [vmem:[#allocation4 + $0x88] sm:$0xff] %vm1777_vm7, %v1716_v34  ;;  %v1718_v15 = vpop.permute.xlu0 %1717  ;;  %6939 = vmatpush3.bf16.msra.mxu0 %v7174_v57  ;;  %v2126_v34 = vld [vmem:[#allocation2 + $0x319] sm:$0xff]  ;;  %v2346_v57 = vld [vmem:[#allocation2 + $0x12a] sm:$0xff] }
 0x1c9   :  { %2218 = vrot.lane.b32.xlu1 %v2143_v19, %s7215_s24  ;;  %1796 = vst.msk [vmem:[#allocation4 + $0x90] sm:$0xff] %vm1777_vm7, %v1718_v15  ;;  %v2125_v19 = vld [vmem:[#allocation2 + $0x309] sm:$0xff]  ;;  %6940 = vmatprep.subr.bf16.mxu0 %v7175_v14 }
 0x1ca   :  { %2220 = vrot.lane.b32.xlu0 %v2144_v13, %s7215_s24  ;;  %v2127_v13 = vld [vmem:[#allocation2 + $0x321] sm:$0xff]  ;;  %v2160_v15 = vpack.c.bf16 %v2125_v19, %v2124_v9 }
 0x1cb   :  { %v1720_v20 = vpop.permute.xlu1 %1719  ;;  %v2347_v9 = vld [vmem:[#allocation2 + $0x13a] sm:$0xff]  ;;  %v2348_v19 = vld [vmem:[#allocation2 + $0x142] sm:$0xff] }
 0x1cc   :  { %1797 = vst.msk [vmem:[#allocation4 + $0x98] sm:$0xff] %vm1777_vm7, %v1720_v20  ;;  %v1722_v24 = vpop.permute.xlu0 %1721  ;;  %6941 = vmatpush3.bf16.msra.mxu0 %v7175_v14 }
 0x1cd   :  { %2222 = vrot.lane.b32.xlu1 %v2145_v50, %s7215_s24  ;;  %1798 = vst.msk [vmem:[#allocation4 + $0xa0] sm:$0xff] %vm1777_vm7, %v1722_v24  ;;  %v2128_v50 = vld [vmem:[#allocation2 + $0x331] sm:$0xff]  ;;  %7082 = vmatprep.subr.msk.bf16.mxu0 %vm2731_vm9, %v7176_v51  ;;  %v2733_v24 = vsel %vm2731_vm9, %v7176_v51, 0  ;;  %vm5548_vm9 = vcmask 588800  }
 0x1ce   :  { %2224 = vrot.lane.b32.xlu0 %v2146_v21, %s7215_s24  ;;  %v2161_v21 = vpack.c.bf16 %v2127_v13, %v2126_v34  ;;  %v2162_v27 = vpack.c.bf16 %v2129_v16, %v2128_v50  ;;  %v2349_v34 = vld [vmem:[#allocation2 + $0x152] sm:$0xff]  ;;  %v2350_v13 = vld [vmem:[#allocation2 + $0x15a] sm:$0xff] }
 0x1cf   :  { %v1724_v28 = vpop.permute.xlu1 %1723  ;;  %v2352_v50 = vld [vmem:[#allocation2 + $0x172] sm:$0xff]  ;;  %v2401_v51 = vpack.c.bf16 %v2350_v13, %v2349_v34  ;;  %v2381_v13 = vld [vmem:[#allocation2 + $0x302] sm:$0xff] }
 0x1d0   :  { %1799 = vst.msk [vmem:[#allocation4 + $0xa8] sm:$0xff] %vm1777_vm7, %v1724_v28  ;;  %v1726_v36 = vpop.permute.xlu0 %1725  ;;  %v2326_v28 = vld [vmem:[#allocation2 + $0x3a] sm:$0xff]  ;;  %6943 = vmatpush3.bf16.msra.mxu0 %v2733_v24 }
 0x1d1   :  { %2226 = vrot.lane.b32.xlu1 %v2147_v25, %s7215_s24  ;;  %1800 = vst.msk [vmem:[#allocation4 + $0xb0] sm:$0xff] %vm1777_vm7, %v1726_v36  ;;  %v2328_v36 = vld [vmem:[#allocation2 + $0x52] sm:$0xff]  ;;  %v2389_v38 = vpack.c.bf16 %v2326_v28, %v2325_v3  ;;  %v2355_v24 = vld [vmem:[#allocation2 + $0x19a] sm:$0xff]  ;;  %v2357_v28 = vld [vmem:[#allocation2 + $0x1e2] sm:$0xff] }
 0x1d2   :  { %2228 = vrot.lane.b32.xlu0 %v2148_v31, %s7215_s24  ;;  %v2390_v46 = vpack.c.bf16 %v2328_v36, %v2327_v4  ;;  %v2359_v36 = vld [vmem:[#allocation2 + $0x1fa] sm:$0xff] }
 0x1d3   :  { %v1728_v40 = vpop.permute.xlu1 %1727 }
 0x1d4   :  { %1801 = vst.msk [vmem:[#allocation4 + $0xb8] sm:$0xff] %vm1777_vm7, %v1728_v40  ;;  %v1730_v49 = vpop.permute.xlu0 %1729  ;;  %v2330_v40 = vld [vmem:[#allocation2 + $0x6a] sm:$0xff] }
 0x1d5   :  { %2230 = vrot.lane.b32.xlu1 %v2149_v37, %s7215_s24  ;;  %1802 = vst.msk [vmem:[#allocation4 + $0xc0] sm:$0xff] %vm1777_vm7, %v1730_v49  ;;  %v2332_v49 = vld [vmem:[#allocation2 + $0x82] sm:$0xff]  ;;  %v2391_v54 = vpack.c.bf16 %v2330_v40, %v2329_v39  ;;  %v2361_v40 = vld [vmem:[#allocation2 + $0x212] sm:$0xff] }
 0x1d6   :  { %2232 = vrot.lane.b32.xlu0 %v2150_v45, %s7215_s24  ;;  %v2392_v63 = vpack.c.bf16 %v2332_v49, %v2331_v47  ;;  %v2363_v49 = vld [vmem:[#allocation2 + $0x22a] sm:$0xff] }
 0x1d7   :  { %v1732_v59 = vpop.permute.xlu1 %1731 }
 0x1d8   :  { %1803 = vst.msk [vmem:[#allocation4 + $0xc8] sm:$0xff] %vm1777_vm7, %v1732_v59  ;;  %v1734_v48 = vpop.permute.xlu0 %1733  ;;  %v2334_v59 = vld [vmem:[#allocation2 + $0x9a] sm:$0xff] }
 0x1d9   :  { %2234 = vrot.lane.b32.xlu1 %v2151_v53, %s7215_s24  ;;  %1804 = vst.msk [vmem:[#allocation4 + $0xd0] sm:$0xff] %vm1777_vm7, %v1734_v48  ;;  %v2336_v48 = vld [vmem:[#allocation2 + $0xb2] sm:$0xff]  ;;  %v2393_v52 = vpack.c.bf16 %v2334_v59, %v2333_v55  ;;  %v2365_v59 = vld [vmem:[#allocation2 + $0x242] sm:$0xff] }
 0x1da   :  { %2236 = vrot.lane.b32.xlu0 %v2152_v60, %s7215_s24  ;;  %v2394_v11 = vpack.c.bf16 %v2336_v48, %v2335_v2  ;;  %v2367_v48 = vld [vmem:[#allocation2 + $0x25a] sm:$0xff] }
 0x1db   :  { %v1736_v62 = vpop.permute.xlu1 %1735 }
 0x1dc   :  { %1805 = vst.msk [vmem:[#allocation4 + $0xd8] sm:$0xff] %vm1777_vm7, %v1736_v62  ;;  %v1738_v18 = vpop.permute.xlu0 %1737  ;;  %v2338_v62 = vld [vmem:[#allocation2 + $0xca] sm:$0xff] }
 0x1dd   :  { %2238 = vrot.lane.b32.xlu1 %v2153_v43, %s7215_s24  ;;  %1806 = vst.msk [vmem:[#allocation4 + $0xe0] sm:$0xff] %vm1777_vm7, %v1738_v18  ;;  %v2340_v18 = vld [vmem:[#allocation2 + $0xe2] sm:$0xff]  ;;  %v2395_v7 = vpack.c.bf16 %v2338_v62, %v2337_v61  ;;  %v2369_v62 = vld [vmem:[#allocation2 + $0x272] sm:$0xff] }
 0x1de   :  { %2240 = vrot.lane.b32.xlu0 %v2154_v6, %s7215_s24  ;;  %v2396_v30 = vpack.c.bf16 %v2340_v18, %v2339_v17  ;;  %v2371_v18 = vld [vmem:[#allocation2 + $0x28a] sm:$0xff] }
 0x1df   :  { %v1740_v29 = vpop.permute.xlu1 %1739 }
 0x1e0   :  { %1807 = vst.msk [vmem:[#allocation4 + $0xe8] sm:$0xff] %vm1777_vm7, %v1740_v29  ;;  %v1742_v41 = vpop.permute.xlu0 %1741  ;;  %v2342_v29 = vld [vmem:[#allocation2 + $0xfa] sm:$0xff] }
 0x1e1   :  { %2242 = vrot.lane.b32.xlu1 %v2155_v5, %s7215_s24  ;;  %1808 = vst.msk [vmem:[#allocation4 + $0xf0] sm:$0xff] %vm1777_vm7, %v1742_v41  ;;  %v2344_v41 = vld [vmem:[#allocation2 + $0x112] sm:$0xff]  ;;  %v2397_v12 = vpack.c.bf16 %v2342_v29, %v2341_v23  ;;  %v2373_v29 = vld [vmem:[#allocation2 + $0x2a2] sm:$0xff] }
 0x1e2   :  { %2244 = vrot.lane.b32.xlu0 %v2156_v10, %s7215_s24 }
 0x1e3   :  { %v1744_v0 = vpop.permute.xlu1 %1743 }
 0x1e4   :  { %1809 = vst.msk [vmem:[#allocation4 + $0xf8] sm:$0xff] %vm1777_vm7, %v1744_v0  ;;  %v1940_v26 = vpop.permute.xlu0 %1939  ;;  %vm5190_vm7 = vcmask 523712  }
 0x1e5   :  { %2246 = vrot.lane.b32.xlu1 %v2157_v42, %s7215_s24  ;;  %2036 = vst.msk [vmem:[#allocation4] sm:$0xff] %vm2035_vm8, %v1940_v26 }
 0x1e6   :  { %2248 = vrot.lane.b32.xlu0 %v2158_v8, %s7215_s24  ;;  %v2398_v8 = vpack.c.bf16 %v2344_v41, %v2343_v35  ;;  %v2375_v41 = vld [vmem:[#allocation2 + $0x2ba] sm:$0xff] }
 0x1e7   :  { %v1942_v44 = vpop.permute.xlu1 %1941 }
 0x1e8   :  { %2037 = vst.msk [vmem:[#allocation4 + $0x8] sm:$0xff] %vm2035_vm8, %v1942_v44  ;;  %v1944_v20 = vpop.permute.xlu0 %1943  ;;  %v2400_v44 = vpack.c.bf16 %v2348_v19, %v2347_v9  ;;  %v2379_v19 = vld [vmem:[#allocation2 + $0x2ea] sm:$0xff] }
 0x1e9   :  { %2250 = vrot.lane.b32.xlu1 %v2159_v33, %s7215_s24  ;;  %2038 = vst.msk [vmem:[#allocation4 + $0x10] sm:$0xff] %vm2035_vm8, %v1944_v20  ;;  %v2399_v33 = vpack.c.bf16 %v2346_v57, %v2345_v56  ;;  %v2353_v20 = vld [vmem:[#allocation2 + $0x182] sm:$0xff]  ;;  %v2377_v57 = vld [vmem:[#allocation2 + $0x2d2] sm:$0xff] }
 0x1ea   :  { %2252 = vrot.lane.b32.xlu0 %v2160_v15, %s7215_s24  ;;  %v2351_v15 = vld [vmem:[#allocation2 + $0x16a] sm:$0xff] }
 0x1eb   :  { %v1946_v25 = vpop.permute.xlu1 %1945  ;;  %v2402_v58 = vpack.c.bf16 %v2352_v50, %v2351_v15  ;;  %v2383_v50 = vld [vmem:[#allocation2 + $0x31a] sm:$0xff] }
 0x1ec   :  { %2039 = vst.msk [vmem:[#allocation4 + $0x18] sm:$0xff] %vm2035_vm8, %v1946_v25  ;;  %v1948_v31 = vpop.permute.xlu0 %1947  ;;  %v2356_v25 = vld [vmem:[#allocation2 + $0x1a2] sm:$0xff] }
 0x1ed   :  { %2254 = vrot.lane.b32.xlu1 %v2161_v21, %s7215_s24  ;;  %2040 = vst.msk [vmem:[#allocation4 + $0x20] sm:$0xff] %vm2035_vm8, %v1948_v31  ;;  %v2354_v21 = vld [vmem:[#allocation2 + $0x18a] sm:$0xff]  ;;  %v2404_v4 = vpack.c.bf16 %v2356_v25, %v2355_v24 }
 0x1ee   :  { %2256 = vrot.lane.b32.xlu0 %v2162_v27, %s7215_s24  ;;  %v2403_v3 = vpack.c.bf16 %v2354_v21, %v2353_v20  ;;  %v2358_v31 = vld [vmem:[#allocation2 + $0x1ea] sm:$0xff]  ;;  %v2385_v21 = vld [vmem:[#allocation2 + $0x332] sm:$0xff] }
 0x1ef   :  { %v1950_v37 = vpop.permute.xlu1 %1949  ;;  %v2405_v39 = vpack.c.bf16 %v2358_v31, %v2357_v28  ;;  %v2387_v25 = vld [vmem:[#allocation2 + $0x34a] sm:$0xff] }
 0x1f0   :  { %2041 = vst.msk [vmem:[#allocation4 + $0x28] sm:$0xff] %vm2035_vm8, %v1950_v37  ;;  %v1952_v45 = vpop.permute.xlu0 %1951  ;;  %v2360_v37 = vld [vmem:[#allocation2 + $0x202] sm:$0xff] }
 0x1f1   :  { %2258 = vrot.lane.b32.xlu1 %v2163_v32, %s7215_s24  ;;  %2042 = vst.msk [vmem:[#allocation4 + $0x30] sm:$0xff] %vm2035_vm8, %v1952_v45  ;;  %v2362_v45 = vld [vmem:[#allocation2 + $0x21a] sm:$0xff]  ;;  %v2406_v47 = vpack.c.bf16 %v2360_v37, %v2359_v36 }
 0x1f2   :  { %2453 = vrot.lane.b32.xlu0 %v2389_v38, %s7216_s1  ;;  %v2407_v55 = vpack.c.bf16 %v2362_v45, %v2361_v40 }
 0x1f3   :  { %v1954_v53 = vpop.permute.xlu1 %1953 }
 0x1f4   :  { %2043 = vst.msk [vmem:[#allocation4 + $0x38] sm:$0xff] %vm2035_vm8, %v1954_v53  ;;  %v1956_v60 = vpop.permute.xlu0 %1955  ;;  %v2364_v53 = vld [vmem:[#allocation2 + $0x232] sm:$0xff] }
 0x1f5   :  { %2455 = vrot.lane.b32.xlu1 %v2390_v46, %s7216_s1  ;;  %2044 = vst.msk [vmem:[#allocation4 + $0x40] sm:$0xff] %vm2035_vm8, %v1956_v60  ;;  %v2366_v60 = vld [vmem:[#allocation2 + $0x24a] sm:$0xff]  ;;  %v2408_v2 = vpack.c.bf16 %v2364_v53, %v2363_v49 }
 0x1f6   :  { %2457 = vrot.lane.b32.xlu0 %v2391_v54, %s7216_s1  ;;  %v2409_v61 = vpack.c.bf16 %v2366_v60, %v2365_v59 }
 0x1f7   :  { %v1958_v43 = vpop.permute.xlu1 %1957 }
 0x1f8   :  { %2045 = vst.msk [vmem:[#allocation4 + $0x48] sm:$0xff] %vm2035_vm8, %v1958_v43  ;;  %v1960_v6 = vpop.permute.xlu0 %1959  ;;  %v2368_v43 = vld [vmem:[#allocation2 + $0x262] sm:$0xff] }
 0x1f9   :  { %2459 = vrot.lane.b32.xlu1 %v2392_v63, %s7216_s1  ;;  %2046 = vst.msk [vmem:[#allocation4 + $0x50] sm:$0xff] %vm2035_vm8, %v1960_v6  ;;  %v2370_v6 = vld [vmem:[#allocation2 + $0x27a] sm:$0xff]  ;;  %v2410_v17 = vpack.c.bf16 %v2368_v43, %v2367_v48 }
 0x1fa   :  { %2461 = vrot.lane.b32.xlu0 %v2393_v52, %s7216_s1  ;;  %v2411_v23 = vpack.c.bf16 %v2370_v6, %v2369_v62 }
 0x1fb   :  { %v1962_v5 = vpop.permute.xlu1 %1961 }
 0x1fc   :  { %2047 = vst.msk [vmem:[#allocation4 + $0x58] sm:$0xff] %vm2035_vm8, %v1962_v5  ;;  %v1964_v10 = vpop.permute.xlu0 %1963  ;;  %v2372_v5 = vld [vmem:[#allocation2 + $0x292] sm:$0xff] }
 0x1fd   :  { %2463 = vrot.lane.b32.xlu1 %v2394_v11, %s7216_s1  ;;  %2048 = vst.msk [vmem:[#allocation4 + $0x60] sm:$0xff] %vm2035_vm8, %v1964_v10  ;;  %v2374_v10 = vld [vmem:[#allocation2 + $0x2aa] sm:$0xff]  ;;  %v2412_v35 = vpack.c.bf16 %v2372_v5, %v2371_v18 }
 0x1fe   :  { %2465 = vrot.lane.b32.xlu0 %v2395_v7, %s7216_s1  ;;  %v2413_v56 = vpack.c.bf16 %v2374_v10, %v2373_v29 }
 0x1ff   :  { %v1966_v42 = vpop.permute.xlu1 %1965 }
 0x200   :  { %2049 = vst.msk [vmem:[#allocation4 + $0x68] sm:$0xff] %vm2035_vm8, %v1966_v42  ;;  %v1968_v0 = vpop.permute.xlu0 %1967  ;;  %v2376_v42 = vld [vmem:[#allocation2 + $0x2c2] sm:$0xff] }
 0x201   :  { %2467 = vrot.lane.b32.xlu1 %v2396_v30, %s7216_s1  ;;  %2050 = vst.msk [vmem:[#allocation4 + $0x70] sm:$0xff] %vm2035_vm8, %v1968_v0  ;;  %v2378_v0 = vld [vmem:[#allocation2 + $0x2da] sm:$0xff]  ;;  %v2414_v9 = vpack.c.bf16 %v2376_v42, %v2375_v41 }
 0x202   :  { %2469 = vrot.lane.b32.xlu0 %v2397_v12, %s7216_s1  ;;  %v2415_v34 = vpack.c.bf16 %v2378_v0, %v2377_v57 }
 0x203   :  { %v1970_v26 = vpop.permute.xlu1 %1969 }
 0x204   :  { %2051 = vst.msk [vmem:[#allocation4 + $0x78] sm:$0xff] %vm2035_vm8, %v1970_v26  ;;  %v1972_v14 = vpop.permute.xlu0 %1971  ;;  %v2380_v26 = vld [vmem:[#allocation2 + $0x2f2] sm:$0xff] }
 0x205   :  { %2471 = vrot.lane.b32.xlu1 %v2398_v8, %s7216_s1  ;;  %2052 = vst.msk [vmem:[#allocation4 + $0x80] sm:$0xff] %vm2035_vm8, %v1972_v14  ;;  %v2382_v14 = vld [vmem:[#allocation2 + $0x30a] sm:$0xff]  ;;  %v2416_v15 = vpack.c.bf16 %v2380_v26, %v2379_v19 }
 0x206   :  { %2473 = vrot.lane.b32.xlu0 %v2399_v33, %s7216_s1  ;;  %v2417_v20 = vpack.c.bf16 %v2382_v14, %v2381_v13 }
 0x207   :  { %v1974_v16 = vpop.permute.xlu1 %1973 }
 0x208   :  { %2053 = vst.msk [vmem:[#allocation4 + $0x88] sm:$0xff] %vm2035_vm8, %v1974_v16  ;;  %v1976_v22 = vpop.permute.xlu0 %1975  ;;  %v2384_v16 = vld [vmem:[#allocation2 + $0x322] sm:$0xff] }
 0x209   :  { %2475 = vrot.lane.b32.xlu1 %v2400_v44, %s7216_s1  ;;  %2054 = vst.msk [vmem:[#allocation4 + $0x90] sm:$0xff] %vm2035_vm8, %v1976_v22  ;;  %v2386_v22 = vld [vmem:[#allocation2 + $0x33a] sm:$0xff]  ;;  %v2418_v24 = vpack.c.bf16 %v2384_v16, %v2383_v50 }
 0x20a   :  { %2477 = vrot.lane.b32.xlu0 %v2401_v51, %s7216_s1  ;;  %v2419_v28 = vpack.c.bf16 %v2386_v22, %v2385_v21 }
 0x20b   :  { %v1978_v27 = vpop.permute.xlu1 %1977 }
 0x20c   :  { %2055 = vst.msk [vmem:[#allocation4 + $0x98] sm:$0xff] %vm2035_vm8, %v1978_v27  ;;  %v1980_v32 = vpop.permute.xlu0 %1979  ;;  %v2388_v27 = vld [vmem:[#allocation2 + $0x352] sm:$0xff] }
 0x20d   :  { %2479 = vrot.lane.b32.xlu1 %v2402_v58, %s7216_s1  ;;  %2056 = vst.msk [vmem:[#allocation4 + $0xa0] sm:$0xff] %vm2035_vm8, %v1980_v32  ;;  %v2420_v32 = vpack.c.bf16 %v2388_v27, %v2387_v25 }
 0x20e   :  { %2481 = vrot.lane.b32.xlu0 %v2403_v3, %s7216_s1 }
 0x20f   :  { %v1982_v38 = vpop.permute.xlu1 %1981 }
 0x210   :  { %2057 = vst.msk [vmem:[#allocation4 + $0xa8] sm:$0xff] %vm2035_vm8, %v1982_v38  ;;  %v1984_v46 = vpop.permute.xlu0 %1983 }
 0x211   :  { %2483 = vrot.lane.b32.xlu1 %v2404_v4, %s7216_s1  ;;  %2058 = vst.msk [vmem:[#allocation4 + $0xb0] sm:$0xff] %vm2035_vm8, %v1984_v46 }
 0x212   :  { %2485 = vrot.lane.b32.xlu0 %v2405_v39, %s7216_s1 }
 0x213   :  { %v1986_v54 = vpop.permute.xlu1 %1985 }
 0x214   :  { %2059 = vst.msk [vmem:[#allocation4 + $0xb8] sm:$0xff] %vm2035_vm8, %v1986_v54  ;;  %v1988_v63 = vpop.permute.xlu0 %1987 }
 0x215   :  { %2487 = vrot.lane.b32.xlu1 %v2406_v47, %s7216_s1  ;;  %2060 = vst.msk [vmem:[#allocation4 + $0xc0] sm:$0xff] %vm2035_vm8, %v1988_v63 }
 0x216   :  { %2489 = vrot.lane.b32.xlu0 %v2407_v55, %s7216_s1 }
 0x217   :  { %v1990_v52 = vpop.permute.xlu1 %1989 }
 0x218   :  { %2061 = vst.msk [vmem:[#allocation4 + $0xc8] sm:$0xff] %vm2035_vm8, %v1990_v52  ;;  %v1992_v11 = vpop.permute.xlu0 %1991 }
 0x219   :  { %2491 = vrot.lane.b32.xlu1 %v2408_v2, %s7216_s1  ;;  %2062 = vst.msk [vmem:[#allocation4 + $0xd0] sm:$0xff] %vm2035_vm8, %v1992_v11 }
 0x21a   :  { %2493 = vrot.lane.b32.xlu0 %v2409_v61, %s7216_s1 }
 0x21b   :  { %v1994_v7 = vpop.permute.xlu1 %1993 }
 0x21c   :  { %2063 = vst.msk [vmem:[#allocation4 + $0xd8] sm:$0xff] %vm2035_vm8, %v1994_v7  ;;  %v1996_v30 = vpop.permute.xlu0 %1995 }
 0x21d   :  { %2495 = vrot.lane.b32.xlu1 %v2410_v17, %s7216_s1  ;;  %2064 = vst.msk [vmem:[#allocation4 + $0xe0] sm:$0xff] %vm2035_vm8, %v1996_v30 }
 0x21e   :  { %2497 = vrot.lane.b32.xlu0 %v2411_v23, %s7216_s1 }
 0x21f   :  { %v1998_v12 = vpop.permute.xlu1 %1997 }
 0x220   :  { %2065 = vst.msk [vmem:[#allocation4 + $0xe8] sm:$0xff] %vm2035_vm8, %v1998_v12  ;;  %v2000_v8 = vpop.permute.xlu0 %1999 }
 0x221   :  { %2499 = vrot.lane.b32.xlu1 %v2412_v35, %s7216_s1  ;;  %2066 = vst.msk [vmem:[#allocation4 + $0xf0] sm:$0xff] %vm2035_vm8, %v2000_v8 }
 0x222   :  { %2501 = vrot.lane.b32.xlu0 %v2413_v56, %s7216_s1 }
 0x223   :  { %v2002_v33 = vpop.permute.xlu1 %2001 }
 0x224   :  { %2067 = vst.msk [vmem:[#allocation4 + $0xf8] sm:$0xff] %vm2035_vm8, %v2002_v33  ;;  %v2197_v44 = vpop.permute.xlu0 %2196  ;;  %vm5447_vm8 = vcmask 589312  }
 0x225   :  { %2503 = vrot.lane.b32.xlu1 %v2414_v9, %s7216_s1  ;;  %2293 = vst.msk [vmem:[#allocation4] sm:$0xff] %vm2292_vm10, %v2197_v44 }
 0x226   :  { %2505 = vrot.lane.b32.xlu0 %v2415_v34, %s7216_s1 }
 0x227   :  { %v2199_v51 = vpop.permute.xlu1 %2198 }
 0x228   :  { %2294 = vst.msk [vmem:[#allocation4 + $0x8] sm:$0xff] %vm2292_vm10, %v2199_v51  ;;  %v2201_v58 = vpop.permute.xlu0 %2200 }
 0x229   :  { %2507 = vrot.lane.b32.xlu1 %v2416_v15, %s7216_s1  ;;  %2295 = vst.msk [vmem:[#allocation4 + $0x10] sm:$0xff] %vm2292_vm10, %v2201_v58 }
 0x22a   :  { %2509 = vrot.lane.b32.xlu0 %v2417_v20, %s7216_s1 }
 0x22b   :  { %v2203_v3 = vpop.permute.xlu1 %2202 }
 0x22c   :  { %2296 = vst.msk [vmem:[#allocation4 + $0x18] sm:$0xff] %vm2292_vm10, %v2203_v3  ;;  %v2205_v31 = vpop.permute.xlu0 %2204 }
 0x22d   :  { %2511 = vrot.lane.b32.xlu1 %v2418_v24, %s7216_s1  ;;  %2297 = vst.msk [vmem:[#allocation4 + $0x20] sm:$0xff] %vm2292_vm10, %v2205_v31 }
 0x22e   :  { %2513 = vrot.lane.b32.xlu0 %v2419_v28, %s7216_s1 }
 0x22f   :  { %v2207_v4 = vpop.permute.xlu1 %2206 }
 0x230   :  { %2298 = vst.msk [vmem:[#allocation4 + $0x28] sm:$0xff] %vm2292_vm10, %v2207_v4  ;;  %v2209_v36 = vpop.permute.xlu0 %2208 }
 0x231   :  { %2515 = vrot.lane.b32.xlu1 %v2420_v32, %s7216_s1  ;;  %2299 = vst.msk [vmem:[#allocation4 + $0x30] sm:$0xff] %vm2292_vm10, %v2209_v36 }
 0x233   :  { %v2211_v37 = vpop.permute.xlu1 %2210 }
 0x234   :  { %2300 = vst.msk [vmem:[#allocation4 + $0x38] sm:$0xff] %vm2292_vm10, %v2211_v37  ;;  %v2213_v38 = vpop.permute.xlu0 %2212 }
 0x235   :  { %2301 = vst.msk [vmem:[#allocation4 + $0x40] sm:$0xff] %vm2292_vm10, %v2213_v38 }
 0x237   :  { %v2215_v39 = vpop.permute.xlu1 %2214 }
 0x238   :  { %2302 = vst.msk [vmem:[#allocation4 + $0x48] sm:$0xff] %vm2292_vm10, %v2215_v39  ;;  %v2217_v40 = vpop.permute.xlu0 %2216 }
 0x239   :  { %2303 = vst.msk [vmem:[#allocation4 + $0x50] sm:$0xff] %vm2292_vm10, %v2217_v40 }
 0x23b   :  { %v2219_v45 = vpop.permute.xlu1 %2218 }
 0x23c   :  { %2304 = vst.msk [vmem:[#allocation4 + $0x58] sm:$0xff] %vm2292_vm10, %v2219_v45  ;;  %v2221_v46 = vpop.permute.xlu0 %2220 }
 0x23d   :  { %2305 = vst.msk [vmem:[#allocation4 + $0x60] sm:$0xff] %vm2292_vm10, %v2221_v46 }
 0x23f   :  { %v2223_v47 = vpop.permute.xlu1 %2222 }
 0x240   :  { %2306 = vst.msk [vmem:[#allocation4 + $0x68] sm:$0xff] %vm2292_vm10, %v2223_v47  ;;  %v2225_v49 = vpop.permute.xlu0 %2224 }
 0x241   :  { %2307 = vst.msk [vmem:[#allocation4 + $0x70] sm:$0xff] %vm2292_vm10, %v2225_v49 }
 0x243   :  { %v2227_v53 = vpop.permute.xlu1 %2226 }
 0x244   :  { %2308 = vst.msk [vmem:[#allocation4 + $0x78] sm:$0xff] %vm2292_vm10, %v2227_v53  ;;  %v2229_v54 = vpop.permute.xlu0 %2228 }
 0x245   :  { %2309 = vst.msk [vmem:[#allocation4 + $0x80] sm:$0xff] %vm2292_vm10, %v2229_v54 }
 0x247   :  { %v2231_v55 = vpop.permute.xlu1 %2230 }
 0x248   :  { %2310 = vst.msk [vmem:[#allocation4 + $0x88] sm:$0xff] %vm2292_vm10, %v2231_v55  ;;  %v2233_v59 = vpop.permute.xlu0 %2232 }
 0x249   :  { %2311 = vst.msk [vmem:[#allocation4 + $0x90] sm:$0xff] %vm2292_vm10, %v2233_v59 }
 0x24b   :  { %v2235_v60 = vpop.permute.xlu1 %2234 }
 0x24c   :  { %2312 = vst.msk [vmem:[#allocation4 + $0x98] sm:$0xff] %vm2292_vm10, %v2235_v60  ;;  %v2237_v63 = vpop.permute.xlu0 %2236 }
 0x24d   :  { %2313 = vst.msk [vmem:[#allocation4 + $0xa0] sm:$0xff] %vm2292_vm10, %v2237_v63 }
 0x24f   :  { %v2239_v2 = vpop.permute.xlu1 %2238 }
 0x250   :  { %2314 = vst.msk [vmem:[#allocation4 + $0xa8] sm:$0xff] %vm2292_vm10, %v2239_v2  ;;  %v2241_v48 = vpop.permute.xlu0 %2240 }
 0x251   :  { %2315 = vst.msk [vmem:[#allocation4 + $0xb0] sm:$0xff] %vm2292_vm10, %v2241_v48 }
 0x253   :  { %v2243_v43 = vpop.permute.xlu1 %2242 }
 0x254   :  { %2316 = vst.msk [vmem:[#allocation4 + $0xb8] sm:$0xff] %vm2292_vm10, %v2243_v43  ;;  %v2245_v52 = vpop.permute.xlu0 %2244 }
 0x255   :  { %2317 = vst.msk [vmem:[#allocation4 + $0xc0] sm:$0xff] %vm2292_vm10, %v2245_v52 }
 0x257   :  { %v2247_v61 = vpop.permute.xlu1 %2246 }
 0x258   :  { %2318 = vst.msk [vmem:[#allocation4 + $0xc8] sm:$0xff] %vm2292_vm10, %v2247_v61  ;;  %v2249_v62 = vpop.permute.xlu0 %2248 }
 0x259   :  { %2319 = vst.msk [vmem:[#allocation4 + $0xd0] sm:$0xff] %vm2292_vm10, %v2249_v62 }
 0x25b   :  { %v2251_v6 = vpop.permute.xlu1 %2250 }
 0x25c   :  { %2320 = vst.msk [vmem:[#allocation4 + $0xd8] sm:$0xff] %vm2292_vm10, %v2251_v6  ;;  %v2253_v11 = vpop.permute.xlu0 %2252 }
 0x25d   :  { %2321 = vst.msk [vmem:[#allocation4 + $0xe0] sm:$0xff] %vm2292_vm10, %v2253_v11  ;;  %v3423_v11 = vld [vmem:[#allocation3 + $0x1] sm:$0xff] }
 0x25f   :  { %v2255_v17 = vpop.permute.xlu1 %2254 }
 0x260   :  { %2322 = vst.msk [vmem:[#allocation4 + $0xe8] sm:$0xff] %vm2292_vm10, %v2255_v17  ;;  %v2257_v18 = vpop.permute.xlu0 %2256  ;;  %v3424_v17 = vld [vmem:[#allocation3 + $0x9] sm:$0xff] }
 0x261   :  { %2323 = vst.msk [vmem:[#allocation4 + $0xf0] sm:$0xff] %vm2292_vm10, %v2257_v18  ;;  %v3487_v18 = vpack.c.bf16 %v3424_v17, %v3423_v11 }
 0x263   :  { %v2259_v5 = vpop.permute.xlu1 %2258  ;;  %3551 = vrot.lane.b32.xlu0 %v3487_v18, %s7210_s18 }
 0x264   :  { %2324 = vst.msk [vmem:[#allocation4 + $0xf8] sm:$0xff] %vm2292_vm10, %v2259_v5  ;;  %v2454_v7 = vpop.permute.xlu0 %2453 }
 0x265   :  { %2550 = vst.msk [vmem:[#allocation4] sm:$0xff] %vm2549_vm11, %v2454_v7 }
 0x267   :  { %v2456_v23 = vpop.permute.xlu1 %2455 }
 0x268   :  { %2551 = vst.msk [vmem:[#allocation4 + $0x8] sm:$0xff] %vm2549_vm11, %v2456_v23  ;;  %v2458_v29 = vpop.permute.xlu0 %2457 }
 0x269   :  { %2552 = vst.msk [vmem:[#allocation4 + $0x10] sm:$0xff] %vm2549_vm11, %v2458_v29 }
 0x26b   :  { %v2460_v10 = vpop.permute.xlu1 %2459 }
 0x26c   :  { %2553 = vst.msk [vmem:[#allocation4 + $0x18] sm:$0xff] %vm2549_vm11, %v2460_v10  ;;  %v2582_v30 = vld [vmem:[#allocation4] sm:$0xff]  ;;  %v2462_v35 = vpop.permute.xlu0 %2461 }
 0x26d   :  { %6944 = vmatprep.mubr.msk.bf16.mxu0 %vm2634_vm13, %v2582_v30  ;;  %2554 = vst.msk [vmem:[#allocation4 + $0x20] sm:$0xff] %vm2549_vm11, %v2462_v35  ;;  %v8512_v10 = vld [vmem:[%s10152_s2] ss:$0 sm:$0xff] }
 0x26e   :  { %v8517_v35 = vld [vmem:[%s10153_s3] ss:$0 sm:$0xff] }
 0x26f   :  { %v2583_v41 = vld [vmem:[#allocation4 + $0x8] sm:$0xff]  ;;  %v2464_v42 = vpop.permute.xlu1 %2463 }
 0x270   :  { %6945 = vmatmul.mubr.msk.bf16.vlgmr.msra.gmra.mrb[0].mxu0 %vm2634_vm13, %v2583_v41  ;;  %2555 = vst.msk [vmem:[#allocation4 + $0x28] sm:$0xff] %vm2549_vm11, %v2464_v42  ;;  %v2584_v12 = vld [vmem:[#allocation4 + $0x10] sm:$0xff]  ;;  %v2466_v56 = vpop.permute.xlu0 %2465 }
 0x271   :  { %6948 = vmatprep.mubr.msk.bf16.mxu0 %vm2634_vm13, %v2584_v12  ;;  %2556 = vst.msk [vmem:[#allocation4 + $0x30] sm:$0xff] %vm2549_vm11, %v2466_v56 }
 0x273   :  { %v2468_v57 = vpop.permute.xlu1 %2467  ;;  %v2585_v0 = vld [vmem:[#allocation4 + $0x18] sm:$0xff] }
 0x274   :  { %2557 = vst.msk [vmem:[#allocation4 + $0x38] sm:$0xff] %vm2549_vm11, %v2468_v57  ;;  %v2470_v8 = vpop.permute.xlu0 %2469  ;;  %v2586_v9 = vld [vmem:[#allocation4 + $0x20] sm:$0xff] }
 0x275   :  { %2558 = vst.msk [vmem:[#allocation4 + $0x40] sm:$0xff] %vm2549_vm11, %v2470_v8  ;;  %v3295_v57 = vld [vmem:[#allocation3] sm:$0xff] }
 0x277   :  { %v2472_v19 = vpop.permute.xlu1 %2471  ;;  %v2587_v34 = vld [vmem:[#allocation4 + $0x28] sm:$0xff] }
 0x278   :  { %6949 = vmatmul.mubr.msk.bf16.gmra.mrb[4].mxu0 %vm2634_vm13, %v2585_v0  ;;  %2559 = vst.msk [vmem:[#allocation4 + $0x48] sm:$0xff] %vm2549_vm11, %v2472_v19  ;;  %v2474_v26 = vpop.permute.xlu0 %2473  ;;  %v2588_v14 = vld [vmem:[#allocation4 + $0x30] sm:$0xff]  ;;  %v3296_v0 = vld [vmem:[#allocation3 + $0x8] sm:$0xff] }
 0x279   :  { %6952 = vmatprep.mubr.msk.bf16.mxu0 %vm2634_vm13, %v2586_v9  ;;  %2560 = vst.msk [vmem:[#allocation4 + $0x50] sm:$0xff] %vm2549_vm11, %v2474_v26  ;;  %v3359_v26 = vpack.c.bf16 %v3296_v0, %v3295_v57 }
 0x27b   :  { %v2476_v33 = vpop.permute.xlu1 %2475  ;;  %v2589_v16 = vld [vmem:[#allocation4 + $0x38] sm:$0xff]  ;;  %3391 = vst.msk [vmem:[#allocation4] sm:$0xff] %vm116_vm12, %v3359_v26 }
 0x27c   :  { %2561 = vst.msk [vmem:[#allocation4 + $0x58] sm:$0xff] %vm2549_vm11, %v2476_v33  ;;  %v2478_v13 = vpop.permute.xlu0 %2477  ;;  %v2590_v20 = vld [vmem:[#allocation4 + $0x40] sm:$0xff] }
 0x27d   :  { %2562 = vst.msk [vmem:[#allocation4 + $0x60] sm:$0xff] %vm2549_vm11, %v2478_v13 }
 0x27f   :  { %v2480_v44 = vpop.permute.xlu1 %2479  ;;  %v2591_v24 = vld [vmem:[#allocation4 + $0x48] sm:$0xff] }
 0x280   :  { %6953 = vmatmul.mubr.msk.bf16.gmra.mrb[8].mxu0 %vm2634_vm13, %v2587_v34  ;;  %2563 = vst.msk [vmem:[#allocation4 + $0x68] sm:$0xff] %vm2549_vm11, %v2480_v44  ;;  %v2482_v15 = vpop.permute.xlu0 %2481  ;;  %v2592_v27 = vld [vmem:[#allocation4 + $0x50] sm:$0xff] }
 0x281   :  { %6956 = vmatprep.mubr.msk.bf16.mxu0 %vm2634_vm13, %v2588_v14  ;;  %2564 = vst.msk [vmem:[#allocation4 + $0x70] sm:$0xff] %vm2549_vm11, %v2482_v15 }
 0x283   :  { %v2484_v50 = vpop.permute.xlu1 %2483  ;;  %v2593_v32 = vld [vmem:[#allocation4 + $0x58] sm:$0xff] }
 0x284   :  { %2565 = vst.msk [vmem:[#allocation4 + $0x78] sm:$0xff] %vm2549_vm11, %v2484_v50  ;;  %v2486_v51 = vpop.permute.xlu0 %2485  ;;  %v2594_v36 = vld [vmem:[#allocation4 + $0x60] sm:$0xff] }
 0x285   :  { %2566 = vst.msk [vmem:[#allocation4 + $0x80] sm:$0xff] %vm2549_vm11, %v2486_v51 }
 0x287   :  { %v2488_v21 = vpop.permute.xlu1 %2487  ;;  %v2595_v40 = vld [vmem:[#allocation4 + $0x68] sm:$0xff] }
 0x288   :  { %6957 = vmatmul.mubr.msk.bf16.gmra.mrb[12].mxu0 %vm2634_vm13, %v2589_v16  ;;  %2567 = vst.msk [vmem:[#allocation4 + $0x88] sm:$0xff] %vm2549_vm11, %v2488_v21  ;;  %v2490_v22 = vpop.permute.xlu0 %2489  ;;  %v2596_v46 = vld [vmem:[#allocation4 + $0x70] sm:$0xff] }
 0x289   :  { %6960 = vmatprep.mubr.msk.bf16.mxu0 %vm2634_vm13, %v2590_v20  ;;  %2568 = vst.msk [vmem:[#allocation4 + $0x90] sm:$0xff] %vm2549_vm11, %v2490_v22 }
 0x28b   :  { %v2492_v58 = vpop.permute.xlu1 %2491  ;;  %v2597_v54 = vld [vmem:[#allocation4 + $0x78] sm:$0xff] }
 0x28c   :  { %2569 = vst.msk [vmem:[#allocation4 + $0x98] sm:$0xff] %vm2549_vm11, %v2492_v58  ;;  %v2494_v25 = vpop.permute.xlu0 %2493  ;;  %v2598_v55 = vld [vmem:[#allocation4 + $0x80] sm:$0xff] }
 0x28d   :  { %2570 = vst.msk [vmem:[#allocation4 + $0xa0] sm:$0xff] %vm2549_vm11, %v2494_v25 }
 0x28f   :  { %v2496_v3 = vpop.permute.xlu1 %2495  ;;  %v2599_v59 = vld [vmem:[#allocation4 + $0x88] sm:$0xff] }
 0x290   :  { %6961 = vmatmul.mubr.msk.bf16.gmra.mrb[16].mxu0 %vm2634_vm13, %v2591_v24  ;;  %2571 = vst.msk [vmem:[#allocation4 + $0xa8] sm:$0xff] %vm2549_vm11, %v2496_v3  ;;  %v2498_v28 = vpop.permute.xlu0 %2497  ;;  %v2600_v60 = vld [vmem:[#allocation4 + $0x90] sm:$0xff] }
 0x291   :  { %6964 = vmatprep.mubr.msk.bf16.mxu0 %vm2634_vm13, %v2592_v27  ;;  %2572 = vst.msk [vmem:[#allocation4 + $0xb0] sm:$0xff] %vm2549_vm11, %v2498_v28 }
 0x293   :  { %v2500_v31 = vpop.permute.xlu1 %2499  ;;  %v2601_v63 = vld [vmem:[#allocation4 + $0x98] sm:$0xff] }
 0x294   :  { %2573 = vst.msk [vmem:[#allocation4 + $0xb8] sm:$0xff] %vm2549_vm11, %v2500_v31  ;;  %v2502_v4 = vpop.permute.xlu0 %2501  ;;  %v2602_v2 = vld [vmem:[#allocation4 + $0xa0] sm:$0xff] }
 0x295   :  { %2574 = vst.msk [vmem:[#allocation4 + $0xc0] sm:$0xff] %vm2549_vm11, %v2502_v4 }
 0x297   :  { %v2504_v37 = vpop.permute.xlu1 %2503  ;;  %v2603_v48 = vld [vmem:[#allocation4 + $0xa8] sm:$0xff] }
 0x298   :  { %6965 = vmatmul.mubr.msk.bf16.gmra.mrb[20].mxu0 %vm2634_vm13, %v2593_v32  ;;  %2575 = vst.msk [vmem:[#allocation4 + $0xc8] sm:$0xff] %vm2549_vm11, %v2504_v37  ;;  %v2506_v38 = vpop.permute.xlu0 %2505  ;;  %v2604_v43 = vld [vmem:[#allocation4 + $0xb0] sm:$0xff] }
 0x299   :  { %6968 = vmatprep.mubr.msk.bf16.mxu0 %vm2634_vm13, %v2594_v36  ;;  %2576 = vst.msk [vmem:[#allocation4 + $0xd0] sm:$0xff] %vm2549_vm11, %v2506_v38 }
 0x29b   :  { %v2508_v39 = vpop.permute.xlu1 %2507  ;;  %v2605_v52 = vld [vmem:[#allocation4 + $0xb8] sm:$0xff] }
 0x29c   :  { %2577 = vst.msk [vmem:[#allocation4 + $0xd8] sm:$0xff] %vm2549_vm11, %v2508_v39  ;;  %v2510_v45 = vpop.permute.xlu0 %2509  ;;  %v2606_v61 = vld [vmem:[#allocation4 + $0xc0] sm:$0xff] }
 0x29d   :  { %2578 = vst.msk [vmem:[#allocation4 + $0xe0] sm:$0xff] %vm2549_vm11, %v2510_v45 }
 0x29f   :  { %v2512_v47 = vpop.permute.xlu1 %2511  ;;  %v2607_v62 = vld [vmem:[#allocation4 + $0xc8] sm:$0xff] }
 0x2a0   :  { %6969 = vmatmul.mubr.msk.bf16.gmra.mrb[24].mxu0 %vm2634_vm13, %v2595_v40  ;;  %2579 = vst.msk [vmem:[#allocation4 + $0xe8] sm:$0xff] %vm2549_vm11, %v2512_v47  ;;  %v2514_v49 = vpop.permute.xlu0 %2513  ;;  %v2608_v6 = vld [vmem:[#allocation4 + $0xd0] sm:$0xff] }
 0x2a1   :  { %6972 = vmatprep.mubr.msk.bf16.mxu0 %vm2634_vm13, %v2596_v46  ;;  %2580 = vst.msk [vmem:[#allocation4 + $0xf0] sm:$0xff] %vm2549_vm11, %v2514_v49 }
 0x2a3   :  { %v2516_v53 = vpop.permute.xlu1 %2515  ;;  %v2609_v5 = vld [vmem:[#allocation4 + $0xd8] sm:$0xff] }
 0x2a4   :  { %2581 = vst.msk [vmem:[#allocation4 + $0xf8] sm:$0xff] %vm2549_vm11, %v2516_v53  ;;  %v2610_v7 = vld [vmem:[#allocation4 + $0xe0] sm:$0xff] }
 0x2a7   :  { %v2611_v23 = vld [vmem:[#allocation4 + $0xe8] sm:$0xff] }
 0x2a8   :  { %6973 = vmatmul.mubr.msk.bf16.gmra.mrb[28].mxu0 %vm2634_vm13, %v2597_v54  ;;  %v2612_v29 = vld [vmem:[#allocation4 + $0xf0] sm:$0xff] }
 0x2a9   :  { %6976 = vmatprep.mubr.msk.bf16.mxu0 %vm2634_vm13, %v2598_v55 }
 0x2ab   :  { %v2613_v1 = vld [vmem:[#allocation4 + $0xf8] sm:$0xff] }
 0x2b0   :  { %6977 = vmatmul.mubr.msk.bf16.gmra.mrb[32].mxu0 %vm2634_vm13, %v2599_v59 }
 0x2b1   :  { %6980 = vmatprep.mubr.msk.bf16.mxu0 %vm2634_vm13, %v2600_v60 }
 0x2b8   :  { %6981 = vmatmul.mubr.msk.bf16.gmra.mrb[36].mxu0 %vm2634_vm13, %v2601_v63 }
 0x2b9   :  { %6984 = vmatprep.mubr.msk.bf16.mxu0 %vm2634_vm13, %v2602_v2 }
 0x2c0   :  { %6985 = vmatmul.mubr.msk.bf16.gmra.mrb[40].mxu0 %vm2634_vm13, %v2603_v48 }
 0x2c1   :  { %6988 = vmatprep.mubr.msk.bf16.mxu0 %vm2634_vm13, %v2604_v43 }
 0x2c8   :  { %6989 = vmatmul.mubr.msk.bf16.gmra.mrb[44].mxu0 %vm2634_vm13, %v2605_v52 }
 0x2c9   :  { %6992 = vmatprep.mubr.msk.bf16.mxu0 %vm2634_vm13, %v2606_v61 }
 0x2d0   :  { %6993 = vmatmul.mubr.msk.bf16.gmra.mrb[48].mxu0 %vm2634_vm13, %v2607_v62 }
 0x2d1   :  { %6996 = vmatprep.mubr.msk.bf16.mxu0 %vm2634_vm13, %v2608_v6 }
 0x2d5   :  { %v3552_v44 = vpop.permute.xlu0 %3551 }
 0x2d6   :  { %3648 = vst.msk [vmem:[#allocation4] sm:$0xff] %vm3647_vm0, %v3552_v44 }
 0x2d8   :  { %6997 = vmatmul.mubr.msk.bf16.gmra.mrb[52].mxu0 %vm2634_vm13, %v2609_v5 }
 0x2d9   :  { %7000 = vmatprep.mubr.msk.bf16.mxu0 %vm2634_vm13, %v2610_v7 }
 0x2e0   :  { %7001 = vmatmul.mubr.msk.bf16.gmra.mrb[56].mxu0 %vm2634_vm13, %v2611_v23 }
 0x2e1   :  { %7004 = vmatprep.mubr.msk.bf16.mxu0 %vm2634_vm13, %v2612_v29 }
 0x2e8   :  { %7005 = vmatmul.mubr.msk.bf16.gmra.mrb[60].mxu0 %vm2634_vm13, %v2613_v1 }
 0x343   :  { %v6946_v30 = vpop.f32.mrb[0].mxu0 }
 0x344   :  { %v3033_v41 = vmul.f32 %v6946_v30, %v8512_v10  ;;  %v2769_v42 = vpop.f32.mrb[1].mxu0 }
 0x345   :  { %v3031_v12 = vmul.f32 %v8512_v10, %v2769_v42  ;;  %v6947_v56 = vpop.f32.mrb[2].mxu0 }
 0x346   :  { %v8522_v8 = vadd.f32 %v8517_v35, %v3033_v41  ;;  %v3034_v9 = vmul.f32 %v6947_v56, %v8512_v10  ;;  %v2772_v19 = vpop.f32.mrb[3].mxu0 }
 0x347   :  { %v8526_v33 = vadd.f32 %v8517_v35, %v3031_v12  ;;  %v3032_v34 = vmul.f32 %v8512_v10, %v2772_v19 }
 0x348   :  { %v3168_v13 = vmax.f32 %v8522_v8, 0.0  ;;  %v8531_v14 = vadd.f32 %v8517_v35, %v3034_v9 }
 0x349   :  { %v3166_v15 = vmax.f32 %v8526_v33, 0.0  ;;  %v8536_v50 = vadd.f32 %v8517_v35, %v3032_v34 }
 0x34a   :  { %3233 = vst.msk [vmem:[#allocation3 + $0x31] sm:$0xff] %vm116_vm12, %v3168_v13  ;;  %v3169_v16 = vmax.f32 %v8531_v14, 0.0 }
 0x34b   :  { %3231 = vst.msk [vmem:[#allocation3 + $0x19] sm:$0xff] %vm116_vm12, %v3166_v15  ;;  %v3167_v51 = vmax.f32 %v8536_v50, 0.0  ;;  %v6950_v20 = vpop.f32.mrb[4].mxu0 }
 0x34c   :  { %3234 = vst.msk [vmem:[#allocation3 + $0x39] sm:$0xff] %vm116_vm12, %v3169_v16  ;;  %v3037_v21 = vmul.f32 %v6950_v20, %v8512_v10  ;;  %v2785_v22 = vpop.f32.mrb[5].mxu0 }
 0x34d   :  { %3232 = vst.msk [vmem:[#allocation3 + $0x21] sm:$0xff] %vm116_vm12, %v3167_v51  ;;  %v3035_v58 = vmul.f32 %v8512_v10, %v2785_v22  ;;  %v6951_v24 = vpop.f32.mrb[6].mxu0 }
 0x34e   :  { %v8548_v25 = vadd.f32 %v8517_v35, %v3037_v21  ;;  %v3038_v27 = vmul.f32 %v6951_v24, %v8512_v10  ;;  %v2788_v3 = vpop.f32.mrb[7].mxu0 }
 0x34f   :  { %v8552_v28 = vadd.f32 %v8517_v35, %v3035_v58  ;;  %v3036_v31 = vmul.f32 %v8512_v10, %v2788_v3 }
 0x350   :  { %v3172_v32 = vmax.f32 %v8548_v25, 0.0  ;;  %v8557_v4 = vadd.f32 %v8517_v35, %v3038_v27 }
 0x351   :  { %v3170_v36 = vmax.f32 %v8552_v28, 0.0  ;;  %v8561_v37 = vadd.f32 %v8517_v35, %v3036_v31  ;;  %v3427_v39 = vld [vmem:[#allocation3 + $0x31] sm:$0xff] }
 0x352   :  { %3237 = vst.msk [vmem:[#allocation3 + $0x61] sm:$0xff] %vm116_vm12, %v3172_v32  ;;  %v3173_v38 = vmax.f32 %v8557_v4, 0.0  ;;  %v3299_v40 = vld [vmem:[#allocation3 + $0x30] sm:$0xff]  ;;  %v3425_v49 = vld [vmem:[#allocation3 + $0x19] sm:$0xff] }
 0x353   :  { %3235 = vst.msk [vmem:[#allocation3 + $0x49] sm:$0xff] %vm116_vm12, %v3170_v36  ;;  %v3171_v45 = vmax.f32 %v8561_v37, 0.0  ;;  %v6954_v46 = vpop.f32.mrb[8].mxu0  ;;  %v3428_v47 = vld [vmem:[#allocation3 + $0x39] sm:$0xff] }
 0x354   :  { %v3300_v53 = vld [vmem:[#allocation3 + $0x38] sm:$0xff]  ;;  %3238 = vst.msk [vmem:[#allocation3 + $0x69] sm:$0xff] %vm116_vm12, %v3173_v38  ;;  %v3041_v54 = vmul.f32 %v6954_v46, %v8512_v10  ;;  %v2801_v55 = vpop.f32.mrb[9].mxu0  ;;  %v3489_v59 = vpack.c.bf16 %v3428_v47, %v3427_v39  ;;  %v3426_v60 = vld [vmem:[#allocation3 + $0x21] sm:$0xff] }
 0x355   :  { %v8569_v63 = vpack.c.bf16 %v3300_v53, %v3299_v40  ;;  %v3297_v2 = vld [vmem:[#allocation3 + $0x18] sm:$0xff]  ;;  %v3298_v48 = vld [vmem:[#allocation3 + $0x20] sm:$0xff]  ;;  %3236 = vst.msk [vmem:[#allocation3 + $0x51] sm:$0xff] %vm116_vm12, %v3171_v45  ;;  %v3039_v43 = vmul.f32 %v8512_v10, %v2801_v55  ;;  %v6955_v52 = vpop.f32.mrb[10].mxu0  ;;  %v3488_v61 = vpack.c.bf16 %v3426_v60, %v3425_v49 }
 0x356   :  { %v8573_v62 = vpack.c.bf16 %v3298_v48, %v3297_v2  ;;  %v8576_v6 = vadd.f32 %v8517_v35, %v3041_v54  ;;  %v3042_v11 = vmul.f32 %v6955_v52, %v8512_v10  ;;  %3555 = vrot.lane.b32.xlu0 %v3489_v59, %s7210_s18  ;;  %v2804_v17 = vpop.f32.mrb[11].mxu0 }
 0x357   :  { %3393 = vst.msk [vmem:[#allocation4 + $0x10] sm:$0xff] %vm116_vm12, %v8569_v63  ;;  %v8583_v18 = vadd.f32 %v8517_v35, %v3039_v43  ;;  %v3040_v5 = vmul.f32 %v8512_v10, %v2804_v17  ;;  %3553 = vrot.lane.b32.xlu1 %v3488_v61, %s7210_s18 }
 0x358   :  { %3392 = vst.msk [vmem:[#allocation4 + $0x8] sm:$0xff] %vm116_vm12, %v8573_v62  ;;  %v3176_v7 = vmax.f32 %v8576_v6, 0.0  ;;  %v8591_v23 = vadd.f32 %v8517_v35, %v3042_v11 }
 0x359   :  { %v3174_v29 = vmax.f32 %v8583_v18, 0.0  ;;  %v8595_v1 = vadd.f32 %v8517_v35, %v3040_v5  ;;  %v3431_v41 = vld [vmem:[#allocation3 + $0x61] sm:$0xff] }
 0x35a   :  { %3241 = vst.msk [vmem:[#allocation3 + $0x91] sm:$0xff] %vm116_vm12, %v3176_v7  ;;  %v3177_v30 = vmax.f32 %v8591_v23, 0.0  ;;  %v3303_v42 = vld [vmem:[#allocation3 + $0x60] sm:$0xff]  ;;  %v3429_v0 = vld [vmem:[#allocation3 + $0x49] sm:$0xff] }
 0x35b   :  { %3239 = vst.msk [vmem:[#allocation3 + $0x79] sm:$0xff] %vm116_vm12, %v3174_v29  ;;  %v3175_v12 = vmax.f32 %v8595_v1, 0.0  ;;  %v6958_v56 = vpop.f32.mrb[12].mxu0  ;;  %v3432_v57 = vld [vmem:[#allocation3 + $0x69] sm:$0xff] }
 0x35c   :  { %v3304_v9 = vld [vmem:[#allocation3 + $0x68] sm:$0xff]  ;;  %3242 = vst.msk [vmem:[#allocation3 + $0x99] sm:$0xff] %vm116_vm12, %v3177_v30  ;;  %v3045_v19 = vmul.f32 %v6958_v56, %v8512_v10  ;;  %v2817_v26 = vpop.f32.mrb[13].mxu0  ;;  %v3491_v34 = vpack.c.bf16 %v3432_v57, %v3431_v41  ;;  %v3430_v13 = vld [vmem:[#allocation3 + $0x51] sm:$0xff] }
 0x35d   :  { %v8603_v44 = vpack.c.bf16 %v3304_v9, %v3303_v42  ;;  %v3301_v15 = vld [vmem:[#allocation3 + $0x48] sm:$0xff]  ;;  %v3302_v16 = vld [vmem:[#allocation3 + $0x50] sm:$0xff]  ;;  %3240 = vst.msk [vmem:[#allocation3 + $0x81] sm:$0xff] %vm116_vm12, %v3175_v12  ;;  %v3043_v51 = vmul.f32 %v8512_v10, %v2817_v26  ;;  %v6959_v20 = vpop.f32.mrb[14].mxu0  ;;  %v3490_v21 = vpack.c.bf16 %v3430_v13, %v3429_v0 }
 0x35e   :  { %v8607_v22 = vpack.c.bf16 %v3302_v16, %v3301_v15  ;;  %v8610_v58 = vadd.f32 %v8517_v35, %v3045_v19  ;;  %v3046_v24 = vmul.f32 %v6959_v20, %v8512_v10  ;;  %3559 = vrot.lane.b32.xlu0 %v3491_v34, %s7210_s18  ;;  %v2820_v27 = vpop.f32.mrb[15].mxu0 }
 0x35f   :  { %3395 = vst.msk [vmem:[#allocation4 + $0x20] sm:$0xff] %vm116_vm12, %v8603_v44  ;;  %v8617_v3 = vadd.f32 %v8517_v35, %v3043_v51  ;;  %v3044_v31 = vmul.f32 %v8512_v10, %v2820_v27  ;;  %3557 = vrot.lane.b32.xlu1 %v3490_v21, %s7210_s18 }
 0x360   :  { %3394 = vst.msk [vmem:[#allocation4 + $0x18] sm:$0xff] %vm116_vm12, %v8607_v22  ;;  %v3180_v32 = vmax.f32 %v8610_v58, 0.0  ;;  %v8625_v36 = vadd.f32 %v8517_v35, %v3046_v24 }
 0x361   :  { %v3178_v38 = vmax.f32 %v8617_v3, 0.0  ;;  %v8629_v39 = vadd.f32 %v8517_v35, %v3044_v31  ;;  %v3435_v45 = vld [vmem:[#allocation3 + $0x91] sm:$0xff] }
 0x362   :  { %10205 = vst [vmem:[#allocation8_spill] sm:$0xff] %v8625_v36  ;;  %3245 = vst.msk [vmem:[#allocation3 + $0xc1] sm:$0xff] %vm116_vm12, %v3180_v32  ;;  %v3181_v40 = vmax.f32 %v8625_v36, 0.0  ;;  %v3307_v46 = vld [vmem:[#allocation3 + $0x90] sm:$0xff]  ;;  %v3433_v54 = vld [vmem:[#allocation3 + $0x79] sm:$0xff] }
 0x363   :  { %3243 = vst.msk [vmem:[#allocation3 + $0xa9] sm:$0xff] %vm116_vm12, %v3178_v38  ;;  %v3179_v47 = vmax.f32 %v8629_v39, 0.0  ;;  %v6962_v49 = vpop.f32.mrb[16].mxu0  ;;  %v3436_v53 = vld [vmem:[#allocation3 + $0x99] sm:$0xff] }
 0x364   :  { %v3305_v55 = vld [vmem:[#allocation3 + $0x78] sm:$0xff]  ;;  %3246 = vst.msk [vmem:[#allocation3 + $0xc9] sm:$0xff] %vm116_vm12, %v3181_v40  ;;  %v3049_v59 = vmul.f32 %v6962_v49, %v8512_v10  ;;  %v2833_v60 = vpop.f32.mrb[17].mxu0  ;;  %v3493_v2 = vpack.c.bf16 %v3436_v53, %v3435_v45  ;;  %v3434_v48 = vld [vmem:[#allocation3 + $0x81] sm:$0xff] }
 0x365   :  { %v3308_v43 = vld [vmem:[#allocation3 + $0x98] sm:$0xff]  ;;  %v3306_v52 = vld [vmem:[#allocation3 + $0x80] sm:$0xff]  ;;  %3244 = vst.msk [vmem:[#allocation3 + $0xb1] sm:$0xff] %vm116_vm12, %v3179_v47  ;;  %v3047_v61 = vmul.f32 %v8512_v10, %v2833_v60  ;;  %v6963_v11 = vpop.f32.mrb[18].mxu0  ;;  %v3492_v17 = vpack.c.bf16 %v3434_v48, %v3433_v54 }
 0x366   :  { %v8639_v5 = vpack.c.bf16 %v3308_v43, %v3307_v46  ;;  %v8641_v7 = vpack.c.bf16 %v3306_v52, %v3305_v55  ;;  %v8644_v29 = vadd.f32 %v8517_v35, %v3049_v59  ;;  %v3050_v30 = vmul.f32 %v6963_v11, %v8512_v10  ;;  %3563 = vrot.lane.b32.xlu0 %v3493_v2, %s7210_s18  ;;  %v2836_v41 = vpop.f32.mrb[19].mxu0 }
 0x367   :  { %v8649_v42 = vadd.f32 %v8517_v35, %v3047_v61  ;;  %v3048_v12 = vmul.f32 %v8512_v10, %v2836_v41  ;;  %3561 = vrot.lane.b32.xlu1 %v3492_v17, %s7210_s18 }
 0x368   :  { %3397 = vst.msk [vmem:[#allocation4 + $0x30] sm:$0xff] %vm116_vm12, %v8639_v5  ;;  %3396 = vst.msk [vmem:[#allocation4 + $0x28] sm:$0xff] %vm116_vm12, %v8641_v7  ;;  %v3184_v56 = vmax.f32 %v8644_v29, 0.0  ;;  %v8659_v57 = vadd.f32 %v8517_v35, %v3050_v30 }
 0x369   :  { %v3182_v0 = vmax.f32 %v8649_v42, 0.0  ;;  %v8663_v9 = vadd.f32 %v8517_v35, %v3048_v12  ;;  %v3439_v13 = vld [vmem:[#allocation3 + $0xc1] sm:$0xff] }
 0x36a   :  { %10206 = vst [vmem:[#allocation9_spill] sm:$0xff] %v8659_v57  ;;  %3249 = vst.msk [vmem:[#allocation3 + $0xf1] sm:$0xff] %vm116_vm12, %v3184_v56  ;;  %v3185_v19 = vmax.f32 %v8659_v57, 0.0  ;;  %v3437_v21 = vld [vmem:[#allocation3 + $0xa9] sm:$0xff]  ;;  %v3311_v27 = vld [vmem:[#allocation3 + $0xc0] sm:$0xff] }
 0x36b   :  { %10207 = vst [vmem:[#allocation10_spill] sm:$0xff] %v8663_v9  ;;  %3247 = vst.msk [vmem:[#allocation3 + $0xd9] sm:$0xff] %vm116_vm12, %v3182_v0  ;;  %v3183_v26 = vmax.f32 %v8663_v9, 0.0  ;;  %v6966_v34 = vpop.f32.mrb[20].mxu0  ;;  %v3440_v15 = vld [vmem:[#allocation3 + $0xc9] sm:$0xff] }
 0x36c   :  { %3250 = vst.msk [vmem:[#allocation3 + $0xf9] sm:$0xff] %vm116_vm12, %v3185_v19  ;;  %v3053_v16 = vmul.f32 %v6966_v34, %v8512_v10  ;;  %v2849_v51 = vpop.f32.mrb[21].mxu0  ;;  %v3495_v20 = vpack.c.bf16 %v3440_v15, %v3439_v13  ;;  %v3438_v24 = vld [vmem:[#allocation3 + $0xb1] sm:$0xff]  ;;  %v3312_v40 = vld [vmem:[#allocation3 + $0xc8] sm:$0xff] }
 0x36d   :  { %3248 = vst.msk [vmem:[#allocation3 + $0xe1] sm:$0xff] %vm116_vm12, %v3183_v26  ;;  %v3051_v31 = vmul.f32 %v8512_v10, %v2849_v51  ;;  %v6967_v32 = vpop.f32.mrb[22].mxu0  ;;  %v3494_v38 = vpack.c.bf16 %v3438_v24, %v3437_v21  ;;  %v3309_v45 = vld [vmem:[#allocation3 + $0xa8] sm:$0xff]  ;;  %v3310_v46 = vld [vmem:[#allocation3 + $0xb0] sm:$0xff]  ;;  %v8678_v54 = vpack.c.bf16 %v3312_v40, %v3311_v27 }
 0x36e   :  { %v8674_v47 = vadd.f32 %v8517_v35, %v3053_v16  ;;  %v3054_v49 = vmul.f32 %v6967_v32, %v8512_v10  ;;  %3567 = vrot.lane.b32.xlu0 %v3495_v20, %s7210_s18  ;;  %v2852_v53 = vpop.f32.mrb[23].mxu0  ;;  %v8680_v55 = vpack.c.bf16 %v3310_v46, %v3309_v45 }
 0x36f   :  { %v8683_v59 = vadd.f32 %v8517_v35, %v3051_v31  ;;  %v3052_v60 = vmul.f32 %v8512_v10, %v2852_v53  ;;  %3565 = vrot.lane.b32.xlu1 %v3494_v38, %s7210_s18  ;;  %3399 = vst.msk [vmem:[#allocation4 + $0x40] sm:$0xff] %vm116_vm12, %v8678_v54 }
 0x370   :  { %10208 = vst [vmem:[#allocation11_spill] sm:$0xff] %v8674_v47  ;;  %v3188_v2 = vmax.f32 %v8674_v47, 0.0  ;;  %v8689_v48 = vadd.f32 %v8517_v35, %v3054_v49  ;;  %3398 = vst.msk [vmem:[#allocation4 + $0x38] sm:$0xff] %vm116_vm12, %v8680_v55 }
 0x371   :  { %10209 = vst [vmem:[#allocation12_spill] sm:$0xff] %v8683_v59  ;;  %v3186_v43 = vmax.f32 %v8683_v59, 0.0  ;;  %v8697_v52 = vadd.f32 %v8517_v35, %v3052_v60  ;;  %v3443_v30 = vld [vmem:[#allocation3 + $0xf1] sm:$0xff] }
 0x372   :  { %10210 = vst [vmem:[#allocation13_spill] sm:$0xff] %v8689_v48  ;;  %3253 = vst.msk [vmem:[#allocation3 + $0x121] sm:$0xff] %vm116_vm12, %v3188_v2  ;;  %v3189_v61 = vmax.f32 %v8689_v48, 0.0  ;;  %v3441_v19 = vld [vmem:[#allocation3 + $0xd9] sm:$0xff]  ;;  %v3315_v34 = vld [vmem:[#allocation3 + $0xf0] sm:$0xff] }
 0x373   :  { %10211 = vst [vmem:[#allocation14_spill] sm:$0xff] %v8697_v52  ;;  %3251 = vst.msk [vmem:[#allocation3 + $0x109] sm:$0xff] %vm116_vm12, %v3186_v43  ;;  %v3187_v11 = vmax.f32 %v8697_v52, 0.0  ;;  %v6970_v17 = vpop.f32.mrb[24].mxu0  ;;  %v3444_v41 = vld [vmem:[#allocation3 + $0xf9] sm:$0xff] }
 0x374   :  { %3254 = vst.msk [vmem:[#allocation3 + $0x129] sm:$0xff] %vm116_vm12, %v3189_v61  ;;  %v3057_v12 = vmul.f32 %v6970_v17, %v8512_v10  ;;  %v2865_v56 = vpop.f32.mrb[25].mxu0  ;;  %v3497_v0 = vpack.c.bf16 %v3444_v41, %v3443_v30  ;;  %v3442_v26 = vld [vmem:[#allocation3 + $0xe1] sm:$0xff]  ;;  %v3316_v51 = vld [vmem:[#allocation3 + $0xf8] sm:$0xff] }
 0x375   :  { %3252 = vst.msk [vmem:[#allocation3 + $0x111] sm:$0xff] %vm116_vm12, %v3187_v11  ;;  %v3055_v13 = vmul.f32 %v8512_v10, %v2865_v56  ;;  %v6971_v15 = vpop.f32.mrb[26].mxu0  ;;  %v3496_v16 = vpack.c.bf16 %v3442_v26, %v3441_v19  ;;  %v3313_v20 = vld [vmem:[#allocation3 + $0xd8] sm:$0xff]  ;;  %v3314_v21 = vld [vmem:[#allocation3 + $0xe0] sm:$0xff]  ;;  %v8712_v32 = vpack.c.bf16 %v3316_v51, %v3315_v34 }
 0x376   :  { %v8708_v24 = vadd.f32 %v8517_v35, %v3057_v12  ;;  %v3058_v27 = vmul.f32 %v6971_v15, %v8512_v10  ;;  %3571 = vrot.lane.b32.xlu0 %v3497_v0, %s7210_s18  ;;  %v2868_v31 = vpop.f32.mrb[27].mxu0  ;;  %v8714_v38 = vpack.c.bf16 %v3314_v21, %v3313_v20  ;;  %v3700_v59 = vld [vmem:[#allocation3 + $0xf2] sm:$0xff]  ;;  %v3701_v36 = vld [vmem:[#allocation3 + $0xfa] sm:$0xff] }
 0x377   :  { %v8717_v40 = vadd.f32 %v8517_v35, %v3055_v13  ;;  %v3056_v45 = vmul.f32 %v8512_v10, %v2868_v31  ;;  %3569 = vrot.lane.b32.xlu1 %v3496_v16, %s7210_s18  ;;  %3401 = vst.msk [vmem:[#allocation4 + $0x50] sm:$0xff] %vm116_vm12, %v8712_v32 }
 0x378   :  { %10212 = vst [vmem:[#allocation15_spill] sm:$0xff] %v8708_v24  ;;  %v3192_v46 = vmax.f32 %v8708_v24, 0.0  ;;  %v8723_v49 = vadd.f32 %v8517_v35, %v3058_v27  ;;  %3400 = vst.msk [vmem:[#allocation4 + $0x48] sm:$0xff] %vm116_vm12, %v8714_v38 }
 0x379   :  { %10213 = vst [vmem:[#allocation16_spill] sm:$0xff] %v8717_v40  ;;  %v3190_v53 = vmax.f32 %v8717_v40, 0.0  ;;  %v8731_v60 = vadd.f32 %v8517_v35, %v3056_v45  ;;  %v3447_v11 = vld [vmem:[#allocation3 + $0x121] sm:$0xff] }
 0x37a   :  { %10214 = vst [vmem:[#allocation17_spill] sm:$0xff] %v8723_v49  ;;  %3257 = vst.msk [vmem:[#allocation3 + $0x151] sm:$0xff] %vm116_vm12, %v3192_v46  ;;  %v3193_v2 = vmax.f32 %v8723_v49, 0.0  ;;  %v3445_v56 = vld [vmem:[#allocation3 + $0x109] sm:$0xff]  ;;  %v3319_v19 = vld [vmem:[#allocation3 + $0x120] sm:$0xff] }
 0x37b   :  { %10215 = vst [vmem:[#allocation18_spill] sm:$0xff] %v8731_v60  ;;  %3255 = vst.msk [vmem:[#allocation3 + $0x139] sm:$0xff] %vm116_vm12, %v3190_v53  ;;  %v3191_v43 = vmax.f32 %v8731_v60, 0.0  ;;  %v6974_v61 = vpop.f32.mrb[28].mxu0  ;;  %v3448_v17 = vld [vmem:[#allocation3 + $0x129] sm:$0xff] }
 0x37c   :  { %3258 = vst.msk [vmem:[#allocation3 + $0x159] sm:$0xff] %vm116_vm12, %v3193_v2  ;;  %v3061_v30 = vmul.f32 %v6974_v61, %v8512_v10  ;;  %v2881_v41 = vpop.f32.mrb[29].mxu0  ;;  %v3499_v12 = vpack.c.bf16 %v3448_v17, %v3447_v11  ;;  %v3446_v0 = vld [vmem:[#allocation3 + $0x111] sm:$0xff]  ;;  %v3320_v15 = vld [vmem:[#allocation3 + $0x128] sm:$0xff] }
 0x37d   :  { %3256 = vst.msk [vmem:[#allocation3 + $0x141] sm:$0xff] %vm116_vm12, %v3191_v43  ;;  %v3059_v26 = vmul.f32 %v8512_v10, %v2881_v41  ;;  %v6975_v34 = vpop.f32.mrb[30].mxu0  ;;  %v3498_v13 = vpack.c.bf16 %v3446_v0, %v3445_v56  ;;  %v3317_v16 = vld [vmem:[#allocation3 + $0x108] sm:$0xff]  ;;  %v3318_v51 = vld [vmem:[#allocation3 + $0x110] sm:$0xff]  ;;  %v8746_v31 = vpack.c.bf16 %v3320_v15, %v3319_v19  ;;  %v3456_v41 = vld [vmem:[#allocation3 + $0x1b9] sm:$0xff] }
 0x37e   :  { %v8742_v20 = vadd.f32 %v8517_v35, %v3061_v30  ;;  %v3062_v21 = vmul.f32 %v6975_v34, %v8512_v10  ;;  %3575 = vrot.lane.b32.xlu0 %v3499_v12, %s7210_s18  ;;  %v2884_v27 = vpop.f32.mrb[31].mxu0  ;;  %v8748_v45 = vpack.c.bf16 %v3318_v51, %v3317_v16  ;;  %v3455_v30 = vld [vmem:[#allocation3 + $0x1b1] sm:$0xff] }
 0x37f   :  { %v8751_v46 = vadd.f32 %v8517_v35, %v3059_v26  ;;  %v3060_v53 = vmul.f32 %v8512_v10, %v2884_v27  ;;  %3573 = vrot.lane.b32.xlu1 %v3498_v13, %s7210_s18  ;;  %3403 = vst.msk [vmem:[#allocation4 + $0x60] sm:$0xff] %vm116_vm12, %v8746_v31  ;;  %v3327_v49 = vld [vmem:[#allocation3 + $0x1b0] sm:$0xff] }
 0x380   :  { %10216 = vst [vmem:[#allocation19_spill] sm:$0xff] %v8742_v20  ;;  %v3196_v2 = vmax.f32 %v8742_v20, 0.0  ;;  %v8757_v43 = vadd.f32 %v8517_v35, %v3062_v21  ;;  %3402 = vst.msk [vmem:[#allocation4 + $0x58] sm:$0xff] %vm116_vm12, %v8748_v45 }
 0x381   :  { %10217 = vst [vmem:[#allocation20_spill] sm:$0xff] %v8751_v46  ;;  %v3194_v61 = vmax.f32 %v8751_v46, 0.0  ;;  %v8765_v11 = vadd.f32 %v8517_v35, %v3060_v53  ;;  %v3451_v0 = vld [vmem:[#allocation3 + $0x151] sm:$0xff] }
 0x382   :  { %10218 = vst [vmem:[#allocation21_spill] sm:$0xff] %v8757_v43  ;;  %3261 = vst.msk [vmem:[#allocation3 + $0x181] sm:$0xff] %vm116_vm12, %v3196_v2  ;;  %v3197_v17 = vmax.f32 %v8757_v43, 0.0  ;;  %v3323_v26 = vld [vmem:[#allocation3 + $0x150] sm:$0xff]  ;;  %v3449_v16 = vld [vmem:[#allocation3 + $0x139] sm:$0xff] }
 0x383   :  { %10219 = vst [vmem:[#allocation22_spill] sm:$0xff] %v8765_v11  ;;  %3259 = vst.msk [vmem:[#allocation3 + $0x169] sm:$0xff] %vm116_vm12, %v3194_v61  ;;  %v3195_v12 = vmax.f32 %v8765_v11, 0.0  ;;  %v6978_v56 = vpop.f32.mrb[32].mxu0  ;;  %v3452_v19 = vld [vmem:[#allocation3 + $0x159] sm:$0xff]  ;;  %v3503_v61 = vpack.c.bf16 %v3456_v41, %v3455_v30 }
 0x384   :  { %3262 = vst.msk [vmem:[#allocation3 + $0x189] sm:$0xff] %vm116_vm12, %v3197_v17  ;;  %v3065_v34 = vmul.f32 %v6978_v56, %v8512_v10  ;;  %v2897_v13 = vpop.f32.mrb[33].mxu0  ;;  %v3501_v15 = vpack.c.bf16 %v3452_v19, %v3451_v0  ;;  %v3450_v51 = vld [vmem:[#allocation3 + $0x141] sm:$0xff]  ;;  %v3321_v21 = vld [vmem:[#allocation3 + $0x138] sm:$0xff] }
 0x385   :  { %3260 = vst.msk [vmem:[#allocation3 + $0x171] sm:$0xff] %vm116_vm12, %v3195_v12  ;;  %v3063_v27 = vmul.f32 %v8512_v10, %v2897_v13  ;;  %v6979_v53 = vpop.f32.mrb[34].mxu0  ;;  %v3500_v2 = vpack.c.bf16 %v3450_v51, %v3449_v16  ;;  %v3324_v43 = vld [vmem:[#allocation3 + $0x158] sm:$0xff]  ;;  %v3322_v11 = vld [vmem:[#allocation3 + $0x140] sm:$0xff] }
 0x386   :  { %v8776_v20 = vadd.f32 %v8517_v35, %v3065_v34  ;;  %v3066_v17 = vmul.f32 %v6979_v53, %v8512_v10  ;;  %3579 = vrot.lane.b32.xlu0 %v3501_v15, %s7210_s18  ;;  %v2900_v56 = vpop.f32.mrb[35].mxu0  ;;  %v8780_v0 = vpack.c.bf16 %v3324_v43, %v3323_v26  ;;  %v8782_v19 = vpack.c.bf16 %v3322_v11, %v3321_v21  ;;  %v3328_v12 = vld [vmem:[#allocation3 + $0x1b8] sm:$0xff] }
 0x387   :  { %v8785_v13 = vadd.f32 %v8517_v35, %v3063_v27  ;;  %v3064_v30 = vmul.f32 %v8512_v10, %v2900_v56  ;;  %3577 = vrot.lane.b32.xlu1 %v3500_v2, %s7210_s18  ;;  %v3375_v41 = vpack.c.bf16 %v3328_v12, %v3327_v49 }
 0x388   :  { %10220 = vst [vmem:[#allocation23_spill] sm:$0xff] %v8776_v20  ;;  %v3200_v34 = vmax.f32 %v8776_v20, 0.0  ;;  %v8791_v16 = vadd.f32 %v8517_v35, %v3066_v17  ;;  %3405 = vst.msk [vmem:[#allocation4 + $0x70] sm:$0xff] %vm116_vm12, %v8780_v0 }
 0x389   :  { %10221 = vst [vmem:[#allocation24_spill] sm:$0xff] %v8785_v13  ;;  %3404 = vst.msk [vmem:[#allocation4 + $0x68] sm:$0xff] %vm116_vm12, %v8782_v19  ;;  %v3198_v43 = vmax.f32 %v8785_v13, 0.0  ;;  %v8799_v11 = vadd.f32 %v8517_v35, %v3064_v30 }
 0x38a   :  { %10222 = vst [vmem:[#allocation25_spill] sm:$0xff] %v8791_v16  ;;  %3407 = vst.msk [vmem:[#allocation4 + $0x80] sm:$0xff] %vm116_vm12, %v3375_v41  ;;  %v3201_v49 = vmax.f32 %v8791_v16, 0.0  ;;  %3583 = vrot.lane.b32.xlu0 %v3503_v61, %s7210_s18  ;;  %v3453_v27 = vld [vmem:[#allocation3 + $0x169] sm:$0xff] }
 0x38b   :  { %10223 = vst [vmem:[#allocation26_spill] sm:$0xff] %v8799_v11  ;;  %3265 = vst.msk [vmem:[#allocation3 + $0x1e1] sm:$0xff] %vm116_vm12, %v3200_v34  ;;  %v3199_v26 = vmax.f32 %v8799_v11, 0.0  ;;  %v6982_v15 = vpop.f32.mrb[36].mxu0  ;;  %v3325_v12 = vld [vmem:[#allocation3 + $0x168] sm:$0xff] }
 0x38c   :  { %3263 = vst.msk [vmem:[#allocation3 + $0x1c9] sm:$0xff] %vm116_vm12, %v3198_v43  ;;  %3266 = vst.msk [vmem:[#allocation3 + $0x1e9] sm:$0xff] %vm116_vm12, %v3201_v49  ;;  %v3069_v51 = vmul.f32 %v6982_v15, %v8512_v10  ;;  %v2913_v21 = vpop.f32.mrb[37].mxu0  ;;  %v3454_v53 = vld [vmem:[#allocation3 + $0x171] sm:$0xff] }
 0x38d   :  { %3264 = vst.msk [vmem:[#allocation3 + $0x1d1] sm:$0xff] %vm116_vm12, %v3199_v26  ;;  %v3067_v2 = vmul.f32 %v8512_v10, %v2913_v21  ;;  %v6983_v17 = vpop.f32.mrb[38].mxu0  ;;  %v3502_v56 = vpack.c.bf16 %v3454_v53, %v3453_v27  ;;  %v3326_v61 = vld [vmem:[#allocation3 + $0x170] sm:$0xff] }
 0x38e   :  { %v8812_v30 = vadd.f32 %v8517_v35, %v3069_v51  ;;  %v3070_v41 = vmul.f32 %v6983_v17, %v8512_v10  ;;  %v2916_v34 = vpop.f32.mrb[39].mxu0  ;;  %v8815_v43 = vpack.c.bf16 %v3326_v61, %v3325_v12 }
 0x38f   :  { %v8818_v49 = vadd.f32 %v8517_v35, %v3067_v2  ;;  %v3068_v15 = vmul.f32 %v8512_v10, %v2916_v34  ;;  %3581 = vrot.lane.b32.xlu1 %v3502_v56, %s7210_s18 }
 0x390   :  { %10224 = vst [vmem:[#allocation27_spill] sm:$0xff] %v8812_v30  ;;  %v3204_v26 = vmax.f32 %v8812_v30, 0.0  ;;  %v8824_v21 = vadd.f32 %v8517_v35, %v3070_v41  ;;  %3406 = vst.msk [vmem:[#allocation4 + $0x78] sm:$0xff] %vm116_vm12, %v8815_v43 }
 0x391   :  { %10225 = vst [vmem:[#allocation28_spill] sm:$0xff] %v8818_v49  ;;  %v3202_v51 = vmax.f32 %v8818_v49, 0.0  ;;  %v8830_v27 = vadd.f32 %v8517_v35, %v3068_v15 }
 0x392   :  { %10226 = vst [vmem:[#allocation29_spill] sm:$0xff] %v8824_v21  ;;  %3269 = vst.msk [vmem:[#allocation3 + $0x211] sm:$0xff] %vm116_vm12, %v3204_v26  ;;  %v3205_v53 = vmax.f32 %v8824_v21, 0.0  ;;  %v3459_v56 = vld [vmem:[#allocation3 + $0x1e1] sm:$0xff] }
 0x393   :  { %10227 = vst [vmem:[#allocation30_spill] sm:$0xff] %v8830_v27  ;;  %3267 = vst.msk [vmem:[#allocation3 + $0x1f9] sm:$0xff] %vm116_vm12, %v3202_v51  ;;  %v3203_v2 = vmax.f32 %v8830_v27, 0.0  ;;  %v6986_v17 = vpop.f32.mrb[40].mxu0  ;;  %v3460_v12 = vld [vmem:[#allocation3 + $0x1e9] sm:$0xff]  ;;  %v3331_v30 = vld [vmem:[#allocation3 + $0x1e0] sm:$0xff] }
 0x394   :  { %3270 = vst.msk [vmem:[#allocation3 + $0x219] sm:$0xff] %vm116_vm12, %v3205_v53  ;;  %v3073_v61 = vmul.f32 %v6986_v17, %v8512_v10  ;;  %v2929_v41 = vpop.f32.mrb[41].mxu0  ;;  %v3505_v34 = vpack.c.bf16 %v3460_v12, %v3459_v56  ;;  %v3457_v16 = vld [vmem:[#allocation3 + $0x1c9] sm:$0xff]  ;;  %v3458_v15 = vld [vmem:[#allocation3 + $0x1d1] sm:$0xff] }
 0x395   :  { %3268 = vst.msk [vmem:[#allocation3 + $0x201] sm:$0xff] %vm116_vm12, %v3203_v2  ;;  %v3071_v26 = vmul.f32 %v8512_v10, %v2929_v41  ;;  %v6987_v21 = vpop.f32.mrb[42].mxu0  ;;  %v3504_v51 = vpack.c.bf16 %v3458_v15, %v3457_v16  ;;  %v3332_v11 = vld [vmem:[#allocation3 + $0x1e8] sm:$0xff]  ;;  %v3330_v49 = vld [vmem:[#allocation3 + $0x1d0] sm:$0xff] }
 0x396   :  { %v3329_v27 = vld [vmem:[#allocation3 + $0x1c8] sm:$0xff]  ;;  %v8841_v20 = vadd.f32 %v8517_v35, %v3073_v61  ;;  %v3074_v53 = vmul.f32 %v6987_v21, %v8512_v10  ;;  %3587 = vrot.lane.b32.xlu0 %v3505_v34, %s7210_s18  ;;  %v2932_v17 = vpop.f32.mrb[43].mxu0  ;;  %v8845_v56 = vpack.c.bf16 %v3332_v11, %v3331_v30 }
 0x397   :  { %v8847_v12 = vpack.c.bf16 %v3330_v49, %v3329_v27  ;;  %v8850_v2 = vadd.f32 %v8517_v35, %v3071_v26  ;;  %v3072_v16 = vmul.f32 %v8512_v10, %v2932_v17  ;;  %3585 = vrot.lane.b32.xlu1 %v3504_v51, %s7210_s18 }
 0x398   :  { %10228 = vst [vmem:[#allocation31_spill] sm:$0xff] %v8841_v20  ;;  %v3208_v41 = vmax.f32 %v8841_v20, 0.0  ;;  %v8856_v61 = vadd.f32 %v8517_v35, %v3074_v53  ;;  %3409 = vst.msk [vmem:[#allocation4 + $0x90] sm:$0xff] %vm116_vm12, %v8845_v56 }
 0x399   :  { %10229 = vst [vmem:[#allocation32_spill] sm:$0xff] %v8850_v2  ;;  %3408 = vst.msk [vmem:[#allocation4 + $0x88] sm:$0xff] %vm116_vm12, %v8847_v12  ;;  %v3206_v11 = vmax.f32 %v8850_v2, 0.0  ;;  %v8864_v30 = vadd.f32 %v8517_v35, %v3072_v16  ;;  %v3463_v34 = vld [vmem:[#allocation3 + $0x211] sm:$0xff] }
 0x39a   :  { %10230 = vst [vmem:[#allocation33_spill] sm:$0xff] %v8856_v61  ;;  %3273 = vst.msk [vmem:[#allocation3 + $0x241] sm:$0xff] %vm116_vm12, %v3208_v41  ;;  %v3209_v49 = vmax.f32 %v8856_v61, 0.0  ;;  %v3461_v17 = vld [vmem:[#allocation3 + $0x1f9] sm:$0xff]  ;;  %v3335_v20 = vld [vmem:[#allocation3 + $0x210] sm:$0xff] }
 0x39b   :  { %10231 = vst [vmem:[#allocation34_spill] sm:$0xff] %v8864_v30  ;;  %3271 = vst.msk [vmem:[#allocation3 + $0x229] sm:$0xff] %vm116_vm12, %v3206_v11  ;;  %v3207_v21 = vmax.f32 %v8864_v30, 0.0  ;;  %v6990_v27 = vpop.f32.mrb[44].mxu0  ;;  %v3464_v15 = vld [vmem:[#allocation3 + $0x219] sm:$0xff] }
 0x39c   :  { %3274 = vst.msk [vmem:[#allocation3 + $0x249] sm:$0xff] %vm116_vm12, %v3209_v49  ;;  %v3077_v26 = vmul.f32 %v6990_v27, %v8512_v10  ;;  %v2945_v51 = vpop.f32.mrb[45].mxu0  ;;  %v3507_v53 = vpack.c.bf16 %v3464_v15, %v3463_v34  ;;  %v3462_v16 = vld [vmem:[#allocation3 + $0x201] sm:$0xff]  ;;  %v3336_v2 = vld [vmem:[#allocation3 + $0x218] sm:$0xff] }
 0x39d   :  { %3272 = vst.msk [vmem:[#allocation3 + $0x231] sm:$0xff] %vm116_vm12, %v3207_v21  ;;  %v3075_v41 = vmul.f32 %v8512_v10, %v2945_v51  ;;  %v6991_v61 = vpop.f32.mrb[46].mxu0  ;;  %v3506_v11 = vpack.c.bf16 %v3462_v16, %v3461_v17  ;;  %v3333_v30 = vld [vmem:[#allocation3 + $0x1f8] sm:$0xff]  ;;  %v3334_v13 = vld [vmem:[#allocation3 + $0x200] sm:$0xff]  ;;  %v8879_v34 = vpack.c.bf16 %v3336_v2, %v3335_v20 }
 0x39e   :  { %v8875_v60 = vadd.f32 %v8517_v35, %v3077_v26  ;;  %v3078_v49 = vmul.f32 %v6991_v61, %v8512_v10  ;;  %3591 = vrot.lane.b32.xlu0 %v3507_v53, %s7210_s18  ;;  %v2948_v27 = vpop.f32.mrb[47].mxu0  ;;  %v8881_v15 = vpack.c.bf16 %v3334_v13, %v3333_v30 }
 0x39f   :  { %v8884_v21 = vadd.f32 %v8517_v35, %v3075_v41  ;;  %v3076_v51 = vmul.f32 %v8512_v10, %v2948_v27  ;;  %3589 = vrot.lane.b32.xlu1 %v3506_v11, %s7210_s18  ;;  %3411 = vst.msk [vmem:[#allocation4 + $0xa0] sm:$0xff] %vm116_vm12, %v8879_v34 }
 0x3a0   :  { %10232 = vst [vmem:[#allocation35_spill] sm:$0xff] %v8875_v60  ;;  %v3212_v17 = vmax.f32 %v8875_v60, 0.0  ;;  %v8890_v26 = vadd.f32 %v8517_v35, %v3078_v49  ;;  %3410 = vst.msk [vmem:[#allocation4 + $0x98] sm:$0xff] %vm116_vm12, %v8881_v15 }
 0x3a1   :  { %10233 = vst [vmem:[#allocation36_spill] sm:$0xff] %v8884_v21  ;;  %v3210_v20 = vmax.f32 %v8884_v21, 0.0  ;;  %v8898_v13 = vadd.f32 %v8517_v35, %v3076_v51  ;;  %v3467_v53 = vld [vmem:[#allocation3 + $0x241] sm:$0xff] }
 0x3a2   :  { %10234 = vst [vmem:[#allocation37_spill] sm:$0xff] %v8890_v26  ;;  %3277 = vst.msk [vmem:[#allocation3 + $0x271] sm:$0xff] %vm116_vm12, %v3212_v17  ;;  %v3213_v2 = vmax.f32 %v8890_v26, 0.0  ;;  %v3465_v27 = vld [vmem:[#allocation3 + $0x229] sm:$0xff]  ;;  %v3339_v60 = vld [vmem:[#allocation3 + $0x240] sm:$0xff] }
 0x3a3   :  { %10235 = vst [vmem:[#allocation38_spill] sm:$0xff] %v8898_v13  ;;  %3275 = vst.msk [vmem:[#allocation3 + $0x259] sm:$0xff] %vm116_vm12, %v3210_v20  ;;  %v3211_v61 = vmax.f32 %v8898_v13, 0.0  ;;  %v6994_v30 = vpop.f32.mrb[48].mxu0  ;;  %v3468_v16 = vld [vmem:[#allocation3 + $0x249] sm:$0xff] }
 0x3a4   :  { %3278 = vst.msk [vmem:[#allocation3 + $0x279] sm:$0xff] %vm116_vm12, %v3213_v2  ;;  %v3081_v41 = vmul.f32 %v6994_v30, %v8512_v10  ;;  %v2961_v11 = vpop.f32.mrb[49].mxu0  ;;  %v3509_v49 = vpack.c.bf16 %v3468_v16, %v3467_v53  ;;  %v3466_v51 = vld [vmem:[#allocation3 + $0x231] sm:$0xff]  ;;  %v3340_v21 = vld [vmem:[#allocation3 + $0x248] sm:$0xff] }
 0x3a5   :  { %3276 = vst.msk [vmem:[#allocation3 + $0x261] sm:$0xff] %vm116_vm12, %v3211_v61  ;;  %v3079_v17 = vmul.f32 %v8512_v10, %v2961_v11  ;;  %v6995_v26 = vpop.f32.mrb[50].mxu0  ;;  %v3508_v20 = vpack.c.bf16 %v3466_v51, %v3465_v27  ;;  %v3337_v13 = vld [vmem:[#allocation3 + $0x228] sm:$0xff]  ;;  %v3338_v46 = vld [vmem:[#allocation3 + $0x230] sm:$0xff]  ;;  %v8913_v53 = vpack.c.bf16 %v3340_v21, %v3339_v60 }
 0x3a6   :  { %v8909_v48 = vadd.f32 %v8517_v35, %v3081_v41  ;;  %v3082_v2 = vmul.f32 %v6995_v26, %v8512_v10  ;;  %3595 = vrot.lane.b32.xlu0 %v3509_v49, %s7210_s18  ;;  %v2964_v30 = vpop.f32.mrb[51].mxu0  ;;  %v8915_v16 = vpack.c.bf16 %v3338_v46, %v3337_v13 }
 0x3a7   :  { %v8918_v61 = vadd.f32 %v8517_v35, %v3079_v17  ;;  %v3080_v11 = vmul.f32 %v8512_v10, %v2964_v30  ;;  %3593 = vrot.lane.b32.xlu1 %v3508_v20, %s7210_s18  ;;  %3413 = vst.msk [vmem:[#allocation4 + $0xb0] sm:$0xff] %vm116_vm12, %v8913_v53 }
 0x3a8   :  { %10236 = vst [vmem:[#allocation39_spill] sm:$0xff] %v8909_v48  ;;  %v3216_v27 = vmax.f32 %v8909_v48, 0.0  ;;  %v8924_v41 = vadd.f32 %v8517_v35, %v3082_v2  ;;  %3412 = vst.msk [vmem:[#allocation4 + $0xa8] sm:$0xff] %vm116_vm12, %v8915_v16 }
 0x3a9   :  { %10237 = vst [vmem:[#allocation40_spill] sm:$0xff] %v8918_v61  ;;  %v3214_v60 = vmax.f32 %v8918_v61, 0.0  ;;  %v8932_v46 = vadd.f32 %v8517_v35, %v3080_v11  ;;  %v3471_v49 = vld [vmem:[#allocation3 + $0x271] sm:$0xff] }
 0x3aa   :  { %10238 = vst [vmem:[#allocation41_spill] sm:$0xff] %v8924_v41  ;;  %3281 = vst.msk [vmem:[#allocation3 + $0x2a1] sm:$0xff] %vm116_vm12, %v3216_v27  ;;  %v3217_v21 = vmax.f32 %v8924_v41, 0.0  ;;  %v3469_v30 = vld [vmem:[#allocation3 + $0x259] sm:$0xff]  ;;  %v3343_v48 = vld [vmem:[#allocation3 + $0x270] sm:$0xff] }
 0x3ab   :  { %10239 = vst [vmem:[#allocation42_spill] sm:$0xff] %v8932_v46  ;;  %3279 = vst.msk [vmem:[#allocation3 + $0x289] sm:$0xff] %vm116_vm12, %v3214_v60  ;;  %v3215_v26 = vmax.f32 %v8932_v46, 0.0  ;;  %v6998_v13 = vpop.f32.mrb[52].mxu0  ;;  %v3472_v51 = vld [vmem:[#allocation3 + $0x279] sm:$0xff] }
 0x3ac   :  { %3282 = vst.msk [vmem:[#allocation3 + $0x2a9] sm:$0xff] %vm116_vm12, %v3217_v21  ;;  %v3085_v17 = vmul.f32 %v6998_v13, %v8512_v10  ;;  %v2977_v20 = vpop.f32.mrb[53].mxu0  ;;  %v3511_v2 = vpack.c.bf16 %v3472_v51, %v3471_v49  ;;  %v3470_v11 = vld [vmem:[#allocation3 + $0x261] sm:$0xff]  ;;  %v3344_v61 = vld [vmem:[#allocation3 + $0x278] sm:$0xff] }
 0x3ad   :  { %3280 = vst.msk [vmem:[#allocation3 + $0x291] sm:$0xff] %vm116_vm12, %v3215_v26  ;;  %v3083_v27 = vmul.f32 %v8512_v10, %v2977_v20  ;;  %v6999_v41 = vpop.f32.mrb[54].mxu0  ;;  %v3510_v60 = vpack.c.bf16 %v3470_v11, %v3469_v30  ;;  %v3341_v46 = vld [vmem:[#allocation3 + $0x258] sm:$0xff]  ;;  %v3342_v24 = vld [vmem:[#allocation3 + $0x260] sm:$0xff]  ;;  %v8947_v49 = vpack.c.bf16 %v3344_v61, %v3343_v48 }
 0x3ae   :  { %v8943_v52 = vadd.f32 %v8517_v35, %v3085_v17  ;;  %v3086_v21 = vmul.f32 %v6999_v41, %v8512_v10  ;;  %3599 = vrot.lane.b32.xlu0 %v3511_v2, %s7210_s18  ;;  %v2980_v13 = vpop.f32.mrb[55].mxu0  ;;  %v8949_v51 = vpack.c.bf16 %v3342_v24, %v3341_v46 }
 0x3af   :  { %v8952_v26 = vadd.f32 %v8517_v35, %v3083_v27  ;;  %v3084_v20 = vmul.f32 %v8512_v10, %v2980_v13  ;;  %3597 = vrot.lane.b32.xlu1 %v3510_v60, %s7210_s18  ;;  %3415 = vst.msk [vmem:[#allocation4 + $0xc0] sm:$0xff] %vm116_vm12, %v8947_v49 }
 0x3b0   :  { %10240 = vst [vmem:[#allocation43_spill] sm:$0xff] %v8943_v52  ;;  %v3220_v30 = vmax.f32 %v8943_v52, 0.0  ;;  %v8958_v17 = vadd.f32 %v8517_v35, %v3086_v21  ;;  %3414 = vst.msk [vmem:[#allocation4 + $0xb8] sm:$0xff] %vm116_vm12, %v8949_v51 }
 0x3b1   :  { %10241 = vst [vmem:[#allocation44_spill] sm:$0xff] %v8952_v26  ;;  %v3218_v48 = vmax.f32 %v8952_v26, 0.0  ;;  %v8966_v24 = vadd.f32 %v8517_v35, %v3084_v20  ;;  %v3475_v2 = vld [vmem:[#allocation3 + $0x2a1] sm:$0xff] }
 0x3b2   :  { %10242 = vst [vmem:[#allocation45_spill] sm:$0xff] %v8958_v17  ;;  %3285 = vst.msk [vmem:[#allocation3 + $0x2d1] sm:$0xff] %vm116_vm12, %v3220_v30  ;;  %v3221_v61 = vmax.f32 %v8958_v17, 0.0  ;;  %v3473_v13 = vld [vmem:[#allocation3 + $0x289] sm:$0xff]  ;;  %v3347_v52 = vld [vmem:[#allocation3 + $0x2a0] sm:$0xff] }
 0x3b3   :  { %10243 = vst [vmem:[#allocation46_spill] sm:$0xff] %v8966_v24  ;;  %3283 = vst.msk [vmem:[#allocation3 + $0x2b9] sm:$0xff] %vm116_vm12, %v3218_v48  ;;  %v3219_v41 = vmax.f32 %v8966_v24, 0.0  ;;  %v7002_v46 = vpop.f32.mrb[56].mxu0  ;;  %v3476_v11 = vld [vmem:[#allocation3 + $0x2a9] sm:$0xff] }
 0x3b4   :  { %3286 = vst.msk [vmem:[#allocation3 + $0x2d9] sm:$0xff] %vm116_vm12, %v3221_v61  ;;  %v3089_v27 = vmul.f32 %v7002_v46, %v8512_v10  ;;  %v2993_v60 = vpop.f32.mrb[57].mxu0  ;;  %v3513_v21 = vpack.c.bf16 %v3476_v11, %v3475_v2  ;;  %v3474_v20 = vld [vmem:[#allocation3 + $0x291] sm:$0xff]  ;;  %v3348_v26 = vld [vmem:[#allocation3 + $0x2a8] sm:$0xff] }
 0x3b5   :  { %3284 = vst.msk [vmem:[#allocation3 + $0x2c1] sm:$0xff] %vm116_vm12, %v3219_v41  ;;  %v3087_v30 = vmul.f32 %v8512_v10, %v2993_v60  ;;  %v7003_v17 = vpop.f32.mrb[58].mxu0  ;;  %v3512_v48 = vpack.c.bf16 %v3474_v20, %v3473_v13  ;;  %v3345_v24 = vld [vmem:[#allocation3 + $0x288] sm:$0xff]  ;;  %v3346_v40 = vld [vmem:[#allocation3 + $0x290] sm:$0xff]  ;;  %v8981_v2 = vpack.c.bf16 %v3348_v26, %v3347_v52  ;;  %v7182_v20 = vld [vmem:[%s10152_s2] ss:$0 sm:$0xff] }
 0x3b6   :  { %v8977_v57 = vadd.f32 %v8517_v35, %v3089_v27  ;;  %v3090_v61 = vmul.f32 %v7003_v17, %v8512_v10  ;;  %3603 = vrot.lane.b32.xlu0 %v3513_v21, %s7210_s18  ;;  %v2996_v46 = vpop.f32.mrb[59].mxu0  ;;  %v8983_v11 = vpack.c.bf16 %v3346_v40, %v3345_v24  ;;  %s7217_s2 = smov 40  }
 0x3b7   :  { %v8986_v41 = vadd.f32 %v8517_v35, %v3087_v30  ;;  %v3088_v60 = vmul.f32 %v8512_v10, %v2996_v46  ;;  %3601 = vrot.lane.b32.xlu1 %v3512_v48, %s7210_s18  ;;  %3417 = vst.msk [vmem:[#allocation4 + $0xd0] sm:$0xff] %vm116_vm12, %v8981_v2 }
 0x3b8   :  { %10244 = vst [vmem:[#allocation47_spill] sm:$0xff] %v8977_v57  ;;  %v3224_v13 = vmax.f32 %v8977_v57, 0.0  ;;  %v8992_v27 = vadd.f32 %v8517_v35, %v3090_v61  ;;  %3416 = vst.msk [vmem:[#allocation4 + $0xc8] sm:$0xff] %vm116_vm12, %v8983_v11 }
 0x3b9   :  { %10245 = vst [vmem:[#allocation48_spill] sm:$0xff] %v8986_v41  ;;  %v3222_v52 = vmax.f32 %v8986_v41, 0.0  ;;  %v9000_v40 = vadd.f32 %v8517_v35, %v3088_v60  ;;  %v3479_v24 = vld [vmem:[#allocation3 + $0x2d1] sm:$0xff] }
 0x3ba   :  { %10246 = vst [vmem:[#allocation49_spill] sm:$0xff] %v8992_v27  ;;  %3289 = vst.msk [vmem:[#allocation3 + $0x301] sm:$0xff] %vm116_vm12, %v3224_v13  ;;  %v3225_v10 = vmax.f32 %v8992_v27, 0.0  ;;  %v3477_v61 = vld [vmem:[#allocation3 + $0x2b9] sm:$0xff]  ;;  %v3351_v60 = vld [vmem:[#allocation3 + $0x2d0] sm:$0xff] }
 0x3bb   :  { %10247 = vst [vmem:[#allocation50_spill] sm:$0xff] %v9000_v40  ;;  %3287 = vst.msk [vmem:[#allocation3 + $0x2e9] sm:$0xff] %vm116_vm12, %v3222_v52  ;;  %v3223_v26 = vmax.f32 %v9000_v40, 0.0  ;;  %v7006_v17 = vpop.f32.mrb[60].mxu0  ;;  %v3480_v21 = vld [vmem:[#allocation3 + $0x2d9] sm:$0xff] }
 0x3bc   :  { %3290 = vst.msk [vmem:[#allocation3 + $0x309] sm:$0xff] %vm116_vm12, %v3225_v10  ;;  %v3093_v30 = vmul.f32 %v7182_v20, %v7006_v17  ;;  %v3009_v35 = vpop.f32.mrb[61].mxu0  ;;  %v3515_v48 = vpack.c.bf16 %v3480_v21, %v3479_v24  ;;  %v3478_v46 = vld [vmem:[#allocation3 + $0x2c1] sm:$0xff]  ;;  %v3352_v40 = vld [vmem:[#allocation3 + $0x2d8] sm:$0xff]  ;;  %v7183_v10 = vld [vmem:[%s10153_s3] ss:$0 sm:$0xff] }
 0x3bd   :  { %3288 = vst.msk [vmem:[#allocation3 + $0x2f1] sm:$0xff] %vm116_vm12, %v3223_v26  ;;  %v3091_v13 = vmul.f32 %v7182_v20, %v3009_v35  ;;  %v7007_v52 = vpop.f32.mrb[62].mxu0  ;;  %v3514_v27 = vpack.c.bf16 %v3478_v46, %v3477_v61  ;;  %v3349_v57 = vld [vmem:[#allocation3 + $0x2b8] sm:$0xff]  ;;  %v3350_v41 = vld [vmem:[#allocation3 + $0x2c0] sm:$0xff]  ;;  %v9017_v21 = vpack.c.bf16 %v3352_v40, %v3351_v60  ;;  %v3681_v60 = vld [vmem:[#allocation3 + $0xa] sm:$0xff] }
 0x3be   :  { %v9014_v47 = vadd.f32 %v7183_v10, %v3093_v30  ;;  %v3094_v17 = vmul.f32 %v7182_v20, %v7007_v52  ;;  %3607 = vrot.lane.b32.xlu0 %v3515_v48, %s7210_s18  ;;  %v3012_v24 = vpop.f32.mrb[63].mxu0  ;;  %v9019_v9 = vpack.c.bf16 %v3350_v41, %v3349_v57  ;;  %v3680_v41 = vld [vmem:[#allocation3 + $0x2] sm:$0xff] }
 0x3bf   :  { %v9021_v26 = vadd.f32 %v7183_v10, %v3091_v13  ;;  %v3092_v35 = vmul.f32 %v7182_v20, %v3012_v24  ;;  %3605 = vrot.lane.b32.xlu1 %v3514_v27, %s7210_s18  ;;  %3419 = vst.msk [vmem:[#allocation4 + $0xe0] sm:$0xff] %vm116_vm12, %v9017_v21 }
 0x3c0   :  { %10248 = vst [vmem:[#allocation51_spill] sm:$0xff] %v9014_v47  ;;  %v3228_v61 = vmax.f32 %v9014_v47, 0.0  ;;  %v9025_v46 = vadd.f32 %v7183_v10, %v3094_v17  ;;  %3418 = vst.msk [vmem:[#allocation4 + $0xd8] sm:$0xff] %vm116_vm12, %v9019_v9 }
 0x3c1   :  { %10249 = vst [vmem:[#allocation52_spill] sm:$0xff] %v9021_v26  ;;  %v3226_v40 = vmax.f32 %v9021_v26, 0.0  ;;  %v9032_v30 = vadd.f32 %v7183_v10, %v3092_v35  ;;  %v3483_v20 = vld [vmem:[#allocation3 + $0x301] sm:$0xff] }
 0x3c2   :  { %10250 = vst [vmem:[#allocation53_spill] sm:$0xff] %v9025_v46  ;;  %3293 = vst.msk [vmem:[#allocation3 + $0x331] sm:$0xff] %vm116_vm12, %v3228_v61  ;;  %v3229_v57 = vmax.f32 %v9025_v46, 0.0  ;;  %v3481_v52 = vld [vmem:[#allocation3 + $0x2e9] sm:$0xff]  ;;  %v3355_v24 = vld [vmem:[#allocation3 + $0x300] sm:$0xff] }
 0x3c3   :  { %10251 = vst [vmem:[#allocation54_spill] sm:$0xff] %v9032_v30  ;;  %3291 = vst.msk [vmem:[#allocation3 + $0x319] sm:$0xff] %vm116_vm12, %v3226_v40  ;;  %v3227_v27 = vmax.f32 %v9032_v30, 0.0  ;;  %v3484_v48 = vld [vmem:[#allocation3 + $0x309] sm:$0xff]  ;;  %v3744_v40 = vpack.c.bf16 %v3681_v60, %v3680_v41 }
 0x3c4   :  { %3294 = vst.msk [vmem:[#allocation3 + $0x339] sm:$0xff] %vm116_vm12, %v3229_v57  ;;  %v3517_v13 = vpack.c.bf16 %v3484_v48, %v3483_v20  ;;  %v3482_v17 = vld [vmem:[#allocation3 + $0x2f1] sm:$0xff]  ;;  %v3356_v35 = vld [vmem:[#allocation3 + $0x308] sm:$0xff]  ;;  %v3685_v48 = vld [vmem:[#allocation3 + $0x3a] sm:$0xff] }
 0x3c5   :  { %3292 = vst.msk [vmem:[#allocation3 + $0x321] sm:$0xff] %vm116_vm12, %v3227_v27  ;;  %v3516_v10 = vpack.c.bf16 %v3482_v17, %v3481_v52  ;;  %v3353_v61 = vld [vmem:[#allocation3 + $0x2e8] sm:$0xff]  ;;  %v3354_v46 = vld [vmem:[#allocation3 + $0x2f0] sm:$0xff]  ;;  %v9041_v47 = vpack.c.bf16 %v3356_v35, %v3355_v24  ;;  %v3682_v35 = vld [vmem:[#allocation3 + $0x1a] sm:$0xff] }
 0x3c6   :  { %3611 = vrot.lane.b32.xlu0 %v3517_v13, %s7210_s18  ;;  %v9043_v30 = vpack.c.bf16 %v3354_v46, %v3353_v61  ;;  %v3684_v20 = vld [vmem:[#allocation3 + $0x32] sm:$0xff]  ;;  %v3688_v13 = vld [vmem:[#allocation3 + $0x62] sm:$0xff]  ;;  %v3689_v17 = vld [vmem:[#allocation3 + $0x6a] sm:$0xff] }
 0x3c7   :  { %3609 = vrot.lane.b32.xlu1 %v3516_v10, %s7210_s18  ;;  %3421 = vst.msk [vmem:[#allocation4 + $0xf0] sm:$0xff] %vm116_vm12, %v9041_v47  ;;  %v3746_v46 = vpack.c.bf16 %v3685_v48, %v3684_v20  ;;  %v3683_v61 = vld [vmem:[#allocation3 + $0x22] sm:$0xff]  ;;  %v3692_v48 = vld [vmem:[#allocation3 + $0x92] sm:$0xff] }
 0x3c8   :  { %v3556_v57 = vpop.permute.xlu0 %3555  ;;  %3420 = vst.msk [vmem:[#allocation4 + $0xe8] sm:$0xff] %vm116_vm12, %v9043_v30  ;;  %v3745_v20 = vpack.c.bf16 %v3683_v61, %v3682_v35 }
 0x3c9   :  { %3650 = vst.msk [vmem:[#allocation4 + $0x10] sm:$0xff] %vm3647_vm0, %v3556_v57  ;;  %v3554_v27 = vpop.permute.xlu1 %3553 }
 0x3ca   :  { %3649 = vst.msk [vmem:[#allocation4 + $0x8] sm:$0xff] %vm3647_vm0, %v3554_v27  ;;  %3808 = vrot.lane.b32.xlu0 %v3744_v40, %s7212_s21  ;;  %v3485_v41 = vld [vmem:[#allocation3 + $0x319] sm:$0xff]  ;;  %v3748_v27 = vpack.c.bf16 %v3689_v17, %v3688_v13  ;;  %v3696_v13 = vld [vmem:[#allocation3 + $0xc2] sm:$0xff]  ;;  %v3697_v17 = vld [vmem:[#allocation3 + $0xca] sm:$0xff] }
 0x3cb   :  { %v3357_v24 = vld [vmem:[#allocation3 + $0x318] sm:$0xff]  ;;  %v3752_v61 = vpack.c.bf16 %v3697_v17, %v3696_v13  ;;  %v3699_v13 = vld [vmem:[#allocation3 + $0xe2] sm:$0xff] }
 0x3cc   :  { %v3486_v60 = vld [vmem:[#allocation3 + $0x321] sm:$0xff] }
 0x3cd   :  { %v3518_v52 = vpack.c.bf16 %v3486_v60, %v3485_v41  ;;  %v3358_v10 = vld [vmem:[#allocation3 + $0x320] sm:$0xff]  ;;  %v3687_v60 = vld [vmem:[#allocation3 + $0x52] sm:$0xff] }
 0x3ce   :  { %3812 = vrot.lane.b32.xlu0 %v3746_v46, %s7212_s21  ;;  %v9054_v57 = vpack.c.bf16 %v3358_v10, %v3357_v24  ;;  %v3693_v41 = vld [vmem:[#allocation3 + $0x9a] sm:$0xff]  ;;  %v3686_v46 = vld [vmem:[#allocation3 + $0x4a] sm:$0xff] }
 0x3cf   :  { %3613 = vrot.lane.b32.xlu1 %v3518_v52, %s7210_s18  ;;  %v3750_v52 = vpack.c.bf16 %v3693_v41, %v3692_v48  ;;  %v3747_v24 = vpack.c.bf16 %v3687_v60, %v3686_v46  ;;  %v3690_v10 = vld [vmem:[#allocation3 + $0x7a] sm:$0xff]  ;;  %v3695_v48 = vld [vmem:[#allocation3 + $0xb2] sm:$0xff]  ;;  %v3754_v41 = vpack.c.bf16 %v3701_v36, %v3700_v59  ;;  %v3704_v60 = vld [vmem:[#allocation3 + $0x122] sm:$0xff] }
 0x3d0   :  { %v3560_v26 = vpop.permute.xlu0 %3559  ;;  %3422 = vst.msk [vmem:[#allocation4 + $0xf8] sm:$0xff] %vm116_vm12, %v9054_v57  ;;  %v3702_v36 = vld [vmem:[#allocation3 + $0x10a] sm:$0xff]  ;;  %v3703_v59 = vld [vmem:[#allocation3 + $0x112] sm:$0xff] }
 0x3d1   :  { %3652 = vst.msk [vmem:[#allocation4 + $0x20] sm:$0xff] %vm3647_vm0, %v3560_v26  ;;  %v3558_v40 = vpop.permute.xlu1 %3557  ;;  %v3691_v26 = vld [vmem:[#allocation3 + $0x82] sm:$0xff] }
 0x3d2   :  { %3651 = vst.msk [vmem:[#allocation4 + $0x18] sm:$0xff] %vm3647_vm0, %v3558_v40  ;;  %3816 = vrot.lane.b32.xlu0 %v3748_v27, %s7212_s21  ;;  %v3749_v27 = vpack.c.bf16 %v3691_v26, %v3690_v10 }
 0x3d3   :  { %3810 = vrot.lane.b32.xlu1 %v3745_v20, %s7212_s21  ;;  %v3694_v20 = vld [vmem:[#allocation3 + $0xaa] sm:$0xff] }
 0x3d4   :  { %v3751_v46 = vpack.c.bf16 %v3695_v48, %v3694_v20  ;;  %v3713_v20 = vld [vmem:[#allocation3 + $0x1ba] sm:$0xff] }
 0x3d6   :  { %3820 = vrot.lane.b32.xlu0 %v3750_v52, %s7212_s21  ;;  %v3705_v52 = vld [vmem:[#allocation3 + $0x12a] sm:$0xff] }
 0x3d7   :  { %3814 = vrot.lane.b32.xlu1 %v3747_v24, %s7212_s21  ;;  %v3698_v24 = vld [vmem:[#allocation3 + $0xda] sm:$0xff]  ;;  %v3756_v10 = vpack.c.bf16 %v3705_v52, %v3704_v60  ;;  %v3707_v52 = vld [vmem:[#allocation3 + $0x142] sm:$0xff] }
 0x3d8   :  { %v3564_v35 = vpop.permute.xlu0 %3563  ;;  %v3706_v60 = vld [vmem:[#allocation3 + $0x13a] sm:$0xff] }
 0x3d9   :  { %3654 = vst.msk [vmem:[#allocation4 + $0x30] sm:$0xff] %vm3647_vm0, %v3564_v35  ;;  %v3562_v40 = vpop.permute.xlu1 %3561  ;;  %v3753_v35 = vpack.c.bf16 %v3699_v13, %v3698_v24 }
 0x3da   :  { %3653 = vst.msk [vmem:[#allocation4 + $0x28] sm:$0xff] %vm3647_vm0, %v3562_v40  ;;  %3824 = vrot.lane.b32.xlu0 %v3752_v61, %s7212_s21  ;;  %v3708_v61 = vld [vmem:[#allocation3 + $0x152] sm:$0xff]  ;;  %v3709_v40 = vld [vmem:[#allocation3 + $0x15a] sm:$0xff] }
 0x3db   :  { %3818 = vrot.lane.b32.xlu1 %v3749_v27, %s7212_s21  ;;  %v3712_v27 = vld [vmem:[#allocation3 + $0x1b2] sm:$0xff]  ;;  %v3758_v48 = vpack.c.bf16 %v3709_v40, %v3708_v61 }
 0x3dc   :  { %v3711_v61 = vld [vmem:[#allocation3 + $0x172] sm:$0xff] }
 0x3de   :  { %3828 = vrot.lane.b32.xlu0 %v3754_v41, %s7212_s21  ;;  %v3755_v41 = vpack.c.bf16 %v3703_v59, %v3702_v36  ;;  %v3720_v59 = vld [vmem:[#allocation3 + $0x212] sm:$0xff] }
 0x3df   :  { %3822 = vrot.lane.b32.xlu1 %v3751_v46, %s7212_s21  ;;  %v3760_v46 = vpack.c.bf16 %v3713_v20, %v3712_v27  ;;  %v3721_v27 = vld [vmem:[#allocation3 + $0x21a] sm:$0xff]  ;;  %v3714_v20 = vld [vmem:[#allocation3 + $0x1ca] sm:$0xff] }
 0x3e0   :  { %v3568_v17 = vpop.permute.xlu0 %3567 }
 0x3e1   :  { %3656 = vst.msk [vmem:[#allocation4 + $0x40] sm:$0xff] %vm3647_vm0, %v3568_v17  ;;  %v3566_v26 = vpop.permute.xlu1 %3565  ;;  %v3757_v17 = vpack.c.bf16 %v3707_v52, %v3706_v60  ;;  %v3764_v60 = vpack.c.bf16 %v3721_v27, %v3720_v59  ;;  %v3723_v59 = vld [vmem:[#allocation3 + $0x232] sm:$0xff] }
 0x3e2   :  { %3655 = vst.msk [vmem:[#allocation4 + $0x38] sm:$0xff] %vm3647_vm0, %v3566_v26  ;;  %3832 = vrot.lane.b32.xlu0 %v3756_v10, %s7212_s21  ;;  %v3716_v10 = vld [vmem:[#allocation3 + $0x1e2] sm:$0xff]  ;;  %v3717_v26 = vld [vmem:[#allocation3 + $0x1ea] sm:$0xff] }
 0x3e3   :  { %3826 = vrot.lane.b32.xlu1 %v3753_v35, %s7212_s21  ;;  %v3710_v35 = vld [vmem:[#allocation3 + $0x16a] sm:$0xff]  ;;  %v3762_v40 = vpack.c.bf16 %v3717_v26, %v3716_v10  ;;  %v3719_v10 = vld [vmem:[#allocation3 + $0x202] sm:$0xff] }
 0x3e4   :  { %v3759_v36 = vpack.c.bf16 %v3711_v61, %v3710_v35  ;;  %v3728_v61 = vld [vmem:[#allocation3 + $0x272] sm:$0xff] }
 0x3e6   :  { %3836 = vrot.lane.b32.xlu0 %v3758_v48, %s7212_s21  ;;  %v3715_v48 = vld [vmem:[#allocation3 + $0x1d2] sm:$0xff] }
 0x3e7   :  { %3830 = vrot.lane.b32.xlu1 %v3755_v41, %s7212_s21 }
 0x3e8   :  { %v3572_v24 = vpop.permute.xlu0 %3571 }
 0x3e9   :  { %3658 = vst.msk [vmem:[#allocation4 + $0x50] sm:$0xff] %vm3647_vm0, %v3572_v24  ;;  %v3570_v13 = vpop.permute.xlu1 %3569  ;;  %v3724_v24 = vld [vmem:[#allocation3 + $0x242] sm:$0xff] }
 0x3ea   :  { %3657 = vst.msk [vmem:[#allocation4 + $0x48] sm:$0xff] %vm3647_vm0, %v3570_v13  ;;  %3840 = vrot.lane.b32.xlu0 %v3760_v46, %s7212_s21  ;;  %v3761_v46 = vpack.c.bf16 %v3715_v48, %v3714_v20  ;;  %v3725_v13 = vld [vmem:[#allocation3 + $0x24a] sm:$0xff] }
 0x3eb   :  { %3834 = vrot.lane.b32.xlu1 %v3757_v17, %s7212_s21  ;;  %v3718_v17 = vld [vmem:[#allocation3 + $0x1fa] sm:$0xff]  ;;  %v3766_v26 = vpack.c.bf16 %v3725_v13, %v3724_v24  ;;  %v3727_v24 = vld [vmem:[#allocation3 + $0x262] sm:$0xff] }
 0x3ec   :  { %v3763_v35 = vpack.c.bf16 %v3719_v10, %v3718_v17 }
 0x3ee   :  { %3844 = vrot.lane.b32.xlu0 %v3762_v40, %s7212_s21  ;;  %v3729_v40 = vld [vmem:[#allocation3 + $0x27a] sm:$0xff] }
 0x3ef   :  { %3838 = vrot.lane.b32.xlu1 %v3759_v36, %s7212_s21  ;;  %v3722_v36 = vld [vmem:[#allocation3 + $0x22a] sm:$0xff]  ;;  %v3768_v20 = vpack.c.bf16 %v3729_v40, %v3728_v61  ;;  %v3731_v40 = vld [vmem:[#allocation3 + $0x292] sm:$0xff] }
 0x3f0   :  { %v3576_v41 = vpop.permute.xlu0 %3575  ;;  %v3730_v61 = vld [vmem:[#allocation3 + $0x28a] sm:$0xff] }
 0x3f1   :  { %3660 = vst.msk [vmem:[#allocation4 + $0x60] sm:$0xff] %vm3647_vm0, %v3576_v41  ;;  %v3574_v52 = vpop.permute.xlu1 %3573  ;;  %v3765_v41 = vpack.c.bf16 %v3723_v59, %v3722_v36 }
 0x3f2   :  { %3659 = vst.msk [vmem:[#allocation4 + $0x58] sm:$0xff] %vm3647_vm0, %v3574_v52  ;;  %3848 = vrot.lane.b32.xlu0 %v3764_v60, %s7212_s21  ;;  %v3732_v60 = vld [vmem:[#allocation3 + $0x2a2] sm:$0xff]  ;;  %v3733_v52 = vld [vmem:[#allocation3 + $0x2aa] sm:$0xff] }
 0x3f3   :  { %3842 = vrot.lane.b32.xlu1 %v3761_v46, %s7212_s21  ;;  %v3726_v46 = vld [vmem:[#allocation3 + $0x25a] sm:$0xff]  ;;  %v3770_v13 = vpack.c.bf16 %v3733_v52, %v3732_v60  ;;  %v3735_v60 = vld [vmem:[#allocation3 + $0x2c2] sm:$0xff] }
 0x3f4   :  { %v3767_v10 = vpack.c.bf16 %v3727_v24, %v3726_v46  ;;  %v3738_v24 = vld [vmem:[#allocation3 + $0x2ea] sm:$0xff] }
 0x3f6   :  { %3852 = vrot.lane.b32.xlu0 %v3766_v26, %s7212_s21  ;;  %v3736_v26 = vld [vmem:[#allocation3 + $0x2d2] sm:$0xff] }
 0x3f7   :  { %3846 = vrot.lane.b32.xlu1 %v3763_v35, %s7212_s21  ;;  %v3737_v35 = vld [vmem:[#allocation3 + $0x2da] sm:$0xff] }
 0x3f8   :  { %v3580_v27 = vpop.permute.xlu0 %3579  ;;  %v3772_v36 = vpack.c.bf16 %v3737_v35, %v3736_v26  ;;  %v3742_v35 = vld [vmem:[#allocation3 + $0x31a] sm:$0xff] }
 0x3f9   :  { %3662 = vst.msk [vmem:[#allocation4 + $0x70] sm:$0xff] %vm3647_vm0, %v3580_v27  ;;  %v3578_v48 = vpop.permute.xlu1 %3577  ;;  %v3769_v27 = vpack.c.bf16 %v3731_v40, %v3730_v61  ;;  %v3743_v61 = vld [vmem:[#allocation3 + $0x322] sm:$0xff] }
 0x3fa   :  { %3661 = vst.msk [vmem:[#allocation4 + $0x68] sm:$0xff] %vm3647_vm0, %v3578_v48  ;;  %3856 = vrot.lane.b32.xlu0 %v3768_v20, %s7212_s21  ;;  %v3740_v20 = vld [vmem:[#allocation3 + $0x302] sm:$0xff]  ;;  %v3741_v48 = vld [vmem:[#allocation3 + $0x30a] sm:$0xff]  ;;  %v3775_v40 = vpack.c.bf16 %v3743_v61, %v3742_v35 }
 0x3fb   :  { %3850 = vrot.lane.b32.xlu1 %v3765_v41, %s7212_s21  ;;  %v3734_v41 = vld [vmem:[#allocation3 + $0x2ba] sm:$0xff]  ;;  %v3774_v52 = vpack.c.bf16 %v3741_v48, %v3740_v20 }
 0x3fc   :  { %v3584_v17 = vpop.permute.xlu0 %3583  ;;  %v3771_v46 = vpack.c.bf16 %v3735_v60, %v3734_v41  ;;  %v4203_v48 = vld [vmem:[#allocation3 + $0x81] sm:$0xff]  ;;  %v4197_v41 = vld [vmem:[#allocation3 + $0x39] sm:$0xff] }
 0x3fd   :  { %3664 = vst.msk [vmem:[#allocation4 + $0x80] sm:$0xff] %vm3647_vm0, %v3584_v17  ;;  %v4202_v60 = vld [vmem:[#allocation3 + $0x79] sm:$0xff] }
 0x3fe   :  { %3860 = vrot.lane.b32.xlu0 %v3770_v13, %s7212_s21  ;;  %v3739_v13 = vld [vmem:[#allocation3 + $0x2f2] sm:$0xff] }
 0x3ff   :  { %3854 = vrot.lane.b32.xlu1 %v3767_v10, %s7212_s21  ;;  %v3773_v26 = vpack.c.bf16 %v3739_v13, %v3738_v24 }
 0x401   :  { %v3582_v59 = vpop.permute.xlu1 %3581 }
 0x402   :  { %3663 = vst.msk [vmem:[#allocation4 + $0x78] sm:$0xff] %vm3647_vm0, %v3582_v59  ;;  %3864 = vrot.lane.b32.xlu0 %v3772_v36, %s7212_s21 }
 0x403   :  { %3858 = vrot.lane.b32.xlu1 %v3769_v27, %s7212_s21 }
 0x406   :  { %3868 = vrot.lane.b32.xlu0 %v3774_v52, %s7212_s21  ;;  %v9193_v52 = vpack.c.bf16 %v4203_v48, %v4202_v60  ;;  %v4227_v60 = vld [vmem:[#allocation3 + $0x1d1] sm:$0xff] }
 0x407   :  { %3862 = vrot.lane.b32.xlu1 %v3771_v46, %s7212_s21  ;;  %v4196_v46 = vld [vmem:[#allocation3 + $0x31] sm:$0xff] }
 0x408   :  { %v3588_v17 = vpop.permute.xlu0 %3587  ;;  %v9196_v13 = vpack.c.bf16 %v4197_v41, %v4196_v46  ;;  %v4226_v46 = vld [vmem:[#allocation3 + $0x1c9] sm:$0xff] }
 0x409   :  { %3666 = vst.msk [vmem:[#allocation4 + $0x90] sm:$0xff] %vm3647_vm0, %v3588_v17  ;;  %v3586_v10 = vpop.permute.xlu1 %3585  ;;  %v4207_v17 = vld [vmem:[#allocation3 + $0xb1] sm:$0xff] }
 0x40a   :  { %3665 = vst.msk [vmem:[#allocation4 + $0x88] sm:$0xff] %vm3647_vm0, %v3586_v10  ;;  %4065 = vrot.lane.b32.xlu0 %v8573_v62, %s7214_s23  ;;  %v4201_v10 = vld [vmem:[#allocation3 + $0x69] sm:$0xff] }
 0x40b   :  { %3866 = vrot.lane.b32.xlu1 %v3773_v26, %s7212_s21  ;;  %v4206_v26 = vld [vmem:[#allocation3 + $0xa9] sm:$0xff] }
 0x40c   :  { %v9203_v61 = vpack.c.bf16 %v4207_v17, %v4206_v26  ;;  %v4274_v17 = vpack.c.bf16 %v4227_v60, %v4226_v46  ;;  %v4236_v60 = vld [vmem:[#allocation3 + $0x241] sm:$0xff] }
 0x40e   :  { %4069 = vrot.lane.b32.xlu0 %v8607_v22, %s7214_s23 }
 0x40f   :  { %3870 = vrot.lane.b32.xlu1 %v3775_v40, %s7212_s21  ;;  %v4200_v40 = vld [vmem:[#allocation3 + $0x61] sm:$0xff] }
 0x410   :  { %v3592_v36 = vpop.permute.xlu0 %3591 }
 0x411   :  { %3668 = vst.msk [vmem:[#allocation4 + $0xa0] sm:$0xff] %vm3647_vm0, %v3592_v36  ;;  %v3590_v59 = vpop.permute.xlu1 %3589 }
 0x412   :  { %3667 = vst.msk [vmem:[#allocation4 + $0x98] sm:$0xff] %vm3647_vm0, %v3590_v59  ;;  %4073 = vrot.lane.b32.xlu0 %v8641_v7, %s7214_s23  ;;  %v9206_v59 = vpack.c.bf16 %v4201_v10, %v4200_v40  ;;  %v4220_v10 = vld [vmem:[#allocation3 + $0x151] sm:$0xff]  ;;  %v4231_v40 = vld [vmem:[#allocation3 + $0x201] sm:$0xff] }
 0x413   :  { %4067 = vrot.lane.b32.xlu1 %v8569_v63, %s7214_s23 }
 0x416   :  { %4077 = vrot.lane.b32.xlu0 %v8680_v55, %s7214_s23  ;;  %v3967_v55 = vld [vmem:[#allocation3 + $0x180] sm:$0xff] }
 0x417   :  { %4071 = vrot.lane.b32.xlu1 %v8603_v44, %s7214_s23 }
 0x418   :  { %v3596_v62 = vpop.permute.xlu0 %3595 }
 0x419   :  { %3670 = vst.msk [vmem:[#allocation4 + $0xb0] sm:$0xff] %vm3647_vm0, %v3596_v62  ;;  %v3594_v22 = vpop.permute.xlu1 %3593  ;;  %v4211_v62 = vld [vmem:[#allocation3 + $0xe1] sm:$0xff] }
 0x41a   :  { %3669 = vst.msk [vmem:[#allocation4 + $0xa8] sm:$0xff] %vm3647_vm0, %v3594_v22  ;;  %4081 = vrot.lane.b32.xlu0 %v8714_v38, %s7214_s23  ;;  %v4205_v22 = vld [vmem:[#allocation3 + $0x99] sm:$0xff] }
 0x41b   :  { %4075 = vrot.lane.b32.xlu1 %v8639_v5, %s7214_s23 }
 0x41e   :  { %4085 = vrot.lane.b32.xlu0 %v8748_v45, %s7214_s23 }
 0x41f   :  { %4079 = vrot.lane.b32.xlu1 %v8678_v54, %s7214_s23  ;;  %v3968_v54 = vld [vmem:[#allocation3 + $0x188] sm:$0xff] }
 0x420   :  { %v3600_v63 = vpop.permute.xlu0 %3599 }
 0x421   :  { %3672 = vst.msk [vmem:[#allocation4 + $0xc0] sm:$0xff] %vm3647_vm0, %v3600_v63  ;;  %v3598_v44 = vpop.permute.xlu1 %3597  ;;  %v4210_v63 = vld [vmem:[#allocation3 + $0xd9] sm:$0xff] }
 0x422   :  { %3671 = vst.msk [vmem:[#allocation4 + $0xb8] sm:$0xff] %vm3647_vm0, %v3598_v44  ;;  %4089 = vrot.lane.b32.xlu0 %v8782_v19, %s7214_s23 }
 0x423   :  { %4083 = vrot.lane.b32.xlu1 %v8712_v32, %s7214_s23  ;;  %v4016_v32 = vpack.c.bf16 %v3968_v54, %v3967_v55 }
 0x426   :  { %4093 = vrot.lane.b32.xlu0 %v8815_v43, %s7214_s23 }
 0x427   :  { %4087 = vrot.lane.b32.xlu1 %v8746_v31, %s7214_s23 }
 0x428   :  { %v3604_v5 = vpop.permute.xlu0 %3603 }
 0x429   :  { %3674 = vst.msk [vmem:[#allocation4 + $0xd0] sm:$0xff] %vm3647_vm0, %v3604_v5  ;;  %v3602_v7 = vpop.permute.xlu1 %3601  ;;  %v9213_v5 = vpack.c.bf16 %v4211_v62, %v4210_v63  ;;  %v4230_v62 = vld [vmem:[#allocation3 + $0x1f9] sm:$0xff] }
 0x42a   :  { %3673 = vst.msk [vmem:[#allocation4 + $0xc8] sm:$0xff] %vm3647_vm0, %v3602_v7  ;;  %4097 = vrot.lane.b32.xlu0 %v8847_v12, %s7214_s23  ;;  %v4204_v7 = vld [vmem:[#allocation3 + $0x91] sm:$0xff]  ;;  %v4276_v63 = vpack.c.bf16 %v4231_v40, %v4230_v62 }
 0x42b   :  { %4091 = vrot.lane.b32.xlu1 %v8780_v0, %s7214_s23  ;;  %v9216_v55 = vpack.c.bf16 %v4205_v22, %v4204_v7  ;;  %v4240_v40 = vld [vmem:[#allocation3 + $0x271] sm:$0xff] }
 0x42e   :  { %4101 = vrot.lane.b32.xlu0 %v8881_v15, %s7214_s23  ;;  %v4194_v15 = vld [vmem:[#allocation3 + $0x19] sm:$0xff] }
 0x42f   :  { %4095 = vrot.lane.b32.xlu1 %v4016_v32, %s7214_s23  ;;  %v4215_v32 = vld [vmem:[#allocation3 + $0x111] sm:$0xff] }
 0x430   :  { %v3608_v38 = vpop.permute.xlu0 %3607 }
 0x431   :  { %3676 = vst.msk [vmem:[#allocation4 + $0xe0] sm:$0xff] %vm3647_vm0, %v3608_v38  ;;  %v3606_v31 = vpop.permute.xlu1 %3605  ;;  %v4209_v38 = vld [vmem:[#allocation3 + $0xc9] sm:$0xff] }
 0x432   :  { %3675 = vst.msk [vmem:[#allocation4 + $0xd8] sm:$0xff] %vm3647_vm0, %v3606_v31  ;;  %4105 = vrot.lane.b32.xlu0 %v8915_v16, %s7214_s23  ;;  %v4214_v31 = vld [vmem:[#allocation3 + $0x109] sm:$0xff] }
 0x433   :  { %4099 = vrot.lane.b32.xlu1 %v8845_v56, %s7214_s23 }
 0x436   :  { %4109 = vrot.lane.b32.xlu0 %v8949_v51, %s7214_s23  ;;  %v4199_v51 = vld [vmem:[#allocation3 + $0x51] sm:$0xff] }
 0x437   :  { %4103 = vrot.lane.b32.xlu1 %v8879_v34, %s7214_s23 }
 0x438   :  { %v3612_v45 = vpop.permute.xlu0 %3611 }
 0x439   :  { %3678 = vst.msk [vmem:[#allocation4 + $0xf0] sm:$0xff] %vm3647_vm0, %v3612_v45  ;;  %v3610_v0 = vpop.permute.xlu1 %3609 }
 0x43a   :  { %3677 = vst.msk [vmem:[#allocation4 + $0xe8] sm:$0xff] %vm3647_vm0, %v3610_v0  ;;  %4113 = vrot.lane.b32.xlu0 %v8983_v11, %s7214_s23  ;;  %v4198_v11 = vld [vmem:[#allocation3 + $0x49] sm:$0xff]  ;;  %v4268_v0 = vpack.c.bf16 %v4215_v32, %v4214_v31  ;;  %v4235_v32 = vld [vmem:[#allocation3 + $0x231] sm:$0xff] }
 0x43b   :  { %4107 = vrot.lane.b32.xlu1 %v8913_v53, %s7214_s23  ;;  %v4234_v31 = vld [vmem:[#allocation3 + $0x229] sm:$0xff] }
 0x43c   :  { %v3809_v19 = vpop.permute.xlu0 %3808 }
 0x43d   :  { %3905 = vst.msk [vmem:[#allocation4] sm:$0xff] %vm3904_vm1, %v3809_v19  ;;  %v4208_v19 = vld [vmem:[#allocation3 + $0xc1] sm:$0xff] }
 0x43e   :  { %4117 = vrot.lane.b32.xlu0 %v9019_v9, %s7214_s23  ;;  %v4195_v9 = vld [vmem:[#allocation3 + $0x21] sm:$0xff] }
 0x43f   :  { %4111 = vrot.lane.b32.xlu1 %v8947_v49, %s7214_s23  ;;  %v4258_v16 = vpack.c.bf16 %v4195_v9, %v4194_v15  ;;  %v4218_v9 = vld [vmem:[#allocation3 + $0x139] sm:$0xff] }
 0x440   :  { %v3813_v43 = vpop.permute.xlu0 %3812 }
 0x441   :  { %3907 = vst.msk [vmem:[#allocation4 + $0x10] sm:$0xff] %vm3904_vm1, %v3813_v43  ;;  %v3614_v56 = vpop.permute.xlu1 %3613 }
 0x442   :  { %3679 = vst.msk [vmem:[#allocation4 + $0xf8] sm:$0xff] %vm3647_vm0, %v3614_v56  ;;  %4121 = vrot.lane.b32.xlu0 %v9043_v30, %s7214_s23  ;;  %v9224_v56 = vpack.c.bf16 %v4209_v38, %v4208_v19  ;;  %v4229_v38 = vld [vmem:[#allocation3 + $0x1e9] sm:$0xff]  ;;  %v4228_v19 = vld [vmem:[#allocation3 + $0x1e1] sm:$0xff] }
 0x443   :  { %4115 = vrot.lane.b32.xlu1 %v8981_v2, %s7214_s23  ;;  %v4000_v2 = vld [vmem:[#allocation3 + $0x338] sm:$0xff] }
 0x444   :  { %v3817_v12 = vpop.permute.xlu0 %3816 }
 0x445   :  { %3909 = vst.msk [vmem:[#allocation4 + $0x20] sm:$0xff] %vm3904_vm1, %v3817_v12  ;;  %v3811_v34 = vpop.permute.xlu1 %3810  ;;  %v4219_v12 = vld [vmem:[#allocation3 + $0x141] sm:$0xff] }
 0x446   :  { %3906 = vst.msk [vmem:[#allocation4 + $0x8] sm:$0xff] %vm3904_vm1, %v3811_v34  ;;  %4125 = vrot.lane.b32.xlu0 %v9054_v57, %s7214_s23  ;;  %v9186_v57 = vpack.c.bf16 %v4199_v51, %v4198_v11  ;;  %v4213_v34 = vld [vmem:[#allocation3 + $0xf9] sm:$0xff]  ;;  %v4217_v11 = vld [vmem:[#allocation3 + $0x129] sm:$0xff] }
 0x447   :  { %4119 = vrot.lane.b32.xlu1 %v9017_v21, %s7214_s23  ;;  %v3999_v21 = vld [vmem:[#allocation3 + $0x330] sm:$0xff] }
 0x448   :  { %v3821_v53 = vpop.permute.xlu0 %3820  ;;  %v4032_v20 = vpack.c.bf16 %v4000_v2, %v3999_v21  ;;  %v4223_v2 = vld [vmem:[#allocation3 + $0x171] sm:$0xff] }
 0x449   :  { %3911 = vst.msk [vmem:[#allocation4 + $0x30] sm:$0xff] %vm3904_vm1, %v3821_v53  ;;  %v3815_v49 = vpop.permute.xlu1 %3814  ;;  %v4270_v53 = vpack.c.bf16 %v4219_v12, %v4218_v9  ;;  %v4275_v12 = vpack.c.bf16 %v4229_v38, %v4228_v19  ;;  %v4233_v9 = vld [vmem:[#allocation3 + $0x219] sm:$0xff] }
 0x44a   :  { %3908 = vst.msk [vmem:[#allocation4 + $0x18] sm:$0xff] %vm3904_vm1, %v3815_v49  ;;  %4322 = vrot.lane.b32.xlu0 %v4258_v16, %s7216_s1  ;;  %v4212_v16 = vld [vmem:[#allocation3 + $0xf1] sm:$0xff]  ;;  %v4254_v19 = vld [vmem:[#allocation3 + $0x319] sm:$0xff] }
 0x44b   :  { %4123 = vrot.lane.b32.xlu1 %v9041_v47, %s7214_s23  ;;  %v9231_v51 = vpack.c.bf16 %v4213_v34, %v4212_v16  ;;  %v4239_v34 = vld [vmem:[#allocation3 + $0x261] sm:$0xff] }
 0x44c   :  { %v3825_v30 = vpop.permute.xlu0 %3824 }
 0x44d   :  { %3913 = vst.msk [vmem:[#allocation4 + $0x40] sm:$0xff] %vm3904_vm1, %v3825_v30  ;;  %v3819_v27 = vpop.permute.xlu1 %3818  ;;  %v4222_v30 = vld [vmem:[#allocation3 + $0x169] sm:$0xff] }
 0x44e   :  { %3910 = vst.msk [vmem:[#allocation4 + $0x28] sm:$0xff] %vm3904_vm1, %v3819_v27  ;;  %4326 = vrot.lane.b32.xlu0 %v9186_v57, %s7216_s1  ;;  %v4272_v27 = vpack.c.bf16 %v4223_v2, %v4222_v30  ;;  %v4243_v30 = vld [vmem:[#allocation3 + $0x291] sm:$0xff] }
 0x44f   :  { %4127 = vrot.lane.b32.xlu1 %v4032_v20, %s7214_s23  ;;  %v4216_v20 = vld [vmem:[#allocation3 + $0x121] sm:$0xff] }
 0x450   :  { %v3829_v47 = vpop.permute.xlu0 %3828  ;;  %v9238_v41 = vpack.c.bf16 %v4217_v11, %v4216_v20 }
 0x451   :  { %3915 = vst.msk [vmem:[#allocation4 + $0x50] sm:$0xff] %vm3904_vm1, %v3829_v47  ;;  %v3823_v24 = vpop.permute.xlu1 %3822  ;;  %v4221_v47 = vld [vmem:[#allocation3 + $0x159] sm:$0xff] }
 0x452   :  { %3912 = vst.msk [vmem:[#allocation4 + $0x38] sm:$0xff] %vm3904_vm1, %v3823_v24  ;;  %4330 = vrot.lane.b32.xlu0 %v9193_v52, %s7216_s1 }
 0x453   :  { %4324 = vrot.lane.b32.xlu1 %v9196_v13, %s7216_s1 }
 0x454   :  { %v3833_v35 = vpop.permute.xlu0 %3832 }
 0x455   :  { %3917 = vst.msk [vmem:[#allocation4 + $0x60] sm:$0xff] %vm3904_vm1, %v3833_v35  ;;  %v3827_v36 = vpop.permute.xlu1 %3826  ;;  %v4271_v35 = vpack.c.bf16 %v4221_v47, %v4220_v10  ;;  %v4246_v10 = vld [vmem:[#allocation3 + $0x2b9] sm:$0xff] }
 0x456   :  { %3914 = vst.msk [vmem:[#allocation4 + $0x48] sm:$0xff] %vm3904_vm1, %v3827_v36  ;;  %4334 = vrot.lane.b32.xlu0 %v9203_v61, %s7216_s1  ;;  %v4225_v36 = vld [vmem:[#allocation3 + $0x189] sm:$0xff] }
 0x457   :  { %4328 = vrot.lane.b32.xlu1 %v9206_v59, %s7216_s1 }
 0x458   :  { %v3837_v44 = vpop.permute.xlu0 %3836 }
 0x459   :  { %3919 = vst.msk [vmem:[#allocation4 + $0x70] sm:$0xff] %vm3904_vm1, %v3837_v44  ;;  %v3831_v54 = vpop.permute.xlu1 %3830  ;;  %v4224_v44 = vld [vmem:[#allocation3 + $0x181] sm:$0xff] }
 0x45a   :  { %3916 = vst.msk [vmem:[#allocation4 + $0x58] sm:$0xff] %vm3904_vm1, %v3831_v54  ;;  %4338 = vrot.lane.b32.xlu0 %v9213_v5, %s7216_s1  ;;  %v4273_v54 = vpack.c.bf16 %v4225_v36, %v4224_v44  ;;  %v4250_v44 = vld [vmem:[#allocation3 + $0x2e9] sm:$0xff] }
 0x45b   :  { %4332 = vrot.lane.b32.xlu1 %v9216_v55, %s7216_s1 }
 0x45c   :  { %v3841_v45 = vpop.permute.xlu0 %3840 }
 0x45d   :  { %3921 = vst.msk [vmem:[#allocation4 + $0x80] sm:$0xff] %vm3904_vm1, %v3841_v45  ;;  %v3835_v43 = vpop.permute.xlu1 %3834 }
 0x45e   :  { %3918 = vst.msk [vmem:[#allocation4 + $0x68] sm:$0xff] %vm3904_vm1, %v3835_v43  ;;  %4342 = vrot.lane.b32.xlu0 %v4268_v0, %s7216_s1  ;;  %v4278_v0 = vpack.c.bf16 %v4235_v32, %v4234_v31  ;;  %v4244_v32 = vld [vmem:[#allocation3 + $0x2a1] sm:$0xff] }
 0x45f   :  { %4336 = vrot.lane.b32.xlu1 %v9224_v56, %s7216_s1 }
 0x460   :  { %v3845_v15 = vpop.permute.xlu0 %3844 }
 0x461   :  { %3923 = vst.msk [vmem:[#allocation4 + $0x90] sm:$0xff] %vm3904_vm1, %v3845_v15  ;;  %v3839_v49 = vpop.permute.xlu1 %3838  ;;  %v4238_v15 = vld [vmem:[#allocation3 + $0x259] sm:$0xff] }
 0x462   :  { %3920 = vst.msk [vmem:[#allocation4 + $0x78] sm:$0xff] %vm3904_vm1, %v3839_v49  ;;  %4346 = vrot.lane.b32.xlu0 %v4270_v53, %s7216_s1  ;;  %v4280_v16 = vpack.c.bf16 %v4239_v34, %v4238_v15  ;;  %v4232_v49 = vld [vmem:[#allocation3 + $0x211] sm:$0xff] }
 0x463   :  { %4340 = vrot.lane.b32.xlu1 %v9231_v51, %s7216_s1  ;;  %v4277_v11 = vpack.c.bf16 %v4233_v9, %v4232_v49  ;;  %v4248_v34 = vld [vmem:[#allocation3 + $0x2d1] sm:$0xff]  ;;  %v4253_v49 = vld [vmem:[#allocation3 + $0x309] sm:$0xff] }
 0x464   :  { %v3849_v21 = vpop.permute.xlu0 %3848 }
 0x465   :  { %3925 = vst.msk [vmem:[#allocation4 + $0xa0] sm:$0xff] %vm3904_vm1, %v3849_v21  ;;  %v3843_v48 = vpop.permute.xlu1 %3842  ;;  %v4237_v21 = vld [vmem:[#allocation3 + $0x249] sm:$0xff] }
 0x466   :  { %3922 = vst.msk [vmem:[#allocation4 + $0x88] sm:$0xff] %vm3904_vm1, %v3843_v48  ;;  %4350 = vrot.lane.b32.xlu0 %v4272_v27, %s7216_s1  ;;  %v4242_v27 = vld [vmem:[#allocation3 + $0x289] sm:$0xff]  ;;  %v4279_v46 = vpack.c.bf16 %v4237_v21, %v4236_v60  ;;  %v4257_v60 = vld [vmem:[#allocation3 + $0x339] sm:$0xff] }
 0x467   :  { %4344 = vrot.lane.b32.xlu1 %v9238_v41, %s7216_s1  ;;  %v4282_v48 = vpack.c.bf16 %v4243_v30, %v4242_v27  ;;  %v4252_v30 = vld [vmem:[#allocation3 + $0x301] sm:$0xff] }
 0x468   :  { %v3853_v24 = vpop.permute.xlu0 %3852  ;;  %v4287_v27 = vpack.c.bf16 %v4253_v49, %v4252_v30  ;;  %v4465_v30 = vld [vmem:[#allocation3 + $0xc2] sm:$0xff] }
 0x469   :  { %3927 = vst.msk [vmem:[#allocation4 + $0xb0] sm:$0xff] %vm3904_vm1, %v3853_v24  ;;  %v3847_v26 = vpop.permute.xlu1 %3846  ;;  %v4247_v24 = vld [vmem:[#allocation3 + $0x2c1] sm:$0xff] }
 0x46a   :  { %3924 = vst.msk [vmem:[#allocation4 + $0x98] sm:$0xff] %vm3904_vm1, %v3847_v26  ;;  %4354 = vrot.lane.b32.xlu0 %v4274_v17, %s7216_s1  ;;  %v4241_v17 = vld [vmem:[#allocation3 + $0x279] sm:$0xff] }
 0x46b   :  { %4348 = vrot.lane.b32.xlu1 %v4271_v35, %s7216_s1  ;;  %v4284_v35 = vpack.c.bf16 %v4247_v24, %v4246_v10  ;;  %v4281_v62 = vpack.c.bf16 %v4241_v17, %v4240_v40  ;;  %v4256_v24 = vld [vmem:[#allocation3 + $0x331] sm:$0xff] }
 0x46c   :  { %v3857_v22 = vpop.permute.xlu0 %3856  ;;  %v4289_v10 = vpack.c.bf16 %v4257_v60, %v4256_v24  ;;  %v4453_v40 = vld [vmem:[#allocation3 + $0x32] sm:$0xff]  ;;  %v4476_v24 = vld [vmem:[#allocation3 + $0x142] sm:$0xff] }
 0x46d   :  { %3929 = vst.msk [vmem:[#allocation4 + $0xc0] sm:$0xff] %vm3904_vm1, %v3857_v22  ;;  %v3851_v7 = vpop.permute.xlu1 %3850  ;;  %v4251_v22 = vld [vmem:[#allocation3 + $0x2f1] sm:$0xff] }
 0x46e   :  { %3926 = vst.msk [vmem:[#allocation4 + $0xa8] sm:$0xff] %vm3904_vm1, %v3851_v7  ;;  %4358 = vrot.lane.b32.xlu0 %v4276_v63, %s7216_s1  ;;  %v4245_v63 = vld [vmem:[#allocation3 + $0x2a9] sm:$0xff] }
 0x46f   :  { %4352 = vrot.lane.b32.xlu1 %v4273_v54, %s7216_s1  ;;  %v4286_v54 = vpack.c.bf16 %v4251_v22, %v4250_v44  ;;  %v4283_v31 = vpack.c.bf16 %v4245_v63, %v4244_v32  ;;  %v4457_v32 = vld [vmem:[#allocation3 + $0x62] sm:$0xff] }
 0x470   :  { %v3861_v45 = vpop.permute.xlu0 %3860 }
 0x471   :  { %3931 = vst.msk [vmem:[#allocation4 + $0xd0] sm:$0xff] %vm3904_vm1, %v3861_v45  ;;  %v3855_v43 = vpop.permute.xlu1 %3854  ;;  %v4255_v45 = vld [vmem:[#allocation3 + $0x321] sm:$0xff] }
 0x472   :  { %3928 = vst.msk [vmem:[#allocation4 + $0xb8] sm:$0xff] %vm3904_vm1, %v3855_v43  ;;  %4362 = vrot.lane.b32.xlu0 %v4278_v0, %s7216_s1  ;;  %v4249_v0 = vld [vmem:[#allocation3 + $0x2d9] sm:$0xff] }
 0x473   :  { %4356 = vrot.lane.b32.xlu1 %v4275_v12, %s7216_s1  ;;  %v4288_v12 = vpack.c.bf16 %v4255_v45, %v4254_v19  ;;  %v4285_v15 = vpack.c.bf16 %v4249_v0, %v4248_v34  ;;  %v4461_v34 = vld [vmem:[#allocation3 + $0x92] sm:$0xff] }
 0x474   :  { %v3865_v53 = vpop.permute.xlu0 %3864 }
 0x475   :  { %3933 = vst.msk [vmem:[#allocation4 + $0xe0] sm:$0xff] %vm3904_vm1, %v3865_v53  ;;  %v3859_v2 = vpop.permute.xlu1 %3858  ;;  %v4451_v53 = vld [vmem:[#allocation3 + $0x1a] sm:$0xff] }
 0x476   :  { %3930 = vst.msk [vmem:[#allocation4 + $0xc8] sm:$0xff] %vm3904_vm1, %v3859_v2  ;;  %4366 = vrot.lane.b32.xlu0 %v4280_v16, %s7216_s1  ;;  %v4452_v16 = vld [vmem:[#allocation3 + $0x22] sm:$0xff] }
 0x477   :  { %4360 = vrot.lane.b32.xlu1 %v4277_v11, %s7216_s1  ;;  %v4515_v11 = vpack.c.bf16 %v4452_v16, %v4451_v53 }
 0x478   :  { %v3869_v20 = vpop.permute.xlu0 %3868 }
 0x479   :  { %3935 = vst.msk [vmem:[#allocation4 + $0xf0] sm:$0xff] %vm3904_vm1, %v3869_v20  ;;  %v3863_v47 = vpop.permute.xlu1 %3862  ;;  %v4455_v20 = vld [vmem:[#allocation3 + $0x4a] sm:$0xff] }
 0x47a   :  { %3932 = vst.msk [vmem:[#allocation4 + $0xd8] sm:$0xff] %vm3904_vm1, %v3863_v47  ;;  %4370 = vrot.lane.b32.xlu0 %v4282_v48, %s7216_s1  ;;  %v4456_v48 = vld [vmem:[#allocation3 + $0x52] sm:$0xff] }
 0x47b   :  { %4364 = vrot.lane.b32.xlu1 %v4279_v46, %s7216_s1  ;;  %v9280_v46 = vpack.c.bf16 %v4456_v48, %v4455_v20 }
 0x47c   :  { %v4066_v26 = vpop.permute.xlu0 %4065 }
 0x47d   :  { %4162 = vst.msk [vmem:[#allocation4] sm:$0xff] %vm4161_vm2, %v4066_v26  ;;  %v3867_v36 = vpop.permute.xlu1 %3866  ;;  %v4459_v26 = vld [vmem:[#allocation3 + $0x7a] sm:$0xff] }
 0x47e   :  { %3934 = vst.msk [vmem:[#allocation4 + $0xe8] sm:$0xff] %vm3904_vm1, %v3867_v36  ;;  %4374 = vrot.lane.b32.xlu0 %v4284_v35, %s7216_s1  ;;  %v4460_v35 = vld [vmem:[#allocation3 + $0x82] sm:$0xff]  ;;  %v4454_v36 = vld [vmem:[#allocation3 + $0x3a] sm:$0xff] }
 0x47f   :  { %4368 = vrot.lane.b32.xlu1 %v4281_v62, %s7216_s1  ;;  %v9287_v22 = vpack.c.bf16 %v4460_v35, %v4459_v26  ;;  %v9290_v44 = vpack.c.bf16 %v4454_v36, %v4453_v40 }
 0x480   :  { %v4070_v7 = vpop.permute.xlu0 %4069 }
 0x481   :  { %4164 = vst.msk [vmem:[#allocation4 + $0x10] sm:$0xff] %vm4161_vm2, %v4070_v7  ;;  %v3871_v38 = vpop.permute.xlu1 %3870  ;;  %v4463_v7 = vld [vmem:[#allocation3 + $0xaa] sm:$0xff] }
 0x482   :  { %3936 = vst.msk [vmem:[#allocation4 + $0xf8] sm:$0xff] %vm3904_vm1, %v3871_v38  ;;  %4378 = vrot.lane.b32.xlu0 %v4286_v54, %s7216_s1  ;;  %v4464_v54 = vld [vmem:[#allocation3 + $0xb2] sm:$0xff]  ;;  %v4458_v38 = vld [vmem:[#allocation3 + $0x6a] sm:$0xff] }
 0x483   :  { %4372 = vrot.lane.b32.xlu1 %v4283_v31, %s7216_s1  ;;  %v9297_v45 = vpack.c.bf16 %v4464_v54, %v4463_v7  ;;  %v9300_v19 = vpack.c.bf16 %v4458_v38, %v4457_v32  ;;  %v4473_v7 = vld [vmem:[#allocation3 + $0x122] sm:$0xff]  ;;  %v4474_v54 = vld [vmem:[#allocation3 + $0x12a] sm:$0xff] }
 0x484   :  { %v4074_v43 = vpop.permute.xlu0 %4073 }
 0x485   :  { %4166 = vst.msk [vmem:[#allocation4 + $0x20] sm:$0xff] %vm4161_vm2, %v4074_v43  ;;  %v4068_v9 = vpop.permute.xlu1 %4067  ;;  %v4467_v43 = vld [vmem:[#allocation3 + $0xda] sm:$0xff] }
 0x486   :  { %4163 = vst.msk [vmem:[#allocation4 + $0x8] sm:$0xff] %vm4161_vm2, %v4068_v9  ;;  %4382 = vrot.lane.b32.xlu0 %v4288_v12, %s7216_s1  ;;  %v4468_v12 = vld [vmem:[#allocation3 + $0xe2] sm:$0xff]  ;;  %v4462_v9 = vld [vmem:[#allocation3 + $0x9a] sm:$0xff] }
 0x487   :  { %4376 = vrot.lane.b32.xlu1 %v4285_v15, %s7216_s1  ;;  %v9307_v53 = vpack.c.bf16 %v4468_v12, %v4467_v43  ;;  %v9310_v49 = vpack.c.bf16 %v4462_v9, %v4461_v34  ;;  %v4483_v43 = vld [vmem:[#allocation3 + $0x1ca] sm:$0xff]  ;;  %v4484_v12 = vld [vmem:[#allocation3 + $0x1d2] sm:$0xff]  ;;  %v4478_v9 = vld [vmem:[#allocation3 + $0x15a] sm:$0xff] }
 0x488   :  { %v4078_v2 = vpop.permute.xlu0 %4077  ;;  %v4477_v34 = vld [vmem:[#allocation3 + $0x152] sm:$0xff] }
 0x489   :  { %4168 = vst.msk [vmem:[#allocation4 + $0x30] sm:$0xff] %vm4161_vm2, %v4078_v2  ;;  %v4072_v21 = vpop.permute.xlu1 %4071  ;;  %v4471_v2 = vld [vmem:[#allocation3 + $0x10a] sm:$0xff] }
 0x48a   :  { %4165 = vst.msk [vmem:[#allocation4 + $0x18] sm:$0xff] %vm4161_vm2, %v4072_v21  ;;  %4579 = vrot.lane.b32.xlu0 %v4515_v11, %s7217_s2  ;;  %v4472_v11 = vld [vmem:[#allocation3 + $0x112] sm:$0xff]  ;;  %v4466_v21 = vld [vmem:[#allocation3 + $0xca] sm:$0xff] }
 0x48b   :  { %4380 = vrot.lane.b32.xlu1 %v4287_v27, %s7216_s1  ;;  %v9317_v20 = vpack.c.bf16 %v4472_v11, %v4471_v2  ;;  %v9320_v60 = vpack.c.bf16 %v4466_v21, %v4465_v30  ;;  %v9348_v11 = vpack.c.bf16 %v4478_v9, %v4477_v34  ;;  %v4487_v30 = vld [vmem:[#allocation3 + $0x1fa] sm:$0xff]  ;;  %v4488_v21 = vld [vmem:[#allocation3 + $0x202] sm:$0xff]  ;;  %v4489_v34 = vld [vmem:[#allocation3 + $0x212] sm:$0xff] }
 0x48c   :  { %v4082_v47 = vpop.permute.xlu0 %4081  ;;  %v4490_v9 = vld [vmem:[#allocation3 + $0x21a] sm:$0xff] }
 0x48d   :  { %4170 = vst.msk [vmem:[#allocation4 + $0x40] sm:$0xff] %vm4161_vm2, %v4082_v47  ;;  %v4076_v17 = vpop.permute.xlu1 %4075  ;;  %v4475_v47 = vld [vmem:[#allocation3 + $0x13a] sm:$0xff] }
 0x48e   :  { %4167 = vst.msk [vmem:[#allocation4 + $0x28] sm:$0xff] %vm4161_vm2, %v4076_v17  ;;  %4583 = vrot.lane.b32.xlu0 %v9280_v46, %s7217_s2  ;;  %v4469_v17 = vld [vmem:[#allocation3 + $0xf2] sm:$0xff]  ;;  %v9327_v35 = vpack.c.bf16 %v4476_v24, %v4475_v47  ;;  %v9354_v24 = vpack.c.bf16 %v4488_v21, %v4487_v30  ;;  %v9377_v30 = vpack.c.bf16 %v4490_v9, %v4489_v34  ;;  %v4499_v21 = vld [vmem:[#allocation3 + $0x28a] sm:$0xff] }
 0x48f   :  { %4384 = vrot.lane.b32.xlu1 %v4289_v10, %s7216_s1  ;;  %v4470_v10 = vld [vmem:[#allocation3 + $0xfa] sm:$0xff] }
 0x490   :  { %v4086_v62 = vpop.permute.xlu0 %4085  ;;  %v9330_v36 = vpack.c.bf16 %v4470_v10, %v4469_v17 }
 0x491   :  { %4172 = vst.msk [vmem:[#allocation4 + $0x50] sm:$0xff] %vm4161_vm2, %v4086_v62  ;;  %v4080_v63 = vpop.permute.xlu1 %4079  ;;  %v4479_v62 = vld [vmem:[#allocation3 + $0x16a] sm:$0xff] }
 0x492   :  { %4169 = vst.msk [vmem:[#allocation4 + $0x38] sm:$0xff] %vm4161_vm2, %v4080_v63  ;;  %4587 = vrot.lane.b32.xlu0 %v9287_v22, %s7217_s2  ;;  %v4480_v63 = vld [vmem:[#allocation3 + $0x172] sm:$0xff] }
 0x493   :  { %4581 = vrot.lane.b32.xlu1 %v9290_v44, %s7217_s2  ;;  %v9337_v38 = vpack.c.bf16 %v4480_v63, %v4479_v62  ;;  %v4485_v62 = vld [vmem:[#allocation3 + $0x1e2] sm:$0xff]  ;;  %v4486_v63 = vld [vmem:[#allocation3 + $0x1ea] sm:$0xff] }
 0x494   :  { %v4090_v31 = vpop.permute.xlu0 %4089 }
 0x495   :  { %4174 = vst.msk [vmem:[#allocation4 + $0x60] sm:$0xff] %vm4161_vm2, %v4090_v31  ;;  %v4084_v0 = vpop.permute.xlu1 %4083 }
 0x496   :  { %4171 = vst.msk [vmem:[#allocation4 + $0x48] sm:$0xff] %vm4161_vm2, %v4084_v0  ;;  %4591 = vrot.lane.b32.xlu0 %v9297_v45, %s7217_s2  ;;  %v9340_v0 = vpack.c.bf16 %v4474_v54, %v4473_v7 }
 0x497   :  { %4585 = vrot.lane.b32.xlu1 %v9300_v19, %s7217_s2 }
 0x498   :  { %v4094_v15 = vpop.permute.xlu0 %4093 }
 0x499   :  { %4176 = vst.msk [vmem:[#allocation4 + $0x70] sm:$0xff] %vm4161_vm2, %v4094_v15  ;;  %v4088_v16 = vpop.permute.xlu1 %4087 }
 0x49a   :  { %4173 = vst.msk [vmem:[#allocation4 + $0x58] sm:$0xff] %vm4161_vm2, %v4088_v16  ;;  %4595 = vrot.lane.b32.xlu0 %v9307_v53, %s7217_s2  ;;  %v4531_v16 = vpack.c.bf16 %v4484_v12, %v4483_v43  ;;  %v4495_v43 = vld [vmem:[#allocation3 + $0x25a] sm:$0xff]  ;;  %v4496_v12 = vld [vmem:[#allocation3 + $0x262] sm:$0xff] }
 0x49b   :  { %4589 = vrot.lane.b32.xlu1 %v9310_v49, %s7217_s2 }
 0x49c   :  { %v4098_v27 = vpop.permute.xlu0 %4097 }
 0x49d   :  { %4178 = vst.msk [vmem:[#allocation4 + $0x80] sm:$0xff] %vm4161_vm2, %v4098_v27  ;;  %v4092_v48 = vpop.permute.xlu1 %4091  ;;  %v4481_v27 = vld [vmem:[#allocation3 + $0x182] sm:$0xff] }
 0x49e   :  { %4175 = vst.msk [vmem:[#allocation4 + $0x68] sm:$0xff] %vm4161_vm2, %v4092_v48  ;;  %4599 = vrot.lane.b32.xlu0 %v9317_v20, %s7217_s2  ;;  %v4482_v48 = vld [vmem:[#allocation3 + $0x18a] sm:$0xff] }
 0x49f   :  { %4593 = vrot.lane.b32.xlu1 %v9320_v60, %s7217_s2  ;;  %v9357_v10 = vpack.c.bf16 %v4482_v48, %v4481_v27  ;;  %v4500_v27 = vld [vmem:[#allocation3 + $0x292] sm:$0xff]  ;;  %v4493_v48 = vld [vmem:[#allocation3 + $0x242] sm:$0xff] }
 0x4a0   :  { %v4102_v26 = vpop.permute.xlu0 %4101 }
 0x4a1   :  { %4180 = vst.msk [vmem:[#allocation4 + $0x90] sm:$0xff] %vm4161_vm2, %v4102_v26  ;;  %v4096_v40 = vpop.permute.xlu1 %4095  ;;  %v4491_v26 = vld [vmem:[#allocation3 + $0x22a] sm:$0xff] }
 0x4a2   :  { %4177 = vst.msk [vmem:[#allocation4 + $0x78] sm:$0xff] %vm4161_vm2, %v4096_v40  ;;  %4603 = vrot.lane.b32.xlu0 %v9327_v35, %s7217_s2  ;;  %v4492_v40 = vld [vmem:[#allocation3 + $0x232] sm:$0xff] }
 0x4a3   :  { %4597 = vrot.lane.b32.xlu1 %v9330_v36, %s7217_s2  ;;  %v9364_v54 = vpack.c.bf16 %v4492_v40, %v4491_v26  ;;  %v4539_v26 = vpack.c.bf16 %v4500_v27, %v4499_v21  ;;  %v4508_v21 = vld [vmem:[#allocation3 + $0x2f2] sm:$0xff]  ;;  %v4501_v27 = vld [vmem:[#allocation3 + $0x2a2] sm:$0xff] }
 0x4a4   :  { %v4106_v32 = vpop.permute.xlu0 %4105 }
 0x4a5   :  { %4182 = vst.msk [vmem:[#allocation4 + $0xa0] sm:$0xff] %vm4161_vm2, %v4106_v32  ;;  %v4100_v31 = vpop.permute.xlu1 %4099 }
 0x4a6   :  { %4179 = vst.msk [vmem:[#allocation4 + $0x88] sm:$0xff] %vm4161_vm2, %v4100_v31  ;;  %4607 = vrot.lane.b32.xlu0 %v9337_v38, %s7217_s2  ;;  %v9367_v31 = vpack.c.bf16 %v4486_v63, %v4485_v62  ;;  %v4503_v63 = vld [vmem:[#allocation3 + $0x2ba] sm:$0xff] }
 0x4a7   :  { %4601 = vrot.lane.b32.xlu1 %v9340_v0, %s7217_s2 }
 0x4a8   :  { %v4110_v15 = vpop.permute.xlu0 %4109 }
 0x4a9   :  { %4184 = vst.msk [vmem:[#allocation4 + $0xb0] sm:$0xff] %vm4161_vm2, %v4110_v15  ;;  %v4104_v2 = vpop.permute.xlu1 %4103 }
 0x4aa   :  { %4181 = vst.msk [vmem:[#allocation4 + $0x98] sm:$0xff] %vm4161_vm2, %v4104_v2  ;;  %4611 = vrot.lane.b32.xlu0 %v4531_v16, %s7217_s2  ;;  %v9374_v16 = vpack.c.bf16 %v4496_v12, %v4495_v43  ;;  %v4498_v43 = vld [vmem:[#allocation3 + $0x27a] sm:$0xff] }
 0x4ab   :  { %4605 = vrot.lane.b32.xlu1 %v9348_v11, %s7217_s2 }
 0x4ac   :  { %v4114_v47 = vpop.permute.xlu0 %4113 }
 0x4ad   :  { %4186 = vst.msk [vmem:[#allocation4 + $0xc0] sm:$0xff] %vm4161_vm2, %v4114_v47  ;;  %v4108_v17 = vpop.permute.xlu1 %4107  ;;  %v4494_v47 = vld [vmem:[#allocation3 + $0x24a] sm:$0xff] }
 0x4ae   :  { %4183 = vst.msk [vmem:[#allocation4 + $0xa8] sm:$0xff] %vm4161_vm2, %v4108_v17  ;;  %4615 = vrot.lane.b32.xlu0 %v9354_v24, %s7217_s2  ;;  %v9385_v62 = vpack.c.bf16 %v4494_v47, %v4493_v48  ;;  %v4502_v48 = vld [vmem:[#allocation3 + $0x2aa] sm:$0xff] }
 0x4af   :  { %4609 = vrot.lane.b32.xlu1 %v9357_v10, %s7217_s2 }
 0x4b0   :  { %v4118_v7 = vpop.permute.xlu0 %4117 }
 0x4b1   :  { %4188 = vst.msk [vmem:[#allocation4 + $0xd0] sm:$0xff] %vm4161_vm2, %v4118_v7  ;;  %v4112_v32 = vpop.permute.xlu1 %4111  ;;  %v4504_v7 = vld [vmem:[#allocation3 + $0x2c2] sm:$0xff] }
 0x4b2   :  { %4185 = vst.msk [vmem:[#allocation4 + $0xb8] sm:$0xff] %vm4161_vm2, %v4112_v32  ;;  %4619 = vrot.lane.b32.xlu0 %v9364_v54, %s7217_s2  ;;  %v4497_v32 = vld [vmem:[#allocation3 + $0x272] sm:$0xff]  ;;  %v4541_v34 = vpack.c.bf16 %v4504_v7, %v4503_v63  ;;  %v4511_v63 = vld [vmem:[#allocation3 + $0x31a] sm:$0xff]  ;;  %v4512_v7 = vld [vmem:[#allocation3 + $0x322] sm:$0xff] }
 0x4b3   :  { %4613 = vrot.lane.b32.xlu1 %v9367_v31, %s7217_s2 }
 0x4b4   :  { %v4122_v15 = vpop.permute.xlu0 %4121 }
 0x4b5   :  { %4190 = vst.msk [vmem:[#allocation4 + $0xe0] sm:$0xff] %vm4161_vm2, %v4122_v15  ;;  %v4116_v2 = vpop.permute.xlu1 %4115  ;;  %v9392_v15 = vpack.c.bf16 %v4498_v43, %v4497_v32  ;;  %v4505_v32 = vld [vmem:[#allocation3 + $0x2d2] sm:$0xff]  ;;  %v4506_v43 = vld [vmem:[#allocation3 + $0x2da] sm:$0xff] }
 0x4b6   :  { %4187 = vst.msk [vmem:[#allocation4 + $0xc8] sm:$0xff] %vm4161_vm2, %v4116_v2  ;;  %4623 = vrot.lane.b32.xlu0 %v9374_v16, %s7217_s2  ;;  %v4507_v2 = vld [vmem:[#allocation3 + $0x2ea] sm:$0xff] }
 0x4b7   :  { %4617 = vrot.lane.b32.xlu1 %v9377_v30, %s7217_s2 }
 0x4b8   :  { %v4126_v17 = vpop.permute.xlu0 %4125 }
 0x4b9   :  { %4192 = vst.msk [vmem:[#allocation4 + $0xf0] sm:$0xff] %vm4161_vm2, %v4126_v17  ;;  %v4120_v40 = vpop.permute.xlu1 %4119  ;;  %v4543_v17 = vpack.c.bf16 %v4508_v21, %v4507_v2  ;;  %v4542_v2 = vpack.c.bf16 %v4506_v43, %v4505_v32  ;;  %v4710_v21 = vld [vmem:[#allocation3 + $0x38] sm:$0xff]  ;;  %v4714_v32 = vld [vmem:[#allocation3 + $0x68] sm:$0xff] }
 0x4ba   :  { %4189 = vst.msk [vmem:[#allocation4 + $0xd8] sm:$0xff] %vm4161_vm2, %v4120_v40  ;;  %4627 = vrot.lane.b32.xlu0 %v4539_v26, %s7217_s2  ;;  %v4540_v40 = vpack.c.bf16 %v4502_v48, %v4501_v27  ;;  %v4509_v27 = vld [vmem:[#allocation3 + $0x302] sm:$0xff]  ;;  %v4510_v48 = vld [vmem:[#allocation3 + $0x30a] sm:$0xff]  ;;  %v4513_v43 = vld [vmem:[#allocation3 + $0x332] sm:$0xff] }
 0x4bb   :  { %4621 = vrot.lane.b32.xlu1 %v9385_v62, %s7217_s2 }
 0x4bc   :  { %v4323_v12 = vpop.permute.xlu0 %4322 }
 0x4bd   :  { %4419 = vst.msk [vmem:[#allocation4] sm:$0xff] %vm4418_vm3, %v4323_v12  ;;  %v4124_v9 = vpop.permute.xlu1 %4123 }
 0x4be   :  { %4191 = vst.msk [vmem:[#allocation4 + $0xe8] sm:$0xff] %vm4161_vm2, %v4124_v9  ;;  %4631 = vrot.lane.b32.xlu0 %v4541_v34, %s7217_s2  ;;  %v4545_v34 = vpack.c.bf16 %v4512_v7, %v4511_v63  ;;  %v4544_v7 = vpack.c.bf16 %v4510_v48, %v4509_v27 }
 0x4bf   :  { %4625 = vrot.lane.b32.xlu1 %v9392_v15, %s7217_s2 }
 0x4c0   :  { %v4327_v47 = vpop.permute.xlu0 %4326 }
 0x4c1   :  { %4421 = vst.msk [vmem:[#allocation4 + $0x10] sm:$0xff] %vm4418_vm3, %v4327_v47  ;;  %v4128_v26 = vpop.permute.xlu1 %4127  ;;  %v7177_v47 = vld [vmem:[%s10154_s4] sm:$0xff]  }
 0x4c2   :  { %4193 = vst.msk [vmem:[#allocation4 + $0xf8] sm:$0xff] %vm4161_vm2, %v4128_v26  ;;  %4635 = vrot.lane.b32.xlu0 %v4543_v17, %s7217_s2  ;;  %v4709_v17 = vld [vmem:[#allocation3 + $0x30] sm:$0xff]  ;;  %7008 = vmatprep.subr.bf16.mxu1 %v7177_v47 }
 0x4c3   :  { %4629 = vrot.lane.b32.xlu1 %v4540_v40, %s7217_s2  ;;  %v4773_v40 = vpack.c.bf16 %v4710_v21, %v4709_v17  ;;  %7009 = vmatpush3.bf16.msra.mxu1 %v7177_v47  ;;  %v4712_v47 = vld [vmem:[#allocation3 + $0x50] sm:$0xff] }
 0x4c4   :  { %v4331_v12 = vpop.permute.xlu0 %4330  ;;  %v7179_v17 = vld [vmem:[%s10154_s4 + $0x10] sm:$0xff]  }
 0x4c5   :  { %4423 = vst.msk [vmem:[#allocation4 + $0x20] sm:$0xff] %vm4418_vm3, %v4331_v12  ;;  %v4325_v9 = vpop.permute.xlu1 %4324  ;;  %v4514_v12 = vld [vmem:[#allocation3 + $0x33a] sm:$0xff] }
 0x4c6   :  { %4420 = vst.msk [vmem:[#allocation4 + $0x8] sm:$0xff] %vm4418_vm3, %v4325_v9  ;;  %4639 = vrot.lane.b32.xlu0 %v4545_v34, %s7217_s2  ;;  %v7178_v34 = vld [vmem:[%s10154_s4 + $0x8] sm:$0xff]   ;;  %v4713_v9 = vld [vmem:[#allocation3 + $0x60] sm:$0xff]  ;;  %v4546_v48 = vpack.c.bf16 %v4514_v12, %v4513_v43  ;;  %v7180_v43 = vld [vmem:[%s10154_s4 + $0x18] sm:$0xff]  }
 0x4c7   :  { %4633 = vrot.lane.b32.xlu1 %v4542_v2, %s7217_s2  ;;  %v4775_v21 = vpack.c.bf16 %v4714_v32, %v4713_v9  ;;  %7010 = vmatprep.subr.bf16.mxu1 %v7178_v34  ;;  %v4716_v32 = vld [vmem:[#allocation3 + $0x80] sm:$0xff] }
 0x4c8   :  { %v4335_v26 = vpop.permute.xlu0 %4334  ;;  %7011 = vmatpush3.bf16.msra.mxu1 %v7178_v34  ;;  %v4715_v34 = vld [vmem:[#allocation3 + $0x78] sm:$0xff] }
 0x4c9   :  { %4425 = vst.msk [vmem:[#allocation4 + $0x30] sm:$0xff] %vm4418_vm3, %v4335_v26  ;;  %v4329_v63 = vpop.permute.xlu1 %4328  ;;  %7012 = vmatprep.subr.bf16.mxu1 %v7179_v17 }
 0x4ca   :  { %4422 = vst.msk [vmem:[#allocation4 + $0x18] sm:$0xff] %vm4418_vm3, %v4329_v63  ;;  %4837 = vrot.lane.b32.xlu0 %v4773_v40, %s7218_s17  ;;  %v4711_v40 = vld [vmem:[#allocation3 + $0x48] sm:$0xff] }
 0x4cb   :  { %4637 = vrot.lane.b32.xlu1 %v4544_v7, %s7217_s2  ;;  %v4774_v7 = vpack.c.bf16 %v4712_v47, %v4711_v40 }
 0x4cc   :  { %v4339_v2 = vpop.permute.xlu0 %4338  ;;  %7013 = vmatpush3.bf16.msra.mxu1 %v7179_v17  ;;  %v4718_v17 = vld [vmem:[#allocation3 + $0x98] sm:$0xff] }
 0x4cd   :  { %4427 = vst.msk [vmem:[#allocation4 + $0x40] sm:$0xff] %vm4418_vm3, %v4339_v2  ;;  %v4333_v27 = vpop.permute.xlu1 %4332  ;;  %7014 = vmatprep.subr.bf16.mxu1 %v7180_v43  ;;  %v4776_v2 = vpack.c.bf16 %v4716_v32, %v4715_v34  ;;  %v4719_v32 = vld [vmem:[#allocation3 + $0xa8] sm:$0xff]  ;;  %v4721_v34 = vld [vmem:[#allocation3 + $0xc0] sm:$0xff] }
 0x4ce   :  { %4424 = vst.msk [vmem:[#allocation4 + $0x28] sm:$0xff] %vm4418_vm3, %v4333_v27  ;;  %4841 = vrot.lane.b32.xlu0 %v4775_v21, %s7218_s17 }
 0x4cf   :  { %4641 = vrot.lane.b32.xlu1 %v4546_v48, %s7217_s2 }
 0x4d0   :  { %v4343_v26 = vpop.permute.xlu0 %4342  ;;  %7015 = vmatpush3.bf16.msra.mxu1 %v7180_v43 }
 0x4d1   :  { %4429 = vst.msk [vmem:[#allocation4 + $0x50] sm:$0xff] %vm4418_vm3, %v4343_v26  ;;  %v4337_v63 = vpop.permute.xlu1 %4336  ;;  %v4717_v26 = vld [vmem:[#allocation3 + $0x90] sm:$0xff] }
 0x4d2   :  { %4426 = vst.msk [vmem:[#allocation4 + $0x38] sm:$0xff] %vm4418_vm3, %v4337_v63  ;;  %5094 = vrot.lane.b32.xlu0 %v9196_v13, %s7219_s22  ;;  %v7181_v13 = vld [vmem:[%s10154_s4 + $0x20] ss:$0 sps:$4 sm:$0xff]   ;;  %v4777_v63 = vpack.c.bf16 %v4718_v17, %v4717_v26  ;;  %s7221_s4 = smov 120  }
 0x4d3   :  { %4839 = vrot.lane.b32.xlu1 %v4774_v7, %s7218_s17  ;;  %7083 = vmatprep.subr.msk.bf16.mxu1 %vm5645_vm4, %v7181_v13  ;;  %v5647_v27 = vsel %vm5645_vm4, %v7181_v13, 0 }
 0x4d4   :  { %v4347_v12 = vpop.permute.xlu0 %4346  ;;  %7017 = vmatpush3.bf16.msra.mxu1 %v5647_v27  ;;  %v4723_v27 = vld [vmem:[#allocation3 + $0xd8] sm:$0xff] }
 0x4d5   :  { %4431 = vst.msk [vmem:[#allocation4 + $0x60] sm:$0xff] %vm4418_vm3, %v4347_v12  ;;  %v4341_v9 = vpop.permute.xlu1 %4340 }
 0x4d6   :  { %4428 = vst.msk [vmem:[#allocation4 + $0x48] sm:$0xff] %vm4418_vm3, %v4341_v9  ;;  %5351 = vrot.lane.b32.xlu0 %v9290_v44, %s7220_s25 }
 0x4d7   :  { %4843 = vrot.lane.b32.xlu1 %v4776_v2, %s7218_s17 }
 0x4d8   :  { %v4351_v21 = vpop.permute.xlu0 %4350 }
 0x4d9   :  { %4433 = vst.msk [vmem:[#allocation4 + $0x70] sm:$0xff] %vm4418_vm3, %v4351_v21  ;;  %v4345_v48 = vpop.permute.xlu1 %4344 }
 0x4da   :  { %4430 = vst.msk [vmem:[#allocation4 + $0x58] sm:$0xff] %vm4418_vm3, %v4345_v48  ;;  %5098 = vrot.lane.b32.xlu0 %v9206_v59, %s7219_s22 }
 0x4db   :  { %5096 = vrot.lane.b32.xlu1 %v9186_v57, %s7219_s22 }
 0x4dc   :  { %v4355_v44 = vpop.permute.xlu0 %4354 }
 0x4dd   :  { %4435 = vst.msk [vmem:[#allocation4 + $0x80] sm:$0xff] %vm4418_vm3, %v4355_v44  ;;  %v4349_v47 = vpop.permute.xlu1 %4348 }
 0x4de   :  { %4432 = vst.msk [vmem:[#allocation4 + $0x68] sm:$0xff] %vm4418_vm3, %v4349_v47  ;;  %5355 = vrot.lane.b32.xlu0 %v9300_v19, %s7220_s25  ;;  %v4725_v47 = vld [vmem:[#allocation3 + $0xf0] sm:$0xff] }
 0x4df   :  { %5353 = vrot.lane.b32.xlu1 %v9280_v46, %s7220_s25  ;;  %v4720_v46 = vld [vmem:[#allocation3 + $0xb0] sm:$0xff] }
 0x4e0   :  { %v4359_v40 = vpop.permute.xlu0 %4358  ;;  %v4778_v12 = vpack.c.bf16 %v4720_v46, %v4719_v32  ;;  %v4985_v46 = vld [vmem:[#allocation3 + $0x111] sm:$0xff] }
 0x4e1   :  { %4437 = vst.msk [vmem:[#allocation4 + $0x90] sm:$0xff] %vm4418_vm3, %v4359_v40  ;;  %v4353_v59 = vpop.permute.xlu1 %4352  ;;  %v4728_v40 = vld [vmem:[#allocation3 + $0x110] sm:$0xff] }
 0x4e2   :  { %4434 = vst.msk [vmem:[#allocation4 + $0x78] sm:$0xff] %vm4418_vm3, %v4353_v59  ;;  %4845 = vrot.lane.b32.xlu0 %v4777_v63, %s7218_s17  ;;  %v4727_v59 = vld [vmem:[#allocation3 + $0x108] sm:$0xff] }
 0x4e3   :  { %5100 = vrot.lane.b32.xlu1 %v9193_v52, %s7219_s22  ;;  %v4722_v52 = vld [vmem:[#allocation3 + $0xc8] sm:$0xff] }
 0x4e4   :  { %v4363_v57 = vpop.permute.xlu0 %4362  ;;  %v4779_v9 = vpack.c.bf16 %v4722_v52, %v4721_v34  ;;  %v4732_v34 = vld [vmem:[#allocation3 + $0x140] sm:$0xff] }
 0x4e5   :  { %4439 = vst.msk [vmem:[#allocation4 + $0xa0] sm:$0xff] %vm4418_vm3, %v4363_v57  ;;  %v4357_v19 = vpop.permute.xlu1 %4356 }
 0x4e6   :  { %4436 = vst.msk [vmem:[#allocation4 + $0x88] sm:$0xff] %vm4418_vm3, %v4357_v19  ;;  %5102 = vrot.lane.b32.xlu0 %v9216_v55, %s7219_s22  ;;  %v4782_v19 = vpack.c.bf16 %v4728_v40, %v4727_v59  ;;  %v4738_v59 = vld [vmem:[#allocation3 + $0x188] sm:$0xff] }
 0x4e7   :  { %5357 = vrot.lane.b32.xlu1 %v9287_v22, %s7220_s25 }
 0x4e8   :  { %v4367_v7 = vpop.permute.xlu0 %4366 }
 0x4e9   :  { %4441 = vst.msk [vmem:[#allocation4 + $0xb0] sm:$0xff] %vm4418_vm3, %v4367_v7  ;;  %v4361_v43 = vpop.permute.xlu1 %4360 }
 0x4ea   :  { %4438 = vst.msk [vmem:[#allocation4 + $0x98] sm:$0xff] %vm4418_vm3, %v4361_v43  ;;  %5359 = vrot.lane.b32.xlu0 %v9310_v49, %s7220_s25  ;;  %v4724_v49 = vld [vmem:[#allocation3 + $0xe0] sm:$0xff]  ;;  %v4984_v43 = vld [vmem:[#allocation3 + $0x109] sm:$0xff] }
 0x4eb   :  { %4847 = vrot.lane.b32.xlu1 %v4778_v12, %s7218_s17  ;;  %v4780_v44 = vpack.c.bf16 %v4724_v49, %v4723_v27  ;;  %v5039_v12 = vpack.c.bf16 %v4985_v46, %v4984_v43  ;;  %v4989_v49 = vld [vmem:[#allocation3 + $0x141] sm:$0xff] }
 0x4ec   :  { %v4371_v55 = vpop.permute.xlu0 %4370  ;;  %v4994_v43 = vld [vmem:[#allocation3 + $0x181] sm:$0xff] }
 0x4ed   :  { %4443 = vst.msk [vmem:[#allocation4 + $0xc0] sm:$0xff] %vm4418_vm3, %v4371_v55  ;;  %v4365_v22 = vpop.permute.xlu1 %4364 }
 0x4ee   :  { %4440 = vst.msk [vmem:[#allocation4 + $0xa8] sm:$0xff] %vm4418_vm3, %v4365_v22  ;;  %4849 = vrot.lane.b32.xlu0 %v4779_v9, %s7218_s17  ;;  %v4731_v9 = vld [vmem:[#allocation3 + $0x138] sm:$0xff] }
 0x4ef   :  { %5104 = vrot.lane.b32.xlu1 %v9203_v61, %s7219_s22  ;;  %v4726_v61 = vld [vmem:[#allocation3 + $0xf8] sm:$0xff] }
 0x4f0   :  { %v4375_v2 = vpop.permute.xlu0 %4374  ;;  %v4781_v17 = vpack.c.bf16 %v4726_v61, %v4725_v47  ;;  %v4991_v61 = vld [vmem:[#allocation3 + $0x159] sm:$0xff]  ;;  %v4990_v47 = vld [vmem:[#allocation3 + $0x151] sm:$0xff] }
 0x4f1   :  { %4445 = vst.msk [vmem:[#allocation4 + $0xd0] sm:$0xff] %vm4418_vm3, %v4375_v2  ;;  %v4369_v13 = vpop.permute.xlu1 %4368  ;;  %v4784_v2 = vpack.c.bf16 %v4732_v34, %v4731_v9  ;;  %v4996_v9 = vld [vmem:[#allocation3 + $0x199] sm:$0xff] }
 0x4f2   :  { %4442 = vst.msk [vmem:[#allocation4 + $0xb8] sm:$0xff] %vm4418_vm3, %v4369_v13  ;;  %5106 = vrot.lane.b32.xlu0 %v9224_v56, %s7219_s22  ;;  %v4734_v13 = vld [vmem:[#allocation3 + $0x158] sm:$0xff] }
 0x4f3   :  { %5361 = vrot.lane.b32.xlu1 %v9297_v45, %s7220_s25 }
 0x4f4   :  { %v4379_v21 = vpop.permute.xlu0 %4378 }
 0x4f5   :  { %4447 = vst.msk [vmem:[#allocation4 + $0xe0] sm:$0xff] %vm4418_vm3, %v4379_v21  ;;  %v4373_v48 = vpop.permute.xlu1 %4372 }
 0x4f6   :  { %4444 = vst.msk [vmem:[#allocation4 + $0xc8] sm:$0xff] %vm4418_vm3, %v4373_v48  ;;  %5363 = vrot.lane.b32.xlu0 %v9320_v60, %s7220_s25  ;;  %v4988_v48 = vld [vmem:[#allocation3 + $0x139] sm:$0xff] }
 0x4f7   :  { %4851 = vrot.lane.b32.xlu1 %v4780_v44, %s7218_s17  ;;  %v5041_v44 = vpack.c.bf16 %v4989_v49, %v4988_v48  ;;  %v4741_v49 = vld [vmem:[#allocation3 + $0x1e0] sm:$0xff] }
 0x4f8   :  { %v4383_v56 = vpop.permute.xlu0 %4382  ;;  %v5254_v48 = vld [vmem:[#allocation3 + $0x1a2] sm:$0xff] }
 0x4f9   :  { %4449 = vst.msk [vmem:[#allocation4 + $0xf0] sm:$0xff] %vm4418_vm3, %v4383_v56  ;;  %v4377_v45 = vpop.permute.xlu1 %4376  ;;  %v5042_v56 = vpack.c.bf16 %v4991_v61, %v4990_v47  ;;  %v4998_v61 = vld [vmem:[#allocation3 + $0x1e1] sm:$0xff] }
 0x4fa   :  { %4446 = vst.msk [vmem:[#allocation4 + $0xd8] sm:$0xff] %vm4418_vm3, %v4377_v45  ;;  %4853 = vrot.lane.b32.xlu0 %v4781_v17, %s7218_s17  ;;  %v4736_v45 = vld [vmem:[#allocation3 + $0x170] sm:$0xff] }
 0x4fb   :  { %5108 = vrot.lane.b32.xlu1 %v9213_v5, %s7219_s22  ;;  %v4730_v5 = vld [vmem:[#allocation3 + $0x128] sm:$0xff] }
 0x4fc   :  { %v4580_v26 = vpop.permute.xlu0 %4579 }
 0x4fd   :  { %4676 = vst.msk [vmem:[#allocation4] sm:$0xff] %vm4675_vm5, %v4580_v26  ;;  %v4381_v60 = vpop.permute.xlu1 %4380 }
 0x4fe   :  { %4448 = vst.msk [vmem:[#allocation4 + $0xe8] sm:$0xff] %vm4418_vm3, %v4381_v60  ;;  %5110 = vrot.lane.b32.xlu0 %v9231_v51, %s7219_s22  ;;  %v4729_v51 = vld [vmem:[#allocation3 + $0x120] sm:$0xff]  ;;  %v4735_v60 = vld [vmem:[#allocation3 + $0x168] sm:$0xff] }
 0x4ff   :  { %5365 = vrot.lane.b32.xlu1 %v9307_v53, %s7220_s25  ;;  %v4783_v32 = vpack.c.bf16 %v4730_v5, %v4729_v51  ;;  %v4992_v51 = vld [vmem:[#allocation3 + $0x169] sm:$0xff] }
 0x500   :  { %v4584_v63 = vpop.permute.xlu0 %4583 }
 0x501   :  { %4678 = vst.msk [vmem:[#allocation4 + $0x10] sm:$0xff] %vm4675_vm5, %v4584_v63  ;;  %v4385_v57 = vpop.permute.xlu1 %4384  ;;  %v4786_v63 = vpack.c.bf16 %v4736_v45, %v4735_v60 }
 0x502   :  { %4450 = vst.msk [vmem:[#allocation4 + $0xf8] sm:$0xff] %vm4418_vm3, %v4385_v57  ;;  %5367 = vrot.lane.b32.xlu0 %v9330_v36, %s7220_s25  ;;  %v4993_v57 = vld [vmem:[#allocation3 + $0x171] sm:$0xff] }
 0x503   :  { %4855 = vrot.lane.b32.xlu1 %v4782_v19, %s7218_s17  ;;  %v4737_v19 = vld [vmem:[#allocation3 + $0x180] sm:$0xff] }
 0x504   :  { %v4588_v7 = vpop.permute.xlu0 %4587  ;;  %v4787_v46 = vpack.c.bf16 %v4738_v59, %v4737_v19  ;;  %v5001_v59 = vld [vmem:[#allocation3 + $0x201] sm:$0xff] }
 0x505   :  { %4680 = vst.msk [vmem:[#allocation4 + $0x20] sm:$0xff] %vm4675_vm5, %v4588_v7  ;;  %v4582_v53 = vpop.permute.xlu1 %4581  ;;  %v5043_v7 = vpack.c.bf16 %v4993_v57, %v4992_v51  ;;  %v4745_v57 = vld [vmem:[#allocation3 + $0x210] sm:$0xff] }
 0x506   :  { %4677 = vst.msk [vmem:[#allocation4 + $0x8] sm:$0xff] %vm4675_vm5, %v4582_v53  ;;  %4857 = vrot.lane.b32.xlu0 %v4783_v32, %s7218_s17  ;;  %v4995_v32 = vld [vmem:[#allocation3 + $0x189] sm:$0xff] }
 0x507   :  { %5112 = vrot.lane.b32.xlu1 %v5039_v12, %s7219_s22  ;;  %v5044_v53 = vpack.c.bf16 %v4995_v32, %v4994_v43  ;;  %v4739_v12 = vld [vmem:[#allocation3 + $0x198] sm:$0xff] }
 0x508   :  { %v4592_v52 = vpop.permute.xlu0 %4591  ;;  %v5002_v32 = vld [vmem:[#allocation3 + $0x211] sm:$0xff] }
 0x509   :  { %4682 = vst.msk [vmem:[#allocation4 + $0x30] sm:$0xff] %vm4675_vm5, %v4592_v52  ;;  %v4586_v36 = vpop.permute.xlu1 %4585  ;;  %v4740_v52 = vld [vmem:[#allocation3 + $0x1a0] sm:$0xff] }
 0x50a   :  { %4679 = vst.msk [vmem:[#allocation4 + $0x18] sm:$0xff] %vm4675_vm5, %v4586_v36  ;;  %5114 = vrot.lane.b32.xlu0 %v9238_v41, %s7219_s22  ;;  %v4733_v41 = vld [vmem:[#allocation3 + $0x150] sm:$0xff]  ;;  %v4788_v34 = vpack.c.bf16 %v4740_v52, %v4739_v12  ;;  %v4747_v52 = vld [vmem:[#allocation3 + $0x228] sm:$0xff] }
 0x50b   :  { %5369 = vrot.lane.b32.xlu1 %v9317_v20, %s7220_s25  ;;  %v4785_v27 = vpack.c.bf16 %v4734_v13, %v4733_v41  ;;  %v4742_v13 = vld [vmem:[#allocation3 + $0x1e8] sm:$0xff] }
 0x50c   :  { %v4596_v55 = vpop.permute.xlu0 %4595 }
 0x50d   :  { %4684 = vst.msk [vmem:[#allocation4 + $0x40] sm:$0xff] %vm4675_vm5, %v4596_v55  ;;  %v4590_v22 = vpop.permute.xlu1 %4589 }
 0x50e   :  { %4681 = vst.msk [vmem:[#allocation4 + $0x28] sm:$0xff] %vm4675_vm5, %v4590_v22  ;;  %5371 = vrot.lane.b32.xlu0 %v9340_v0, %s7220_s25  ;;  %v4997_v22 = vld [vmem:[#allocation3 + $0x1a1] sm:$0xff] }
 0x50f   :  { %4859 = vrot.lane.b32.xlu1 %v4784_v2, %s7218_s17  ;;  %v5045_v41 = vpack.c.bf16 %v4997_v22, %v4996_v9  ;;  %v5005_v9 = vld [vmem:[#allocation3 + $0x231] sm:$0xff]  ;;  %v4749_v22 = vld [vmem:[#allocation3 + $0x240] sm:$0xff] }
 0x510   :  { %v4600_v21 = vpop.permute.xlu0 %4599 }
 0x511   :  { %4686 = vst.msk [vmem:[#allocation4 + $0x50] sm:$0xff] %vm4675_vm5, %v4600_v21  ;;  %v4594_v20 = vpop.permute.xlu1 %4593 }
 0x512   :  { %4683 = vst.msk [vmem:[#allocation4 + $0x38] sm:$0xff] %vm4675_vm5, %v4594_v20  ;;  %4861 = vrot.lane.b32.xlu0 %v4785_v27, %s7218_s17  ;;  %v4789_v27 = vpack.c.bf16 %v4742_v13, %v4741_v49  ;;  %v5004_v49 = vld [vmem:[#allocation3 + $0x229] sm:$0xff] }
 0x513   :  { %5116 = vrot.lane.b32.xlu1 %v5041_v44, %s7219_s22  ;;  %v4999_v44 = vld [vmem:[#allocation3 + $0x1e9] sm:$0xff] }
 0x514   :  { %v4604_v0 = vpop.permute.xlu0 %4603 }
 0x515   :  { %4688 = vst.msk [vmem:[#allocation4 + $0x60] sm:$0xff] %vm4675_vm5, %v4604_v0  ;;  %v4598_v17 = vpop.permute.xlu1 %4597  ;;  %v5046_v0 = vpack.c.bf16 %v4999_v44, %v4998_v61  ;;  %v4751_v61 = vld [vmem:[#allocation3 + $0x258] sm:$0xff] }
 0x516   :  { %4685 = vst.msk [vmem:[#allocation4 + $0x48] sm:$0xff] %vm4675_vm5, %v4598_v17  ;;  %5118 = vrot.lane.b32.xlu0 %v5042_v56, %s7219_s22  ;;  %v4744_v17 = vld [vmem:[#allocation3 + $0x200] sm:$0xff] }
 0x517   :  { %5373 = vrot.lane.b32.xlu1 %v9327_v35, %s7220_s25 }
 0x518   :  { %v4608_v26 = vpop.permute.xlu0 %4607 }
 0x519   :  { %4690 = vst.msk [vmem:[#allocation4 + $0x70] sm:$0xff] %vm4675_vm5, %v4608_v26  ;;  %v4602_v40 = vpop.permute.xlu1 %4601  ;;  %v4743_v26 = vld [vmem:[#allocation3 + $0x1f8] sm:$0xff] }
 0x51a   :  { %4687 = vst.msk [vmem:[#allocation4 + $0x58] sm:$0xff] %vm4675_vm5, %v4602_v40  ;;  %5375 = vrot.lane.b32.xlu0 %v9348_v11, %s7220_s25  ;;  %v4790_v40 = vpack.c.bf16 %v4744_v17, %v4743_v26  ;;  %v4753_v17 = vld [vmem:[#allocation3 + $0x270] sm:$0xff] }
 0x51b   :  { %4863 = vrot.lane.b32.xlu1 %v4786_v63, %s7218_s17  ;;  %v4746_v63 = vld [vmem:[#allocation3 + $0x218] sm:$0xff] }
 0x51c   :  { %v4612_v5 = vpop.permute.xlu0 %4611 }
 0x51d   :  { %4692 = vst.msk [vmem:[#allocation4 + $0x80] sm:$0xff] %vm4675_vm5, %v4612_v5  ;;  %v4606_v35 = vpop.permute.xlu1 %4605  ;;  %v4791_v5 = vpack.c.bf16 %v4746_v63, %v4745_v57  ;;  %v5011_v63 = vld [vmem:[#allocation3 + $0x279] sm:$0xff] }
 0x51e   :  { %4689 = vst.msk [vmem:[#allocation4 + $0x68] sm:$0xff] %vm4675_vm5, %v4606_v35  ;;  %4865 = vrot.lane.b32.xlu0 %v4787_v46, %s7218_s17  ;;  %v5000_v46 = vld [vmem:[#allocation3 + $0x1f9] sm:$0xff] }
 0x51f   :  { %5120 = vrot.lane.b32.xlu1 %v5043_v7, %s7219_s22  ;;  %v5047_v35 = vpack.c.bf16 %v5001_v59, %v5000_v46  ;;  %v5003_v7 = vld [vmem:[#allocation3 + $0x219] sm:$0xff]  ;;  %v4756_v46 = vld [vmem:[#allocation3 + $0x290] sm:$0xff] }
 0x520   :  { %v4616_v11 = vpop.permute.xlu0 %4615  ;;  %v5048_v43 = vpack.c.bf16 %v5003_v7, %v5002_v32 }
 0x521   :  { %4694 = vst.msk [vmem:[#allocation4 + $0x90] sm:$0xff] %vm4675_vm5, %v4616_v11  ;;  %v4610_v36 = vpop.permute.xlu1 %4609 }
 0x522   :  { %4691 = vst.msk [vmem:[#allocation4 + $0x78] sm:$0xff] %vm4675_vm5, %v4610_v36  ;;  %5122 = vrot.lane.b32.xlu0 %v5044_v53, %s7219_s22  ;;  %v4748_v53 = vld [vmem:[#allocation3 + $0x230] sm:$0xff] }
 0x523   :  { %5377 = vrot.lane.b32.xlu1 %v9337_v38, %s7220_s25  ;;  %v5253_v38 = vld [vmem:[#allocation3 + $0x19a] sm:$0xff] }
 0x524   :  { %v4620_v55 = vpop.permute.xlu0 %4619 }
 0x525   :  { %4696 = vst.msk [vmem:[#allocation4 + $0xa0] sm:$0xff] %vm4675_vm5, %v4620_v55  ;;  %v4614_v2 = vpop.permute.xlu1 %4613  ;;  %v4750_v55 = vld [vmem:[#allocation3 + $0x248] sm:$0xff] }
 0x526   :  { %4693 = vst.msk [vmem:[#allocation4 + $0x88] sm:$0xff] %vm4675_vm5, %v4614_v2  ;;  %5379 = vrot.lane.b32.xlu0 %v9357_v10, %s7220_s25  ;;  %v5302_v10 = vpack.c.bf16 %v5254_v48, %v5253_v38  ;;  %v4793_v13 = vpack.c.bf16 %v4750_v55, %v4749_v22  ;;  %v5015_v55 = vld [vmem:[#allocation3 + $0x2a9] sm:$0xff]  ;;  %v5270_v22 = vld [vmem:[#allocation3 + $0x292] sm:$0xff] }
 0x527   :  { %4867 = vrot.lane.b32.xlu1 %v4788_v34, %s7218_s17  ;;  %v4792_v34 = vpack.c.bf16 %v4748_v53, %v4747_v52  ;;  %v5012_v52 = vld [vmem:[#allocation3 + $0x289] sm:$0xff] }
 0x528   :  { %v4624_v21 = vpop.permute.xlu0 %4623 }
 0x529   :  { %4698 = vst.msk [vmem:[#allocation4 + $0xb0] sm:$0xff] %vm4675_vm5, %v4624_v21  ;;  %v4618_v20 = vpop.permute.xlu1 %4617  ;;  %v5007_v21 = vld [vmem:[#allocation3 + $0x249] sm:$0xff] }
 0x52a   :  { %4695 = vst.msk [vmem:[#allocation4 + $0x98] sm:$0xff] %vm4675_vm5, %v4618_v20  ;;  %4869 = vrot.lane.b32.xlu0 %v4789_v27, %s7218_s17  ;;  %v4752_v20 = vld [vmem:[#allocation3 + $0x260] sm:$0xff] }
 0x52b   :  { %5124 = vrot.lane.b32.xlu1 %v5045_v41, %s7219_s22  ;;  %v5049_v41 = vpack.c.bf16 %v5005_v9, %v5004_v49  ;;  %v5269_v9 = vld [vmem:[#allocation3 + $0x28a] sm:$0xff] }
 0x52c   :  { %v4628_v47 = vpop.permute.xlu0 %4627 }
 0x52d   :  { %4700 = vst.msk [vmem:[#allocation4 + $0xc0] sm:$0xff] %vm4675_vm5, %v4628_v47  ;;  %v4622_v56 = vpop.permute.xlu1 %4621  ;;  %v4794_v47 = vpack.c.bf16 %v4752_v20, %v4751_v61  ;;  %v4759_v20 = vld [vmem:[#allocation3 + $0x2b8] sm:$0xff] }
 0x52e   :  { %4697 = vst.msk [vmem:[#allocation4 + $0xa8] sm:$0xff] %vm4675_vm5, %v4622_v56  ;;  %5126 = vrot.lane.b32.xlu0 %v5046_v0, %s7219_s22  ;;  %v4754_v0 = vld [vmem:[#allocation3 + $0x278] sm:$0xff]  ;;  %v5009_v56 = vld [vmem:[#allocation3 + $0x261] sm:$0xff] }
 0x52f   :  { %5381 = vrot.lane.b32.xlu1 %v5302_v10, %s7220_s25  ;;  %v4795_v26 = vpack.c.bf16 %v4754_v0, %v4753_v17  ;;  %v5017_v0 = vld [vmem:[#allocation3 + $0x2c1] sm:$0xff] }
 0x530   :  { %v4632_v45 = vpop.permute.xlu0 %4631 }
 0x531   :  { %4702 = vst.msk [vmem:[#allocation4 + $0xd0] sm:$0xff] %vm4675_vm5, %v4632_v45  ;;  %v4626_v60 = vpop.permute.xlu1 %4625 }
 0x532   :  { %4699 = vst.msk [vmem:[#allocation4 + $0xb8] sm:$0xff] %vm4675_vm5, %v4626_v60  ;;  %5383 = vrot.lane.b32.xlu0 %v9367_v31, %s7220_s25  ;;  %v5008_v60 = vld [vmem:[#allocation3 + $0x259] sm:$0xff] }
 0x533   :  { %4871 = vrot.lane.b32.xlu1 %v4790_v40, %s7218_s17  ;;  %v5051_v40 = vpack.c.bf16 %v5009_v56, %v5008_v60  ;;  %v4761_v56 = vld [vmem:[#allocation3 + $0x2d0] sm:$0xff]  ;;  %v5016_v60 = vld [vmem:[#allocation3 + $0x2b9] sm:$0xff] }
 0x534   :  { %v4636_v19 = vpop.permute.xlu0 %4635 }
 0x535   :  { %4704 = vst.msk [vmem:[#allocation4 + $0xe0] sm:$0xff] %vm4675_vm5, %v4636_v19  ;;  %v4630_v51 = vpop.permute.xlu1 %4629 }
 0x536   :  { %4701 = vst.msk [vmem:[#allocation4 + $0xc8] sm:$0xff] %vm4675_vm5, %v4630_v51  ;;  %4873 = vrot.lane.b32.xlu0 %v4791_v5, %s7218_s17 }
 0x537   :  { %5128 = vrot.lane.b32.xlu1 %v5047_v35, %s7219_s22  ;;  %v4755_v35 = vld [vmem:[#allocation3 + $0x288] sm:$0xff] }
 0x538   :  { %v4640_v31 = vpop.permute.xlu0 %4639  ;;  %v4796_v32 = vpack.c.bf16 %v4756_v46, %v4755_v35  ;;  %v5275_v35 = vld [vmem:[#allocation3 + $0x2d2] sm:$0xff] }
 0x539   :  { %4706 = vst.msk [vmem:[#allocation4 + $0xf0] sm:$0xff] %vm4675_vm5, %v4640_v31  ;;  %v4634_v11 = vpop.permute.xlu1 %4633  ;;  %v4758_v31 = vld [vmem:[#allocation3 + $0x2a8] sm:$0xff] }
 0x53a   :  { %4703 = vst.msk [vmem:[#allocation4 + $0xd8] sm:$0xff] %vm4675_vm5, %v4634_v11  ;;  %5130 = vrot.lane.b32.xlu0 %v5048_v43, %s7219_s22  ;;  %v5013_v43 = vld [vmem:[#allocation3 + $0x291] sm:$0xff]  ;;  %v4757_v11 = vld [vmem:[#allocation3 + $0x2a0] sm:$0xff] }
 0x53b   :  { %5385 = vrot.lane.b32.xlu1 %v9354_v24, %s7220_s25 }
 0x53c   :  { %v4838_v12 = vpop.permute.xlu0 %4837 }
 0x53d   :  { %4934 = vst.msk [vmem:[#allocation4] sm:$0xff] %vm4933_vm6, %v4838_v12  ;;  %v4638_v36 = vpop.permute.xlu1 %4637  ;;  %v4797_v12 = vpack.c.bf16 %v4758_v31, %v4757_v11  ;;  %v4763_v11 = vld [vmem:[#allocation3 + $0x2e8] sm:$0xff] }
 0x53e   :  { %4705 = vst.msk [vmem:[#allocation4 + $0xe8] sm:$0xff] %vm4675_vm5, %v4638_v36  ;;  %5387 = vrot.lane.b32.xlu0 %v9377_v30, %s7220_s25  ;;  %v5006_v30 = vld [vmem:[#allocation3 + $0x241] sm:$0xff] }
 0x53f   :  { %4875 = vrot.lane.b32.xlu1 %v4792_v34, %s7218_s17  ;;  %v5050_v38 = vpack.c.bf16 %v5007_v21, %v5006_v30  ;;  %v5053_v34 = vpack.c.bf16 %v5013_v43, %v5012_v52  ;;  %v5271_v21 = vld [vmem:[#allocation3 + $0x2a2] sm:$0xff]  ;;  %v5272_v30 = vld [vmem:[#allocation3 + $0x2aa] sm:$0xff] }
 0x540   :  { %v4842_v2 = vpop.permute.xlu0 %4841 }
 0x541   :  { %4936 = vst.msk [vmem:[#allocation4 + $0x10] sm:$0xff] %vm4933_vm6, %v4842_v2  ;;  %v4642_v24 = vpop.permute.xlu1 %4641  ;;  %v5014_v2 = vld [vmem:[#allocation3 + $0x2a1] sm:$0xff] }
 0x542   :  { %4707 = vst.msk [vmem:[#allocation4 + $0xf8] sm:$0xff] %vm4675_vm5, %v4642_v24  ;;  %4877 = vrot.lane.b32.xlu0 %v4793_v13, %s7218_s17  ;;  %v5054_v49 = vpack.c.bf16 %v5015_v55, %v5014_v2 }
 0x543   :  { %5132 = vrot.lane.b32.xlu1 %v5049_v41, %s7219_s22  ;;  %v5310_v41 = vpack.c.bf16 %v5270_v22, %v5269_v9  ;;  %v5020_v22 = vld [vmem:[#allocation3 + $0x2e9] sm:$0xff] }
 0x544   :  { %v5095_v27 = vpop.permute.xlu0 %5094 }
 0x545   :  { %5191 = vst.msk [vmem:[#allocation4] sm:$0xff] %vm5190_vm7, %v5095_v27  ;;  %v4840_v48 = vpop.permute.xlu1 %4839  ;;  %v4760_v27 = vld [vmem:[#allocation3 + $0x2c0] sm:$0xff] }
 0x546   :  { %4935 = vst.msk [vmem:[#allocation4 + $0x8] sm:$0xff] %vm4933_vm6, %v4840_v48  ;;  %5134 = vrot.lane.b32.xlu0 %v5050_v38, %s7219_s22  ;;  %v5311_v48 = vpack.c.bf16 %v5272_v30, %v5271_v21  ;;  %v5022_v21 = vld [vmem:[#allocation3 + $0x301] sm:$0xff] }
 0x547   :  { %5389 = vrot.lane.b32.xlu1 %v9364_v54, %s7220_s25 }
 0x548   :  { %v5352_v44 = vpop.permute.xlu0 %5351 }
 0x549   :  { %5448 = vst.msk [vmem:[#allocation4] sm:$0xff] %vm5447_vm8, %v5352_v44  ;;  %v4844_v10 = vpop.permute.xlu1 %4843 }
 0x54a   :  { %4937 = vst.msk [vmem:[#allocation4 + $0x18] sm:$0xff] %vm4933_vm6, %v4844_v10  ;;  %5391 = vrot.lane.b32.xlu0 %v9385_v62, %s7220_s25  ;;  %v5010_v62 = vld [vmem:[#allocation3 + $0x271] sm:$0xff]  ;;  %v4798_v10 = vpack.c.bf16 %v4760_v27, %v4759_v20  ;;  %v5279_v20 = vld [vmem:[#allocation3 + $0x302] sm:$0xff] }
 0x54b   :  { %4879 = vrot.lane.b32.xlu1 %v4794_v47, %s7218_s17  ;;  %v5052_v19 = vpack.c.bf16 %v5011_v63, %v5010_v62  ;;  %v4762_v47 = vld [vmem:[#allocation3 + $0x2d8] sm:$0xff] }
 0x54c   :  { %v5099_v45 = vpop.permute.xlu0 %5098  ;;  %v5019_v63 = vld [vmem:[#allocation3 + $0x2d9] sm:$0xff] }
 0x54d   :  { %5193 = vst.msk [vmem:[#allocation4 + $0x10] sm:$0xff] %vm5190_vm7, %v5099_v45  ;;  %v5097_v54 = vpop.permute.xlu1 %5096  ;;  %v5273_v62 = vld [vmem:[#allocation3 + $0x2ba] sm:$0xff] }
 0x54e   :  { %5192 = vst.msk [vmem:[#allocation4 + $0x8] sm:$0xff] %vm5190_vm7, %v5097_v54  ;;  %4881 = vrot.lane.b32.xlu0 %v4795_v26, %s7218_s17  ;;  %v4799_v26 = vpack.c.bf16 %v4762_v47, %v4761_v56 }
 0x54f   :  { %5136 = vrot.lane.b32.xlu1 %v5051_v40, %s7219_s22  ;;  %v5055_v40 = vpack.c.bf16 %v5017_v0, %v5016_v60  ;;  %v4767_v0 = vld [vmem:[#allocation3 + $0x318] sm:$0xff]  ;;  %v5025_v60 = vld [vmem:[#allocation3 + $0x321] sm:$0xff] }
 0x550   :  { %v5356_v59 = vpop.permute.xlu0 %5355  ;;  %v5480_v57 = vld [vmem:[#allocation4] sm:$0xff] }
 0x551   :  { %5450 = vst.msk [vmem:[#allocation4 + $0x10] sm:$0xff] %vm5447_vm8, %v5356_v59  ;;  %7018 = vmatprep.mubr.msk.bf16.mxu1 %vm5548_vm9, %v5480_v57  ;;  %v5354_v5 = vpop.permute.xlu1 %5353  ;;  %v5274_v59 = vld [vmem:[#allocation3 + $0x2c2] sm:$0xff]  ;;  %v5018_v57 = vld [vmem:[#allocation3 + $0x2d1] sm:$0xff] }
 0x552   :  { %5449 = vst.msk [vmem:[#allocation4 + $0x8] sm:$0xff] %vm5447_vm8, %v5354_v5  ;;  %5138 = vrot.lane.b32.xlu0 %v5052_v19, %s7219_s22  ;;  %v5056_v5 = vpack.c.bf16 %v5019_v63, %v5018_v57 }
 0x553   :  { %5393 = vrot.lane.b32.xlu1 %v9374_v16, %s7220_s25 }
 0x554   :  { %v4846_v51 = vpop.permute.xlu0 %4845 }
 0x555   :  { %4938 = vst.msk [vmem:[#allocation4 + $0x20] sm:$0xff] %vm4933_vm6, %v4846_v51  ;;  %v5101_v7 = vpop.permute.xlu1 %5100  ;;  %v5312_v51 = vpack.c.bf16 %v5274_v59, %v5273_v62  ;;  %v5024_v59 = vld [vmem:[#allocation3 + $0x319] sm:$0xff] }
 0x556   :  { %5194 = vst.msk [vmem:[#allocation4 + $0x18] sm:$0xff] %vm5190_vm7, %v5101_v7  ;;  %5395 = vrot.lane.b32.xlu0 %v9392_v15, %s7220_s25  ;;  %v5276_v7 = vld [vmem:[#allocation3 + $0x2da] sm:$0xff] }
 0x557   :  { %4883 = vrot.lane.b32.xlu1 %v4796_v32, %s7218_s17  ;;  %v4764_v32 = vld [vmem:[#allocation3 + $0x2f0] sm:$0xff]  ;;  %v5313_v43 = vpack.c.bf16 %v5276_v7, %v5275_v35 }
 0x558   :  { %v5103_v53 = vpop.permute.xlu0 %5102  ;;  %v5482_v15 = vld [vmem:[#allocation4 + $0x10] sm:$0xff]  ;;  %v4800_v52 = vpack.c.bf16 %v4764_v32, %v4763_v11 }
 0x559   :  { %5195 = vst.msk [vmem:[#allocation4 + $0x20] sm:$0xff] %vm5190_vm7, %v5103_v53  ;;  %v5358_v16 = vpop.permute.xlu1 %5357  ;;  %v5481_v36 = vld [vmem:[#allocation4 + $0x8] sm:$0xff]  ;;  %v5026_v35 = vld [vmem:[#allocation3 + $0x331] sm:$0xff] }
 0x55a   :  { %5451 = vst.msk [vmem:[#allocation4 + $0x18] sm:$0xff] %vm5447_vm8, %v5358_v16  ;;  %4885 = vrot.lane.b32.xlu0 %v4797_v12, %s7218_s17  ;;  %7019 = vmatmul.mubr.msk.bf16.vlgmr.msra.gmra.mrb[0].mxu1 %vm5548_vm9, %v5481_v36  ;;  %v4766_v16 = vld [vmem:[#allocation3 + $0x308] sm:$0xff]  ;;  %v5021_v36 = vld [vmem:[#allocation3 + $0x2f1] sm:$0xff] }
 0x55b   :  { %5140 = vrot.lane.b32.xlu1 %v5053_v34, %s7219_s22  ;;  %7022 = vmatprep.mubr.msk.bf16.mxu1 %vm5548_vm9, %v5482_v15  ;;  %v4765_v34 = vld [vmem:[#allocation3 + $0x300] sm:$0xff] }
 0x55c   :  { %v5360_v13 = vpop.permute.xlu0 %5359  ;;  %v4801_v9 = vpack.c.bf16 %v4766_v16, %v4765_v34 }
 0x55d   :  { %5452 = vst.msk [vmem:[#allocation4 + $0x20] sm:$0xff] %vm5447_vm8, %v5360_v13  ;;  %v4848_v24 = vpop.permute.xlu1 %4847  ;;  %v5057_v13 = vpack.c.bf16 %v5021_v36, %v5020_v22 }
 0x55e   :  { %4939 = vst.msk [vmem:[#allocation4 + $0x28] sm:$0xff] %vm4933_vm6, %v4848_v24  ;;  %5142 = vrot.lane.b32.xlu0 %v5054_v49, %s7219_s22  ;;  %v5023_v49 = vld [vmem:[#allocation3 + $0x309] sm:$0xff] }
 0x55f   :  { %5397 = vrot.lane.b32.xlu1 %v5310_v41, %s7220_s25  ;;  %v5277_v24 = vld [vmem:[#allocation3 + $0x2ea] sm:$0xff]  ;;  %v5278_v41 = vld [vmem:[#allocation3 + $0x2f2] sm:$0xff]  ;;  %v5058_v27 = vpack.c.bf16 %v5023_v49, %v5022_v21 }
 0x560   :  { %v4850_v38 = vpop.permute.xlu0 %4849 }
 0x561   :  { %4940 = vst.msk [vmem:[#allocation4 + $0x30] sm:$0xff] %vm4933_vm6, %v4850_v38  ;;  %v5105_v44 = vpop.permute.xlu1 %5104  ;;  %v5483_v61 = vld [vmem:[#allocation4 + $0x18] sm:$0xff] }
 0x562   :  { %5196 = vst.msk [vmem:[#allocation4 + $0x28] sm:$0xff] %vm5190_vm7, %v5105_v44  ;;  %5399 = vrot.lane.b32.xlu0 %v5311_v48, %s7220_s25  ;;  %7023 = vmatmul.mubr.msk.bf16.gmra.mrb[4].mxu1 %vm5548_vm9, %v5483_v61  ;;  %v5314_v48 = vpack.c.bf16 %v5278_v41, %v5277_v24  ;;  %v5280_v44 = vld [vmem:[#allocation3 + $0x30a] sm:$0xff]  ;;  %v4768_v61 = vld [vmem:[#allocation3 + $0x320] sm:$0xff]  ;;  %v5286_v41 = vld [vmem:[#allocation3 + $0x352] sm:$0xff] }
 0x563   :  { %4887 = vrot.lane.b32.xlu1 %v4798_v10, %s7218_s17  ;;  %v5315_v47 = vpack.c.bf16 %v5280_v44, %v5279_v20  ;;  %v5285_v24 = vld [vmem:[#allocation3 + $0x34a] sm:$0xff] }
 0x564   :  { %v5107_v17 = vpop.permute.xlu0 %5106  ;;  %v5484_v45 = vld [vmem:[#allocation4 + $0x20] sm:$0xff] }
 0x565   :  { %5197 = vst.msk [vmem:[#allocation4 + $0x30] sm:$0xff] %vm5190_vm7, %v5107_v17  ;;  %7026 = vmatprep.mubr.msk.bf16.mxu1 %vm5548_vm9, %v5484_v45  ;;  %v5362_v54 = vpop.permute.xlu1 %5361  ;;  %v4802_v45 = vpack.c.bf16 %v4768_v61, %v4767_v0 }
 0x566   :  { %5453 = vst.msk [vmem:[#allocation4 + $0x28] sm:$0xff] %vm5447_vm8, %v5362_v54  ;;  %4889 = vrot.lane.b32.xlu0 %v4799_v26, %s7218_s17  ;;  %v4770_v26 = vld [vmem:[#allocation3 + $0x338] sm:$0xff]  ;;  %v4769_v54 = vld [vmem:[#allocation3 + $0x330] sm:$0xff] }
 0x567   :  { %5144 = vrot.lane.b32.xlu1 %v5055_v40, %s7219_s22  ;;  %v4803_v62 = vpack.c.bf16 %v4770_v26, %v4769_v54  ;;  %v10254_v26 = vld [vmem:[#allocation10_spill] sm:$0xff] }
 0x568   :  { %v5364_v19 = vpop.permute.xlu0 %5363 }
 0x569   :  { %5454 = vst.msk [vmem:[#allocation4 + $0x30] sm:$0xff] %vm5447_vm8, %v5364_v19  ;;  %v4852_v46 = vpop.permute.xlu1 %4851  ;;  %v5059_v19 = vpack.c.bf16 %v5025_v60, %v5024_v59 }
 0x56a   :  { %4941 = vst.msk [vmem:[#allocation4 + $0x38] sm:$0xff] %vm4933_vm6, %v4852_v46  ;;  %5146 = vrot.lane.b32.xlu0 %v5056_v5, %s7219_s22  ;;  %v5027_v5 = vld [vmem:[#allocation3 + $0x339] sm:$0xff] }
 0x56b   :  { %5401 = vrot.lane.b32.xlu1 %v5312_v51, %s7220_s25  ;;  %v5281_v46 = vld [vmem:[#allocation3 + $0x31a] sm:$0xff]  ;;  %v5282_v51 = vld [vmem:[#allocation3 + $0x322] sm:$0xff]  ;;  %v5060_v32 = vpack.c.bf16 %v5027_v5, %v5026_v35 }
 0x56c   :  { %v4854_v31 = vpop.permute.xlu0 %4853  ;;  %v10258_v5 = vld [vmem:[#allocation14_spill] sm:$0xff]  ;;  %v10259_v35 = vld [vmem:[#allocation15_spill] sm:$0xff] }
 0x56d   :  { %4942 = vst.msk [vmem:[#allocation4 + $0x40] sm:$0xff] %vm4933_vm6, %v4854_v31  ;;  %v5109_v53 = vpop.permute.xlu1 %5108  ;;  %v5485_v12 = vld [vmem:[#allocation4 + $0x28] sm:$0xff] }
 0x56e   :  { %5198 = vst.msk [vmem:[#allocation4 + $0x38] sm:$0xff] %vm5190_vm7, %v5109_v53  ;;  %5403 = vrot.lane.b32.xlu0 %v5313_v43, %s7220_s25  ;;  %7027 = vmatmul.mubr.msk.bf16.gmra.mrb[8].mxu1 %vm5548_vm9, %v5485_v12  ;;  %v4771_v31 = vld [vmem:[#allocation3 + $0x348] sm:$0xff]  ;;  %v4772_v43 = vld [vmem:[#allocation3 + $0x350] sm:$0xff]  ;;  %v5316_v53 = vpack.c.bf16 %v5282_v51, %v5281_v46 }
 0x56f   :  { %4891 = vrot.lane.b32.xlu1 %v4800_v52, %s7218_s17  ;;  %v5283_v12 = vld [vmem:[#allocation3 + $0x332] sm:$0xff]  ;;  %v5284_v52 = vld [vmem:[#allocation3 + $0x33a] sm:$0xff]  ;;  %v4804_v16 = vpack.c.bf16 %v4772_v43, %v4771_v31 }
 0x570   :  { %v5111_v55 = vpop.permute.xlu0 %5110  ;;  %v5486_v15 = vld [vmem:[#allocation4 + $0x30] sm:$0xff]  ;;  %v5317_v34 = vpack.c.bf16 %v5284_v52, %v5283_v12 }
 0x571   :  { %5199 = vst.msk [vmem:[#allocation4 + $0x40] sm:$0xff] %vm5190_vm7, %v5111_v55  ;;  %7030 = vmatprep.mubr.msk.bf16.mxu1 %vm5548_vm9, %v5486_v15  ;;  %v5366_v2 = vpop.permute.xlu1 %5365  ;;  %v5028_v55 = vld [vmem:[#allocation3 + $0x349] sm:$0xff]  ;;  %v5029_v15 = vld [vmem:[#allocation3 + $0x351] sm:$0xff] }
 0x572   :  { %5455 = vst.msk [vmem:[#allocation4 + $0x38] sm:$0xff] %vm5447_vm8, %v5366_v2  ;;  %4893 = vrot.lane.b32.xlu0 %v4801_v9, %s7218_s17  ;;  %v5061_v2 = vpack.c.bf16 %v5029_v15, %v5028_v55 }
 0x573   :  { %5148 = vrot.lane.b32.xlu1 %v5057_v13, %s7219_s22 }
 0x574   :  { %v5368_v30 = vpop.permute.xlu0 %5367 }
 0x575   :  { %5456 = vst.msk [vmem:[#allocation4 + $0x40] sm:$0xff] %vm5447_vm8, %v5368_v30  ;;  %v4856_v38 = vpop.permute.xlu1 %4855  ;;  %v5318_v30 = vpack.c.bf16 %v5286_v41, %v5285_v24  ;;  %v10267_v24 = vld [vmem:[#allocation23_spill] sm:$0xff]  ;;  %v10268_v41 = vld [vmem:[#allocation21_spill] sm:$0xff] }
 0x576   :  { %4943 = vst.msk [vmem:[#allocation4 + $0x48] sm:$0xff] %vm4933_vm6, %v4856_v38  ;;  %5150 = vrot.lane.b32.xlu0 %v5058_v27, %s7219_s22 }
 0x577   :  { %5405 = vrot.lane.b32.xlu1 %v5314_v48, %s7220_s25 }
 0x578   :  { %v4858_v10 = vpop.permute.xlu0 %4857 }
 0x579   :  { %4944 = vst.msk [vmem:[#allocation4 + $0x50] sm:$0xff] %vm4933_vm6, %v4858_v10  ;;  %v5113_v56 = vpop.permute.xlu1 %5112  ;;  %v5487_v17 = vld [vmem:[#allocation4 + $0x38] sm:$0xff] }
 0x57a   :  { %5200 = vst.msk [vmem:[#allocation4 + $0x48] sm:$0xff] %vm5190_vm7, %v5113_v56  ;;  %5407 = vrot.lane.b32.xlu0 %v5315_v47, %s7220_s25  ;;  %7031 = vmatmul.mubr.msk.bf16.gmra.mrb[12].mxu1 %vm5548_vm9, %v5487_v17  ;;  %v10252_v17 = vld [vmem:[#allocation8_spill] sm:$0xff] }
 0x57b   :  { %4895 = vrot.lane.b32.xlu1 %v4802_v45, %s7218_s17 }
 0x57c   :  { %v5115_v40 = vpop.permute.xlu0 %5114  ;;  %v5488_v63 = vld [vmem:[#allocation4 + $0x40] sm:$0xff] }
 0x57d   :  { %5201 = vst.msk [vmem:[#allocation4 + $0x50] sm:$0xff] %vm5190_vm7, %v5115_v40  ;;  %7034 = vmatprep.mubr.msk.bf16.mxu1 %vm5548_vm9, %v5488_v63  ;;  %v5370_v57 = vpop.permute.xlu1 %5369  ;;  %v10255_v40 = vld [vmem:[#allocation11_spill] sm:$0xff]  ;;  %v10256_v63 = vld [vmem:[#allocation9_spill] sm:$0xff] }
 0x57e   :  { %5457 = vst.msk [vmem:[#allocation4 + $0x48] sm:$0xff] %vm5447_vm8, %v5370_v57  ;;  %4897 = vrot.lane.b32.xlu0 %v4803_v62, %s7218_s17 }
 0x57f   :  { %5152 = vrot.lane.b32.xlu1 %v5059_v19, %s7219_s22  ;;  %v10257_v19 = vld [vmem:[#allocation16_spill] sm:$0xff] }
 0x580   :  { %v5372_v7 = vpop.permute.xlu0 %5371 }
 0x581   :  { %5458 = vst.msk [vmem:[#allocation4 + $0x50] sm:$0xff] %vm5447_vm8, %v5372_v7  ;;  %v4860_v11 = vpop.permute.xlu1 %4859  ;;  %v10260_v7 = vld [vmem:[#allocation13_spill] sm:$0xff] }
 0x582   :  { %4945 = vst.msk [vmem:[#allocation4 + $0x58] sm:$0xff] %vm4933_vm6, %v4860_v11  ;;  %5154 = vrot.lane.b32.xlu0 %v5060_v32, %s7219_s22  ;;  %v10261_v11 = vld [vmem:[#allocation20_spill] sm:$0xff] }
 0x583   :  { %5409 = vrot.lane.b32.xlu1 %v5316_v53, %s7220_s25  ;;  %v10262_v53 = vld [vmem:[#allocation18_spill] sm:$0xff] }
 0x584   :  { %v4862_v36 = vpop.permute.xlu0 %4861 }
 0x585   :  { %4946 = vst.msk [vmem:[#allocation4 + $0x60] sm:$0xff] %vm4933_vm6, %v4862_v36  ;;  %v5117_v9 = vpop.permute.xlu1 %5116  ;;  %v5489_v22 = vld [vmem:[#allocation4 + $0x48] sm:$0xff] }
 0x586   :  { %5202 = vst.msk [vmem:[#allocation4 + $0x58] sm:$0xff] %vm5190_vm7, %v5117_v9  ;;  %5411 = vrot.lane.b32.xlu0 %v5317_v34, %s7220_s25  ;;  %7035 = vmatmul.mubr.msk.bf16.gmra.mrb[16].mxu1 %vm5548_vm9, %v5489_v22  ;;  %v10263_v36 = vld [vmem:[#allocation19_spill] sm:$0xff]  ;;  %v10264_v34 = vld [vmem:[#allocation17_spill] sm:$0xff]  ;;  %v10265_v9 = vld [vmem:[#allocation24_spill] sm:$0xff] }
 0x587   :  { %4899 = vrot.lane.b32.xlu1 %v4804_v16, %s7218_s17  ;;  %v10266_v22 = vld [vmem:[#allocation22_spill] sm:$0xff] }
 0x588   :  { %v5119_v13 = vpop.permute.xlu0 %5118  ;;  %v5490_v49 = vld [vmem:[#allocation4 + $0x50] sm:$0xff] }
 0x589   :  { %5203 = vst.msk [vmem:[#allocation4 + $0x60] sm:$0xff] %vm5190_vm7, %v5119_v13  ;;  %7038 = vmatprep.mubr.msk.bf16.mxu1 %vm5548_vm9, %v5490_v49  ;;  %v5374_v21 = vpop.permute.xlu1 %5373 }
 0x58a   :  { %5459 = vst.msk [vmem:[#allocation4 + $0x58] sm:$0xff] %vm5447_vm8, %v5374_v21  ;;  %6144 = vrot.lane.b32.xlu0 %v8526_v33, %s7221_s4 }
 0x58b   :  { %5156 = vrot.lane.b32.xlu1 %v5061_v2, %s7219_s22 }
 0x58c   :  { %v5376_v27 = vpop.permute.xlu0 %5375 }
 0x58d   :  { %5460 = vst.msk [vmem:[#allocation4 + $0x60] sm:$0xff] %vm5447_vm8, %v5376_v27  ;;  %v4864_v38 = vpop.permute.xlu1 %4863 }
 0x58e   :  { %4947 = vst.msk [vmem:[#allocation4 + $0x68] sm:$0xff] %vm4933_vm6, %v4864_v38  ;;  %6148 = vrot.lane.b32.xlu0 %v8522_v8, %s7221_s4  ;;  %v10269_v38 = vld [vmem:[#allocation28_spill] sm:$0xff] }
 0x58f   :  { %5413 = vrot.lane.b32.xlu1 %v5318_v30, %s7220_s25 }
 0x590   :  { %v4866_v48 = vpop.permute.xlu0 %4865 }
 0x591   :  { %4948 = vst.msk [vmem:[#allocation4 + $0x70] sm:$0xff] %vm4933_vm6, %v4866_v48  ;;  %v5121_v20 = vpop.permute.xlu1 %5120  ;;  %v5491_v44 = vld [vmem:[#allocation4 + $0x58] sm:$0xff]  ;;  %v10270_v48 = vld [vmem:[#allocation26_spill] sm:$0xff] }
 0x592   :  { %5204 = vst.msk [vmem:[#allocation4 + $0x68] sm:$0xff] %vm5190_vm7, %v5121_v20  ;;  %6152 = vrot.lane.b32.xlu0 %v8552_v28, %s7221_s4  ;;  %7039 = vmatmul.mubr.msk.bf16.gmra.mrb[20].mxu1 %vm5548_vm9, %v5491_v44 }
 0x593   :  { %6146 = vrot.lane.b32.xlu1 %v8536_v50, %s7221_s4 }
 0x594   :  { %v5123_v33 = vpop.permute.xlu0 %5122  ;;  %v5492_v61 = vld [vmem:[#allocation4 + $0x60] sm:$0xff] }
 0x595   :  { %5205 = vst.msk [vmem:[#allocation4 + $0x70] sm:$0xff] %vm5190_vm7, %v5123_v33  ;;  %7042 = vmatprep.mubr.msk.bf16.mxu1 %vm5548_vm9, %v5492_v61  ;;  %v5378_v8 = vpop.permute.xlu1 %5377  ;;  %v10271_v33 = vld [vmem:[#allocation27_spill] sm:$0xff]  ;;  %v10272_v61 = vld [vmem:[#allocation25_spill] sm:$0xff] }
 0x596   :  { %5461 = vst.msk [vmem:[#allocation4 + $0x68] sm:$0xff] %vm5447_vm8, %v5378_v8  ;;  %6156 = vrot.lane.b32.xlu0 %v8548_v25, %s7221_s4 }
 0x597   :  { %6150 = vrot.lane.b32.xlu1 %v8531_v14, %s7221_s4 }
 0x598   :  { %v5380_v28 = vpop.permute.xlu0 %5379 }
 0x599   :  { %5462 = vst.msk [vmem:[#allocation4 + $0x70] sm:$0xff] %vm5447_vm8, %v5380_v28  ;;  %v4868_v10 = vpop.permute.xlu1 %4867 }
 0x59a   :  { %4949 = vst.msk [vmem:[#allocation4 + $0x78] sm:$0xff] %vm4933_vm6, %v4868_v10  ;;  %6160 = vrot.lane.b32.xlu0 %v8583_v18, %s7221_s4 }
 0x59b   :  { %6154 = vrot.lane.b32.xlu1 %v8561_v37, %s7221_s4 }
 0x59c   :  { %v4870_v50 = vpop.permute.xlu0 %4869 }
 0x59d   :  { %4950 = vst.msk [vmem:[#allocation4 + $0x80] sm:$0xff] %vm4933_vm6, %v4870_v50  ;;  %v5125_v47 = vpop.permute.xlu1 %5124  ;;  %v5493_v25 = vld [vmem:[#allocation4 + $0x68] sm:$0xff]  ;;  %v10273_v50 = vld [vmem:[#allocation32_spill] sm:$0xff] }
 0x59e   :  { %5206 = vst.msk [vmem:[#allocation4 + $0x78] sm:$0xff] %vm5190_vm7, %v5125_v47  ;;  %6164 = vrot.lane.b32.xlu0 %v8576_v6, %s7221_s4  ;;  %7043 = vmatmul.mubr.msk.bf16.gmra.mrb[24].mxu1 %vm5548_vm9, %v5493_v25  ;;  %v10274_v47 = vld [vmem:[#allocation30_spill] sm:$0xff] }
 0x59f   :  { %6158 = vrot.lane.b32.xlu1 %v8557_v4, %s7221_s4 }
 0x5a0   :  { %v5127_v14 = vpop.permute.xlu0 %5126  ;;  %v5494_v18 = vld [vmem:[#allocation4 + $0x70] sm:$0xff] }
 0x5a1   :  { %5207 = vst.msk [vmem:[#allocation4 + $0x80] sm:$0xff] %vm5190_vm7, %v5127_v14  ;;  %7046 = vmatprep.mubr.msk.bf16.mxu1 %vm5548_vm9, %v5494_v18  ;;  %v5382_v37 = vpop.permute.xlu1 %5381 }
 0x5a2   :  { %5463 = vst.msk [vmem:[#allocation4 + $0x78] sm:$0xff] %vm5447_vm8, %v5382_v37  ;;  %6168 = vrot.lane.b32.xlu0 %v8617_v3, %s7221_s4  ;;  %v10275_v37 = vld [vmem:[#allocation31_spill] sm:$0xff] }
 0x5a3   :  { %6162 = vrot.lane.b32.xlu1 %v8595_v1, %s7221_s4 }
 0x5a4   :  { %v5384_v6 = vpop.permute.xlu0 %5383 }
 0x5a5   :  { %5464 = vst.msk [vmem:[#allocation4 + $0x80] sm:$0xff] %vm5447_vm8, %v5384_v6  ;;  %v4872_v0 = vpop.permute.xlu1 %4871  ;;  %v10276_v6 = vld [vmem:[#allocation29_spill] sm:$0xff] }
 0x5a6   :  { %4951 = vst.msk [vmem:[#allocation4 + $0x88] sm:$0xff] %vm4933_vm6, %v4872_v0  ;;  %6172 = vrot.lane.b32.xlu0 %v8610_v58, %s7221_s4 }
 0x5a7   :  { %6166 = vrot.lane.b32.xlu1 %v8591_v23, %s7221_s4 }
 0x5a8   :  { %v4874_v4 = vpop.permute.xlu0 %4873 }
 0x5a9   :  { %4952 = vst.msk [vmem:[#allocation4 + $0x90] sm:$0xff] %vm4933_vm6, %v4874_v4  ;;  %v5129_v56 = vpop.permute.xlu1 %5128  ;;  %v5495_v3 = vld [vmem:[#allocation4 + $0x78] sm:$0xff] }
 0x5aa   :  { %5208 = vst.msk [vmem:[#allocation4 + $0x88] sm:$0xff] %vm5190_vm7, %v5129_v56  ;;  %6176 = vrot.lane.b32.xlu0 %v8649_v42, %s7221_s4  ;;  %7047 = vmatmul.mubr.msk.bf16.gmra.mrb[28].mxu1 %vm5548_vm9, %v5495_v3  ;;  %v10277_v56 = vld [vmem:[#allocation36_spill] sm:$0xff]  ;;  %v10278_v3 = vld [vmem:[#allocation34_spill] sm:$0xff] }
 0x5ab   :  { %6170 = vrot.lane.b32.xlu1 %v8629_v39, %s7221_s4  ;;  %v10253_v39 = vld [vmem:[#allocation12_spill] sm:$0xff] }
 0x5ac   :  { %v5131_v1 = vpop.permute.xlu0 %5130  ;;  %v5496_v58 = vld [vmem:[#allocation4 + $0x80] sm:$0xff] }
 0x5ad   :  { %5209 = vst.msk [vmem:[#allocation4 + $0x90] sm:$0xff] %vm5190_vm7, %v5131_v1  ;;  %7050 = vmatprep.mubr.msk.bf16.mxu1 %vm5548_vm9, %v5496_v58  ;;  %v5386_v23 = vpop.permute.xlu1 %5385 }
 0x5ae   :  { %5465 = vst.msk [vmem:[#allocation4 + $0x88] sm:$0xff] %vm5447_vm8, %v5386_v23  ;;  %6180 = vrot.lane.b32.xlu0 %v8644_v29, %s7221_s4 }
 0x5af   :  { %6174 = vrot.lane.b32.xlu1 %v10252_v17, %s7221_s4  ;;  %v10279_v17 = vld [vmem:[#allocation35_spill] sm:$0xff] }
 0x5b0   :  { %v5388_v42 = vpop.permute.xlu0 %5387 }
 0x5b1   :  { %5466 = vst.msk [vmem:[#allocation4 + $0x90] sm:$0xff] %vm5447_vm8, %v5388_v42  ;;  %v4876_v45 = vpop.permute.xlu1 %4875  ;;  %v10280_v42 = vld [vmem:[#allocation33_spill] sm:$0xff] }
 0x5b2   :  { %4953 = vst.msk [vmem:[#allocation4 + $0x98] sm:$0xff] %vm4933_vm6, %v4876_v45  ;;  %6184 = vrot.lane.b32.xlu0 %v10253_v39, %s7221_s4 }
 0x5b3   :  { %6178 = vrot.lane.b32.xlu1 %v10254_v26, %s7221_s4 }
 0x5b4   :  { %v4878_v60 = vpop.permute.xlu0 %4877 }
 0x5b5   :  { %4954 = vst.msk [vmem:[#allocation4 + $0xa0] sm:$0xff] %vm4933_vm6, %v4878_v60  ;;  %v5133_v54 = vpop.permute.xlu1 %5132  ;;  %v5497_v29 = vld [vmem:[#allocation4 + $0x88] sm:$0xff]  ;;  %v10281_v60 = vld [vmem:[#allocation40_spill] sm:$0xff] }
 0x5b6   :  { %5210 = vst.msk [vmem:[#allocation4 + $0x98] sm:$0xff] %vm5190_vm7, %v5133_v54  ;;  %6188 = vrot.lane.b32.xlu0 %v10255_v40, %s7221_s4  ;;  %7051 = vmatmul.mubr.msk.bf16.gmra.mrb[32].mxu1 %vm5548_vm9, %v5497_v29  ;;  %v10282_v54 = vld [vmem:[#allocation38_spill] sm:$0xff] }
 0x5b7   :  { %6182 = vrot.lane.b32.xlu1 %v10256_v63, %s7221_s4  ;;  %v10283_v63 = vld [vmem:[#allocation39_spill] sm:$0xff] }
 0x5b8   :  { %v5135_v62 = vpop.permute.xlu0 %5134  ;;  %v5498_v59 = vld [vmem:[#allocation4 + $0x90] sm:$0xff] }
 0x5b9   :  { %5211 = vst.msk [vmem:[#allocation4 + $0xa0] sm:$0xff] %vm5190_vm7, %v5135_v62  ;;  %7054 = vmatprep.mubr.msk.bf16.mxu1 %vm5548_vm9, %v5498_v59  ;;  %v5390_v57 = vpop.permute.xlu1 %5389  ;;  %v10284_v62 = vld [vmem:[#allocation37_spill] sm:$0xff] }
 0x5ba   :  { %5467 = vst.msk [vmem:[#allocation4 + $0x98] sm:$0xff] %vm5447_vm8, %v5390_v57  ;;  %6192 = vrot.lane.b32.xlu0 %v10257_v19, %s7221_s4 }
 0x5bb   :  { %6186 = vrot.lane.b32.xlu1 %v10258_v5, %s7221_s4  ;;  %v10285_v5 = vld [vmem:[#allocation44_spill] sm:$0xff] }
 0x5bc   :  { %v5392_v46 = vpop.permute.xlu0 %5391 }
 0x5bd   :  { %5468 = vst.msk [vmem:[#allocation4 + $0xa0] sm:$0xff] %vm5447_vm8, %v5392_v46  ;;  %v4880_v51 = vpop.permute.xlu1 %4879  ;;  %v10286_v46 = vld [vmem:[#allocation42_spill] sm:$0xff] }
 0x5be   :  { %4955 = vst.msk [vmem:[#allocation4 + $0xa8] sm:$0xff] %vm4933_vm6, %v4880_v51  ;;  %6196 = vrot.lane.b32.xlu0 %v10259_v35, %s7221_s4 }
 0x5bf   :  { %6190 = vrot.lane.b32.xlu1 %v10260_v7, %s7221_s4 }
 0x5c0   :  { %v4882_v32 = vpop.permute.xlu0 %4881 }
 0x5c1   :  { %4956 = vst.msk [vmem:[#allocation4 + $0xb0] sm:$0xff] %vm4933_vm6, %v4882_v32  ;;  %v5137_v31 = vpop.permute.xlu1 %5136  ;;  %v5499_v43 = vld [vmem:[#allocation4 + $0x98] sm:$0xff]  ;;  %v10287_v32 = vld [vmem:[#allocation43_spill] sm:$0xff] }
 0x5c2   :  { %5212 = vst.msk [vmem:[#allocation4 + $0xa8] sm:$0xff] %vm5190_vm7, %v5137_v31  ;;  %6200 = vrot.lane.b32.xlu0 %v10261_v11, %s7221_s4  ;;  %7055 = vmatmul.mubr.msk.bf16.gmra.mrb[36].mxu1 %vm5548_vm9, %v5499_v43  ;;  %v10288_v31 = vld [vmem:[#allocation41_spill] sm:$0xff] }
 0x5c3   :  { %6194 = vrot.lane.b32.xlu1 %v10262_v53, %s7221_s4  ;;  %v10289_v53 = vld [vmem:[#allocation48_spill] sm:$0xff] }
 0x5c4   :  { %v5139_v12 = vpop.permute.xlu0 %5138  ;;  %v5500_v52 = vld [vmem:[#allocation4 + $0xa0] sm:$0xff] }
 0x5c5   :  { %5213 = vst.msk [vmem:[#allocation4 + $0xb0] sm:$0xff] %vm5190_vm7, %v5139_v12  ;;  %7058 = vmatprep.mubr.msk.bf16.mxu1 %vm5548_vm9, %v5500_v52  ;;  %v5394_v16 = vpop.permute.xlu1 %5393  ;;  %v10290_v12 = vld [vmem:[#allocation46_spill] sm:$0xff] }
 0x5c6   :  { %5469 = vst.msk [vmem:[#allocation4 + $0xa8] sm:$0xff] %vm5447_vm8, %v5394_v16  ;;  %6204 = vrot.lane.b32.xlu0 %v10263_v36, %s7221_s4  ;;  %v10291_v36 = vld [vmem:[#allocation47_spill] sm:$0xff] }
 0x5c7   :  { %6198 = vrot.lane.b32.xlu1 %v10264_v34, %s7221_s4  ;;  %v10292_v34 = vld [vmem:[#allocation45_spill] sm:$0xff] }
 0x5c8   :  { %v5396_v55 = vpop.permute.xlu0 %5395 }
 0x5c9   :  { %5470 = vst.msk [vmem:[#allocation4 + $0xb0] sm:$0xff] %vm5447_vm8, %v5396_v55  ;;  %v4884_v15 = vpop.permute.xlu1 %4883 }
 0x5ca   :  { %4957 = vst.msk [vmem:[#allocation4 + $0xb8] sm:$0xff] %vm4933_vm6, %v4884_v15  ;;  %6208 = vrot.lane.b32.xlu0 %v10265_v9, %s7221_s4  ;;  %v10293_v9 = vld [vmem:[#allocation52_spill] sm:$0xff] }
 0x5cb   :  { %6202 = vrot.lane.b32.xlu1 %v10266_v22, %s7221_s4  ;;  %v10294_v22 = vld [vmem:[#allocation50_spill] sm:$0xff] }
 0x5cc   :  { %v4886_v2 = vpop.permute.xlu0 %4885 }
 0x5cd   :  { %4958 = vst.msk [vmem:[#allocation4 + $0xc0] sm:$0xff] %vm4933_vm6, %v4886_v2  ;;  %v5141_v13 = vpop.permute.xlu1 %5140  ;;  %v5501_v49 = vld [vmem:[#allocation4 + $0xa8] sm:$0xff] }
 0x5ce   :  { %5214 = vst.msk [vmem:[#allocation4 + $0xb8] sm:$0xff] %vm5190_vm7, %v5141_v13  ;;  %6212 = vrot.lane.b32.xlu0 %v10267_v24, %s7221_s4  ;;  %7059 = vmatmul.mubr.msk.bf16.gmra.mrb[40].mxu1 %vm5548_vm9, %v5501_v49  ;;  %v10295_v2 = vld [vmem:[#allocation51_spill] sm:$0xff]  ;;  %v10296_v13 = vld [vmem:[#allocation49_spill] sm:$0xff]  ;;  %v10297_v24 = vld [vmem:[#allocation54_spill] sm:$0xff] }
 0x5cf   :  { %6206 = vrot.lane.b32.xlu1 %v10268_v41, %s7221_s4  ;;  %v10298_v41 = vld [vmem:[#allocation53_spill] sm:$0xff] }
 0x5d0   :  { %v5143_v21 = vpop.permute.xlu0 %5142  ;;  %v5502_v30 = vld [vmem:[#allocation4 + $0xb0] sm:$0xff] }
 0x5d1   :  { %5215 = vst.msk [vmem:[#allocation4 + $0xc0] sm:$0xff] %vm5190_vm7, %v5143_v21  ;;  %7062 = vmatprep.mubr.msk.bf16.mxu1 %vm5548_vm9, %v5502_v30  ;;  %v5398_v27 = vpop.permute.xlu1 %5397 }
 0x5d2   :  { %5471 = vst.msk [vmem:[#allocation4 + $0xb8] sm:$0xff] %vm5447_vm8, %v5398_v27  ;;  %6216 = vrot.lane.b32.xlu0 %v10269_v38, %s7221_s4 }
 0x5d3   :  { %6210 = vrot.lane.b32.xlu1 %v10270_v48, %s7221_s4 }
 0x5d4   :  { %v5400_v20 = vpop.permute.xlu0 %5399 }
 0x5d5   :  { %5472 = vst.msk [vmem:[#allocation4 + $0xc0] sm:$0xff] %vm5447_vm8, %v5400_v20  ;;  %v4888_v44 = vpop.permute.xlu1 %4887 }
 0x5d6   :  { %4959 = vst.msk [vmem:[#allocation4 + $0xc8] sm:$0xff] %vm4933_vm6, %v4888_v44  ;;  %6220 = vrot.lane.b32.xlu0 %v10271_v33, %s7221_s4 }
 0x5d7   :  { %6214 = vrot.lane.b32.xlu1 %v10272_v61, %s7221_s4 }
 0x5d8   :  { %v4890_v8 = vpop.permute.xlu0 %4889 }
 0x5d9   :  { %4960 = vst.msk [vmem:[#allocation4 + $0xd0] sm:$0xff] %vm4933_vm6, %v4890_v8  ;;  %v5145_v28 = vpop.permute.xlu1 %5144  ;;  %v5503_v10 = vld [vmem:[#allocation4 + $0xb8] sm:$0xff] }
 0x5da   :  { %5216 = vst.msk [vmem:[#allocation4 + $0xc8] sm:$0xff] %vm5190_vm7, %v5145_v28  ;;  %6224 = vrot.lane.b32.xlu0 %v10273_v50, %s7221_s4  ;;  %7063 = vmatmul.mubr.msk.bf16.gmra.mrb[44].mxu1 %vm5548_vm9, %v5503_v10 }
 0x5db   :  { %6218 = vrot.lane.b32.xlu1 %v10274_v47, %s7221_s4 }
 0x5dc   :  { %v5147_v25 = vpop.permute.xlu0 %5146  ;;  %v5504_v14 = vld [vmem:[#allocation4 + $0xc0] sm:$0xff] }
 0x5dd   :  { %5217 = vst.msk [vmem:[#allocation4 + $0xd0] sm:$0xff] %vm5190_vm7, %v5147_v25  ;;  %7066 = vmatprep.mubr.msk.bf16.mxu1 %vm5548_vm9, %v5504_v14  ;;  %v5402_v18 = vpop.permute.xlu1 %5401 }
 0x5de   :  { %5473 = vst.msk [vmem:[#allocation4 + $0xc8] sm:$0xff] %vm5447_vm8, %v5402_v18  ;;  %6228 = vrot.lane.b32.xlu0 %v10275_v37, %s7221_s4 }
 0x5df   :  { %6222 = vrot.lane.b32.xlu1 %v10276_v6, %s7221_s4 }
 0x5e0   :  { %v5404_v0 = vpop.permute.xlu0 %5403 }
 0x5e1   :  { %5474 = vst.msk [vmem:[#allocation4 + $0xd0] sm:$0xff] %vm5447_vm8, %v5404_v0  ;;  %v4892_v4 = vpop.permute.xlu1 %4891 }
 0x5e2   :  { %4961 = vst.msk [vmem:[#allocation4 + $0xd8] sm:$0xff] %vm4933_vm6, %v4892_v4  ;;  %6232 = vrot.lane.b32.xlu0 %v10277_v56, %s7221_s4 }
 0x5e3   :  { %6226 = vrot.lane.b32.xlu1 %v10278_v3, %s7221_s4 }
 0x5e4   :  { %v4894_v1 = vpop.permute.xlu0 %4893 }
 0x5e5   :  { %4962 = vst.msk [vmem:[#allocation4 + $0xe0] sm:$0xff] %vm4933_vm6, %v4894_v1  ;;  %v5149_v58 = vpop.permute.xlu1 %5148  ;;  %v5505_v23 = vld [vmem:[#allocation4 + $0xc8] sm:$0xff] }
 0x5e6   :  { %5218 = vst.msk [vmem:[#allocation4 + $0xd8] sm:$0xff] %vm5190_vm7, %v5149_v58  ;;  %6236 = vrot.lane.b32.xlu0 %v10279_v17, %s7221_s4  ;;  %7067 = vmatmul.mubr.msk.bf16.gmra.mrb[48].mxu1 %vm5548_vm9, %v5505_v23 }
 0x5e7   :  { %6230 = vrot.lane.b32.xlu1 %v10280_v42, %s7221_s4 }
 0x5e8   :  { %v5151_v45 = vpop.permute.xlu0 %5150  ;;  %v5506_v39 = vld [vmem:[#allocation4 + $0xd0] sm:$0xff] }
 0x5e9   :  { %5219 = vst.msk [vmem:[#allocation4 + $0xe0] sm:$0xff] %vm5190_vm7, %v5151_v45  ;;  %7070 = vmatprep.mubr.msk.bf16.mxu1 %vm5548_vm9, %v5506_v39  ;;  %v5406_v26 = vpop.permute.xlu1 %5405 }
 0x5ea   :  { %5475 = vst.msk [vmem:[#allocation4 + $0xd8] sm:$0xff] %vm5447_vm8, %v5406_v26  ;;  %6240 = vrot.lane.b32.xlu0 %v10281_v60, %s7221_s4  ;;  %v9910_v60 = vld [vmem:[%s10155_s5] ss:$0 sm:$0xff]  ;;  %s7222_s5 = smov [#allocation5]  }
 0x5eb   :  { %6234 = vrot.lane.b32.xlu1 %v10282_v54, %s7221_s4 }
 0x5ec   :  { %v5408_v29 = vpop.permute.xlu0 %5407 }
 0x5ed   :  { %5476 = vst.msk [vmem:[#allocation4 + $0xe0] sm:$0xff] %vm5447_vm8, %v5408_v29  ;;  %v4896_v40 = vpop.permute.xlu1 %4895 }
 0x5ee   :  { %4963 = vst.msk [vmem:[#allocation4 + $0xe8] sm:$0xff] %vm4933_vm6, %v4896_v40  ;;  %6244 = vrot.lane.b32.xlu0 %v10283_v63, %s7221_s4  ;;  %v9918_v40 = vld [vmem:[%s10156_s6] ss:$0 sm:$0xff]  ;;  %s6616_s6 = sshll.u32 %s7222_s5, 4  ;;  %s6617_s6 = int_to_ptr.vmem [resolvable:$true] %s6616_s6 }
 0x5ef   :  { %6238 = vrot.lane.b32.xlu1 %v10284_v62, %s7221_s4  ;;  %s7184_s8 = scalar_lea.vmem %s6617_s6, 256  ;;  %p7189_p1 = scmp.lt.s32.totalorder %s6617_s6, %s6617_s6 }
 0x5f0   :  { %v4898_v59 = vpop.permute.xlu0 %4897  ;;  %p7185_p0 = scmp.ne.s32.totalorder %s6617_s6, %s7184_s8  ;;  %p7190_p2 = scmp.lt.s32.totalorder %s7184_s8, %s7184_s8 }
 0x5f1   :  { %4964 = vst.msk [vmem:[#allocation4 + $0xf0] sm:$0xff] %vm4933_vm6, %v4898_v59  ;;  %v5153_v57 = vpop.permute.xlu1 %5152  ;;  %v5507_v19 = vld [vmem:[#allocation4 + $0xd8] sm:$0xff] }
 0x5f2   :  { %5220 = vst.msk [vmem:[#allocation4 + $0xe8] sm:$0xff] %vm5190_vm7, %v5153_v57  ;;  %6248 = vrot.lane.b32.xlu0 %v10285_v5, %s7221_s4  ;;  %7071 = vmatmul.mubr.msk.bf16.gmra.mrb[52].mxu1 %vm5548_vm9, %v5507_v19  ;;  %p7191_p3 = por %p7190_p2, %p7189_p1 }
 0x5f3   :  { %6242 = vrot.lane.b32.xlu1 %v10286_v46, %s7221_s4 }
 0x5f4   :  { %v5155_v51 = vpop.permute.xlu0 %5154  ;;  %v5508_v35 = vld [vmem:[#allocation4 + $0xe0] sm:$0xff]  ;;  %p7192_p4 = pnand %p7191_p3, %p7185_p0 }
 0x5f5   :  { %5221 = vst.msk [vmem:[#allocation4 + $0xf0] sm:$0xff] %vm5190_vm7, %v5155_v51  ;;  %7074 = vmatprep.mubr.msk.bf16.mxu1 %vm5548_vm9, %v5508_v35  ;;  %v5410_v7 = vpop.permute.xlu1 %5409 }
 0x5f6   :  { %5477 = vst.msk [vmem:[#allocation4 + $0xe8] sm:$0xff] %vm5447_vm8, %v5410_v7  ;;  %6252 = vrot.lane.b32.xlu0 %v10287_v32, %s7221_s4 }
 0x5f7   :  { %6246 = vrot.lane.b32.xlu1 %v10288_v31, %s7221_s4 }
 0x5f8   :  { %v5412_v43 = vpop.permute.xlu0 %5411 }
 0x5f9   :  { %5478 = vst.msk [vmem:[#allocation4 + $0xf0] sm:$0xff] %vm5447_vm8, %v5412_v43  ;;  %v4900_v11 = vpop.permute.xlu1 %4899 }
 0x5fa   :  { %4965 = vst.msk [vmem:[#allocation4 + $0xf8] sm:$0xff] %vm4933_vm6, %v4900_v11  ;;  %6256 = vrot.lane.b32.xlu0 %v10289_v53, %s7221_s4 }
 0x5fb   :  { %6250 = vrot.lane.b32.xlu1 %v10290_v12, %s7221_s4 }
 0x5fc   :  { %v6145_v21 = vpop.permute.xlu0 %6144 }
 0x5fd   :  { %v5157_v52 = vpop.permute.xlu1 %5156  ;;  %v5509_v16 = vld [vmem:[#allocation4 + $0xe8] sm:$0xff] }
 0x5fe   :  { %5222 = vst.msk [vmem:[#allocation4 + $0xf8] sm:$0xff] %vm5190_vm7, %v5157_v52  ;;  %6260 = vrot.lane.b32.xlu0 %v10291_v36, %s7221_s4  ;;  %7075 = vmatmul.mubr.msk.bf16.gmra.mrb[56].mxu1 %vm5548_vm9, %v5509_v16 }
 0x5ff   :  { %6254 = vrot.lane.b32.xlu1 %v10292_v34, %s7221_s4 }
 0x600   :  { %v5510_v55 = vld [vmem:[#allocation4 + $0xf0] sm:$0xff]  ;;  %v6149_v27 = vpop.permute.xlu0 %6148 }
 0x601   :  { %7078 = vmatprep.mubr.msk.bf16.mxu1 %vm5548_vm9, %v5510_v55  ;;  %v5414_v15 = vpop.permute.xlu1 %5413 }
 0x602   :  { %5479 = vst.msk [vmem:[#allocation4 + $0xf8] sm:$0xff] %vm5447_vm8, %v5414_v15  ;;  %6264 = vrot.lane.b32.xlu0 %v10293_v9, %s7221_s4 }
 0x603   :  { %6258 = vrot.lane.b32.xlu1 %v10294_v22, %s7221_s4 }
 0x604   :  { %v9867_v61 = vpop.permute.xlu0 %6152 }
 0x605   :  { %v6147_v30 = vpop.permute.xlu1 %6146 }
 0x606   :  { %6268 = vrot.lane.b32.xlu0 %v10295_v2, %s7221_s4 }
 0x607   :  { %6262 = vrot.lane.b32.xlu1 %v10296_v13, %s7221_s4 }
 0x608   :  { %v9873_v25 = vpop.permute.xlu0 %6156 }
 0x609   :  { %v5511_v49 = vld [vmem:[#allocation4 + $0xf8] sm:$0xff]  ;;  %v6151_v20 = vpop.permute.xlu1 %6150 }
 0x60a   :  { %7079 = vmatmul.mubr.msk.bf16.gmra.mrb[60].mxu1 %vm5548_vm9, %v5511_v49 }
 0x60b   :  { %6266 = vrot.lane.b32.xlu1 %v10297_v24, %s7221_s4 }
 0x60c   :  { %v9877_v18 = vpop.permute.xlu0 %6160 }
 0x60d   :  { %v9869_v8 = vpop.permute.xlu1 %6154 }
 0x60f   :  { %6270 = vrot.lane.b32.xlu1 %v10298_v41, %s7221_s4 }
 0x610   :  { %v9889_v3 = vpop.permute.xlu0 %6164 }
 0x611   :  { %v9875_v14 = vpop.permute.xlu1 %6158 }
 0x614   :  { %v9893_v58 = vpop.permute.xlu0 %6168 }
 0x615   :  { %v9879_v37 = vpop.permute.xlu1 %6162 }
 0x618   :  { %v9905_v26 = vpop.permute.xlu0 %6172 }
 0x619   :  { %v9891_v1 = vpop.permute.xlu1 %6166 }
 0x61c   :  { %v6177_v59 = vpop.permute.xlu0 %6176 }
 0x61d   :  { %v9895_v23 = vpop.permute.xlu1 %6170 }
 0x620   :  { %v6181_v36 = vpop.permute.xlu0 %6180 }
 0x621   :  { %v9912_v54 = vpop.permute.xlu1 %6174 }
 0x625   :  { %v6179_v5 = vpop.permute.xlu1 %6178 }
 0x629   :  { %v6183_v13 = vpop.permute.xlu1 %6182 }
 0x62d   :  { %v7020_v38 = vpop.f32.mrb[0].mxu1 }
 0x62e   :  { %v5683_v48 = vpop.f32.mrb[1].mxu1  ;;  %v5947_v29 = vmul.f32 %v7020_v38, %v9910_v60 }
 0x62f   :  { %v7021_v44 = vpop.f32.mrb[2].mxu1  ;;  %v5945_v63 = vmul.f32 %v9910_v60, %v5683_v48 }
 0x630   :  { %v5686_v33 = vpop.f32.mrb[3].mxu1  ;;  %v5948_v62 = vmul.f32 %v7021_v44, %v9910_v60  ;;  %v6018_v19 = vadd.f32 %v9918_v40, %v5947_v29 }
 0x631   :  { %v5946_v57 = vmul.f32 %v9910_v60, %v5686_v33  ;;  %v6016_v46 = vadd.f32 %v9918_v40, %v5945_v63 }
 0x632   :  { %v6019_v35 = vadd.f32 %v9918_v40, %v5948_v62  ;;  %v6338_v53 = vadd.f32 %v6149_v27, %v6018_v19 }
 0x633   :  { %v6017_v31 = vadd.f32 %v9918_v40, %v5946_v57  ;;  %v6336_v34 = vadd.f32 %v6145_v21, %v6016_v46  ;;  %v6185_v46 = vpop.permute.xlu0 %6184 }
 0x634   :  { %v6339_v9 = vadd.f32 %v6151_v20, %v6019_v35  ;;  %v6402_v27 = vmax.f32 %v6338_v53, 0.0 }
 0x635   :  { %v7024_v28 = vpop.f32.mrb[4].mxu1  ;;  %v6337_v49 = vadd.f32 %v6147_v30, %v6017_v31  ;;  %v6400_v33 = vmax.f32 %v6336_v34, 0.0 }
 0x636   :  { %v5699_v10 = vpop.f32.mrb[5].mxu1  ;;  %v5951_v38 = vmul.f32 %v7024_v28, %v9910_v60  ;;  %v6403_v62 = vmax.f32 %v6339_v9, 0.0 }
 0x637   :  { %v7025_v50 = vpop.f32.mrb[6].mxu1  ;;  %v5949_v21 = vmul.f32 %v9910_v60, %v5699_v10  ;;  %v6401_v30 = vmax.f32 %v6337_v49, 0.0 }
 0x638   :  { %v9871_v47 = vpop.f32.mrb[7].mxu1  ;;  %v5952_v20 = vmul.f32 %v7025_v50, %v9910_v60  ;;  %v6022_v28 = vadd.f32 %v9918_v40, %v5951_v38 }
 0x639   :  { %v6020_v10 = vadd.f32 %v9918_v40, %v5949_v21 }
 0x63a   :  { %v6023_v50 = vadd.f32 %v9918_v40, %v5952_v20 }
 0x641   :  { %v9881_v6 = vpop.f32.mrb[8].mxu1 }
 0x642   :  { %v9883_v0 = vpop.f32.mrb[9].mxu1 }
 0x643   :  { %v9885_v4 = vpop.f32.mrb[10].mxu1  ;;  %v5953_v21 = vmul.f32 %v9910_v60, %v9883_v0 }
 0x644   :  { %v9887_v56 = vpop.f32.mrb[11].mxu1 }
 0x64d   :  { %v9897_v17 = vpop.f32.mrb[12].mxu1 }
 0x64e   :  { %v9899_v42 = vpop.f32.mrb[13].mxu1 }
 0x64f   :  { %v9901_v45 = vpop.f32.mrb[14].mxu1 }
 0x650   :  { %v9903_v39 = vpop.f32.mrb[15].mxu1 }
 0x659   :  { %v7036_v51 = vpop.f32.mrb[16].mxu1 }
 0x65a   :  { %v5963_v7 = vmul.f32 %v7036_v51, %v9910_v60  ;;  %v5747_v32 = vpop.f32.mrb[17].mxu1 }
 0x65b   :  { %v5961_v43 = vmul.f32 %v9910_v60, %v5747_v32  ;;  %v7037_v11 = vpop.f32.mrb[18].mxu1  ;;  %v6187_v32 = vpop.permute.xlu1 %6186 }
 0x65c   :  { %v6034_v12 = vadd.f32 %v9918_v40, %v5963_v7  ;;  %v5964_v52 = vmul.f32 %v7037_v11, %v9910_v60  ;;  %v5750_v16 = vpop.f32.mrb[19].mxu1 }
 0x65d   :  { %v6032_v55 = vadd.f32 %v9918_v40, %v5961_v43  ;;  %v5962_v15 = vmul.f32 %v9910_v60, %v5750_v16 }
 0x65e   :  { %v6354_v22 = vadd.f32 %v6181_v36, %v6034_v12  ;;  %v6035_v2 = vadd.f32 %v9918_v40, %v5964_v52  ;;  %v6342_v52 = vadd.f32 %v9873_v25, %v6022_v28 }
 0x65f   :  { %v6352_v24 = vadd.f32 %v6177_v59, %v6032_v55  ;;  %v6033_v41 = vadd.f32 %v9918_v40, %v5962_v15  ;;  %v5950_v59 = vmul.f32 %v9910_v60, %v9871_v47  ;;  %v6189_v55 = vpop.permute.xlu0 %6188  ;;  %v6340_v15 = vadd.f32 %v9867_v61, %v6020_v10 }
 0x660   :  { %v6418_v48 = vmax.f32 %v6354_v22, 0.0  ;;  %v6355_v44 = vadd.f32 %v6183_v13, %v6035_v2  ;;  %v6343_v2 = vadd.f32 %v9875_v14, %v6023_v50  ;;  %v6406_v38 = vmax.f32 %v6342_v52, 0.0 }
 0x661   :  { %v6416_v29 = vmax.f32 %v6352_v24, 0.0  ;;  %v6353_v63 = vadd.f32 %v6179_v5, %v6033_v41  ;;  %v6021_v53 = vadd.f32 %v9918_v40, %v5950_v59  ;;  %v6191_v24 = vpop.permute.xlu1 %6190  ;;  %v5955_v61 = vmul.f32 %v9881_v6, %v9910_v60 }
 0x662   :  { %v6419_v57 = vmax.f32 %v6355_v44, 0.0  ;;  %v7104_v19 = vpack.i.bf16 %v6418_v48, %v6402_v27  ;;  %v5954_v6 = vmul.f32 %v9910_v60, %v9887_v56 }
 0x663   :  { %v6417_v51 = vmax.f32 %v6353_v63, 0.0  ;;  %v7100_v35 = vpack.i.bf16 %v6416_v29, %v6400_v33  ;;  %v6341_v25 = vadd.f32 %v9869_v8, %v6021_v53  ;;  %v6404_v33 = vmax.f32 %v6340_v15, 0.0 }
 0x664   :  { %v7106_v7 = vpack.i.bf16 %v6419_v57, %v6403_v62  ;;  %v6407_v63 = vmax.f32 %v6343_v2, 0.0  ;;  %v5956_v8 = vmul.f32 %v9885_v4, %v9910_v60  ;;  %v6193_v57 = vpop.permute.xlu0 %6192 }
 0x665   :  { %7101 = vxpose.xlu0.b32.start [1/16] (narrow) %v7100_v35, 8  ;;  %v7040_v5 = vpop.f32.mrb[20].mxu1  ;;  %v7102_v31 = vpack.i.bf16 %v6417_v51, %v6401_v30  ;;  %v6026_v51 = vadd.f32 %v9918_v40, %v5955_v61  ;;  %v6195_v0 = vpop.permute.xlu1 %6194 }
 0x666   :  { %v5967_v43 = vmul.f32 %v7040_v5, %v9910_v60  ;;  %v5763_v11 = vpop.f32.mrb[21].mxu1  ;;  %v6027_v4 = vadd.f32 %v9918_v40, %v5956_v8 }
 0x667   :  { %v5965_v47 = vmul.f32 %v9910_v60, %v5763_v11  ;;  %v7041_v12 = vpop.f32.mrb[22].mxu1 }
 0x668   :  { %v6038_v16 = vadd.f32 %v9918_v40, %v5967_v43  ;;  %v5968_v36 = vmul.f32 %v7041_v12, %v9910_v60  ;;  %v5766_v34 = vpop.f32.mrb[23].mxu1  ;;  %v6346_v43 = vadd.f32 %v9889_v3, %v6026_v51  ;;  %v6197_v12 = vpop.permute.xlu0 %6196 }
 0x669   :  { %v6036_v9 = vadd.f32 %v9918_v40, %v5965_v47  ;;  %v5966_v22 = vmul.f32 %v9910_v60, %v5766_v34  ;;  %7103 = vxpose.xlu0.b32.cont [2/16] (narrow) %v7102_v31, 8  ;;  %v6025_v31 = vadd.f32 %v9918_v40, %v5954_v6  ;;  %v6199_v15 = vpop.permute.xlu1 %6198 }
 0x66a   :  { %v6358_v13 = vadd.f32 %v6189_v55, %v6038_v16  ;;  %v6039_v49 = vadd.f32 %v9918_v40, %v5968_v36  ;;  %v6347_v36 = vadd.f32 %v9891_v1, %v6027_v4  ;;  %v6410_v2 = vmax.f32 %v6346_v43, 0.0 }
 0x66b   :  { %v6356_v41 = vadd.f32 %v6185_v46, %v6036_v9  ;;  %v6037_v27 = vadd.f32 %v9918_v40, %v5966_v22  ;;  %v6405_v46 = vmax.f32 %v6341_v25, 0.0  ;;  %v6345_v3 = vadd.f32 %v9879_v37, %v6025_v31 }
 0x66c   :  { %v6422_v48 = vmax.f32 %v6358_v13, 0.0  ;;  %v6359_v44 = vadd.f32 %v6191_v24, %v6039_v49  ;;  %v5957_v25 = vmul.f32 %v9910_v60, %v9899_v42  ;;  %v5960_v37 = vmul.f32 %v9901_v45, %v9910_v60 }
 0x66d   :  { %v6420_v14 = vmax.f32 %v6356_v41, 0.0  ;;  %v6357_v29 = vadd.f32 %v6187_v32, %v6037_v27  ;;  %7105 = vxpose.xlu0.b32.cont [3/16] (narrow) %v7104_v19, 8  ;;  %v6024_v19 = vadd.f32 %v9918_v40, %v5953_v21  ;;  %v6411_v27 = vmax.f32 %v6347_v36, 0.0  ;;  %v6203_v42 = vpop.permute.xlu1 %6202 }
 0x66e   :  { %v6423_v62 = vmax.f32 %v6359_v44, 0.0  ;;  %v7112_v20 = vpack.i.bf16 %v6422_v48, %v6406_v38  ;;  %v6201_v48 = vpop.permute.xlu0 %6200  ;;  %v6409_v44 = vmax.f32 %v6345_v3, 0.0  ;;  %v6031_v45 = vadd.f32 %v9918_v40, %v5960_v37 }
 0x66f   :  { %v6421_v30 = vmax.f32 %v6357_v29, 0.0  ;;  %v7108_v59 = vpack.i.bf16 %v6420_v14, %v6404_v33 }
 0x670   :  { %v9965_v35 = vpack.i.bf16 %v6423_v62, %v6407_v63  ;;  %v6028_v63 = vadd.f32 %v9918_v40, %v5957_v25 }
 0x671   :  { %v7044_v28 = vpop.f32.mrb[24].mxu1  ;;  %7107 = vxpose.xlu0.b32.cont [4/16] (narrow) %v7106_v7, 8  ;;  %v7110_v32 = vpack.i.bf16 %v6421_v30, %v6405_v46  ;;  %v6344_v7 = vadd.f32 %v9877_v18, %v6024_v19  ;;  %v5959_v18 = vmul.f32 %v9897_v17, %v9910_v60  ;;  %v5958_v17 = vmul.f32 %v9910_v60, %v9903_v39 }
 0x672   :  { %v5971_v10 = vmul.f32 %v7044_v28, %v9910_v60  ;;  %v5779_v5 = vpop.f32.mrb[25].mxu1  ;;  %v6205_v28 = vpop.permute.xlu0 %6204 }
 0x673   :  { %v5969_v56 = vmul.f32 %v9910_v60, %v5779_v5  ;;  %v7045_v50 = vpop.f32.mrb[26].mxu1  ;;  %v6408_v24 = vmax.f32 %v6344_v7, 0.0  ;;  %v6030_v14 = vadd.f32 %v9918_v40, %v5959_v18  ;;  %v6029_v6 = vadd.f32 %v9918_v40, %v5958_v17 }
 0x674   :  { %v6042_v11 = vadd.f32 %v9918_v40, %v5971_v10  ;;  %v5972_v53 = vmul.f32 %v7045_v50, %v9910_v60  ;;  %v5782_v47 = vpop.f32.mrb[27].mxu1  ;;  %v6351_v10 = vadd.f32 %v9912_v54, %v6031_v45 }
 0x675   :  { %v6040_v52 = vadd.f32 %v9918_v40, %v5969_v56  ;;  %v5970_v16 = vmul.f32 %v9910_v60, %v5782_v47  ;;  %7109 = vxpose.xlu0.b32.cont [5/16] (narrow) %v7108_v59, 8  ;;  %v6350_v59 = vadd.f32 %v9905_v26, %v6030_v14  ;;  %v6207_v26 = vpop.permute.xlu1 %6206  ;;  %v6349_v56 = vadd.f32 %v9895_v23, %v6029_v6 }
 0x676   :  { %v6362_v34 = vadd.f32 %v6197_v12, %v6042_v11  ;;  %v6043_v55 = vadd.f32 %v9918_v40, %v5972_v53  ;;  %v6209_v54 = vpop.permute.xlu0 %6208 }
 0x677   :  { %v6360_v9 = vadd.f32 %v6193_v57, %v6040_v52  ;;  %v6041_v22 = vadd.f32 %v9918_v40, %v5970_v16  ;;  %v6414_v11 = vmax.f32 %v6350_v59, 0.0  ;;  %v6415_v52 = vmax.f32 %v6351_v10, 0.0 }
 0x678   :  { %v6426_v13 = vmax.f32 %v6362_v34, 0.0  ;;  %v6363_v49 = vadd.f32 %v6199_v15, %v6043_v55  ;;  %v6413_v36 = vmax.f32 %v6349_v56, 0.0 }
 0x679   :  { %v6424_v1 = vmax.f32 %v6360_v9, 0.0  ;;  %v6361_v41 = vadd.f32 %v6195_v0, %v6041_v22  ;;  %7111 = vxpose.xlu0.b32.cont [6/16] (narrow) %v7110_v32, 8  ;;  %v10007_v3 = vpop.permute.xlu1 %6210 }
 0x67a   :  { %v6427_v38 = vmax.f32 %v6363_v49, 0.0  ;;  %v7120_v61 = vpack.i.bf16 %v6426_v13, %v6410_v2  ;;  %v6213_v13 = vpop.permute.xlu0 %6212 }
 0x67b   :  { %v6425_v33 = vmax.f32 %v6361_v41, 0.0  ;;  %v7116_v21 = vpack.i.bf16 %v6424_v1, %v6408_v24 }
 0x67c   :  { %v7122_v29 = vpack.i.bf16 %v6427_v38, %v6411_v27 }
 0x67d   :  { %v7048_v8 = vpop.f32.mrb[28].mxu1  ;;  %7113 = vxpose.xlu0.b32.cont [7/16] (narrow) %v7112_v20, 8  ;;  %v7118_v62 = vpack.i.bf16 %v6425_v33, %v6409_v44  ;;  %v6348_v20 = vadd.f32 %v9893_v58, %v6028_v63  ;;  %v6215_v49 = vpop.permute.xlu1 %6214 }
 0x67e   :  { %v5975_v57 = vmul.f32 %v7048_v8, %v9910_v60  ;;  %v5795_v46 = vpop.f32.mrb[29].mxu1  ;;  %v10009_v24 = vpop.permute.xlu0 %6216 }
 0x67f   :  { %v5973_v39 = vmul.f32 %v9910_v60, %v5795_v46  ;;  %v7049_v30 = vpop.f32.mrb[30].mxu1  ;;  %v6412_v47 = vmax.f32 %v6348_v20, 0.0 }
 0x680   :  { %v6046_v51 = vadd.f32 %v9918_v40, %v5975_v57  ;;  %v5976_v0 = vmul.f32 %v7049_v30, %v9910_v60  ;;  %v5798_v19 = vpop.f32.mrb[31].mxu1 }
 0x681   :  { %v6044_v32 = vadd.f32 %v9918_v40, %v5973_v39  ;;  %v5974_v4 = vmul.f32 %v9910_v60, %v5798_v19  ;;  %7115 = vxpose.xlu0.b32.cont [8/16] (narrow) %v9965_v35, 8  ;;  %v10011_v25 = vpop.permute.xlu1 %6218 }
 0x682   :  { %v6366_v5 = vadd.f32 %v6205_v28, %v6046_v51  ;;  %v6047_v31 = vadd.f32 %v9918_v40, %v5976_v0  ;;  %v10013_v38 = vpop.permute.xlu0 %6220 }
 0x683   :  { %v6364_v50 = vadd.f32 %v6201_v48, %v6044_v32  ;;  %v6045_v43 = vadd.f32 %v9918_v40, %v5974_v4 }
 0x684   :  { %v6430_v53 = vmax.f32 %v6366_v5, 0.0  ;;  %v6367_v58 = vadd.f32 %v6207_v26, %v6047_v31 }
 0x685   :  { %v6428_v12 = vmax.f32 %v6364_v50, 0.0  ;;  %v6365_v7 = vadd.f32 %v6203_v42, %v6045_v43  ;;  %7117 = vxpose.xlu0.b32.cont [9/16] (narrow) %v7116_v21, 8  ;;  %v10015_v48 = vpop.permute.xlu1 %6222 }
 0x686   :  { %v6431_v35 = vmax.f32 %v6367_v58, 0.0  ;;  %v7128_v16 = vpack.i.bf16 %v6430_v53, %v6414_v11  ;;  %v10017_v44 = vpop.permute.xlu0 %6224 }
 0x687   :  { %v6429_v34 = vmax.f32 %v6365_v7, 0.0  ;;  %v7124_v55 = vpack.i.bf16 %v6428_v12, %v6412_v47 }
 0x688   :  { %v7130_v15 = vpack.i.bf16 %v6431_v35, %v6415_v52 }
 0x689   :  { %v7052_v23 = vpop.f32.mrb[32].mxu1  ;;  %7119 = vxpose.xlu0.b32.cont [10/16] (narrow) %v7118_v62, 8  ;;  %v7126_v9 = vpack.i.bf16 %v6429_v34, %v6413_v36 }
 0x68a   :  { %v5811_v22 = vpop.f32.mrb[33].mxu1  ;;  %v5979_v39 = vmul.f32 %v7052_v23, %v9910_v60 }
 0x68b   :  { %v7053_v2 = vpop.f32.mrb[34].mxu1  ;;  %v5977_v59 = vmul.f32 %v9910_v60, %v5811_v22 }
 0x68c   :  { %v5814_v18 = vpop.f32.mrb[35].mxu1  ;;  %v6050_v51 = vadd.f32 %v9918_v40, %v5979_v39  ;;  %v5980_v0 = vmul.f32 %v7053_v2, %v9910_v60 }
 0x68d   :  { %7121 = vxpose.xlu0.b32.cont [11/16] (narrow) %v7120_v61, 8  ;;  %v10019_v61 = vpop.permute.xlu1 %6226  ;;  %v6048_v28 = vadd.f32 %v9918_v40, %v5977_v59  ;;  %v5978_v20 = vmul.f32 %v9910_v60, %v5814_v18 }
 0x68e   :  { %v6370_v10 = vadd.f32 %v6213_v13, %v6050_v51  ;;  %v6051_v5 = vadd.f32 %v9918_v40, %v5980_v0 }
 0x68f   :  { %v6368_v56 = vadd.f32 %v6209_v54, %v6048_v28  ;;  %v6049_v50 = vadd.f32 %v9918_v40, %v5978_v20 }
 0x690   :  { %v6434_v35 = vmax.f32 %v6370_v10, 0.0 }
 0x691   :  { %7123 = vxpose.xlu0.b32.cont [12/16] (narrow) %v7122_v29, 8  ;;  %v10029_v29 = vpop.permute.xlu0 %6228  ;;  %v10031_v42 = vpop.permute.xlu1 %6230 }
 0x695   :  { %v7056_v1 = vpop.f32.mrb[36].mxu1  ;;  %7125 = vxpose.xlu0.b32.cont [13/16] (narrow) %v7124_v55, 8  ;;  %v10033_v63 = vpop.permute.xlu0 %6232  ;;  %v6432_v55 = vmax.f32 %v6368_v56, 0.0 }
 0x696   :  { %v5827_v41 = vpop.f32.mrb[37].mxu1  ;;  %v10035_v8 = vpop.permute.xlu1 %6234  ;;  %v5983_v22 = vmul.f32 %v7056_v1, %v9910_v60 }
 0x697   :  { %v7057_v27 = vpop.f32.mrb[38].mxu1  ;;  %v5981_v2 = vmul.f32 %v9910_v60, %v5827_v41 }
 0x698   :  { %v5830_v37 = vpop.f32.mrb[39].mxu1  ;;  %v5984_v39 = vmul.f32 %v7057_v27, %v9910_v60 }
 0x699   :  { %7127 = vxpose.xlu0.b32.cont [14/16] (narrow) %v7126_v9, 8  ;;  %v10045_v6 = vpop.permute.xlu0 %6236  ;;  %v6052_v1 = vadd.f32 %v9918_v40, %v5981_v2 }
 0x69a   :  { %v10048_v30 = vpop.permute.xlu1 %6238 }
 0x69d   :  { %7129 = vxpose.xlu0.b32.cont [15/16] (narrow) %v7128_v16, 8  ;;  %v6241_v19 = vpop.permute.xlu0 %6240  ;;  %v6371_v16 = vadd.f32 %v6215_v49, %v6051_v5  ;;  %v5982_v49 = vmul.f32 %v9910_v60, %v5830_v37  ;;  %v6054_v5 = vadd.f32 %v9918_v40, %v5983_v22 }
 0x69e   :  { %v6243_v32 = vpop.permute.xlu1 %6242 }
 0x69f   :  { %v6435_v0 = vmax.f32 %v6371_v16, 0.0  ;;  %v6053_v27 = vadd.f32 %v9918_v40, %v5982_v49 }
 0x6a1   :  { %v10021_v17 = vpop.f32.mrb[40].mxu1  ;;  %7131 = vxpose.xlu0.b32.end [16/16] (narrow) %v7130_v15, 8  ;;  %v6245_v12 = vpop.permute.xlu0 %6244  ;;  %v6369_v15 = vadd.f32 %v10007_v3, %v6049_v50  ;;  %v6373_v16 = vadd.f32 %v10011_v25, %v6053_v27 }
 0x6a2   :  { %v10023_v33 = vpop.f32.mrb[41].mxu1  ;;  %v6247_v34 = vpop.permute.xlu1 %6246 }
 0x6a3   :  { %v10025_v21 = vpop.f32.mrb[42].mxu1  ;;  %v6433_v3 = vmax.f32 %v6369_v15, 0.0  ;;  %v5985_v15 = vmul.f32 %v9910_v60, %v10023_v33 }
 0x6a4   :  { %v10027_v14 = vpop.f32.mrb[43].mxu1 }
 0x6ad   :  { %v10037_v62 = vpop.f32.mrb[44].mxu1 }
 0x6ae   :  { %v10039_v45 = vpop.f32.mrb[45].mxu1 }
 0x6af   :  { %v10041_v57 = vpop.f32.mrb[46].mxu1 }
 0x6b0   :  { %v10043_v46 = vpop.f32.mrb[47].mxu1 }
 0x6b9   :  { %v7068_v4 = vpop.f32.mrb[48].mxu1 }
 0x6ba   :  { %v5995_v31 = vmul.f32 %v7068_v4, %v9910_v60  ;;  %v5875_v26 = vpop.f32.mrb[49].mxu1  ;;  %v6249_v4 = vpop.permute.xlu0 %6248 }
 0x6bb   :  { %v5993_v43 = vmul.f32 %v9910_v60, %v5875_v26  ;;  %v7069_v11 = vpop.f32.mrb[50].mxu1  ;;  %v6055_v26 = vadd.f32 %v9918_v40, %v5984_v39 }
 0x6bc   :  { %v6066_v53 = vadd.f32 %v9918_v40, %v5995_v31  ;;  %v5996_v58 = vmul.f32 %v7069_v11, %v9910_v60  ;;  %v5878_v47 = vpop.f32.mrb[51].mxu1  ;;  %v6251_v31 = vpop.permute.xlu1 %6250 }
 0x6bd   :  { %v6064_v7 = vadd.f32 %v9918_v40, %v5993_v43  ;;  %v5994_v52 = vmul.f32 %v9910_v60, %v5878_v47 }
 0x6be   :  { %v6386_v36 = vadd.f32 %v6245_v12, %v6066_v53  ;;  %v6067_v54 = vadd.f32 %v9918_v40, %v5996_v58  ;;  %v6374_v53 = vadd.f32 %v10013_v38, %v6054_v5  ;;  %v6372_v58 = vadd.f32 %v10009_v24, %v6052_v1 }
 0x6bf   :  { %v6384_v23 = vadd.f32 %v6241_v19, %v6064_v7  ;;  %v6065_v9 = vadd.f32 %v9918_v40, %v5994_v52  ;;  %v6253_v52 = vpop.permute.xlu0 %6252  ;;  %v5987_v38 = vmul.f32 %v10021_v17, %v9910_v60 }
 0x6c0   :  { %v6450_v18 = vmax.f32 %v6386_v36, 0.0  ;;  %v6387_v13 = vadd.f32 %v6247_v34, %v6067_v54  ;;  %v6436_v25 = vmax.f32 %v6372_v58, 0.0 }
 0x6c1   :  { %v6448_v59 = vmax.f32 %v6384_v23, 0.0  ;;  %v6385_v51 = vadd.f32 %v6243_v32, %v6065_v9  ;;  %v6438_v9 = vmax.f32 %v6374_v53, 0.0  ;;  %v6058_v17 = vadd.f32 %v9918_v40, %v5987_v38 }
 0x6c2   :  { %v6451_v28 = vmax.f32 %v6387_v13, 0.0  ;;  %v7141_v20 = vpack.i.bf16 %v6450_v18, %v6434_v35  ;;  %v6375_v35 = vadd.f32 %v10015_v48, %v6055_v26  ;;  %v6437_v13 = vmax.f32 %v6373_v16, 0.0 }
 0x6c3   :  { %v6449_v19 = vmax.f32 %v6385_v51, 0.0  ;;  %v7137_v10 = vpack.i.bf16 %v6448_v59, %v6432_v55  ;;  %v6255_v55 = vpop.permute.xlu1 %6254  ;;  %v5988_v59 = vmul.f32 %v10025_v21, %v9910_v60  ;;  %v6257_v33 = vpop.permute.xlu0 %6256  ;;  %v5989_v38 = vmul.f32 %v9910_v60, %v10039_v45 }
 0x6c4   :  { %v7143_v41 = vpack.i.bf16 %v6451_v28, %v6435_v0  ;;  %v6439_v18 = vmax.f32 %v6375_v35, 0.0  ;;  %v6056_v28 = vadd.f32 %v9918_v40, %v5985_v15 }
 0x6c5   :  { %7138 = vxpose.xlu1.b32.start [1/16] (narrow) %v7137_v10, 8  ;;  %v7072_v37 = vpop.f32.mrb[52].mxu1  ;;  %v7139_v32 = vpack.i.bf16 %v6449_v19, %v6433_v3  ;;  %v6059_v21 = vadd.f32 %v9918_v40, %v5988_v59 }
 0x6c6   :  { %v5999_v56 = vmul.f32 %v7072_v37, %v9910_v60  ;;  %v5891_v50 = vpop.f32.mrb[53].mxu1  ;;  %v6376_v37 = vadd.f32 %v10017_v44, %v6056_v28 }
 0x6c7   :  { %v5997_v43 = vmul.f32 %v9910_v60, %v5891_v50  ;;  %v7073_v11 = vpop.f32.mrb[54].mxu1  ;;  %v6259_v5 = vpop.permute.xlu1 %6258 }
 0x6c8   :  { %v6070_v47 = vadd.f32 %v9918_v40, %v5999_v56  ;;  %v6000_v12 = vmul.f32 %v7073_v11, %v9910_v60  ;;  %v5894_v7 = vpop.f32.mrb[55].mxu1  ;;  %v6261_v11 = vpop.permute.xlu0 %6260 }
 0x6c9   :  { %v6068_v36 = vadd.f32 %v9918_v40, %v5997_v43  ;;  %v5998_v54 = vmul.f32 %v9910_v60, %v5894_v7  ;;  %7140 = vxpose.xlu1.b32.cont [2/16] (narrow) %v7139_v32, 8 }
 0x6ca   :  { %v6390_v34 = vadd.f32 %v6253_v52, %v6070_v47  ;;  %v6071_v24 = vadd.f32 %v9918_v40, %v6000_v12  ;;  %v6379_v47 = vadd.f32 %v10031_v42, %v6059_v21  ;;  %v6440_v52 = vmax.f32 %v6376_v37, 0.0 }
 0x6cb   :  { %v6388_v23 = vadd.f32 %v6249_v4, %v6068_v36  ;;  %v6069_v48 = vadd.f32 %v9918_v40, %v5998_v54  ;;  %v5986_v4 = vmul.f32 %v9910_v60, %v10027_v14  ;;  %v6263_v7 = vpop.permute.xlu1 %6262  ;;  %v5991_v54 = vmul.f32 %v10037_v62, %v9910_v60 }
 0x6cc   :  { %v6454_v22 = vmax.f32 %v6390_v34, 0.0  ;;  %v6391_v2 = vadd.f32 %v6255_v55, %v6071_v24  ;;  %v5992_v42 = vmul.f32 %v10041_v57, %v9910_v60  ;;  %v5990_v55 = vmul.f32 %v9910_v60, %v10043_v46 }
 0x6cd   :  { %v6452_v39 = vmax.f32 %v6388_v23, 0.0  ;;  %v6389_v49 = vadd.f32 %v6251_v31, %v6069_v48  ;;  %7142 = vxpose.xlu1.b32.cont [3/16] (narrow) %v7141_v20, 8  ;;  %v6378_v31 = vadd.f32 %v10029_v29, %v6058_v17  ;;  %v6057_v32 = vadd.f32 %v9918_v40, %v5986_v4 }
 0x6ce   :  { %v6455_v51 = vmax.f32 %v6391_v2, 0.0  ;;  %v7149_v0 = vpack.i.bf16 %v6454_v22, %v6438_v9  ;;  %v6062_v45 = vadd.f32 %v9918_v40, %v5991_v54  ;;  %v6063_v57 = vadd.f32 %v9918_v40, %v5992_v42 }
 0x6cf   :  { %v6453_v3 = vmax.f32 %v6389_v49, 0.0  ;;  %v7145_v19 = vpack.i.bf16 %v6452_v39, %v6436_v25  ;;  %v6442_v58 = vmax.f32 %v6378_v31, 0.0  ;;  %v6377_v35 = vadd.f32 %v10019_v61, %v6057_v32  ;;  %v6265_v25 = vpop.permute.xlu0 %6264  ;;  %v6267_v39 = vpop.permute.xlu1 %6266 }
 0x6d0   :  { %v10096_v10 = vpack.i.bf16 %v6455_v51, %v6439_v18  ;;  %v6443_v61 = vmax.f32 %v6379_v47, 0.0  ;;  %v6060_v18 = vadd.f32 %v9918_v40, %v5989_v38  ;;  %v6061_v46 = vadd.f32 %v9918_v40, %v5990_v55 }
 0x6d1   :  { %v7076_v1 = vpop.f32.mrb[56].mxu1  ;;  %7144 = vxpose.xlu1.b32.cont [4/16] (narrow) %v7143_v41, 8  ;;  %v7147_v20 = vpack.i.bf16 %v6453_v3, %v6437_v13  ;;  %v6441_v22 = vmax.f32 %v6377_v35, 0.0  ;;  %v6382_v4 = vadd.f32 %v10045_v6, %v6062_v45 }
 0x6d2   :  { %v6003_v26 = vmul.f32 %v7076_v1, %v9910_v60  ;;  %v5907_v27 = vpop.f32.mrb[57].mxu1  ;;  %v6380_v3 = vadd.f32 %v10033_v63, %v6060_v18  ;;  %v6381_v31 = vadd.f32 %v10035_v8, %v6061_v46 }
 0x6d3   :  { %v6001_v14 = vmul.f32 %v9910_v60, %v5907_v27  ;;  %v7077_v56 = vpop.f32.mrb[58].mxu1  ;;  %v6271_v63 = vpop.permute.xlu1 %6270 }
 0x6d4   :  { %v6074_v50 = vadd.f32 %v9918_v40, %v6003_v26  ;;  %v6004_v43 = vmul.f32 %v7077_v56, %v9910_v60  ;;  %v5910_v41 = vpop.f32.mrb[59].mxu1  ;;  %v6444_v56 = vmax.f32 %v6380_v3, 0.0 }
 0x6d5   :  { %v6072_v29 = vadd.f32 %v9918_v40, %v6001_v14  ;;  %v6002_v53 = vmul.f32 %v9910_v60, %v5910_v41  ;;  %7146 = vxpose.xlu1.b32.cont [5/16] (narrow) %v7145_v19, 8  ;;  %v6446_v14 = vmax.f32 %v6382_v4, 0.0  ;;  %v6445_v41 = vmax.f32 %v6381_v31, 0.0 }
 0x6d6   :  { %v6394_v44 = vadd.f32 %v6261_v11, %v6074_v50  ;;  %v6075_v12 = vadd.f32 %v9918_v40, %v6004_v43 }
 0x6d7   :  { %v6392_v16 = vadd.f32 %v6257_v33, %v6072_v29  ;;  %v6073_v36 = vadd.f32 %v9918_v40, %v6002_v53 }
 0x6d8   :  { %v6458_v34 = vmax.f32 %v6394_v44, 0.0  ;;  %v6395_v24 = vadd.f32 %v6263_v7, %v6075_v12 }
 0x6d9   :  { %v6456_v15 = vmax.f32 %v6392_v16, 0.0  ;;  %v6393_v23 = vadd.f32 %v6259_v5, %v6073_v36  ;;  %7148 = vxpose.xlu1.b32.cont [6/16] (narrow) %v7147_v20, 8  ;;  %v6269_v20 = vpop.permute.xlu0 %6268 }
 0x6da   :  { %v6459_v48 = vmax.f32 %v6395_v24, 0.0  ;;  %v7157_v9 = vpack.i.bf16 %v6458_v34, %v6442_v58 }
 0x6db   :  { %v6457_v62 = vmax.f32 %v6393_v23, 0.0  ;;  %v7153_v2 = vpack.i.bf16 %v6456_v15, %v6440_v52 }
 0x6dc   :  { %v7159_v13 = vpack.i.bf16 %v6459_v48, %v6443_v61 }
 0x6dd   :  { %7150 = vxpose.xlu1.b32.cont [7/16] (narrow) %v7149_v0, 8  ;;  %v7080_v49 = vpop.f32.mrb[60].mxu1  ;;  %v7155_v17 = vpack.i.bf16 %v6457_v62, %v6441_v22  ;;  %v6383_v0 = vadd.f32 %v10048_v30, %v6063_v57 }
 0x6de   :  { %v6007_v59 = vmul.f32 %v7080_v49, %v9910_v60  ;;  %v5923_v51 = vpop.f32.mrb[61].mxu1 }
 0x6df   :  { %v6005_v33 = vmul.f32 %v9910_v60, %v5923_v51  ;;  %v7081_v28 = vpop.f32.mrb[62].mxu1  ;;  %v6447_v30 = vmax.f32 %v6383_v0, 0.0 }
 0x6e0   :  { %v6078_v19 = vadd.f32 %v9918_v40, %v6007_v59  ;;  %v6008_v5 = vmul.f32 %v7081_v28, %v9910_v60  ;;  %v5926_v1 = vpop.f32.mrb[63].mxu1 }
 0x6e1   :  { %v6076_v21 = vadd.f32 %v9918_v40, %v6005_v33  ;;  %v6006_v26 = vmul.f32 %v9910_v60, %v5926_v1  ;;  %7152 = vxpose.xlu1.b32.cont [8/16] (narrow) %v10096_v10, 8 }
 0x6e2   :  { %v6398_v27 = vadd.f32 %v6269_v20, %v6078_v19  ;;  %v6079_v6 = vadd.f32 %v9918_v40, %v6008_v5 }
 0x6e3   :  { %v6396_v37 = vadd.f32 %v6265_v25, %v6076_v21  ;;  %v6077_v32 = vadd.f32 %v9918_v40, %v6006_v26 }
 0x6e4   :  { %v6462_v50 = vmax.f32 %v6398_v27, 0.0  ;;  %v6399_v43 = vadd.f32 %v6271_v63, %v6079_v6 }
 0x6e5   :  { %v6460_v8 = vmax.f32 %v6396_v37, 0.0  ;;  %v6397_v11 = vadd.f32 %v6267_v39, %v6077_v32  ;;  %7154 = vxpose.xlu1.b32.cont [9/16] (narrow) %v7153_v2, 8  ;;  %v7132_v29 = vpop.trf.xlu0 }
 0x6e6   :  { %v6463_v60 = vmax.f32 %v6399_v43, 0.0  ;;  %v7165_v53 = vpack.i.bf16 %v6462_v50, %v6446_v14  ;;  %v7136_v10 = vunpack.i.h.bf16 %v7132_v29  ;;  %v7133_v44 = vunpack.i.l.bf16 %v7132_v29 }
 0x6e7   :  { %v6461_v58 = vmax.f32 %v6397_v11, 0.0  ;;  %v7161_v47 = vpack.i.bf16 %v6460_v8, %v6444_v56 }
 0x6e8   :  { %v7167_v12 = vpack.i.bf16 %v6463_v60, %v6447_v30  ;;  %v6705_v40 = vpack.c.bf16 %v7136_v10, %v7133_v44 }
 0x6e9   :  { %7156 = vxpose.xlu1.b32.cont [10/16] (narrow) %v7155_v17, 8  ;;  %v7163_v7 = vpack.i.bf16 %v6461_v58, %v6445_v41 }
 0x6ea   :  { %6602 = vst [vmem:[#allocation5] sm:$0xff] %v6705_v40 }
 0x6ed   :  { %7158 = vxpose.xlu1.b32.cont [11/16] (narrow) %v7157_v9, 8 }
 0x6f1   :  { %7160 = vxpose.xlu1.b32.cont [12/16] (narrow) %v7159_v13, 8 }
 0x6f5   :  { %7162 = vxpose.xlu1.b32.cont [13/16] (narrow) %v7161_v47, 8 }
 0x6f9   :  { %7164 = vxpose.xlu1.b32.cont [14/16] (narrow) %v7163_v7, 8 }
 0x6fd   :  { %7166 = vxpose.xlu1.b32.cont [15/16] (narrow) %v7165_v53, 8 }
 0x701   :  { %7168 = vxpose.xlu1.b32.end [16/16] (narrow) %v7167_v12, 8 }
 0x745   :  { %v7169_v52 = vpop.trf.xlu1 }
 0x746   :  { %v7173_v35 = vunpack.i.h.bf16 %v7169_v52  ;;  %v7170_v16 = vunpack.i.l.bf16 %v7169_v52 }
 0x748   :  { %v6706_v36 = vpack.c.bf16 %v7173_v35, %v7170_v16 }
 0x74a   :  { %6610 = vst [vmem:[#allocation5 + $0x8] sm:$0xff] %v6706_v36 }
 0x74b   :  { %7195 = shalt.err (!%p7192_p4)
}
 0x74c   :  { %s7196_s11 = scalar_lea.hbm %s10157_s7, 256 }
 0x74d   :  { %p7197_p5 = scmp.ne.s32.totalorder %s10157_s7, %s7196_s11  ;;  %p7200_p6 = scmp.lt.u32.totalorder %s7196_s11, %s10157_s7 }
 0x74f   :  { %p7202_p7 = pnand %p7200_p6, %p7197_p5 }
 0x751   :  { %7205 = shalt.err (!%p7202_p7)
}
 0x752   :  { %s7223_s2 = smov 128  }
 0x753   :  { %6622 = dma.vmem_to_hbm [thread:$0]  %s6617_s6, 256, %s10157_s7, [#allocation6], %s7223_s2, %s7223_s2, %s7210_s18  }
 0x754   :  { %7206 = dma.done.wait [#allocation6], 256  }
 0x755   :  { %7207 = vsyncadd [#allocation6], 4294967040 }
 0x756   :  { %6626 = vsyncpa [#allocation6], 1 }

</bundles_post_ra>
